<compile_context>
chip_gen: v6e
topology: v6e:2x2x1
jax: 0.10.0
libtpu: 0.0.40
codegen_flags: <defaults>
</compile_context>

<pallas_src>
import functools
import math

import jax
import jax.numpy as jnp
from jax import lax
from jax.experimental import pallas as pl
from jax.experimental.pallas import tpu as pltpu

KSIZE = 7
PAD = 3
LANE = 128


def _round_up(a, b):
    return -(-a // b) * b


def _largest_divisor_leq(n, cap):
    cap = max(1, min(n, cap))
    for d in range(cap, 0, -1):
        if n % d == 0:
            return d
    return 1


def _pick_ct(C, cap):
    """Largest channel tile <= cap that divides C, preferring sublane-aligned (x8) tiles."""
    cap = max(1, min(C, cap))
    if cap >= C:
        return C
    for d in range(cap - cap % 8, 7, -8):
        if C % d == 0:
            return d
    return _largest_divisor_leq(C, cap)


def _vmem_tier():
    """Returns (input-block target bytes, vmem_limit cap bytes, two_tensorcores)."""
    cap = None
    try:
        get_info = getattr(pltpu, "get_tpu_info", None)
        if get_info is not None:
            cap = int(getattr(get_info(), "vmem_capacity_bytes", 0)) or None
    except Exception:
        cap = None
    if cap is not None and cap <= (65 << 20):
        # v7x-class: 64 MiB VMEM per TensorCore, 2 TensorCores per chip.
        return (4 << 20), (44 << 20), True
    if cap is not None:
        # v5e / v6e class: 128 MiB physical VMEM, single TensorCore.
        return (6 << 20), (48 << 20), False
    # Unknown chip: conservative budget that fits every generation.
    return (4 << 20), (40 << 20), False


def _spatial_attn_kernel(x_ref, w_ref, b_ref, o_ref,
                         sum_ref, max_ref, pad_a, pad_m, *,
                         H, W, Ct, chunk, npar, hoist_windows):
    # x_ref : (Nb, Ct, H*W)       VMEM  lane-dense channel tile (spatial dims flattened)
    # w_ref : (2, 49)             SMEM  row 0 = avg taps (pre-scaled by 1/C), row 1 = max taps
    # b_ref : (1,)                SMEM  conv bias
    # o_ref : (Nb, H, W)          VMEM  output block (channel dim added back outside)
    # sum_ref/max_ref : (Nb, H*W) f32   running channel sum / max (persist over C steps)
    # pad_a/pad_m     : (Nb, H+6, W+6)  f32 reflect-padded reduced maps (finalize only)
    c_blk = pl.program_id(1)
    Hp = H + 2 * PAD

    # ---- fused single-pass channel reduction, lane dense, chunked over sublanes ----
    n_chunks = Ct // chunk
    main = n_chunks * chunk

    accs_s = []
    accs_m = []
    for i in range(n_chunks):
        c0 = i * chunk
        v = x_ref[:, c0:c0 + chunk, :].astype(jnp.float32)
        if i < npar:
            accs_s.append(v)
            accs_m.append(v)
        else:
            p = i % npar
            accs_s[p] = accs_s[p] + v
            accs_m[p] = jnp.maximum(accs_m[p], v)
    acc_s = accs_s[0]
    acc_m = accs_m[0]
    for p in range(1, len(accs_s)):
        acc_s = acc_s + accs_s[p]
        acc_m = jnp.maximum(acc_m, accs_m[p])
    blk_sum = jnp.sum(acc_s, axis=1)          # (Nb, H*W)
    blk_max = jnp.max(acc_m, axis=1)          # (Nb, H*W)
    if main < Ct:                             # remainder channels (Ct not multiple of chunk)
        vt = x_ref[:, main:Ct, :].astype(jnp.float32)
        blk_sum = blk_sum + jnp.sum(vt, axis=1)
        blk_max = jnp.maximum(blk_max, jnp.max(vt, axis=1))

    @pl.when(c_blk == 0)
    def _():
        sum_ref[...] = blk_sum
        max_ref[...] = blk_max

    @pl.when(c_blk > 0)
    def _():
        sum_ref[...] = sum_ref[...] + blk_sum
        max_ref[...] = jnp.maximum(max_ref[...], blk_max)

    # ---- finalize at last C step: reflect pad in VMEM, 7x7 conv, bias, store ----
    @pl.when(c_blk == pl.num_programs(1) - 1)
    def _():
        # Scatter the flat reduced maps into 2-D reflect-padded buffers, one padded row per
        # copy (covers both the centre rows and the top/bottom reflection).
        for r in range(Hp):
            d = r - PAD
            src = -d if d < 0 else (2 * (H - 1) - d if d >= H else d)
            pad_a[:, r, PAD:PAD + W] = sum_ref[:, src * W:(src + 1) * W]
            pad_m[:, r, PAD:PAD + W] = max_ref[:, src * W:(src + 1) * W]
        # Reflect columns (full padded height; sources are already row-padded).
        for i in range(PAD):
            sl = 2 * PAD - i
            sr = W + PAD - 2 - i
            pad_a[:, :, i:i + 1] = pad_a[:, :, sl:sl + 1]
            pad_a[:, :, PAD + W + i:PAD + W + i + 1] = pad_a[:, :, sr:sr + 1]
            pad_m[:, :, i:i + 1] = pad_m[:, :, sl:sl + 1]
            pad_m[:, :, PAD + W + i:PAD + W + i + 1] = pad_m[:, :, sr:sr + 1]

        if hoist_windows:
            # Hoist the 7 lane-offset (kw) windows once; reuse across all kh.
            a_cols = [pad_a[:, :, kw:kw + W] for kw in range(KSIZE)]
            m_cols = [pad_m[:, :, kw:kw + W] for kw in range(KSIZE)]

        # 4 independent accumulators -> taps can co-issue on the 4 VALU slots.
        acc0 = jnp.zeros(o_ref.shape, jnp.float32)
        acc1 = jnp.zeros(o_ref.shape, jnp.float32)
        acc2 = jnp.zeros(o_ref.shape, jnp.float32)
        acc3 = jnp.zeros(o_ref.shape, jnp.float32)
        for kh in range(KSIZE):
            for kw in range(KSIZE):
                idx = kh * KSIZE + kw
                if hoist_windows:
                    wa = a_cols[kw][:, kh:kh + H, :]
                    wm = m_cols[kw][:, kh:kh + H, :]
                else:
                    wa = pad_a[:, kh:kh + H, kw:kw + W]
                    wm = pad_m[:, kh:kh + H, kw:kw + W]
                ta = w_ref[0, idx] * wa
                tm = w_ref[1, idx] * wm
                if idx % 2 == 0:
                    acc0 = acc0 + ta
                    acc2 = acc2 + tm
                else:
                    acc1 = acc1 + ta
                    acc3 = acc3 + tm
        out = (acc0 + acc1) + (acc2 + acc3) + b_ref[0]
        o_ref[...] = out.astype(o_ref.dtype)


def spatial_attention(x, weight, bias):
    """x: (N, C, H, W); weight: (1, 2, 7, 7); bias: (1,). Returns (N, 1, H, W)."""
    N, C, H, W = x.shape
    assert H > PAD and W > PAD, "reflect padding of 3 requires H, W >= 4"
    HW = H * W
    Hp, Wp = H + 2 * PAD, W + 2 * PAD
    itemsize = jnp.dtype(x.dtype).itemsize

    blk_target, vmem_cap, two_cores = _vmem_tier()
    hw_lane = _round_up(HW, LANE)

    # Batch tile: keep the streamed chunk accumulators vreg-friendly; on 2-TensorCore chips
    # keep >= 2 parallel batch blocks when N >= 2 (megacore sharding of the batch axis).
    nb_cap = max(1, (8 * LANE) // hw_lane)
    if two_cores and N >= 2:
        nb_cap = min(nb_cap, max(1, N // 2))
    Nb = _largest_divisor_leq(N, nb_cap)
    # TODO(synk): for N == 1 on v7x add a second parallel grid axis over H-tiles (3-row halo)
    # so both TensorCores get work.

    # Channel chunk processed per unrolled step (8 sublanes unless vreg pressure says less).
    chunk = min(8, C, max(1, (64 << 10) // max(1, Nb * hw_lane * 4)))

    # Channel tile: prefer the whole C if its block fits comfortably, otherwise target
    # `blk_target` bytes per (double-buffered) input block; bound the in-kernel unroll and
    # let the "arbitrary" C grid axis handle larger C.
    sub_in = 8 * max(1, 4 // itemsize)            # sublane multiple for the input dtype
    full_block = Nb * _round_up(C, sub_in) * hw_lane * itemsize
    if full_block <= 2 * blk_target and C <= 64 * chunk:
        Ct = C
    else:
        ct_cap = max(1, min(blk_target // max(1, Nb * hw_lane * itemsize), 64 * chunk))
        Ct = _pick_ct(C, ct_cap)
    chunk = min(chunk, Ct)

    n_chunks = Ct // chunk
    acc_bytes = Nb * chunk * hw_lane * 4
    npar = max(1, min(n_chunks,
                      4 if acc_bytes <= (8 << 10) else (2 if acc_bytes <= (32 << 10) else 1)))

    hoist_bytes = 14 * Nb * _round_up(Hp, 8) * _round_up(W, LANE) * 4
    hoist_windows = hoist_bytes <= (8 << 20)

    # Fold the 1/C of the channel mean into the avg-tap weights (49 scalars, host side).
    w2 = weight.reshape(2, KSIZE * KSIZE).astype(jnp.float32)
    w_smem = jnp.stack([w2[0] * (1.0 / C), w2[1]], axis=0)      # (2, 49)
    b_smem = bias.astype(jnp.float32).reshape(1)                # (1,)

    # VMEM budget from (8,128)-tiled footprints (+ finalize temporaries + margin),
    # clamped to a per-generation cap.
    in_block = Nb * _round_up(Ct, sub_in) * hw_lane * itemsize
    out_block = Nb * _round_up(H, 8) * _round_up(W, LANE) * itemsize
    scratch = (2 * _round_up(Nb, 8) * hw_lane * 4
               + 2 * Nb * _round_up(Hp, 8) * _round_up(Wp, LANE) * 4)
    finalize_tmp = (hoist_bytes if hoist_windows else 0) \
        + 8 * Nb * _round_up(H, 8) * _round_up(W, LANE) * 4
    vmem_needed = 2 * in_block + 2 * out_block + scratch + finalize_tmp + (2 << 20)
    vmem_limit = int(min(max(vmem_needed, 8 << 20), vmem_cap))

    kernel = functools.partial(_spatial_attn_kernel, H=H, W=W, Ct=Ct,
                               chunk=chunk, npar=npar, hoist_windows=hoist_windows)

    x_flat = x.reshape(N, C, HW)   # free for contiguous NCHW -> lane-dense reduction path

    out = pl.pallas_call(
        kernel,
        out_shape=jax.ShapeDtypeStruct((N, H, W), x.dtype),
        grid=(N // Nb, C // Ct),
        in_specs=[
            pl.BlockSpec((Nb, Ct, HW), lambda n, c: (n, c, 0)),
            pl.BlockSpec(memory_space=pltpu.MemorySpace.SMEM),
            pl.BlockSpec(memory_space=pltpu.MemorySpace.SMEM),
        ],
        out_specs=pl.BlockSpec((Nb, H, W), lambda n, c: (n, 0, 0)),
        scratch_shapes=[
            pltpu.VMEM((Nb, HW), jnp.float32),      # running channel sum (flat)
            pltpu.VMEM((Nb, HW), jnp.float32),      # running channel max (flat)
            pltpu.VMEM((Nb, Hp, Wp), jnp.float32),  # reflect-padded sum map
            pltpu.VMEM((Nb, Hp, Wp), jnp.float32),  # reflect-padded max map
        ],
        compiler_params=pltpu.CompilerParams(
            dimension_semantics=("parallel", "arbitrary"),
            vmem_limit_bytes=vmem_limit,
        ),
    )(x_flat, w_smem, b_smem)

    return out.reshape(N, 1, H, W)


def spatial_attention_ref(x, weight, bias):
    """Pure-JAX reference matching the PyTorch module."""
    x_avg = jnp.mean(x, axis=1, keepdims=True)
    x_max = jnp.max(x, axis=1, keepdims=True)
    x2 = jnp.concatenate([x_avg, x_max], axis=1)
    x2p = jnp.pad(x2, ((0, 0), (0, 0), (PAD, PAD), (PAD, PAD)), mode="reflect")
    out = lax.conv_general_dilated(
        x2p, weight, window_strides=(1, 1), padding="VALID",
        dimension_numbers=("NCHW", "OIHW", "NCHW"))
    return out + bias.reshape(1, 1, 1, 1)


if __name__ == "__main__":
    key = jax.random.PRNGKey(0)
    k_x, k_w, k_b = jax.random.split(key, 3)

    N, C, H, W = 2, 4, 16, 16
    x = jax.random.normal(k_x, (N, C, H, W), dtype=jnp.float32)

    # Deterministic init mimicking nn.Conv2d defaults (kaiming_uniform, a=sqrt(5)):
    fan_in = 2 * KSIZE * KSIZE
    bound = 1.0 / math.sqrt(fan_in)
    weight = jax.random.uniform(k_w, (1, 2, KSIZE, KSIZE), jnp.float32, -bound, bound)
    bias = jax.random.uniform(k_b, (1,), jnp.float32, -bound, bound)

    out = jax.block_until_ready(spatial_attention(x, weight, bias))

    ref = spatial_attention_ref(x, weight, bias)
    assert out.shape == (N, 1, H, W), out.shape
    assert jnp.allclose(out, ref, rtol=1e-4, atol=1e-4), float(jnp.max(jnp.abs(out - ref)))
    print("KERNEL_OK")
</pallas_src>

<mosaic_0001>
module attributes {stable_mosaic.version = 11 : i64} {
  func.func @_spatial_attn_kernel(%arg0: i32, %arg1: i32, %arg2: memref<2x4x256xf32, #tpu.memory_space<vmem>>, %arg3: memref<2x49xf32, #tpu.memory_space<smem>>, %arg4: memref<1xf32, #tpu.memory_space<smem>>, %arg5: memref<2x16x16xf32, #tpu.memory_space<vmem>>, %arg6: memref<2x256xf32, #tpu.memory_space<vmem>>, %arg7: memref<2x256xf32, #tpu.memory_space<vmem>>, %arg8: memref<2x22x22xf32, #tpu.memory_space<vmem>>, %arg9: memref<2x22x22xf32, #tpu.memory_space<vmem>>) attributes {dimension_semantics = [#tpu.dimension_semantics<parallel>, #tpu.dimension_semantics<arbitrary>], iteration_bounds = array<i64: 1, 1>, scalar_prefetch = 0 : i64, scratch_operands = 4 : i64, tpu.core_type = #tpu.core_type<tc>, window_params = [{transform_indices = @transform_0, window_bounds = array<i64: 2, 4, 256>}, {transform_indices = @transform_1, window_bounds = array<i64: 2, 49>}, {transform_indices = @transform_2, window_bounds = array<i64: 1>}, {transform_indices = @transform_3, window_bounds = array<i64: 2, 16, 16>}]} {
    %c0 = arith.constant 0 : index
    %c0_0 = arith.constant 0 : index
    %c0_1 = arith.constant 0 : index
    %0 = vector.load %arg2[%c0, %c0_0, %c0_1] : memref<2x4x256xf32, #tpu.memory_space<vmem>>, vector<2x4x256xf32>
    %cst = arith.constant dense<0.000000e+00> : vector<2x256xf32>
    %1 = vector.multi_reduction <add>, %0, %cst [1] : vector<2x4x256xf32> to vector<2x256xf32>
    %cst_2 = arith.constant dense<0xFF800000> : vector<2x256xf32>
    %2 = vector.multi_reduction <maximumf>, %0, %cst_2 [1] : vector<2x4x256xf32> to vector<2x256xf32>
    %c0_i32 = arith.constant 0 : i32
    %3 = arith.cmpi eq, %arg1, %c0_i32 : i32
    %4 = arith.extui %3 : i1 to i32
    %c0_i32_3 = arith.constant 0 : i32
    %5 = arith.cmpi ne, %4, %c0_i32_3 : i32
    scf.if %5 {
      %c0_8 = arith.constant 0 : index
      %c0_9 = arith.constant 0 : index
      %12 = vector.load %arg6[%c0_8, %c0_9] : memref<2x256xf32, #tpu.memory_space<vmem>>, vector<2x256xf32>
      tpu.vector_store %arg6[%c0_8, %c0_9], %1 {strides = array<i32>} : memref<2x256xf32, #tpu.memory_space<vmem>>, vector<2x256xf32>,
      %c0_10 = arith.constant 0 : index
      %c0_11 = arith.constant 0 : index
      %13 = vector.load %arg7[%c0_10, %c0_11] : memref<2x256xf32, #tpu.memory_space<vmem>>, vector<2x256xf32>
      tpu.vector_store %arg7[%c0_10, %c0_11], %2 {strides = array<i32>} : memref<2x256xf32, #tpu.memory_space<vmem>>, vector<2x256xf32>,
    } else {
    }
    %c0_i32_4 = arith.constant 0 : i32
    %6 = arith.cmpi sgt, %arg1, %c0_i32_4 : i32
    %7 = arith.extui %6 : i1 to i32
    %c0_i32_5 = arith.constant 0 : i32
    %8 = arith.cmpi ne, %7, %c0_i32_5 : i32
    scf.if %8 {
      %c0_8 = arith.constant 0 : index
      %c0_9 = arith.constant 0 : index
      %12 = vector.load %arg6[%c0_8, %c0_9] : memref<2x256xf32, #tpu.memory_space<vmem>>, vector<2x256xf32>
      %13 = arith.addf %12, %1 : vector<2x256xf32>
      %c0_10 = arith.constant 0 : index
      %c0_11 = arith.constant 0 : index
      %14 = vector.load %arg6[%c0_10, %c0_11] : memref<2x256xf32, #tpu.memory_space<vmem>>, vector<2x256xf32>
      tpu.vector_store %arg6[%c0_10, %c0_11], %13 {strides = array<i32>} : memref<2x256xf32, #tpu.memory_space<vmem>>, vector<2x256xf32>,
      %c0_12 = arith.constant 0 : index
      %c0_13 = arith.constant 0 : index
      %15 = vector.load %arg7[%c0_12, %c0_13] : memref<2x256xf32, #tpu.memory_space<vmem>>, vector<2x256xf32>
      %16 = arith.maximumf %15, %2 : vector<2x256xf32>
      %c0_14 = arith.constant 0 : index
      %c0_15 = arith.constant 0 : index
      %17 = vector.load %arg7[%c0_14, %c0_15] : memref<2x256xf32, #tpu.memory_space<vmem>>, vector<2x256xf32>
      tpu.vector_store %arg7[%c0_14, %c0_15], %16 {strides = array<i32>} : memref<2x256xf32, #tpu.memory_space<vmem>>, vector<2x256xf32>,
    } else {
    }
    %c0_i32_6 = arith.constant 0 : i32
    %9 = arith.cmpi eq, %arg1, %c0_i32_6 : i32
    %10 = arith.extui %9 : i1 to i32
    %c0_i32_7 = arith.constant 0 : i32
    %11 = arith.cmpi ne, %10, %c0_i32_7 : i32
    scf.if %11 {
      %c0_8 = arith.constant 0 : index
      %c48 = arith.constant 48 : index
      %12 = vector.load %arg6[%c0_8, %c48] : memref<2x256xf32, #tpu.memory_space<vmem>>, vector<2x16xf32>
      %c0_9 = arith.constant 0 : index
      %c0_10 = arith.constant 0 : index
      %c3 = arith.constant 3 : index
      %13 = vector.load %arg8[%c0_9, %c0_10, %c3] : memref<2x22x22xf32, #tpu.memory_space<vmem>>, vector<2x1x16xf32>
      %14 = vector.shape_cast %13 : vector<2x1x16xf32> to vector<2x16xf32>
      %15 = vector.shape_cast %12 : vector<2x16xf32> to vector<2x1x16xf32>
      tpu.vector_store %arg8[%c0_9, %c0_10, %c3], %15 {strides = array<i32>} : memref<2x22x22xf32, #tpu.memory_space<vmem>>, vector<2x1x16xf32>,
      %c0_11 = arith.constant 0 : index
      %c48_12 = arith.constant 48 : index
      %16 = vector.load %arg7[%c0_11, %c48_12] : memref<2x256xf32, #tpu.memory_space<vmem>>, vector<2x16xf32>
      %c0_13 = arith.constant 0 : index
      %c0_14 = arith.constant 0 : index
      %c3_15 = arith.constant 3 : index
      %17 = vector.load %arg9[%c0_13, %c0_14, %c3_15] : memref<2x22x22xf32, #tpu.memory_space<vmem>>, vector<2x1x16xf32>
      %18 = vector.shape_cast %17 : vector<2x1x16xf32> to vector<2x16xf32>
      %19 = vector.shape_cast %16 : vector<2x16xf32> to vector<2x1x16xf32>
      tpu.vector_store %arg9[%c0_13, %c0_14, %c3_15], %19 {strides = array<i32>} : memref<2x22x22xf32, #tpu.memory_space<vmem>>, vector<2x1x16xf32>,
      %c0_16 = arith.constant 0 : index
      %c32 = arith.constant 32 : index
      %20 = vector.load %arg6[%c0_16, %c32] : memref<2x256xf32, #tpu.memory_space<vmem>>, vector<2x16xf32>
      %c0_17 = arith.constant 0 : index
      %c1 = arith.constant 1 : index
      %c3_18 = arith.constant 3 : index
      %21 = vector.load %arg8[%c0_17, %c1, %c3_18] : memref<2x22x22xf32, #tpu.memory_space<vmem>>, vector<2x1x16xf32>
      %22 = vector.shape_cast %21 : vector<2x1x16xf32> to vector<2x16xf32>
      %23 = vector.shape_cast %20 : vector<2x16xf32> to vector<2x1x16xf32>
      tpu.vector_store %arg8[%c0_17, %c1, %c3_18], %23 {strides = array<i32>} : memref<2x22x22xf32, #tpu.memory_space<vmem>>, vector<2x1x16xf32>,
      %c0_19 = arith.constant 0 : index
      %c32_20 = arith.constant 32 : index
      %24 = vector.load %arg7[%c0_19, %c32_20] : memref<2x256xf32, #tpu.memory_space<vmem>>, vector<2x16xf32>
      %c0_21 = arith.constant 0 : index
      %c1_22 = arith.constant 1 : index
      %c3_23 = arith.constant 3 : index
      %25 = vector.load %arg9[%c0_21, %c1_22, %c3_23] : memref<2x22x22xf32, #tpu.memory_space<vmem>>, vector<2x1x16xf32>
      %26 = vector.shape_cast %25 : vector<2x1x16xf32> to vector<2x16xf32>
      %27 = vector.shape_cast %24 : vector<2x16xf32> to vector<2x1x16xf32>
      tpu.vector_store %arg9[%c0_21, %c1_22, %c3_23], %27 {strides = array<i32>} : memref<2x22x22xf32, #tpu.memory_space<vmem>>, vector<2x1x16xf32>,
      %c0_24 = arith.constant 0 : index
      %c16 = arith.constant 16 : index
      %28 = vector.load %arg6[%c0_24, %c16] : memref<2x256xf32, #tpu.memory_space<vmem>>, vector<2x16xf32>
      %c0_25 = arith.constant 0 : index
      %c2 = arith.constant 2 : index
      %c3_26 = arith.constant 3 : index
      %29 = vector.load %arg8[%c0_25, %c2, %c3_26] : memref<2x22x22xf32, #tpu.memory_space<vmem>>, vector<2x1x16xf32>
      %30 = vector.shape_cast %29 : vector<2x1x16xf32> to vector<2x16xf32>
      %31 = vector.shape_cast %28 : vector<2x16xf32> to vector<2x1x16xf32>
      tpu.vector_store %arg8[%c0_25, %c2, %c3_26], %31 {strides = array<i32>} : memref<2x22x22xf32, #tpu.memory_space<vmem>>, vector<2x1x16xf32>,
      %c0_27 = arith.constant 0 : index
      %c16_28 = arith.constant 16 : index
      %32 = vector.load %arg7[%c0_27, %c16_28] : memref<2x256xf32, #tpu.memory_space<vmem>>, vector<2x16xf32>
      %c0_29 = arith.constant 0 : index
      %c2_30 = arith.constant 2 : index
      %c3_31 = arith.constant 3 : index
      %33 = vector.load %arg9[%c0_29, %c2_30, %c3_31] : memref<2x22x22xf32, #tpu.memory_space<vmem>>, vector<2x1x16xf32>
      %34 = vector.shape_cast %33 : vector<2x1x16xf32> to vector<2x16xf32>
      %35 = vector.shape_cast %32 : vector<2x16xf32> to vector<2x1x16xf32>
      tpu.vector_store %arg9[%c0_29, %c2_30, %c3_31], %35 {strides = array<i32>} : memref<2x22x22xf32, #tpu.memory_space<vmem>>, vector<2x1x16xf32>,
      %c0_32 = arith.constant 0 : index
      %c0_33 = arith.constant 0 : index
      %36 = vector.load %arg6[%c0_32, %c0_33] : memref<2x256xf32, #tpu.memory_space<vmem>>, vector<2x16xf32>
      %c0_34 = arith.constant 0 : index
      %c3_35 = arith.constant 3 : index
      %c3_36 = arith.constant 3 : index
      %37 = vector.load %arg8[%c0_34, %c3_35, %c3_36] : memref<2x22x22xf32, #tpu.memory_space<vmem>>, vector<2x1x16xf32>
      %38 = vector.shape_cast %37 : vector<2x1x16xf32> to vector<2x16xf32>
      %39 = vector.shape_cast %36 : vector<2x16xf32> to vector<2x1x16xf32>
      tpu.vector_store %arg8[%c0_34, %c3_35, %c3_36], %39 {strides = array<i32>} : memref<2x22x22xf32, #tpu.memory_space<vmem>>, vector<2x1x16xf32>,
      %c0_37 = arith.constant 0 : index
      %c0_38 = arith.constant 0 : index
      %40 = vector.load %arg7[%c0_37, %c0_38] : memref<2x256xf32, #tpu.memory_space<vmem>>, vector<2x16xf32>
      %c0_39 = arith.constant 0 : index
      %c3_40 = arith.constant 3 : index
      %c3_41 = arith.constant 3 : index
      %41 = vector.load %arg9[%c0_39, %c3_40, %c3_41] : memref<2x22x22xf32, #tpu.memory_space<vmem>>, vector<2x1x16xf32>
      %42 = vector.shape_cast %41 : vector<2x1x16xf32> to vector<2x16xf32>
      %43 = vector.shape_cast %40 : vector<2x16xf32> to vector<2x1x16xf32>
      tpu.vector_store %arg9[%c0_39, %c3_40, %c3_41], %43 {strides = array<i32>} : memref<2x22x22xf32, #tpu.memory_space<vmem>>, vector<2x1x16xf32>,
      %c0_42 = arith.constant 0 : index
      %c16_43 = arith.constant 16 : index
      %44 = vector.load %arg6[%c0_42, %c16_43] : memref<2x256xf32, #tpu.memory_space<vmem>>, vector<2x16xf32>
      %c0_44 = arith.constant 0 : index
      %c4 = arith.constant 4 : index
      %c3_45 = arith.constant 3 : index
      %45 = vector.load %arg8[%c0_44, %c4, %c3_45] : memref<2x22x22xf32, #tpu.memory_space<vmem>>, vector<2x1x16xf32>
      %46 = vector.shape_cast %45 : vector<2x1x16xf32> to vector<2x16xf32>
      %47 = vector.shape_cast %44 : vector<2x16xf32> to vector<2x1x16xf32>
      tpu.vector_store %arg8[%c0_44, %c4, %c3_45], %47 {strides = array<i32>} : memref<2x22x22xf32, #tpu.memory_space<vmem>>, vector<2x1x16xf32>,
      %c0_46 = arith.constant 0 : index
      %c16_47 = arith.constant 16 : index
      %48 = vector.load %arg7[%c0_46, %c16_47] : memref<2x256xf32, #tpu.memory_space<vmem>>, vector<2x16xf32>
      %c0_48 = arith.constant 0 : index
      %c4_49 = arith.constant 4 : index
      %c3_50 = arith.constant 3 : index
      %49 = vector.load %arg9[%c0_48, %c4_49, %c3_50] : memref<2x22x22xf32, #tpu.memory_space<vmem>>, vector<2x1x16xf32>
      %50 = vector.shape_cast %49 : vector<2x1x16xf32> to vector<2x16xf32>
      %51 = vector.shape_cast %48 : vector<2x16xf32> to vector<2x1x16xf32>
      tpu.vector_store %arg9[%c0_48, %c4_49, %c3_50], %51 {strides = array<i32>} : memref<2x22x22xf32, #tpu.memory_space<vmem>>, vector<2x1x16xf32>,
      %c0_51 = arith.constant 0 : index
      %c32_52 = arith.constant 32 : index
      %52 = vector.load %arg6[%c0_51, %c32_52] : memref<2x256xf32, #tpu.memory_space<vmem>>, vector<2x16xf32>
      %c0_53 = arith.constant 0 : index
      %c5 = arith.constant 5 : index
      %c3_54 = arith.constant 3 : index
      %53 = vector.load %arg8[%c0_53, %c5, %c3_54] : memref<2x22x22xf32, #tpu.memory_space<vmem>>, vector<2x1x16xf32>
      %54 = vector.shape_cast %53 : vector<2x1x16xf32> to vector<2x16xf32>
      %55 = vector.shape_cast %52 : vector<2x16xf32> to vector<2x1x16xf32>
      tpu.vector_store %arg8[%c0_53, %c5, %c3_54], %55 {strides = array<i32>} : memref<2x22x22xf32, #tpu.memory_space<vmem>>, vector<2x1x16xf32>,
      %c0_55 = arith.constant 0 : index
      %c32_56 = arith.constant 32 : index
      %56 = vector.load %arg7[%c0_55, %c32_56] : memref<2x256xf32, #tpu.memory_space<vmem>>, vector<2x16xf32>
      %c0_57 = arith.constant 0 : index
      %c5_58 = arith.constant 5 : index
      %c3_59 = arith.constant 3 : index
      %57 = vector.load %arg9[%c0_57, %c5_58, %c3_59] : memref<2x22x22xf32, #tpu.memory_space<vmem>>, vector<2x1x16xf32>
      %58 = vector.shape_cast %57 : vector<2x1x16xf32> to vector<2x16xf32>
      %59 = vector.shape_cast %56 : vector<2x16xf32> to vector<2x1x16xf32>
      tpu.vector_store %arg9[%c0_57, %c5_58, %c3_59], %59 {strides = array<i32>} : memref<2x22x22xf32, #tpu.memory_space<vmem>>, vector<2x1x16xf32>,
      %c0_60 = arith.constant 0 : index
      %c48_61 = arith.constant 48 : index
      %60 = vector.load %arg6[%c0_60, %c48_61] : memref<2x256xf32, #tpu.memory_space<vmem>>, vector<2x16xf32>
      %c0_62 = arith.constant 0 : index
      %c6 = arith.constant 6 : index
      %c3_63 = arith.constant 3 : index
      %61 = vector.load %arg8[%c0_62, %c6, %c3_63] : memref<2x22x22xf32, #tpu.memory_space<vmem>>, vector<2x1x16xf32>
      %62 = vector.shape_cast %61 : vector<2x1x16xf32> to vector<2x16xf32>
      %63 = vector.shape_cast %60 : vector<2x16xf32> to vector<2x1x16xf32>
      tpu.vector_store %arg8[%c0_62, %c6, %c3_63], %63 {strides = array<i32>} : memref<2x22x22xf32, #tpu.memory_space<vmem>>, vector<2x1x16xf32>,
      %c0_64 = arith.constant 0 : index
      %c48_65 = arith.constant 48 : index
      %64 = vector.load %arg7[%c0_64, %c48_65] : memref<2x256xf32, #tpu.memory_space<vmem>>, vector<2x16xf32>
      %c0_66 = arith.constant 0 : index
      %c6_67 = arith.constant 6 : index
      %c3_68 = arith.constant 3 : index
      %65 = vector.load %arg9[%c0_66, %c6_67, %c3_68] : memref<2x22x22xf32, #tpu.memory_space<vmem>>, vector<2x1x16xf32>
      %66 = vector.shape_cast %65 : vector<2x1x16xf32> to vector<2x16xf32>
      %67 = vector.shape_cast %64 : vector<2x16xf32> to vector<2x1x16xf32>
      tpu.vector_store %arg9[%c0_66, %c6_67, %c3_68], %67 {strides = array<i32>} : memref<2x22x22xf32, #tpu.memory_space<vmem>>, vector<2x1x16xf32>,
      %c0_69 = arith.constant 0 : index
      %c64 = arith.constant 64 : index
      %68 = vector.load %arg6[%c0_69, %c64] : memref<2x256xf32, #tpu.memory_space<vmem>>, vector<2x16xf32>
      %c0_70 = arith.constant 0 : index
      %c7 = arith.constant 7 : index
      %c3_71 = arith.constant 3 : index
      %69 = vector.load %arg8[%c0_70, %c7, %c3_71] : memref<2x22x22xf32, #tpu.memory_space<vmem>>, vector<2x1x16xf32>
      %70 = vector.shape_cast %69 : vector<2x1x16xf32> to vector<2x16xf32>
      %71 = vector.shape_cast %68 : vector<2x16xf32> to vector<2x1x16xf32>
      tpu.vector_store %arg8[%c0_70, %c7, %c3_71], %71 {strides = array<i32>} : memref<2x22x22xf32, #tpu.memory_space<vmem>>, vector<2x1x16xf32>,
      %c0_72 = arith.constant 0 : index
      %c64_73 = arith.constant 64 : index
      %72 = vector.load %arg7[%c0_72, %c64_73] : memref<2x256xf32, #tpu.memory_space<vmem>>, vector<2x16xf32>
      %c0_74 = arith.constant 0 : index
      %c7_75 = arith.constant 7 : index
      %c3_76 = arith.constant 3 : index
      %73 = vector.load %arg9[%c0_74, %c7_75, %c3_76] : memref<2x22x22xf32, #tpu.memory_space<vmem>>, vector<2x1x16xf32>
      %74 = vector.shape_cast %73 : vector<2x1x16xf32> to vector<2x16xf32>
      %75 = vector.shape_cast %72 : vector<2x16xf32> to vector<2x1x16xf32>
      tpu.vector_store %arg9[%c0_74, %c7_75, %c3_76], %75 {strides = array<i32>} : memref<2x22x22xf32, #tpu.memory_space<vmem>>, vector<2x1x16xf32>,
      %c0_77 = arith.constant 0 : index
      %c80 = arith.constant 80 : index
      %76 = vector.load %arg6[%c0_77, %c80] : memref<2x256xf32, #tpu.memory_space<vmem>>, vector<2x16xf32>
      %c0_78 = arith.constant 0 : index
      %c8 = arith.constant 8 : index
      %c3_79 = arith.constant 3 : index
      %77 = vector.load %arg8[%c0_78, %c8, %c3_79] : memref<2x22x22xf32, #tpu.memory_space<vmem>>, vector<2x1x16xf32>
      %78 = vector.shape_cast %77 : vector<2x1x16xf32> to vector<2x16xf32>
      %79 = vector.shape_cast %76 : vector<2x16xf32> to vector<2x1x16xf32>
      tpu.vector_store %arg8[%c0_78, %c8, %c3_79], %79 {strides = array<i32>} : memref<2x22x22xf32, #tpu.memory_space<vmem>>, vector<2x1x16xf32>,
      %c0_80 = arith.constant 0 : index
      %c80_81 = arith.constant 80 : index
      %80 = vector.load %arg7[%c0_80, %c80_81] : memref<2x256xf32, #tpu.memory_space<vmem>>, vector<2x16xf32>
      %c0_82 = arith.constant 0 : index
      %c8_83 = arith.constant 8 : index
      %c3_84 = arith.constant 3 : index
      %81 = vector.load %arg9[%c0_82, %c8_83, %c3_84] : memref<2x22x22xf32, #tpu.memory_space<vmem>>, vector<2x1x16xf32>
      %82 = vector.shape_cast %81 : vector<2x1x16xf32> to vector<2x16xf32>
      %83 = vector.shape_cast %80 : vector<2x16xf32> to vector<2x1x16xf32>
      tpu.vector_store %arg9[%c0_82, %c8_83, %c3_84], %83 {strides = array<i32>} : memref<2x22x22xf32, #tpu.memory_space<vmem>>, vector<2x1x16xf32>,
      %c0_85 = arith.constant 0 : index
      %c96 = arith.constant 96 : index
      %84 = vector.load %arg6[%c0_85, %c96] : memref<2x256xf32, #tpu.memory_space<vmem>>, vector<2x16xf32>
      %c0_86 = arith.constant 0 : index
      %c9 = arith.constant 9 : index
      %c3_87 = arith.constant 3 : index
      %85 = vector.load %arg8[%c0_86, %c9, %c3_87] : memref<2x22x22xf32, #tpu.memory_space<vmem>>, vector<2x1x16xf32>
      %86 = vector.shape_cast %85 : vector<2x1x16xf32> to vector<2x16xf32>
      %87 = vector.shape_cast %84 : vector<2x16xf32> to vector<2x1x16xf32>
      tpu.vector_store %arg8[%c0_86, %c9, %c3_87], %87 {strides = array<i32>} : memref<2x22x22xf32, #tpu.memory_space<vmem>>, vector<2x1x16xf32>,
      %c0_88 = arith.constant 0 : index
      %c96_89 = arith.constant 96 : index
      %88 = vector.load %arg7[%c0_88, %c96_89] : memref<2x256xf32, #tpu.memory_space<vmem>>, vector<2x16xf32>
      %c0_90 = arith.constant 0 : index
      %c9_91 = arith.constant 9 : index
      %c3_92 = arith.constant 3 : index
      %89 = vector.load %arg9[%c0_90, %c9_91, %c3_92] : memref<2x22x22xf32, #tpu.memory_space<vmem>>, vector<2x1x16xf32>
      %90 = vector.shape_cast %89 : vector<2x1x16xf32> to vector<2x16xf32>
      %91 = vector.shape_cast %88 : vector<2x16xf32> to vector<2x1x16xf32>
      tpu.vector_store %arg9[%c0_90, %c9_91, %c3_92], %91 {strides = array<i32>} : memref<2x22x22xf32, #tpu.memory_space<vmem>>, vector<2x1x16xf32>,
      %c0_93 = arith.constant 0 : index
      %c112 = arith.constant 112 : index
      %92 = vector.load %arg6[%c0_93, %c112] : memref<2x256xf32, #tpu.memory_space<vmem>>, vector<2x16xf32>
      %c0_94 = arith.constant 0 : index
      %c10 = arith.constant 10 : index
      %c3_95 = arith.constant 3 : index
      %93 = vector.load %arg8[%c0_94, %c10, %c3_95] : memref<2x22x22xf32, #tpu.memory_space<vmem>>, vector<2x1x16xf32>
      %94 = vector.shape_cast %93 : vector<2x1x16xf32> to vector<2x16xf32>
      %95 = vector.shape_cast %92 : vector<2x16xf32> to vector<2x1x16xf32>
      tpu.vector_store %arg8[%c0_94, %c10, %c3_95], %95 {strides = array<i32>} : memref<2x22x22xf32, #tpu.memory_space<vmem>>, vector<2x1x16xf32>,
      %c0_96 = arith.constant 0 : index
      %c112_97 = arith.constant 112 : index
      %96 = vector.load %arg7[%c0_96, %c112_97] : memref<2x256xf32, #tpu.memory_space<vmem>>, vector<2x16xf32>
      %c0_98 = arith.constant 0 : index
      %c10_99 = arith.constant 10 : index
      %c3_100 = arith.constant 3 : index
      %97 = vector.load %arg9[%c0_98, %c10_99, %c3_100] : memref<2x22x22xf32, #tpu.memory_space<vmem>>, vector<2x1x16xf32>
      %98 = vector.shape_cast %97 : vector<2x1x16xf32> to vector<2x16xf32>
      %99 = vector.shape_cast %96 : vector<2x16xf32> to vector<2x1x16xf32>
      tpu.vector_store %arg9[%c0_98, %c10_99, %c3_100], %99 {strides = array<i32>} : memref<2x22x22xf32, #tpu.memory_space<vmem>>, vector<2x1x16xf32>,
      %c0_101 = arith.constant 0 : index
      %c128 = arith.constant 128 : index
      %100 = vector.load %arg6[%c0_101, %c128] : memref<2x256xf32, #tpu.memory_space<vmem>>, vector<2x16xf32>
      %c0_102 = arith.constant 0 : index
      %c11 = arith.constant 11 : index
      %c3_103 = arith.constant 3 : index
      %101 = vector.load %arg8[%c0_102, %c11, %c3_103] : memref<2x22x22xf32, #tpu.memory_space<vmem>>, vector<2x1x16xf32>
      %102 = vector.shape_cast %101 : vector<2x1x16xf32> to vector<2x16xf32>
      %103 = vector.shape_cast %100 : vector<2x16xf32> to vector<2x1x16xf32>
      tpu.vector_store %arg8[%c0_102, %c11, %c3_103], %103 {strides = array<i32>} : memref<2x22x22xf32, #tpu.memory_space<vmem>>, vector<2x1x16xf32>,
      %c0_104 = arith.constant 0 : index
      %c128_105 = arith.constant 128 : index
      %104 = vector.load %arg7[%c0_104, %c128_105] : memref<2x256xf32, #tpu.memory_space<vmem>>, vector<2x16xf32>
      %c0_106 = arith.constant 0 : index
      %c11_107 = arith.constant 11 : index
      %c3_108 = arith.constant 3 : index
      %105 = vector.load %arg9[%c0_106, %c11_107, %c3_108] : memref<2x22x22xf32, #tpu.memory_space<vmem>>, vector<2x1x16xf32>
      %106 = vector.shape_cast %105 : vector<2x1x16xf32> to vector<2x16xf32>
      %107 = vector.shape_cast %104 : vector<2x16xf32> to vector<2x1x16xf32>
      tpu.vector_store %arg9[%c0_106, %c11_107, %c3_108], %107 {strides = array<i32>} : memref<2x22x22xf32, #tpu.memory_space<vmem>>, vector<2x1x16xf32>,
      %c0_109 = arith.constant 0 : index
      %c144 = arith.constant 144 : index
      %108 = vector.load %arg6[%c0_109, %c144] : memref<2x256xf32, #tpu.memory_space<vmem>>, vector<2x16xf32>
      %c0_110 = arith.constant 0 : index
      %c12 = arith.constant 12 : index
      %c3_111 = arith.constant 3 : index
      %109 = vector.load %arg8[%c0_110, %c12, %c3_111] : memref<2x22x22xf32, #tpu.memory_space<vmem>>, vector<2x1x16xf32>
      %110 = vector.shape_cast %109 : vector<2x1x16xf32> to vector<2x16xf32>
      %111 = vector.shape_cast %108 : vector<2x16xf32> to vector<2x1x16xf32>
      tpu.vector_store %arg8[%c0_110, %c12, %c3_111], %111 {strides = array<i32>} : memref<2x22x22xf32, #tpu.memory_space<vmem>>, vector<2x1x16xf32>,
      %c0_112 = arith.constant 0 : index
      %c144_113 = arith.constant 144 : index
      %112 = vector.load %arg7[%c0_112, %c144_113] : memref<2x256xf32, #tpu.memory_space<vmem>>, vector<2x16xf32>
      %c0_114 = arith.constant 0 : index
      %c12_115 = arith.constant 12 : index
      %c3_116 = arith.constant 3 : index
      %113 = vector.load %arg9[%c0_114, %c12_115, %c3_116] : memref<2x22x22xf32, #tpu.memory_space<vmem>>, vector<2x1x16xf32>
      %114 = vector.shape_cast %113 : vector<2x1x16xf32> to vector<2x16xf32>
      %115 = vector.shape_cast %112 : vector<2x16xf32> to vector<2x1x16xf32>
      tpu.vector_store %arg9[%c0_114, %c12_115, %c3_116], %115 {strides = array<i32>} : memref<2x22x22xf32, #tpu.memory_space<vmem>>, vector<2x1x16xf32>,
      %c0_117 = arith.constant 0 : index
      %c160 = arith.constant 160 : index
      %116 = vector.load %arg6[%c0_117, %c160] : memref<2x256xf32, #tpu.memory_space<vmem>>, vector<2x16xf32>
      %c0_118 = arith.constant 0 : index
      %c13 = arith.constant 13 : index
      %c3_119 = arith.constant 3 : index
      %117 = vector.load %arg8[%c0_118, %c13, %c3_119] : memref<2x22x22xf32, #tpu.memory_space<vmem>>, vector<2x1x16xf32>
      %118 = vector.shape_cast %117 : vector<2x1x16xf32> to vector<2x16xf32>
      %119 = vector.shape_cast %116 : vector<2x16xf32> to vector<2x1x16xf32>
      tpu.vector_store %arg8[%c0_118, %c13, %c3_119], %119 {strides = array<i32>} : memref<2x22x22xf32, #tpu.memory_space<vmem>>, vector<2x1x16xf32>,
      %c0_120 = arith.constant 0 : index
      %c160_121 = arith.constant 160 : index
      %120 = vector.load %arg7[%c0_120, %c160_121] : memref<2x256xf32, #tpu.memory_space<vmem>>, vector<2x16xf32>
      %c0_122 = arith.constant 0 : index
      %c13_123 = arith.constant 13 : index
      %c3_124 = arith.constant 3 : index
      %121 = vector.load %arg9[%c0_122, %c13_123, %c3_124] : memref<2x22x22xf32, #tpu.memory_space<vmem>>, vector<2x1x16xf32>
      %122 = vector.shape_cast %121 : vector<2x1x16xf32> to vector<2x16xf32>
      %123 = vector.shape_cast %120 : vector<2x16xf32> to vector<2x1x16xf32>
      tpu.vector_store %arg9[%c0_122, %c13_123, %c3_124], %123 {strides = array<i32>} : memref<2x22x22xf32, #tpu.memory_space<vmem>>, vector<2x1x16xf32>,
      %c0_125 = arith.constant 0 : index
      %c176 = arith.constant 176 : index
      %124 = vector.load %arg6[%c0_125, %c176] : memref<2x256xf32, #tpu.memory_space<vmem>>, vector<2x16xf32>
      %c0_126 = arith.constant 0 : index
      %c14 = arith.constant 14 : index
      %c3_127 = arith.constant 3 : index
      %125 = vector.load %arg8[%c0_126, %c14, %c3_127] : memref<2x22x22xf32, #tpu.memory_space<vmem>>, vector<2x1x16xf32>
      %126 = vector.shape_cast %125 : vector<2x1x16xf32> to vector<2x16xf32>
      %127 = vector.shape_cast %124 : vector<2x16xf32> to vector<2x1x16xf32>
      tpu.vector_store %arg8[%c0_126, %c14, %c3_127], %127 {strides = array<i32>} : memref<2x22x22xf32, #tpu.memory_space<vmem>>, vector<2x1x16xf32>,
      %c0_128 = arith.constant 0 : index
      %c176_129 = arith.constant 176 : index
      %128 = vector.load %arg7[%c0_128, %c176_129] : memref<2x256xf32, #tpu.memory_space<vmem>>, vector<2x16xf32>
      %c0_130 = arith.constant 0 : index
      %c14_131 = arith.constant 14 : index
      %c3_132 = arith.constant 3 : index
      %129 = vector.load %arg9[%c0_130, %c14_131, %c3_132] : memref<2x22x22xf32, #tpu.memory_space<vmem>>, vector<2x1x16xf32>
      %130 = vector.shape_cast %129 : vector<2x1x16xf32> to vector<2x16xf32>
      %131 = vector.shape_cast %128 : vector<2x16xf32> to vector<2x1x16xf32>
      tpu.vector_store %arg9[%c0_130, %c14_131, %c3_132], %131 {strides = array<i32>} : memref<2x22x22xf32, #tpu.memory_space<vmem>>, vector<2x1x16xf32>,
      %c0_133 = arith.constant 0 : index
      %c192 = arith.constant 192 : index
      %132 = vector.load %arg6[%c0_133, %c192] : memref<2x256xf32, #tpu.memory_space<vmem>>, vector<2x16xf32>
      %c0_134 = arith.constant 0 : index
      %c15 = arith.constant 15 : index
      %c3_135 = arith.constant 3 : index
      %133 = vector.load %arg8[%c0_134, %c15, %c3_135] : memref<2x22x22xf32, #tpu.memory_space<vmem>>, vector<2x1x16xf32>
      %134 = vector.shape_cast %133 : vector<2x1x16xf32> to vector<2x16xf32>
      %135 = vector.shape_cast %132 : vector<2x16xf32> to vector<2x1x16xf32>
      tpu.vector_store %arg8[%c0_134, %c15, %c3_135], %135 {strides = array<i32>} : memref<2x22x22xf32, #tpu.memory_space<vmem>>, vector<2x1x16xf32>,
      %c0_136 = arith.constant 0 : index
      %c192_137 = arith.constant 192 : index
      %136 = vector.load %arg7[%c0_136, %c192_137] : memref<2x256xf32, #tpu.memory_space<vmem>>, vector<2x16xf32>
      %c0_138 = arith.constant 0 : index
      %c15_139 = arith.constant 15 : index
      %c3_140 = arith.constant 3 : index
      %137 = vector.load %arg9[%c0_138, %c15_139, %c3_140] : memref<2x22x22xf32, #tpu.memory_space<vmem>>, vector<2x1x16xf32>
      %138 = vector.shape_cast %137 : vector<2x1x16xf32> to vector<2x16xf32>
      %139 = vector.shape_cast %136 : vector<2x16xf32> to vector<2x1x16xf32>
      tpu.vector_store %arg9[%c0_138, %c15_139, %c3_140], %139 {strides = array<i32>} : memref<2x22x22xf32, #tpu.memory_space<vmem>>, vector<2x1x16xf32>,
      %c0_141 = arith.constant 0 : index
      %c208 = arith.constant 208 : index
      %140 = vector.load %arg6[%c0_141, %c208] : memref<2x256xf32, #tpu.memory_space<vmem>>, vector<2x16xf32>
      %c0_142 = arith.constant 0 : index
      %c16_143 = arith.constant 16 : index
      %c3_144 = arith.constant 3 : index
      %141 = vector.load %arg8[%c0_142, %c16_143, %c3_144] : memref<2x22x22xf32, #tpu.memory_space<vmem>>, vector<2x1x16xf32>
      %142 = vector.shape_cast %141 : vector<2x1x16xf32> to vector<2x16xf32>
      %143 = vector.shape_cast %140 : vector<2x16xf32> to vector<2x1x16xf32>
      tpu.vector_store %arg8[%c0_142, %c16_143, %c3_144], %143 {strides = array<i32>} : memref<2x22x22xf32, #tpu.memory_space<vmem>>, vector<2x1x16xf32>,
      %c0_145 = arith.constant 0 : index
      %c208_146 = arith.constant 208 : index
      %144 = vector.load %arg7[%c0_145, %c208_146] : memref<2x256xf32, #tpu.memory_space<vmem>>, vector<2x16xf32>
      %c0_147 = arith.constant 0 : index
      %c16_148 = arith.constant 16 : index
      %c3_149 = arith.constant 3 : index
      %145 = vector.load %arg9[%c0_147, %c16_148, %c3_149] : memref<2x22x22xf32, #tpu.memory_space<vmem>>, vector<2x1x16xf32>
      %146 = vector.shape_cast %145 : vector<2x1x16xf32> to vector<2x16xf32>
      %147 = vector.shape_cast %144 : vector<2x16xf32> to vector<2x1x16xf32>
      tpu.vector_store %arg9[%c0_147, %c16_148, %c3_149], %147 {strides = array<i32>} : memref<2x22x22xf32, #tpu.memory_space<vmem>>, vector<2x1x16xf32>,
      %c0_150 = arith.constant 0 : index
      %c224 = arith.constant 224 : index
      %148 = vector.load %arg6[%c0_150, %c224] : memref<2x256xf32, #tpu.memory_space<vmem>>, vector<2x16xf32>
      %c0_151 = arith.constant 0 : index
      %c17 = arith.constant 17 : index
      %c3_152 = arith.constant 3 : index
      %149 = vector.load %arg8[%c0_151, %c17, %c3_152] : memref<2x22x22xf32, #tpu.memory_space<vmem>>, vector<2x1x16xf32>
      %150 = vector.shape_cast %149 : vector<2x1x16xf32> to vector<2x16xf32>
      %151 = vector.shape_cast %148 : vector<2x16xf32> to vector<2x1x16xf32>
      tpu.vector_store %arg8[%c0_151, %c17, %c3_152], %151 {strides = array<i32>} : memref<2x22x22xf32, #tpu.memory_space<vmem>>, vector<2x1x16xf32>,
      %c0_153 = arith.constant 0 : index
      %c224_154 = arith.constant 224 : index
      %152 = vector.load %arg7[%c0_153, %c224_154] : memref<2x256xf32, #tpu.memory_space<vmem>>, vector<2x16xf32>
      %c0_155 = arith.constant 0 : index
      %c17_156 = arith.constant 17 : index
      %c3_157 = arith.constant 3 : index
      %153 = vector.load %arg9[%c0_155, %c17_156, %c3_157] : memref<2x22x22xf32, #tpu.memory_space<vmem>>, vector<2x1x16xf32>
      %154 = vector.shape_cast %153 : vector<2x1x16xf32> to vector<2x16xf32>
      %155 = vector.shape_cast %152 : vector<2x16xf32> to vector<2x1x16xf32>
      tpu.vector_store %arg9[%c0_155, %c17_156, %c3_157], %155 {strides = array<i32>} : memref<2x22x22xf32, #tpu.memory_space<vmem>>, vector<2x1x16xf32>,
      %c0_158 = arith.constant 0 : index
      %c240 = arith.constant 240 : index
      %156 = vector.load %arg6[%c0_158, %c240] : memref<2x256xf32, #tpu.memory_space<vmem>>, vector<2x16xf32>
      %c0_159 = arith.constant 0 : index
      %c18 = arith.constant 18 : index
      %c3_160 = arith.constant 3 : index
      %157 = vector.load %arg8[%c0_159, %c18, %c3_160] : memref<2x22x22xf32, #tpu.memory_space<vmem>>, vector<2x1x16xf32>
      %158 = vector.shape_cast %157 : vector<2x1x16xf32> to vector<2x16xf32>
      %159 = vector.shape_cast %156 : vector<2x16xf32> to vector<2x1x16xf32>
      tpu.vector_store %arg8[%c0_159, %c18, %c3_160], %159 {strides = array<i32>} : memref<2x22x22xf32, #tpu.memory_space<vmem>>, vector<2x1x16xf32>,
      %c0_161 = arith.constant 0 : index
      %c240_162 = arith.constant 240 : index
      %160 = vector.load %arg7[%c0_161, %c240_162] : memref<2x256xf32, #tpu.memory_space<vmem>>, vector<2x16xf32>
      %c0_163 = arith.constant 0 : index
      %c18_164 = arith.constant 18 : index
      %c3_165 = arith.constant 3 : index
      %161 = vector.load %arg9[%c0_163, %c18_164, %c3_165] : memref<2x22x22xf32, #tpu.memory_space<vmem>>, vector<2x1x16xf32>
      %162 = vector.shape_cast %161 : vector<2x1x16xf32> to vector<2x16xf32>
      %163 = vector.shape_cast %160 : vector<2x16xf32> to vector<2x1x16xf32>
      tpu.vector_store %arg9[%c0_163, %c18_164, %c3_165], %163 {strides = array<i32>} : memref<2x22x22xf32, #tpu.memory_space<vmem>>, vector<2x1x16xf32>,
      %c0_166 = arith.constant 0 : index
      %c224_167 = arith.constant 224 : index
      %164 = vector.load %arg6[%c0_166, %c224_167] : memref<2x256xf32, #tpu.memory_space<vmem>>, vector<2x16xf32>
      %c0_168 = arith.constant 0 : index
      %c19 = arith.constant 19 : index
      %c3_169 = arith.constant 3 : index
      %165 = vector.load %arg8[%c0_168, %c19, %c3_169] : memref<2x22x22xf32, #tpu.memory_space<vmem>>, vector<2x1x16xf32>
      %166 = vector.shape_cast %165 : vector<2x1x16xf32> to vector<2x16xf32>
      %167 = vector.shape_cast %164 : vector<2x16xf32> to vector<2x1x16xf32>
      tpu.vector_store %arg8[%c0_168, %c19, %c3_169], %167 {strides = array<i32>} : memref<2x22x22xf32, #tpu.memory_space<vmem>>, vector<2x1x16xf32>,
      %c0_170 = arith.constant 0 : index
      %c224_171 = arith.constant 224 : index
      %168 = vector.load %arg7[%c0_170, %c224_171] : memref<2x256xf32, #tpu.memory_space<vmem>>, vector<2x16xf32>
      %c0_172 = arith.constant 0 : index
      %c19_173 = arith.constant 19 : index
      %c3_174 = arith.constant 3 : index
      %169 = vector.load %arg9[%c0_172, %c19_173, %c3_174] : memref<2x22x22xf32, #tpu.memory_space<vmem>>, vector<2x1x16xf32>
      %170 = vector.shape_cast %169 : vector<2x1x16xf32> to vector<2x16xf32>
      %171 = vector.shape_cast %168 : vector<2x16xf32> to vector<2x1x16xf32>
      tpu.vector_store %arg9[%c0_172, %c19_173, %c3_174], %171 {strides = array<i32>} : memref<2x22x22xf32, #tpu.memory_space<vmem>>, vector<2x1x16xf32>,
      %c0_175 = arith.constant 0 : index
      %c208_176 = arith.constant 208 : index
      %172 = vector.load %arg6[%c0_175, %c208_176] : memref<2x256xf32, #tpu.memory_space<vmem>>, vector<2x16xf32>
      %c0_177 = arith.constant 0 : index
      %c20 = arith.constant 20 : index
      %c3_178 = arith.constant 3 : index
      %173 = vector.load %arg8[%c0_177, %c20, %c3_178] : memref<2x22x22xf32, #tpu.memory_space<vmem>>, vector<2x1x16xf32>
      %174 = vector.shape_cast %173 : vector<2x1x16xf32> to vector<2x16xf32>
      %175 = vector.shape_cast %172 : vector<2x16xf32> to vector<2x1x16xf32>
      tpu.vector_store %arg8[%c0_177, %c20, %c3_178], %175 {strides = array<i32>} : memref<2x22x22xf32, #tpu.memory_space<vmem>>, vector<2x1x16xf32>,
      %c0_179 = arith.constant 0 : index
      %c208_180 = arith.constant 208 : index
      %176 = vector.load %arg7[%c0_179, %c208_180] : memref<2x256xf32, #tpu.memory_space<vmem>>, vector<2x16xf32>
      %c0_181 = arith.constant 0 : index
      %c20_182 = arith.constant 20 : index
      %c3_183 = arith.constant 3 : index
      %177 = vector.load %arg9[%c0_181, %c20_182, %c3_183] : memref<2x22x22xf32, #tpu.memory_space<vmem>>, vector<2x1x16xf32>
      %178 = vector.shape_cast %177 : vector<2x1x16xf32> to vector<2x16xf32>
      %179 = vector.shape_cast %176 : vector<2x16xf32> to vector<2x1x16xf32>
      tpu.vector_store %arg9[%c0_181, %c20_182, %c3_183], %179 {strides = array<i32>} : memref<2x22x22xf32, #tpu.memory_space<vmem>>, vector<2x1x16xf32>,
      %c0_184 = arith.constant 0 : index
      %c192_185 = arith.constant 192 : index
      %180 = vector.load %arg6[%c0_184, %c192_185] : memref<2x256xf32, #tpu.memory_space<vmem>>, vector<2x16xf32>
      %c0_186 = arith.constant 0 : index
      %c21 = arith.constant 21 : index
      %c3_187 = arith.constant 3 : index
      %181 = vector.load %arg8[%c0_186, %c21, %c3_187] : memref<2x22x22xf32, #tpu.memory_space<vmem>>, vector<2x1x16xf32>
      %182 = vector.shape_cast %181 : vector<2x1x16xf32> to vector<2x16xf32>
      %183 = vector.shape_cast %180 : vector<2x16xf32> to vector<2x1x16xf32>
      tpu.vector_store %arg8[%c0_186, %c21, %c3_187], %183 {strides = array<i32>} : memref<2x22x22xf32, #tpu.memory_space<vmem>>, vector<2x1x16xf32>,
      %c0_188 = arith.constant 0 : index
      %c192_189 = arith.constant 192 : index
      %184 = vector.load %arg7[%c0_188, %c192_189] : memref<2x256xf32, #tpu.memory_space<vmem>>, vector<2x16xf32>
      %c0_190 = arith.constant 0 : index
      %c21_191 = arith.constant 21 : index
      %c3_192 = arith.constant 3 : index
      %185 = vector.load %arg9[%c0_190, %c21_191, %c3_192] : memref<2x22x22xf32, #tpu.memory_space<vmem>>, vector<2x1x16xf32>
      %186 = vector.shape_cast %185 : vector<2x1x16xf32> to vector<2x16xf32>
      %187 = vector.shape_cast %184 : vector<2x16xf32> to vector<2x1x16xf32>
      tpu.vector_store %arg9[%c0_190, %c21_191, %c3_192], %187 {strides = array<i32>} : memref<2x22x22xf32, #tpu.memory_space<vmem>>, vector<2x1x16xf32>,
      %c0_193 = arith.constant 0 : index
      %c0_194 = arith.constant 0 : index
      %c6_195 = arith.constant 6 : index
      %188 = vector.load %arg8[%c0_193, %c0_194, %c6_195] : memref<2x22x22xf32, #tpu.memory_space<vmem>>, vector<2x22x1xf32>
      %c0_196 = arith.constant 0 : index
      %c0_197 = arith.constant 0 : index
      %c0_198 = arith.constant 0 : index
      %189 = vector.load %arg8[%c0_196, %c0_197, %c0_198] : memref<2x22x22xf32, #tpu.memory_space<vmem>>, vector<2x22x1xf32>
      tpu.vector_store %arg8[%c0_196, %c0_197, %c0_198], %188 {strides = array<i32>} : memref<2x22x22xf32, #tpu.memory_space<vmem>>, vector<2x22x1xf32>,
      %c0_199 = arith.constant 0 : index
      %c0_200 = arith.constant 0 : index
      %c17_201 = arith.constant 17 : index
      %190 = vector.load %arg8[%c0_199, %c0_200, %c17_201] : memref<2x22x22xf32, #tpu.memory_space<vmem>>, vector<2x22x1xf32>
      %c0_202 = arith.constant 0 : index
      %c0_203 = arith.constant 0 : index
      %c19_204 = arith.constant 19 : index
      %191 = vector.load %arg8[%c0_202, %c0_203, %c19_204] : memref<2x22x22xf32, #tpu.memory_space<vmem>>, vector<2x22x1xf32>
      tpu.vector_store %arg8[%c0_202, %c0_203, %c19_204], %190 {strides = array<i32>} : memref<2x22x22xf32, #tpu.memory_space<vmem>>, vector<2x22x1xf32>,
      %c0_205 = arith.constant 0 : index
      %c0_206 = arith.constant 0 : index
      %c6_207 = arith.constant 6 : index
      %192 = vector.load %arg9[%c0_205, %c0_206, %c6_207] : memref<2x22x22xf32, #tpu.memory_space<vmem>>, vector<2x22x1xf32>
      %c0_208 = arith.constant 0 : index
      %c0_209 = arith.constant 0 : index
      %c0_210 = arith.constant 0 : index
      %193 = vector.load %arg9[%c0_208, %c0_209, %c0_210] : memref<2x22x22xf32, #tpu.memory_space<vmem>>, vector<2x22x1xf32>
      tpu.vector_store %arg9[%c0_208, %c0_209, %c0_210], %192 {strides = array<i32>} : memref<2x22x22xf32, #tpu.memory_space<vmem>>, vector<2x22x1xf32>,
      %c0_211 = arith.constant 0 : index
      %c0_212 = arith.constant 0 : index
      %c17_213 = arith.constant 17 : index
      %194 = vector.load %arg9[%c0_211, %c0_212, %c17_213] : memref<2x22x22xf32, #tpu.memory_space<vmem>>, vector<2x22x1xf32>
      %c0_214 = arith.constant 0 : index
      %c0_215 = arith.constant 0 : index
      %c19_216 = arith.constant 19 : index
      %195 = vector.load %arg9[%c0_214, %c0_215, %c19_216] : memref<2x22x22xf32, #tpu.memory_space<vmem>>, vector<2x22x1xf32>
      tpu.vector_store %arg9[%c0_214, %c0_215, %c19_216], %194 {strides = array<i32>} : memref<2x22x22xf32, #tpu.memory_space<vmem>>, vector<2x22x1xf32>,
      %c0_217 = arith.constant 0 : index
      %c0_218 = arith.constant 0 : index
      %c5_219 = arith.constant 5 : index
      %196 = vector.load %arg8[%c0_217, %c0_218, %c5_219] : memref<2x22x22xf32, #tpu.memory_space<vmem>>, vector<2x22x1xf32>
      %c0_220 = arith.constant 0 : index
      %c0_221 = arith.constant 0 : index
      %c1_222 = arith.constant 1 : index
      %197 = vector.load %arg8[%c0_220, %c0_221, %c1_222] : memref<2x22x22xf32, #tpu.memory_space<vmem>>, vector<2x22x1xf32>
      tpu.vector_store %arg8[%c0_220, %c0_221, %c1_222], %196 {strides = array<i32>} : memref<2x22x22xf32, #tpu.memory_space<vmem>>, vector<2x22x1xf32>,
      %c0_223 = arith.constant 0 : index
      %c0_224 = arith.constant 0 : index
      %c16_225 = arith.constant 16 : index
      %198 = vector.load %arg8[%c0_223, %c0_224, %c16_225] : memref<2x22x22xf32, #tpu.memory_space<vmem>>, vector<2x22x1xf32>
      %c0_226 = arith.constant 0 : index
      %c0_227 = arith.constant 0 : index
      %c20_228 = arith.constant 20 : index
      %199 = vector.load %arg8[%c0_226, %c0_227, %c20_228] : memref<2x22x22xf32, #tpu.memory_space<vmem>>, vector<2x22x1xf32>
      tpu.vector_store %arg8[%c0_226, %c0_227, %c20_228], %198 {strides = array<i32>} : memref<2x22x22xf32, #tpu.memory_space<vmem>>, vector<2x22x1xf32>,
      %c0_229 = arith.constant 0 : index
      %c0_230 = arith.constant 0 : index
      %c5_231 = arith.constant 5 : index
      %200 = vector.load %arg9[%c0_229, %c0_230, %c5_231] : memref<2x22x22xf32, #tpu.memory_space<vmem>>, vector<2x22x1xf32>
      %c0_232 = arith.constant 0 : index
      %c0_233 = arith.constant 0 : index
      %c1_234 = arith.constant 1 : index
      %201 = vector.load %arg9[%c0_232, %c0_233, %c1_234] : memref<2x22x22xf32, #tpu.memory_space<vmem>>, vector<2x22x1xf32>
      tpu.vector_store %arg9[%c0_232, %c0_233, %c1_234], %200 {strides = array<i32>} : memref<2x22x22xf32, #tpu.memory_space<vmem>>, vector<2x22x1xf32>,
      %c0_235 = arith.constant 0 : index
      %c0_236 = arith.constant 0 : index
      %c16_237 = arith.constant 16 : index
      %202 = vector.load %arg9[%c0_235, %c0_236, %c16_237] : memref<2x22x22xf32, #tpu.memory_space<vmem>>, vector<2x22x1xf32>
      %c0_238 = arith.constant 0 : index
      %c0_239 = arith.constant 0 : index
      %c20_240 = arith.constant 20 : index
      %203 = vector.load %arg9[%c0_238, %c0_239, %c20_240] : memref<2x22x22xf32, #tpu.memory_space<vmem>>, vector<2x22x1xf32>
      tpu.vector_store %arg9[%c0_238, %c0_239, %c20_240], %202 {strides = array<i32>} : memref<2x22x22xf32, #tpu.memory_space<vmem>>, vector<2x22x1xf32>,
      %c0_241 = arith.constant 0 : index
      %c0_242 = arith.constant 0 : index
      %c4_243 = arith.constant 4 : index
      %204 = vector.load %arg8[%c0_241, %c0_242, %c4_243] : memref<2x22x22xf32, #tpu.memory_space<vmem>>, vector<2x22x1xf32>
      %c0_244 = arith.constant 0 : index
      %c0_245 = arith.constant 0 : index
      %c2_246 = arith.constant 2 : index
      %205 = vector.load %arg8[%c0_244, %c0_245, %c2_246] : memref<2x22x22xf32, #tpu.memory_space<vmem>>, vector<2x22x1xf32>
      tpu.vector_store %arg8[%c0_244, %c0_245, %c2_246], %204 {strides = array<i32>} : memref<2x22x22xf32, #tpu.memory_space<vmem>>, vector<2x22x1xf32>,
      %c0_247 = arith.constant 0 : index
      %c0_248 = arith.constant 0 : index
      %c15_249 = arith.constant 15 : index
      %206 = vector.load %arg8[%c0_247, %c0_248, %c15_249] : memref<2x22x22xf32, #tpu.memory_space<vmem>>, vector<2x22x1xf32>
      %c0_250 = arith.constant 0 : index
      %c0_251 = arith.constant 0 : index
      %c21_252 = arith.constant 21 : index
      %207 = vector.load %arg8[%c0_250, %c0_251, %c21_252] : memref<2x22x22xf32, #tpu.memory_space<vmem>>, vector<2x22x1xf32>
      tpu.vector_store %arg8[%c0_250, %c0_251, %c21_252], %206 {strides = array<i32>} : memref<2x22x22xf32, #tpu.memory_space<vmem>>, vector<2x22x1xf32>,
      %c0_253 = arith.constant 0 : index
      %c0_254 = arith.constant 0 : index
      %c4_255 = arith.constant 4 : index
      %208 = vector.load %arg9[%c0_253, %c0_254, %c4_255] : memref<2x22x22xf32, #tpu.memory_space<vmem>>, vector<2x22x1xf32>
      %c0_256 = arith.constant 0 : index
      %c0_257 = arith.constant 0 : index
      %c2_258 = arith.constant 2 : index
      %209 = vector.load %arg9[%c0_256, %c0_257, %c2_258] : memref<2x22x22xf32, #tpu.memory_space<vmem>>, vector<2x22x1xf32>
      tpu.vector_store %arg9[%c0_256, %c0_257, %c2_258], %208 {strides = array<i32>} : memref<2x22x22xf32, #tpu.memory_space<vmem>>, vector<2x22x1xf32>,
      %c0_259 = arith.constant 0 : index
      %c0_260 = arith.constant 0 : index
      %c15_261 = arith.constant 15 : index
      %210 = vector.load %arg9[%c0_259, %c0_260, %c15_261] : memref<2x22x22xf32, #tpu.memory_space<vmem>>, vector<2x22x1xf32>
      %c0_262 = arith.constant 0 : index
      %c0_263 = arith.constant 0 : index
      %c21_264 = arith.constant 21 : index
      %211 = vector.load %arg9[%c0_262, %c0_263, %c21_264] : memref<2x22x22xf32, #tpu.memory_space<vmem>>, vector<2x22x1xf32>
      tpu.vector_store %arg9[%c0_262, %c0_263, %c21_264], %210 {strides = array<i32>} : memref<2x22x22xf32, #tpu.memory_space<vmem>>, vector<2x22x1xf32>,
      %c0_265 = arith.constant 0 : index
      %c0_266 = arith.constant 0 : index
      %c0_267 = arith.constant 0 : index
      %212 = vector.load %arg8[%c0_265, %c0_266, %c0_267] : memref<2x22x22xf32, #tpu.memory_space<vmem>>, vector<2x22x16xf32>
      %c0_268 = arith.constant 0 : index
      %c0_269 = arith.constant 0 : index
      %c1_270 = arith.constant 1 : index
      %213 = vector.load %arg8[%c0_268, %c0_269, %c1_270] : memref<2x22x22xf32, #tpu.memory_space<vmem>>, vector<2x22x16xf32>
      %c0_271 = arith.constant 0 : index
      %c0_272 = arith.constant 0 : index
      %c2_273 = arith.constant 2 : index
      %214 = vector.load %arg8[%c0_271, %c0_272, %c2_273] : memref<2x22x22xf32, #tpu.memory_space<vmem>>, vector<2x22x16xf32>
      %c0_274 = arith.constant 0 : index
      %c0_275 = arith.constant 0 : index
      %c3_276 = arith.constant 3 : index
      %215 = vector.load %arg8[%c0_274, %c0_275, %c3_276] : memref<2x22x22xf32, #tpu.memory_space<vmem>>, vector<2x22x16xf32>
      %c0_277 = arith.constant 0 : index
      %c0_278 = arith.constant 0 : index
      %c4_279 = arith.constant 4 : index
      %216 = vector.load %arg8[%c0_277, %c0_278, %c4_279] : memref<2x22x22xf32, #tpu.memory_space<vmem>>, vector<2x22x16xf32>
      %c0_280 = arith.constant 0 : index
      %c0_281 = arith.constant 0 : index
      %c5_282 = arith.constant 5 : index
      %217 = vector.load %arg8[%c0_280, %c0_281, %c5_282] : memref<2x22x22xf32, #tpu.memory_space<vmem>>, vector<2x22x16xf32>
      %c0_283 = arith.constant 0 : index
      %c0_284 = arith.constant 0 : index
      %c6_285 = arith.constant 6 : index
      %218 = vector.load %arg8[%c0_283, %c0_284, %c6_285] : memref<2x22x22xf32, #tpu.memory_space<vmem>>, vector<2x22x16xf32>
      %c0_286 = arith.constant 0 : index
      %c0_287 = arith.constant 0 : index
      %c0_288 = arith.constant 0 : index
      %219 = vector.load %arg9[%c0_286, %c0_287, %c0_288] : memref<2x22x22xf32, #tpu.memory_space<vmem>>, vector<2x22x16xf32>
      %c0_289 = arith.constant 0 : index
      %c0_290 = arith.constant 0 : index
      %c1_291 = arith.constant 1 : index
      %220 = vector.load %arg9[%c0_289, %c0_290, %c1_291] : memref<2x22x22xf32, #tpu.memory_space<vmem>>, vector<2x22x16xf32>
      %c0_292 = arith.constant 0 : index
      %c0_293 = arith.constant 0 : index
      %c2_294 = arith.constant 2 : index
      %221 = vector.load %arg9[%c0_292, %c0_293, %c2_294] : memref<2x22x22xf32, #tpu.memory_space<vmem>>, vector<2x22x16xf32>
      %c0_295 = arith.constant 0 : index
      %c0_296 = arith.constant 0 : index
      %c3_297 = arith.constant 3 : index
      %222 = vector.load %arg9[%c0_295, %c0_296, %c3_297] : memref<2x22x22xf32, #tpu.memory_space<vmem>>, vector<2x22x16xf32>
      %c0_298 = arith.constant 0 : index
      %c0_299 = arith.constant 0 : index
      %c4_300 = arith.constant 4 : index
      %223 = vector.load %arg9[%c0_298, %c0_299, %c4_300] : memref<2x22x22xf32, #tpu.memory_space<vmem>>, vector<2x22x16xf32>
      %c0_301 = arith.constant 0 : index
      %c0_302 = arith.constant 0 : index
      %c5_303 = arith.constant 5 : index
      %224 = vector.load %arg9[%c0_301, %c0_302, %c5_303] : memref<2x22x22xf32, #tpu.memory_space<vmem>>, vector<2x22x16xf32>
      %c0_304 = arith.constant 0 : index
      %c0_305 = arith.constant 0 : index
      %c6_306 = arith.constant 6 : index
      %225 = vector.load %arg9[%c0_304, %c0_305, %c6_306] : memref<2x22x22xf32, #tpu.memory_space<vmem>>, vector<2x22x16xf32>
      %cst_307 = arith.constant 0.000000e+00 : f32
      %226 = vector.broadcast %cst_307 : f32 to vector<2x16x16xf32>
      %cst_308 = arith.constant 0.000000e+00 : f32
      %227 = vector.broadcast %cst_308 : f32 to vector<2x16x16xf32>
      %cst_309 = arith.constant 0.000000e+00 : f32
      %228 = vector.broadcast %cst_309 : f32 to vector<2x16x16xf32>
      %cst_310 = arith.constant 0.000000e+00 : f32
      %229 = vector.broadcast %cst_310 : f32 to vector<2x16x16xf32>
      %230 = vector.extract_strided_slice %212 {offsets = [0, 0, 0], sizes = [2, 16, 16], strides = [1, 1, 1]} : vector<2x22x16xf32> to vector<2x16x16xf32>
      %231 = vector.extract_strided_slice %219 {offsets = [0, 0, 0], sizes = [2, 16, 16], strides = [1, 1, 1]} : vector<2x22x16xf32> to vector<2x16x16xf32>
      %c0_311 = arith.constant 0 : index
      %c0_312 = arith.constant 0 : index
      %232 = memref.load %arg3[%c0_311, %c0_312] : memref<2x49xf32, #tpu.memory_space<smem>>
      %233 = vector.broadcast %232 : f32 to vector<2x16x16xf32>
      %234 = arith.mulf %233, %230 : vector<2x16x16xf32>
      %c1_313 = arith.constant 1 : index
      %c0_314 = arith.constant 0 : index
      %235 = memref.load %arg3[%c1_313, %c0_314] : memref<2x49xf32, #tpu.memory_space<smem>>
      %236 = vector.broadcast %235 : f32 to vector<2x16x16xf32>
      %237 = arith.mulf %236, %231 : vector<2x16x16xf32>
      %238 = arith.addf %226, %234 : vector<2x16x16xf32>
      %239 = arith.addf %228, %237 : vector<2x16x16xf32>
      %240 = vector.extract_strided_slice %213 {offsets = [0, 0, 0], sizes = [2, 16, 16], strides = [1, 1, 1]} : vector<2x22x16xf32> to vector<2x16x16xf32>
      %241 = vector.extract_strided_slice %220 {offsets = [0, 0, 0], sizes = [2, 16, 16], strides = [1, 1, 1]} : vector<2x22x16xf32> to vector<2x16x16xf32>
      %c0_315 = arith.constant 0 : index
      %c1_316 = arith.constant 1 : index
      %242 = memref.load %arg3[%c0_315, %c1_316] : memref<2x49xf32, #tpu.memory_space<smem>>
      %243 = vector.broadcast %242 : f32 to vector<2x16x16xf32>
      %244 = arith.mulf %243, %240 : vector<2x16x16xf32>
      %c1_317 = arith.constant 1 : index
      %c1_318 = arith.constant 1 : index
      %245 = memref.load %arg3[%c1_317, %c1_318] : memref<2x49xf32, #tpu.memory_space<smem>>
      %246 = vector.broadcast %245 : f32 to vector<2x16x16xf32>
      %247 = arith.mulf %246, %241 : vector<2x16x16xf32>
      %248 = arith.addf %227, %244 : vector<2x16x16xf32>
      %249 = arith.addf %229, %247 : vector<2x16x16xf32>
      %250 = vector.extract_strided_slice %214 {offsets = [0, 0, 0], sizes = [2, 16, 16], strides = [1, 1, 1]} : vector<2x22x16xf32> to vector<2x16x16xf32>
      %251 = vector.extract_strided_slice %221 {offsets = [0, 0, 0], sizes = [2, 16, 16], strides = [1, 1, 1]} : vector<2x22x16xf32> to vector<2x16x16xf32>
      %c0_319 = arith.constant 0 : index
      %c2_320 = arith.constant 2 : index
      %252 = memref.load %arg3[%c0_319, %c2_320] : memref<2x49xf32, #tpu.memory_space<smem>>
      %253 = vector.broadcast %252 : f32 to vector<2x16x16xf32>
      %254 = arith.mulf %253, %250 : vector<2x16x16xf32>
      %c1_321 = arith.constant 1 : index
      %c2_322 = arith.constant 2 : index
      %255 = memref.load %arg3[%c1_321, %c2_322] : memref<2x49xf32, #tpu.memory_space<smem>>
      %256 = vector.broadcast %255 : f32 to vector<2x16x16xf32>
      %257 = arith.mulf %256, %251 : vector<2x16x16xf32>
      %258 = arith.addf %238, %254 : vector<2x16x16xf32>
      %259 = arith.addf %239, %257 : vector<2x16x16xf32>
      %260 = vector.extract_strided_slice %215 {offsets = [0, 0, 0], sizes = [2, 16, 16], strides = [1, 1, 1]} : vector<2x22x16xf32> to vector<2x16x16xf32>
      %261 = vector.extract_strided_slice %222 {offsets = [0, 0, 0], sizes = [2, 16, 16], strides = [1, 1, 1]} : vector<2x22x16xf32> to vector<2x16x16xf32>
      %c0_323 = arith.constant 0 : index
      %c3_324 = arith.constant 3 : index
      %262 = memref.load %arg3[%c0_323, %c3_324] : memref<2x49xf32, #tpu.memory_space<smem>>
      %263 = vector.broadcast %262 : f32 to vector<2x16x16xf32>
      %264 = arith.mulf %263, %260 : vector<2x16x16xf32>
      %c1_325 = arith.constant 1 : index
      %c3_326 = arith.constant 3 : index
      %265 = memref.load %arg3[%c1_325, %c3_326] : memref<2x49xf32, #tpu.memory_space<smem>>
      %266 = vector.broadcast %265 : f32 to vector<2x16x16xf32>
      %267 = arith.mulf %266, %261 : vector<2x16x16xf32>
      %268 = arith.addf %248, %264 : vector<2x16x16xf32>
      %269 = arith.addf %249, %267 : vector<2x16x16xf32>
      %270 = vector.extract_strided_slice %216 {offsets = [0, 0, 0], sizes = [2, 16, 16], strides = [1, 1, 1]} : vector<2x22x16xf32> to vector<2x16x16xf32>
      %271 = vector.extract_strided_slice %223 {offsets = [0, 0, 0], sizes = [2, 16, 16], strides = [1, 1, 1]} : vector<2x22x16xf32> to vector<2x16x16xf32>
      %c0_327 = arith.constant 0 : index
      %c4_328 = arith.constant 4 : index
      %272 = memref.load %arg3[%c0_327, %c4_328] : memref<2x49xf32, #tpu.memory_space<smem>>
      %273 = vector.broadcast %272 : f32 to vector<2x16x16xf32>
      %274 = arith.mulf %273, %270 : vector<2x16x16xf32>
      %c1_329 = arith.constant 1 : index
      %c4_330 = arith.constant 4 : index
      %275 = memref.load %arg3[%c1_329, %c4_330] : memref<2x49xf32, #tpu.memory_space<smem>>
      %276 = vector.broadcast %275 : f32 to vector<2x16x16xf32>
      %277 = arith.mulf %276, %271 : vector<2x16x16xf32>
      %278 = arith.addf %258, %274 : vector<2x16x16xf32>
      %279 = arith.addf %259, %277 : vector<2x16x16xf32>
      %280 = vector.extract_strided_slice %217 {offsets = [0, 0, 0], sizes = [2, 16, 16], strides = [1, 1, 1]} : vector<2x22x16xf32> to vector<2x16x16xf32>
      %281 = vector.extract_strided_slice %224 {offsets = [0, 0, 0], sizes = [2, 16, 16], strides = [1, 1, 1]} : vector<2x22x16xf32> to vector<2x16x16xf32>
      %c0_331 = arith.constant 0 : index
      %c5_332 = arith.constant 5 : index
      %282 = memref.load %arg3[%c0_331, %c5_332] : memref<2x49xf32, #tpu.memory_space<smem>>
      %283 = vector.broadcast %282 : f32 to vector<2x16x16xf32>
      %284 = arith.mulf %283, %280 : vector<2x16x16xf32>
      %c1_333 = arith.constant 1 : index
      %c5_334 = arith.constant 5 : index
      %285 = memref.load %arg3[%c1_333, %c5_334] : memref<2x49xf32, #tpu.memory_space<smem>>
      %286 = vector.broadcast %285 : f32 to vector<2x16x16xf32>
      %287 = arith.mulf %286, %281 : vector<2x16x16xf32>
      %288 = arith.addf %268, %284 : vector<2x16x16xf32>
      %289 = arith.addf %269, %287 : vector<2x16x16xf32>
      %290 = vector.extract_strided_slice %218 {offsets = [0, 0, 0], sizes = [2, 16, 16], strides = [1, 1, 1]} : vector<2x22x16xf32> to vector<2x16x16xf32>
      %291 = vector.extract_strided_slice %225 {offsets = [0, 0, 0], sizes = [2, 16, 16], strides = [1, 1, 1]} : vector<2x22x16xf32> to vector<2x16x16xf32>
      %c0_335 = arith.constant 0 : index
      %c6_336 = arith.constant 6 : index
      %292 = memref.load %arg3[%c0_335, %c6_336] : memref<2x49xf32, #tpu.memory_space<smem>>
      %293 = vector.broadcast %292 : f32 to vector<2x16x16xf32>
      %294 = arith.mulf %293, %290 : vector<2x16x16xf32>
      %c1_337 = arith.constant 1 : index
      %c6_338 = arith.constant 6 : index
      %295 = memref.load %arg3[%c1_337, %c6_338] : memref<2x49xf32, #tpu.memory_space<smem>>
      %296 = vector.broadcast %295 : f32 to vector<2x16x16xf32>
      %297 = arith.mulf %296, %291 : vector<2x16x16xf32>
      %298 = arith.addf %278, %294 : vector<2x16x16xf32>
      %299 = arith.addf %279, %297 : vector<2x16x16xf32>
      %300 = vector.extract_strided_slice %212 {offsets = [0, 1, 0], sizes = [2, 16, 16], strides = [1, 1, 1]} : vector<2x22x16xf32> to vector<2x16x16xf32>
      %301 = vector.extract_strided_slice %219 {offsets = [0, 1, 0], sizes = [2, 16, 16], strides = [1, 1, 1]} : vector<2x22x16xf32> to vector<2x16x16xf32>
      %c0_339 = arith.constant 0 : index
      %c7_340 = arith.constant 7 : index
      %302 = memref.load %arg3[%c0_339, %c7_340] : memref<2x49xf32, #tpu.memory_space<smem>>
      %303 = vector.broadcast %302 : f32 to vector<2x16x16xf32>
      %304 = arith.mulf %303, %300 : vector<2x16x16xf32>
      %c1_341 = arith.constant 1 : index
      %c7_342 = arith.constant 7 : index
      %305 = memref.load %arg3[%c1_341, %c7_342] : memref<2x49xf32, #tpu.memory_space<smem>>
      %306 = vector.broadcast %305 : f32 to vector<2x16x16xf32>
      %307 = arith.mulf %306, %301 : vector<2x16x16xf32>
      %308 = arith.addf %288, %304 : vector<2x16x16xf32>
      %309 = arith.addf %289, %307 : vector<2x16x16xf32>
      %310 = vector.extract_strided_slice %213 {offsets = [0, 1, 0], sizes = [2, 16, 16], strides = [1, 1, 1]} : vector<2x22x16xf32> to vector<2x16x16xf32>
      %311 = vector.extract_strided_slice %220 {offsets = [0, 1, 0], sizes = [2, 16, 16], strides = [1, 1, 1]} : vector<2x22x16xf32> to vector<2x16x16xf32>
      %c0_343 = arith.constant 0 : index
      %c8_344 = arith.constant 8 : index
      %312 = memref.load %arg3[%c0_343, %c8_344] : memref<2x49xf32, #tpu.memory_space<smem>>
      %313 = vector.broadcast %312 : f32 to vector<2x16x16xf32>
      %314 = arith.mulf %313, %310 : vector<2x16x16xf32>
      %c1_345 = arith.constant 1 : index
      %c8_346 = arith.constant 8 : index
      %315 = memref.load %arg3[%c1_345, %c8_346] : memref<2x49xf32, #tpu.memory_space<smem>>
      %316 = vector.broadcast %315 : f32 to vector<2x16x16xf32>
      %317 = arith.mulf %316, %311 : vector<2x16x16xf32>
      %318 = arith.addf %298, %314 : vector<2x16x16xf32>
      %319 = arith.addf %299, %317 : vector<2x16x16xf32>
      %320 = vector.extract_strided_slice %214 {offsets = [0, 1, 0], sizes = [2, 16, 16], strides = [1, 1, 1]} : vector<2x22x16xf32> to vector<2x16x16xf32>
      %321 = vector.extract_strided_slice %221 {offsets = [0, 1, 0], sizes = [2, 16, 16], strides = [1, 1, 1]} : vector<2x22x16xf32> to vector<2x16x16xf32>
      %c0_347 = arith.constant 0 : index
      %c9_348 = arith.constant 9 : index
      %322 = memref.load %arg3[%c0_347, %c9_348] : memref<2x49xf32, #tpu.memory_space<smem>>
      %323 = vector.broadcast %322 : f32 to vector<2x16x16xf32>
      %324 = arith.mulf %323, %320 : vector<2x16x16xf32>
      %c1_349 = arith.constant 1 : index
      %c9_350 = arith.constant 9 : index
      %325 = memref.load %arg3[%c1_349, %c9_350] : memref<2x49xf32, #tpu.memory_space<smem>>
      %326 = vector.broadcast %325 : f32 to vector<2x16x16xf32>
      %327 = arith.mulf %326, %321 : vector<2x16x16xf32>
      %328 = arith.addf %308, %324 : vector<2x16x16xf32>
      %329 = arith.addf %309, %327 : vector<2x16x16xf32>
      %330 = vector.extract_strided_slice %215 {offsets = [0, 1, 0], sizes = [2, 16, 16], strides = [1, 1, 1]} : vector<2x22x16xf32> to vector<2x16x16xf32>
      %331 = vector.extract_strided_slice %222 {offsets = [0, 1, 0], sizes = [2, 16, 16], strides = [1, 1, 1]} : vector<2x22x16xf32> to vector<2x16x16xf32>
      %c0_351 = arith.constant 0 : index
      %c10_352 = arith.constant 10 : index
      %332 = memref.load %arg3[%c0_351, %c10_352] : memref<2x49xf32, #tpu.memory_space<smem>>
      %333 = vector.broadcast %332 : f32 to vector<2x16x16xf32>
      %334 = arith.mulf %333, %330 : vector<2x16x16xf32>
      %c1_353 = arith.constant 1 : index
      %c10_354 = arith.constant 10 : index
      %335 = memref.load %arg3[%c1_353, %c10_354] : memref<2x49xf32, #tpu.memory_space<smem>>
      %336 = vector.broadcast %335 : f32 to vector<2x16x16xf32>
      %337 = arith.mulf %336, %331 : vector<2x16x16xf32>
      %338 = arith.addf %318, %334 : vector<2x16x16xf32>
      %339 = arith.addf %319, %337 : vector<2x16x16xf32>
      %340 = vector.extract_strided_slice %216 {offsets = [0, 1, 0], sizes = [2, 16, 16], strides = [1, 1, 1]} : vector<2x22x16xf32> to vector<2x16x16xf32>
      %341 = vector.extract_strided_slice %223 {offsets = [0, 1, 0], sizes = [2, 16, 16], strides = [1, 1, 1]} : vector<2x22x16xf32> to vector<2x16x16xf32>
      %c0_355 = arith.constant 0 : index
      %c11_356 = arith.constant 11 : index
      %342 = memref.load %arg3[%c0_355, %c11_356] : memref<2x49xf32, #tpu.memory_space<smem>>
      %343 = vector.broadcast %342 : f32 to vector<2x16x16xf32>
      %344 = arith.mulf %343, %340 : vector<2x16x16xf32>
      %c1_357 = arith.constant 1 : index
      %c11_358 = arith.constant 11 : index
      %345 = memref.load %arg3[%c1_357, %c11_358] : memref<2x49xf32, #tpu.memory_space<smem>>
      %346 = vector.broadcast %345 : f32 to vector<2x16x16xf32>
      %347 = arith.mulf %346, %341 : vector<2x16x16xf32>
      %348 = arith.addf %328, %344 : vector<2x16x16xf32>
      %349 = arith.addf %329, %347 : vector<2x16x16xf32>
      %350 = vector.extract_strided_slice %217 {offsets = [0, 1, 0], sizes = [2, 16, 16], strides = [1, 1, 1]} : vector<2x22x16xf32> to vector<2x16x16xf32>
      %351 = vector.extract_strided_slice %224 {offsets = [0, 1, 0], sizes = [2, 16, 16], strides = [1, 1, 1]} : vector<2x22x16xf32> to vector<2x16x16xf32>
      %c0_359 = arith.constant 0 : index
      %c12_360 = arith.constant 12 : index
      %352 = memref.load %arg3[%c0_359, %c12_360] : memref<2x49xf32, #tpu.memory_space<smem>>
      %353 = vector.broadcast %352 : f32 to vector<2x16x16xf32>
      %354 = arith.mulf %353, %350 : vector<2x16x16xf32>
      %c1_361 = arith.constant 1 : index
      %c12_362 = arith.constant 12 : index
      %355 = memref.load %arg3[%c1_361, %c12_362] : memref<2x49xf32, #tpu.memory_space<smem>>
      %356 = vector.broadcast %355 : f32 to vector<2x16x16xf32>
      %357 = arith.mulf %356, %351 : vector<2x16x16xf32>
      %358 = arith.addf %338, %354 : vector<2x16x16xf32>
      %359 = arith.addf %339, %357 : vector<2x16x16xf32>
      %360 = vector.extract_strided_slice %218 {offsets = [0, 1, 0], sizes = [2, 16, 16], strides = [1, 1, 1]} : vector<2x22x16xf32> to vector<2x16x16xf32>
      %361 = vector.extract_strided_slice %225 {offsets = [0, 1, 0], sizes = [2, 16, 16], strides = [1, 1, 1]} : vector<2x22x16xf32> to vector<2x16x16xf32>
      %c0_363 = arith.constant 0 : index
      %c13_364 = arith.constant 13 : index
      %362 = memref.load %arg3[%c0_363, %c13_364] : memref<2x49xf32, #tpu.memory_space<smem>>
      %363 = vector.broadcast %362 : f32 to vector<2x16x16xf32>
      %364 = arith.mulf %363, %360 : vector<2x16x16xf32>
      %c1_365 = arith.constant 1 : index
      %c13_366 = arith.constant 13 : index
      %365 = memref.load %arg3[%c1_365, %c13_366] : memref<2x49xf32, #tpu.memory_space<smem>>
      %366 = vector.broadcast %365 : f32 to vector<2x16x16xf32>
      %367 = arith.mulf %366, %361 : vector<2x16x16xf32>
      %368 = arith.addf %348, %364 : vector<2x16x16xf32>
      %369 = arith.addf %349, %367 : vector<2x16x16xf32>
      %370 = vector.extract_strided_slice %212 {offsets = [0, 2, 0], sizes = [2, 16, 16], strides = [1, 1, 1]} : vector<2x22x16xf32> to vector<2x16x16xf32>
      %371 = vector.extract_strided_slice %219 {offsets = [0, 2, 0], sizes = [2, 16, 16], strides = [1, 1, 1]} : vector<2x22x16xf32> to vector<2x16x16xf32>
      %c0_367 = arith.constant 0 : index
      %c14_368 = arith.constant 14 : index
      %372 = memref.load %arg3[%c0_367, %c14_368] : memref<2x49xf32, #tpu.memory_space<smem>>
      %373 = vector.broadcast %372 : f32 to vector<2x16x16xf32>
      %374 = arith.mulf %373, %370 : vector<2x16x16xf32>
      %c1_369 = arith.constant 1 : index
      %c14_370 = arith.constant 14 : index
      %375 = memref.load %arg3[%c1_369, %c14_370] : memref<2x49xf32, #tpu.memory_space<smem>>
      %376 = vector.broadcast %375 : f32 to vector<2x16x16xf32>
      %377 = arith.mulf %376, %371 : vector<2x16x16xf32>
      %378 = arith.addf %358, %374 : vector<2x16x16xf32>
      %379 = arith.addf %359, %377 : vector<2x16x16xf32>
      %380 = vector.extract_strided_slice %213 {offsets = [0, 2, 0], sizes = [2, 16, 16], strides = [1, 1, 1]} : vector<2x22x16xf32> to vector<2x16x16xf32>
      %381 = vector.extract_strided_slice %220 {offsets = [0, 2, 0], sizes = [2, 16, 16], strides = [1, 1, 1]} : vector<2x22x16xf32> to vector<2x16x16xf32>
      %c0_371 = arith.constant 0 : index
      %c15_372 = arith.constant 15 : index
      %382 = memref.load %arg3[%c0_371, %c15_372] : memref<2x49xf32, #tpu.memory_space<smem>>
      %383 = vector.broadcast %382 : f32 to vector<2x16x16xf32>
      %384 = arith.mulf %383, %380 : vector<2x16x16xf32>
      %c1_373 = arith.constant 1 : index
      %c15_374 = arith.constant 15 : index
      %385 = memref.load %arg3[%c1_373, %c15_374] : memref<2x49xf32, #tpu.memory_space<smem>>
      %386 = vector.broadcast %385 : f32 to vector<2x16x16xf32>
      %387 = arith.mulf %386, %381 : vector<2x16x16xf32>
      %388 = arith.addf %368, %384 : vector<2x16x16xf32>
      %389 = arith.addf %369, %387 : vector<2x16x16xf32>
      %390 = vector.extract_strided_slice %214 {offsets = [0, 2, 0], sizes = [2, 16, 16], strides = [1, 1, 1]} : vector<2x22x16xf32> to vector<2x16x16xf32>
      %391 = vector.extract_strided_slice %221 {offsets = [0, 2, 0], sizes = [2, 16, 16], strides = [1, 1, 1]} : vector<2x22x16xf32> to vector<2x16x16xf32>
      %c0_375 = arith.constant 0 : index
      %c16_376 = arith.constant 16 : index
      %392 = memref.load %arg3[%c0_375, %c16_376] : memref<2x49xf32, #tpu.memory_space<smem>>
      %393 = vector.broadcast %392 : f32 to vector<2x16x16xf32>
      %394 = arith.mulf %393, %390 : vector<2x16x16xf32>
      %c1_377 = arith.constant 1 : index
      %c16_378 = arith.constant 16 : index
      %395 = memref.load %arg3[%c1_377, %c16_378] : memref<2x49xf32, #tpu.memory_space<smem>>
      %396 = vector.broadcast %395 : f32 to vector<2x16x16xf32>
      %397 = arith.mulf %396, %391 : vector<2x16x16xf32>
      %398 = arith.addf %378, %394 : vector<2x16x16xf32>
      %399 = arith.addf %379, %397 : vector<2x16x16xf32>
      %400 = vector.extract_strided_slice %215 {offsets = [0, 2, 0], sizes = [2, 16, 16], strides = [1, 1, 1]} : vector<2x22x16xf32> to vector<2x16x16xf32>
      %401 = vector.extract_strided_slice %222 {offsets = [0, 2, 0], sizes = [2, 16, 16], strides = [1, 1, 1]} : vector<2x22x16xf32> to vector<2x16x16xf32>
      %c0_379 = arith.constant 0 : index
      %c17_380 = arith.constant 17 : index
      %402 = memref.load %arg3[%c0_379, %c17_380] : memref<2x49xf32, #tpu.memory_space<smem>>
      %403 = vector.broadcast %402 : f32 to vector<2x16x16xf32>
      %404 = arith.mulf %403, %400 : vector<2x16x16xf32>
      %c1_381 = arith.constant 1 : index
      %c17_382 = arith.constant 17 : index
      %405 = memref.load %arg3[%c1_381, %c17_382] : memref<2x49xf32, #tpu.memory_space<smem>>
      %406 = vector.broadcast %405 : f32 to vector<2x16x16xf32>
      %407 = arith.mulf %406, %401 : vector<2x16x16xf32>
      %408 = arith.addf %388, %404 : vector<2x16x16xf32>
      %409 = arith.addf %389, %407 : vector<2x16x16xf32>
      %410 = vector.extract_strided_slice %216 {offsets = [0, 2, 0], sizes = [2, 16, 16], strides = [1, 1, 1]} : vector<2x22x16xf32> to vector<2x16x16xf32>
      %411 = vector.extract_strided_slice %223 {offsets = [0, 2, 0], sizes = [2, 16, 16], strides = [1, 1, 1]} : vector<2x22x16xf32> to vector<2x16x16xf32>
      %c0_383 = arith.constant 0 : index
      %c18_384 = arith.constant 18 : index
      %412 = memref.load %arg3[%c0_383, %c18_384] : memref<2x49xf32, #tpu.memory_space<smem>>
      %413 = vector.broadcast %412 : f32 to vector<2x16x16xf32>
      %414 = arith.mulf %413, %410 : vector<2x16x16xf32>
      %c1_385 = arith.constant 1 : index
      %c18_386 = arith.constant 18 : index
      %415 = memref.load %arg3[%c1_385, %c18_386] : memref<2x49xf32, #tpu.memory_space<smem>>
      %416 = vector.broadcast %415 : f32 to vector<2x16x16xf32>
      %417 = arith.mulf %416, %411 : vector<2x16x16xf32>
      %418 = arith.addf %398, %414 : vector<2x16x16xf32>
      %419 = arith.addf %399, %417 : vector<2x16x16xf32>
      %420 = vector.extract_strided_slice %217 {offsets = [0, 2, 0], sizes = [2, 16, 16], strides = [1, 1, 1]} : vector<2x22x16xf32> to vector<2x16x16xf32>
      %421 = vector.extract_strided_slice %224 {offsets = [0, 2, 0], sizes = [2, 16, 16], strides = [1, 1, 1]} : vector<2x22x16xf32> to vector<2x16x16xf32>
      %c0_387 = arith.constant 0 : index
      %c19_388 = arith.constant 19 : index
      %422 = memref.load %arg3[%c0_387, %c19_388] : memref<2x49xf32, #tpu.memory_space<smem>>
      %423 = vector.broadcast %422 : f32 to vector<2x16x16xf32>
      %424 = arith.mulf %423, %420 : vector<2x16x16xf32>
      %c1_389 = arith.constant 1 : index
      %c19_390 = arith.constant 19 : index
      %425 = memref.load %arg3[%c1_389, %c19_390] : memref<2x49xf32, #tpu.memory_space<smem>>
      %426 = vector.broadcast %425 : f32 to vector<2x16x16xf32>
      %427 = arith.mulf %426, %421 : vector<2x16x16xf32>
      %428 = arith.addf %408, %424 : vector<2x16x16xf32>
      %429 = arith.addf %409, %427 : vector<2x16x16xf32>
      %430 = vector.extract_strided_slice %218 {offsets = [0, 2, 0], sizes = [2, 16, 16], strides = [1, 1, 1]} : vector<2x22x16xf32> to vector<2x16x16xf32>
      %431 = vector.extract_strided_slice %225 {offsets = [0, 2, 0], sizes = [2, 16, 16], strides = [1, 1, 1]} : vector<2x22x16xf32> to vector<2x16x16xf32>
      %c0_391 = arith.constant 0 : index
      %c20_392 = arith.constant 20 : index
      %432 = memref.load %arg3[%c0_391, %c20_392] : memref<2x49xf32, #tpu.memory_space<smem>>
      %433 = vector.broadcast %432 : f32 to vector<2x16x16xf32>
      %434 = arith.mulf %433, %430 : vector<2x16x16xf32>
      %c1_393 = arith.constant 1 : index
      %c20_394 = arith.constant 20 : index
      %435 = memref.load %arg3[%c1_393, %c20_394] : memref<2x49xf32, #tpu.memory_space<smem>>
      %436 = vector.broadcast %435 : f32 to vector<2x16x16xf32>
      %437 = arith.mulf %436, %431 : vector<2x16x16xf32>
      %438 = arith.addf %418, %434 : vector<2x16x16xf32>
      %439 = arith.addf %419, %437 : vector<2x16x16xf32>
      %440 = vector.extract_strided_slice %212 {offsets = [0, 3, 0], sizes = [2, 16, 16], strides = [1, 1, 1]} : vector<2x22x16xf32> to vector<2x16x16xf32>
      %441 = vector.extract_strided_slice %219 {offsets = [0, 3, 0], sizes = [2, 16, 16], strides = [1, 1, 1]} : vector<2x22x16xf32> to vector<2x16x16xf32>
      %c0_395 = arith.constant 0 : index
      %c21_396 = arith.constant 21 : index
      %442 = memref.load %arg3[%c0_395, %c21_396] : memref<2x49xf32, #tpu.memory_space<smem>>
      %443 = vector.broadcast %442 : f32 to vector<2x16x16xf32>
      %444 = arith.mulf %443, %440 : vector<2x16x16xf32>
      %c1_397 = arith.constant 1 : index
      %c21_398 = arith.constant 21 : index
      %445 = memref.load %arg3[%c1_397, %c21_398] : memref<2x49xf32, #tpu.memory_space<smem>>
      %446 = vector.broadcast %445 : f32 to vector<2x16x16xf32>
      %447 = arith.mulf %446, %441 : vector<2x16x16xf32>
      %448 = arith.addf %428, %444 : vector<2x16x16xf32>
      %449 = arith.addf %429, %447 : vector<2x16x16xf32>
      %450 = vector.extract_strided_slice %213 {offsets = [0, 3, 0], sizes = [2, 16, 16], strides = [1, 1, 1]} : vector<2x22x16xf32> to vector<2x16x16xf32>
      %451 = vector.extract_strided_slice %220 {offsets = [0, 3, 0], sizes = [2, 16, 16], strides = [1, 1, 1]} : vector<2x22x16xf32> to vector<2x16x16xf32>
      %c0_399 = arith.constant 0 : index
      %c22 = arith.constant 22 : index
      %452 = memref.load %arg3[%c0_399, %c22] : memref<2x49xf32, #tpu.memory_space<smem>>
      %453 = vector.broadcast %452 : f32 to vector<2x16x16xf32>
      %454 = arith.mulf %453, %450 : vector<2x16x16xf32>
      %c1_400 = arith.constant 1 : index
      %c22_401 = arith.constant 22 : index
      %455 = memref.load %arg3[%c1_400, %c22_401] : memref<2x49xf32, #tpu.memory_space<smem>>
      %456 = vector.broadcast %455 : f32 to vector<2x16x16xf32>
      %457 = arith.mulf %456, %451 : vector<2x16x16xf32>
      %458 = arith.addf %438, %454 : vector<2x16x16xf32>
      %459 = arith.addf %439, %457 : vector<2x16x16xf32>
      %460 = vector.extract_strided_slice %214 {offsets = [0, 3, 0], sizes = [2, 16, 16], strides = [1, 1, 1]} : vector<2x22x16xf32> to vector<2x16x16xf32>
      %461 = vector.extract_strided_slice %221 {offsets = [0, 3, 0], sizes = [2, 16, 16], strides = [1, 1, 1]} : vector<2x22x16xf32> to vector<2x16x16xf32>
      %c0_402 = arith.constant 0 : index
      %c23 = arith.constant 23 : index
      %462 = memref.load %arg3[%c0_402, %c23] : memref<2x49xf32, #tpu.memory_space<smem>>
      %463 = vector.broadcast %462 : f32 to vector<2x16x16xf32>
      %464 = arith.mulf %463, %460 : vector<2x16x16xf32>
      %c1_403 = arith.constant 1 : index
      %c23_404 = arith.constant 23 : index
      %465 = memref.load %arg3[%c1_403, %c23_404] : memref<2x49xf32, #tpu.memory_space<smem>>
      %466 = vector.broadcast %465 : f32 to vector<2x16x16xf32>
      %467 = arith.mulf %466, %461 : vector<2x16x16xf32>
      %468 = arith.addf %448, %464 : vector<2x16x16xf32>
      %469 = arith.addf %449, %467 : vector<2x16x16xf32>
      %470 = vector.extract_strided_slice %215 {offsets = [0, 3, 0], sizes = [2, 16, 16], strides = [1, 1, 1]} : vector<2x22x16xf32> to vector<2x16x16xf32>
      %471 = vector.extract_strided_slice %222 {offsets = [0, 3, 0], sizes = [2, 16, 16], strides = [1, 1, 1]} : vector<2x22x16xf32> to vector<2x16x16xf32>
      %c0_405 = arith.constant 0 : index
      %c24 = arith.constant 24 : index
      %472 = memref.load %arg3[%c0_405, %c24] : memref<2x49xf32, #tpu.memory_space<smem>>
      %473 = vector.broadcast %472 : f32 to vector<2x16x16xf32>
      %474 = arith.mulf %473, %470 : vector<2x16x16xf32>
      %c1_406 = arith.constant 1 : index
      %c24_407 = arith.constant 24 : index
      %475 = memref.load %arg3[%c1_406, %c24_407] : memref<2x49xf32, #tpu.memory_space<smem>>
      %476 = vector.broadcast %475 : f32 to vector<2x16x16xf32>
      %477 = arith.mulf %476, %471 : vector<2x16x16xf32>
      %478 = arith.addf %458, %474 : vector<2x16x16xf32>
      %479 = arith.addf %459, %477 : vector<2x16x16xf32>
      %480 = vector.extract_strided_slice %216 {offsets = [0, 3, 0], sizes = [2, 16, 16], strides = [1, 1, 1]} : vector<2x22x16xf32> to vector<2x16x16xf32>
      %481 = vector.extract_strided_slice %223 {offsets = [0, 3, 0], sizes = [2, 16, 16], strides = [1, 1, 1]} : vector<2x22x16xf32> to vector<2x16x16xf32>
      %c0_408 = arith.constant 0 : index
      %c25 = arith.constant 25 : index
      %482 = memref.load %arg3[%c0_408, %c25] : memref<2x49xf32, #tpu.memory_space<smem>>
      %483 = vector.broadcast %482 : f32 to vector<2x16x16xf32>
      %484 = arith.mulf %483, %480 : vector<2x16x16xf32>
      %c1_409 = arith.constant 1 : index
      %c25_410 = arith.constant 25 : index
      %485 = memref.load %arg3[%c1_409, %c25_410] : memref<2x49xf32, #tpu.memory_space<smem>>
      %486 = vector.broadcast %485 : f32 to vector<2x16x16xf32>
      %487 = arith.mulf %486, %481 : vector<2x16x16xf32>
      %488 = arith.addf %468, %484 : vector<2x16x16xf32>
      %489 = arith.addf %469, %487 : vector<2x16x16xf32>
      %490 = vector.extract_strided_slice %217 {offsets = [0, 3, 0], sizes = [2, 16, 16], strides = [1, 1, 1]} : vector<2x22x16xf32> to vector<2x16x16xf32>
      %491 = vector.extract_strided_slice %224 {offsets = [0, 3, 0], sizes = [2, 16, 16], strides = [1, 1, 1]} : vector<2x22x16xf32> to vector<2x16x16xf32>
      %c0_411 = arith.constant 0 : index
      %c26 = arith.constant 26 : index
      %492 = memref.load %arg3[%c0_411, %c26] : memref<2x49xf32, #tpu.memory_space<smem>>
      %493 = vector.broadcast %492 : f32 to vector<2x16x16xf32>
      %494 = arith.mulf %493, %490 : vector<2x16x16xf32>
      %c1_412 = arith.constant 1 : index
      %c26_413 = arith.constant 26 : index
      %495 = memref.load %arg3[%c1_412, %c26_413] : memref<2x49xf32, #tpu.memory_space<smem>>
      %496 = vector.broadcast %495 : f32 to vector<2x16x16xf32>
      %497 = arith.mulf %496, %491 : vector<2x16x16xf32>
      %498 = arith.addf %478, %494 : vector<2x16x16xf32>
      %499 = arith.addf %479, %497 : vector<2x16x16xf32>
      %500 = vector.extract_strided_slice %218 {offsets = [0, 3, 0], sizes = [2, 16, 16], strides = [1, 1, 1]} : vector<2x22x16xf32> to vector<2x16x16xf32>
      %501 = vector.extract_strided_slice %225 {offsets = [0, 3, 0], sizes = [2, 16, 16], strides = [1, 1, 1]} : vector<2x22x16xf32> to vector<2x16x16xf32>
      %c0_414 = arith.constant 0 : index
      %c27 = arith.constant 27 : index
      %502 = memref.load %arg3[%c0_414, %c27] : memref<2x49xf32, #tpu.memory_space<smem>>
      %503 = vector.broadcast %502 : f32 to vector<2x16x16xf32>
      %504 = arith.mulf %503, %500 : vector<2x16x16xf32>
      %c1_415 = arith.constant 1 : index
      %c27_416 = arith.constant 27 : index
      %505 = memref.load %arg3[%c1_415, %c27_416] : memref<2x49xf32, #tpu.memory_space<smem>>
      %506 = vector.broadcast %505 : f32 to vector<2x16x16xf32>
      %507 = arith.mulf %506, %501 : vector<2x16x16xf32>
      %508 = arith.addf %488, %504 : vector<2x16x16xf32>
      %509 = arith.addf %489, %507 : vector<2x16x16xf32>
      %510 = vector.extract_strided_slice %212 {offsets = [0, 4, 0], sizes = [2, 16, 16], strides = [1, 1, 1]} : vector<2x22x16xf32> to vector<2x16x16xf32>
      %511 = vector.extract_strided_slice %219 {offsets = [0, 4, 0], sizes = [2, 16, 16], strides = [1, 1, 1]} : vector<2x22x16xf32> to vector<2x16x16xf32>
      %c0_417 = arith.constant 0 : index
      %c28 = arith.constant 28 : index
      %512 = memref.load %arg3[%c0_417, %c28] : memref<2x49xf32, #tpu.memory_space<smem>>
      %513 = vector.broadcast %512 : f32 to vector<2x16x16xf32>
      %514 = arith.mulf %513, %510 : vector<2x16x16xf32>
      %c1_418 = arith.constant 1 : index
      %c28_419 = arith.constant 28 : index
      %515 = memref.load %arg3[%c1_418, %c28_419] : memref<2x49xf32, #tpu.memory_space<smem>>
      %516 = vector.broadcast %515 : f32 to vector<2x16x16xf32>
      %517 = arith.mulf %516, %511 : vector<2x16x16xf32>
      %518 = arith.addf %498, %514 : vector<2x16x16xf32>
      %519 = arith.addf %499, %517 : vector<2x16x16xf32>
      %520 = vector.extract_strided_slice %213 {offsets = [0, 4, 0], sizes = [2, 16, 16], strides = [1, 1, 1]} : vector<2x22x16xf32> to vector<2x16x16xf32>
      %521 = vector.extract_strided_slice %220 {offsets = [0, 4, 0], sizes = [2, 16, 16], strides = [1, 1, 1]} : vector<2x22x16xf32> to vector<2x16x16xf32>
      %c0_420 = arith.constant 0 : index
      %c29 = arith.constant 29 : index
      %522 = memref.load %arg3[%c0_420, %c29] : memref<2x49xf32, #tpu.memory_space<smem>>
      %523 = vector.broadcast %522 : f32 to vector<2x16x16xf32>
      %524 = arith.mulf %523, %520 : vector<2x16x16xf32>
      %c1_421 = arith.constant 1 : index
      %c29_422 = arith.constant 29 : index
      %525 = memref.load %arg3[%c1_421, %c29_422] : memref<2x49xf32, #tpu.memory_space<smem>>
      %526 = vector.broadcast %525 : f32 to vector<2x16x16xf32>
      %527 = arith.mulf %526, %521 : vector<2x16x16xf32>
      %528 = arith.addf %508, %524 : vector<2x16x16xf32>
      %529 = arith.addf %509, %527 : vector<2x16x16xf32>
      %530 = vector.extract_strided_slice %214 {offsets = [0, 4, 0], sizes = [2, 16, 16], strides = [1, 1, 1]} : vector<2x22x16xf32> to vector<2x16x16xf32>
      %531 = vector.extract_strided_slice %221 {offsets = [0, 4, 0], sizes = [2, 16, 16], strides = [1, 1, 1]} : vector<2x22x16xf32> to vector<2x16x16xf32>
      %c0_423 = arith.constant 0 : index
      %c30 = arith.constant 30 : index
      %532 = memref.load %arg3[%c0_423, %c30] : memref<2x49xf32, #tpu.memory_space<smem>>
      %533 = vector.broadcast %532 : f32 to vector<2x16x16xf32>
      %534 = arith.mulf %533, %530 : vector<2x16x16xf32>
      %c1_424 = arith.constant 1 : index
      %c30_425 = arith.constant 30 : index
      %535 = memref.load %arg3[%c1_424, %c30_425] : memref<2x49xf32, #tpu.memory_space<smem>>
      %536 = vector.broadcast %535 : f32 to vector<2x16x16xf32>
      %537 = arith.mulf %536, %531 : vector<2x16x16xf32>
      %538 = arith.addf %518, %534 : vector<2x16x16xf32>
      %539 = arith.addf %519, %537 : vector<2x16x16xf32>
      %540 = vector.extract_strided_slice %215 {offsets = [0, 4, 0], sizes = [2, 16, 16], strides = [1, 1, 1]} : vector<2x22x16xf32> to vector<2x16x16xf32>
      %541 = vector.extract_strided_slice %222 {offsets = [0, 4, 0], sizes = [2, 16, 16], strides = [1, 1, 1]} : vector<2x22x16xf32> to vector<2x16x16xf32>
      %c0_426 = arith.constant 0 : index
      %c31 = arith.constant 31 : index
      %542 = memref.load %arg3[%c0_426, %c31] : memref<2x49xf32, #tpu.memory_space<smem>>
      %543 = vector.broadcast %542 : f32 to vector<2x16x16xf32>
      %544 = arith.mulf %543, %540 : vector<2x16x16xf32>
      %c1_427 = arith.constant 1 : index
      %c31_428 = arith.constant 31 : index
      %545 = memref.load %arg3[%c1_427, %c31_428] : memref<2x49xf32, #tpu.memory_space<smem>>
      %546 = vector.broadcast %545 : f32 to vector<2x16x16xf32>
      %547 = arith.mulf %546, %541 : vector<2x16x16xf32>
      %548 = arith.addf %528, %544 : vector<2x16x16xf32>
      %549 = arith.addf %529, %547 : vector<2x16x16xf32>
      %550 = vector.extract_strided_slice %216 {offsets = [0, 4, 0], sizes = [2, 16, 16], strides = [1, 1, 1]} : vector<2x22x16xf32> to vector<2x16x16xf32>
      %551 = vector.extract_strided_slice %223 {offsets = [0, 4, 0], sizes = [2, 16, 16], strides = [1, 1, 1]} : vector<2x22x16xf32> to vector<2x16x16xf32>
      %c0_429 = arith.constant 0 : index
      %c32_430 = arith.constant 32 : index
      %552 = memref.load %arg3[%c0_429, %c32_430] : memref<2x49xf32, #tpu.memory_space<smem>>
      %553 = vector.broadcast %552 : f32 to vector<2x16x16xf32>
      %554 = arith.mulf %553, %550 : vector<2x16x16xf32>
      %c1_431 = arith.constant 1 : index
      %c32_432 = arith.constant 32 : index
      %555 = memref.load %arg3[%c1_431, %c32_432] : memref<2x49xf32, #tpu.memory_space<smem>>
      %556 = vector.broadcast %555 : f32 to vector<2x16x16xf32>
      %557 = arith.mulf %556, %551 : vector<2x16x16xf32>
      %558 = arith.addf %538, %554 : vector<2x16x16xf32>
      %559 = arith.addf %539, %557 : vector<2x16x16xf32>
      %560 = vector.extract_strided_slice %217 {offsets = [0, 4, 0], sizes = [2, 16, 16], strides = [1, 1, 1]} : vector<2x22x16xf32> to vector<2x16x16xf32>
      %561 = vector.extract_strided_slice %224 {offsets = [0, 4, 0], sizes = [2, 16, 16], strides = [1, 1, 1]} : vector<2x22x16xf32> to vector<2x16x16xf32>
      %c0_433 = arith.constant 0 : index
      %c33 = arith.constant 33 : index
      %562 = memref.load %arg3[%c0_433, %c33] : memref<2x49xf32, #tpu.memory_space<smem>>
      %563 = vector.broadcast %562 : f32 to vector<2x16x16xf32>
      %564 = arith.mulf %563, %560 : vector<2x16x16xf32>
      %c1_434 = arith.constant 1 : index
      %c33_435 = arith.constant 33 : index
      %565 = memref.load %arg3[%c1_434, %c33_435] : memref<2x49xf32, #tpu.memory_space<smem>>
      %566 = vector.broadcast %565 : f32 to vector<2x16x16xf32>
      %567 = arith.mulf %566, %561 : vector<2x16x16xf32>
      %568 = arith.addf %548, %564 : vector<2x16x16xf32>
      %569 = arith.addf %549, %567 : vector<2x16x16xf32>
      %570 = vector.extract_strided_slice %218 {offsets = [0, 4, 0], sizes = [2, 16, 16], strides = [1, 1, 1]} : vector<2x22x16xf32> to vector<2x16x16xf32>
      %571 = vector.extract_strided_slice %225 {offsets = [0, 4, 0], sizes = [2, 16, 16], strides = [1, 1, 1]} : vector<2x22x16xf32> to vector<2x16x16xf32>
      %c0_436 = arith.constant 0 : index
      %c34 = arith.constant 34 : index
      %572 = memref.load %arg3[%c0_436, %c34] : memref<2x49xf32, #tpu.memory_space<smem>>
      %573 = vector.broadcast %572 : f32 to vector<2x16x16xf32>
      %574 = arith.mulf %573, %570 : vector<2x16x16xf32>
      %c1_437 = arith.constant 1 : index
      %c34_438 = arith.constant 34 : index
      %575 = memref.load %arg3[%c1_437, %c34_438] : memref<2x49xf32, #tpu.memory_space<smem>>
      %576 = vector.broadcast %575 : f32 to vector<2x16x16xf32>
      %577 = arith.mulf %576, %571 : vector<2x16x16xf32>
      %578 = arith.addf %558, %574 : vector<2x16x16xf32>
      %579 = arith.addf %559, %577 : vector<2x16x16xf32>
      %580 = vector.extract_strided_slice %212 {offsets = [0, 5, 0], sizes = [2, 16, 16], strides = [1, 1, 1]} : vector<2x22x16xf32> to vector<2x16x16xf32>
      %581 = vector.extract_strided_slice %219 {offsets = [0, 5, 0], sizes = [2, 16, 16], strides = [1, 1, 1]} : vector<2x22x16xf32> to vector<2x16x16xf32>
      %c0_439 = arith.constant 0 : index
      %c35 = arith.constant 35 : index
      %582 = memref.load %arg3[%c0_439, %c35] : memref<2x49xf32, #tpu.memory_space<smem>>
      %583 = vector.broadcast %582 : f32 to vector<2x16x16xf32>
      %584 = arith.mulf %583, %580 : vector<2x16x16xf32>
      %c1_440 = arith.constant 1 : index
      %c35_441 = arith.constant 35 : index
      %585 = memref.load %arg3[%c1_440, %c35_441] : memref<2x49xf32, #tpu.memory_space<smem>>
      %586 = vector.broadcast %585 : f32 to vector<2x16x16xf32>
      %587 = arith.mulf %586, %581 : vector<2x16x16xf32>
      %588 = arith.addf %568, %584 : vector<2x16x16xf32>
      %589 = arith.addf %569, %587 : vector<2x16x16xf32>
      %590 = vector.extract_strided_slice %213 {offsets = [0, 5, 0], sizes = [2, 16, 16], strides = [1, 1, 1]} : vector<2x22x16xf32> to vector<2x16x16xf32>
      %591 = vector.extract_strided_slice %220 {offsets = [0, 5, 0], sizes = [2, 16, 16], strides = [1, 1, 1]} : vector<2x22x16xf32> to vector<2x16x16xf32>
      %c0_442 = arith.constant 0 : index
      %c36 = arith.constant 36 : index
      %592 = memref.load %arg3[%c0_442, %c36] : memref<2x49xf32, #tpu.memory_space<smem>>
      %593 = vector.broadcast %592 : f32 to vector<2x16x16xf32>
      %594 = arith.mulf %593, %590 : vector<2x16x16xf32>
      %c1_443 = arith.constant 1 : index
      %c36_444 = arith.constant 36 : index
      %595 = memref.load %arg3[%c1_443, %c36_444] : memref<2x49xf32, #tpu.memory_space<smem>>
      %596 = vector.broadcast %595 : f32 to vector<2x16x16xf32>
      %597 = arith.mulf %596, %591 : vector<2x16x16xf32>
      %598 = arith.addf %578, %594 : vector<2x16x16xf32>
      %599 = arith.addf %579, %597 : vector<2x16x16xf32>
      %600 = vector.extract_strided_slice %214 {offsets = [0, 5, 0], sizes = [2, 16, 16], strides = [1, 1, 1]} : vector<2x22x16xf32> to vector<2x16x16xf32>
      %601 = vector.extract_strided_slice %221 {offsets = [0, 5, 0], sizes = [2, 16, 16], strides = [1, 1, 1]} : vector<2x22x16xf32> to vector<2x16x16xf32>
      %c0_445 = arith.constant 0 : index
      %c37 = arith.constant 37 : index
      %602 = memref.load %arg3[%c0_445, %c37] : memref<2x49xf32, #tpu.memory_space<smem>>
      %603 = vector.broadcast %602 : f32 to vector<2x16x16xf32>
      %604 = arith.mulf %603, %600 : vector<2x16x16xf32>
      %c1_446 = arith.constant 1 : index
      %c37_447 = arith.constant 37 : index
      %605 = memref.load %arg3[%c1_446, %c37_447] : memref<2x49xf32, #tpu.memory_space<smem>>
      %606 = vector.broadcast %605 : f32 to vector<2x16x16xf32>
      %607 = arith.mulf %606, %601 : vector<2x16x16xf32>
      %608 = arith.addf %588, %604 : vector<2x16x16xf32>
      %609 = arith.addf %589, %607 : vector<2x16x16xf32>
      %610 = vector.extract_strided_slice %215 {offsets = [0, 5, 0], sizes = [2, 16, 16], strides = [1, 1, 1]} : vector<2x22x16xf32> to vector<2x16x16xf32>
      %611 = vector.extract_strided_slice %222 {offsets = [0, 5, 0], sizes = [2, 16, 16], strides = [1, 1, 1]} : vector<2x22x16xf32> to vector<2x16x16xf32>
      %c0_448 = arith.constant 0 : index
      %c38 = arith.constant 38 : index
      %612 = memref.load %arg3[%c0_448, %c38] : memref<2x49xf32, #tpu.memory_space<smem>>
      %613 = vector.broadcast %612 : f32 to vector<2x16x16xf32>
      %614 = arith.mulf %613, %610 : vector<2x16x16xf32>
      %c1_449 = arith.constant 1 : index
      %c38_450 = arith.constant 38 : index
      %615 = memref.load %arg3[%c1_449, %c38_450] : memref<2x49xf32, #tpu.memory_space<smem>>
      %616 = vector.broadcast %615 : f32 to vector<2x16x16xf32>
      %617 = arith.mulf %616, %611 : vector<2x16x16xf32>
      %618 = arith.addf %598, %614 : vector<2x16x16xf32>
      %619 = arith.addf %599, %617 : vector<2x16x16xf32>
      %620 = vector.extract_strided_slice %216 {offsets = [0, 5, 0], sizes = [2, 16, 16], strides = [1, 1, 1]} : vector<2x22x16xf32> to vector<2x16x16xf32>
      %621 = vector.extract_strided_slice %223 {offsets = [0, 5, 0], sizes = [2, 16, 16], strides = [1, 1, 1]} : vector<2x22x16xf32> to vector<2x16x16xf32>
      %c0_451 = arith.constant 0 : index
      %c39 = arith.constant 39 : index
      %622 = memref.load %arg3[%c0_451, %c39] : memref<2x49xf32, #tpu.memory_space<smem>>
      %623 = vector.broadcast %622 : f32 to vector<2x16x16xf32>
      %624 = arith.mulf %623, %620 : vector<2x16x16xf32>
      %c1_452 = arith.constant 1 : index
      %c39_453 = arith.constant 39 : index
      %625 = memref.load %arg3[%c1_452, %c39_453] : memref<2x49xf32, #tpu.memory_space<smem>>
      %626 = vector.broadcast %625 : f32 to vector<2x16x16xf32>
      %627 = arith.mulf %626, %621 : vector<2x16x16xf32>
      %628 = arith.addf %608, %624 : vector<2x16x16xf32>
      %629 = arith.addf %609, %627 : vector<2x16x16xf32>
      %630 = vector.extract_strided_slice %217 {offsets = [0, 5, 0], sizes = [2, 16, 16], strides = [1, 1, 1]} : vector<2x22x16xf32> to vector<2x16x16xf32>
      %631 = vector.extract_strided_slice %224 {offsets = [0, 5, 0], sizes = [2, 16, 16], strides = [1, 1, 1]} : vector<2x22x16xf32> to vector<2x16x16xf32>
      %c0_454 = arith.constant 0 : index
      %c40 = arith.constant 40 : index
      %632 = memref.load %arg3[%c0_454, %c40] : memref<2x49xf32, #tpu.memory_space<smem>>
      %633 = vector.broadcast %632 : f32 to vector<2x16x16xf32>
      %634 = arith.mulf %633, %630 : vector<2x16x16xf32>
      %c1_455 = arith.constant 1 : index
      %c40_456 = arith.constant 40 : index
      %635 = memref.load %arg3[%c1_455, %c40_456] : memref<2x49xf32, #tpu.memory_space<smem>>
      %636 = vector.broadcast %635 : f32 to vector<2x16x16xf32>
      %637 = arith.mulf %636, %631 : vector<2x16x16xf32>
      %638 = arith.addf %618, %634 : vector<2x16x16xf32>
      %639 = arith.addf %619, %637 : vector<2x16x16xf32>
      %640 = vector.extract_strided_slice %218 {offsets = [0, 5, 0], sizes = [2, 16, 16], strides = [1, 1, 1]} : vector<2x22x16xf32> to vector<2x16x16xf32>
      %641 = vector.extract_strided_slice %225 {offsets = [0, 5, 0], sizes = [2, 16, 16], strides = [1, 1, 1]} : vector<2x22x16xf32> to vector<2x16x16xf32>
      %c0_457 = arith.constant 0 : index
      %c41 = arith.constant 41 : index
      %642 = memref.load %arg3[%c0_457, %c41] : memref<2x49xf32, #tpu.memory_space<smem>>
      %643 = vector.broadcast %642 : f32 to vector<2x16x16xf32>
      %644 = arith.mulf %643, %640 : vector<2x16x16xf32>
      %c1_458 = arith.constant 1 : index
      %c41_459 = arith.constant 41 : index
      %645 = memref.load %arg3[%c1_458, %c41_459] : memref<2x49xf32, #tpu.memory_space<smem>>
      %646 = vector.broadcast %645 : f32 to vector<2x16x16xf32>
      %647 = arith.mulf %646, %641 : vector<2x16x16xf32>
      %648 = arith.addf %628, %644 : vector<2x16x16xf32>
      %649 = arith.addf %629, %647 : vector<2x16x16xf32>
      %650 = vector.extract_strided_slice %212 {offsets = [0, 6, 0], sizes = [2, 16, 16], strides = [1, 1, 1]} : vector<2x22x16xf32> to vector<2x16x16xf32>
      %651 = vector.extract_strided_slice %219 {offsets = [0, 6, 0], sizes = [2, 16, 16], strides = [1, 1, 1]} : vector<2x22x16xf32> to vector<2x16x16xf32>
      %c0_460 = arith.constant 0 : index
      %c42 = arith.constant 42 : index
      %652 = memref.load %arg3[%c0_460, %c42] : memref<2x49xf32, #tpu.memory_space<smem>>
      %653 = vector.broadcast %652 : f32 to vector<2x16x16xf32>
      %654 = arith.mulf %653, %650 : vector<2x16x16xf32>
      %c1_461 = arith.constant 1 : index
      %c42_462 = arith.constant 42 : index
      %655 = memref.load %arg3[%c1_461, %c42_462] : memref<2x49xf32, #tpu.memory_space<smem>>
      %656 = vector.broadcast %655 : f32 to vector<2x16x16xf32>
      %657 = arith.mulf %656, %651 : vector<2x16x16xf32>
      %658 = arith.addf %638, %654 : vector<2x16x16xf32>
      %659 = arith.addf %639, %657 : vector<2x16x16xf32>
      %660 = vector.extract_strided_slice %213 {offsets = [0, 6, 0], sizes = [2, 16, 16], strides = [1, 1, 1]} : vector<2x22x16xf32> to vector<2x16x16xf32>
      %661 = vector.extract_strided_slice %220 {offsets = [0, 6, 0], sizes = [2, 16, 16], strides = [1, 1, 1]} : vector<2x22x16xf32> to vector<2x16x16xf32>
      %c0_463 = arith.constant 0 : index
      %c43 = arith.constant 43 : index
      %662 = memref.load %arg3[%c0_463, %c43] : memref<2x49xf32, #tpu.memory_space<smem>>
      %663 = vector.broadcast %662 : f32 to vector<2x16x16xf32>
      %664 = arith.mulf %663, %660 : vector<2x16x16xf32>
      %c1_464 = arith.constant 1 : index
      %c43_465 = arith.constant 43 : index
      %665 = memref.load %arg3[%c1_464, %c43_465] : memref<2x49xf32, #tpu.memory_space<smem>>
      %666 = vector.broadcast %665 : f32 to vector<2x16x16xf32>
      %667 = arith.mulf %666, %661 : vector<2x16x16xf32>
      %668 = arith.addf %648, %664 : vector<2x16x16xf32>
      %669 = arith.addf %649, %667 : vector<2x16x16xf32>
      %670 = vector.extract_strided_slice %214 {offsets = [0, 6, 0], sizes = [2, 16, 16], strides = [1, 1, 1]} : vector<2x22x16xf32> to vector<2x16x16xf32>
      %671 = vector.extract_strided_slice %221 {offsets = [0, 6, 0], sizes = [2, 16, 16], strides = [1, 1, 1]} : vector<2x22x16xf32> to vector<2x16x16xf32>
      %c0_466 = arith.constant 0 : index
      %c44 = arith.constant 44 : index
      %672 = memref.load %arg3[%c0_466, %c44] : memref<2x49xf32, #tpu.memory_space<smem>>
      %673 = vector.broadcast %672 : f32 to vector<2x16x16xf32>
      %674 = arith.mulf %673, %670 : vector<2x16x16xf32>
      %c1_467 = arith.constant 1 : index
      %c44_468 = arith.constant 44 : index
      %675 = memref.load %arg3[%c1_467, %c44_468] : memref<2x49xf32, #tpu.memory_space<smem>>
      %676 = vector.broadcast %675 : f32 to vector<2x16x16xf32>
      %677 = arith.mulf %676, %671 : vector<2x16x16xf32>
      %678 = arith.addf %658, %674 : vector<2x16x16xf32>
      %679 = arith.addf %659, %677 : vector<2x16x16xf32>
      %680 = vector.extract_strided_slice %215 {offsets = [0, 6, 0], sizes = [2, 16, 16], strides = [1, 1, 1]} : vector<2x22x16xf32> to vector<2x16x16xf32>
      %681 = vector.extract_strided_slice %222 {offsets = [0, 6, 0], sizes = [2, 16, 16], strides = [1, 1, 1]} : vector<2x22x16xf32> to vector<2x16x16xf32>
      %c0_469 = arith.constant 0 : index
      %c45 = arith.constant 45 : index
      %682 = memref.load %arg3[%c0_469, %c45] : memref<2x49xf32, #tpu.memory_space<smem>>
      %683 = vector.broadcast %682 : f32 to vector<2x16x16xf32>
      %684 = arith.mulf %683, %680 : vector<2x16x16xf32>
      %c1_470 = arith.constant 1 : index
      %c45_471 = arith.constant 45 : index
      %685 = memref.load %arg3[%c1_470, %c45_471] : memref<2x49xf32, #tpu.memory_space<smem>>
      %686 = vector.broadcast %685 : f32 to vector<2x16x16xf32>
      %687 = arith.mulf %686, %681 : vector<2x16x16xf32>
      %688 = arith.addf %668, %684 : vector<2x16x16xf32>
      %689 = arith.addf %669, %687 : vector<2x16x16xf32>
      %690 = vector.extract_strided_slice %216 {offsets = [0, 6, 0], sizes = [2, 16, 16], strides = [1, 1, 1]} : vector<2x22x16xf32> to vector<2x16x16xf32>
      %691 = vector.extract_strided_slice %223 {offsets = [0, 6, 0], sizes = [2, 16, 16], strides = [1, 1, 1]} : vector<2x22x16xf32> to vector<2x16x16xf32>
      %c0_472 = arith.constant 0 : index
      %c46 = arith.constant 46 : index
      %692 = memref.load %arg3[%c0_472, %c46] : memref<2x49xf32, #tpu.memory_space<smem>>
      %693 = vector.broadcast %692 : f32 to vector<2x16x16xf32>
      %694 = arith.mulf %693, %690 : vector<2x16x16xf32>
      %c1_473 = arith.constant 1 : index
      %c46_474 = arith.constant 46 : index
      %695 = memref.load %arg3[%c1_473, %c46_474] : memref<2x49xf32, #tpu.memory_space<smem>>
      %696 = vector.broadcast %695 : f32 to vector<2x16x16xf32>
      %697 = arith.mulf %696, %691 : vector<2x16x16xf32>
      %698 = arith.addf %678, %694 : vector<2x16x16xf32>
      %699 = arith.addf %679, %697 : vector<2x16x16xf32>
      %700 = vector.extract_strided_slice %217 {offsets = [0, 6, 0], sizes = [2, 16, 16], strides = [1, 1, 1]} : vector<2x22x16xf32> to vector<2x16x16xf32>
      %701 = vector.extract_strided_slice %224 {offsets = [0, 6, 0], sizes = [2, 16, 16], strides = [1, 1, 1]} : vector<2x22x16xf32> to vector<2x16x16xf32>
      %c0_475 = arith.constant 0 : index
      %c47 = arith.constant 47 : index
      %702 = memref.load %arg3[%c0_475, %c47] : memref<2x49xf32, #tpu.memory_space<smem>>
      %703 = vector.broadcast %702 : f32 to vector<2x16x16xf32>
      %704 = arith.mulf %703, %700 : vector<2x16x16xf32>
      %c1_476 = arith.constant 1 : index
      %c47_477 = arith.constant 47 : index
      %705 = memref.load %arg3[%c1_476, %c47_477] : memref<2x49xf32, #tpu.memory_space<smem>>
      %706 = vector.broadcast %705 : f32 to vector<2x16x16xf32>
      %707 = arith.mulf %706, %701 : vector<2x16x16xf32>
      %708 = arith.addf %688, %704 : vector<2x16x16xf32>
      %709 = arith.addf %689, %707 : vector<2x16x16xf32>
      %710 = vector.extract_strided_slice %218 {offsets = [0, 6, 0], sizes = [2, 16, 16], strides = [1, 1, 1]} : vector<2x22x16xf32> to vector<2x16x16xf32>
      %711 = vector.extract_strided_slice %225 {offsets = [0, 6, 0], sizes = [2, 16, 16], strides = [1, 1, 1]} : vector<2x22x16xf32> to vector<2x16x16xf32>
      %c0_478 = arith.constant 0 : index
      %c48_479 = arith.constant 48 : index
      %712 = memref.load %arg3[%c0_478, %c48_479] : memref<2x49xf32, #tpu.memory_space<smem>>
      %713 = vector.broadcast %712 : f32 to vector<2x16x16xf32>
      %714 = arith.mulf %713, %710 : vector<2x16x16xf32>
      %c1_480 = arith.constant 1 : index
      %c48_481 = arith.constant 48 : index
      %715 = memref.load %arg3[%c1_480, %c48_481] : memref<2x49xf32, #tpu.memory_space<smem>>
      %716 = vector.broadcast %715 : f32 to vector<2x16x16xf32>
      %717 = arith.mulf %716, %711 : vector<2x16x16xf32>
      %718 = arith.addf %698, %714 : vector<2x16x16xf32>
      %719 = arith.addf %699, %717 : vector<2x16x16xf32>
      %720 = arith.addf %718, %708 : vector<2x16x16xf32>
      %721 = arith.addf %719, %709 : vector<2x16x16xf32>
      %722 = arith.addf %720, %721 : vector<2x16x16xf32>
      %c0_482 = arith.constant 0 : index
      %723 = memref.load %arg4[%c0_482] : memref<1xf32, #tpu.memory_space<smem>>
      %724 = vector.broadcast %723 : f32 to vector<2x16x16xf32>
      %725 = arith.addf %722, %724 : vector<2x16x16xf32>
      %c0_483 = arith.constant 0 : index
      %c0_484 = arith.constant 0 : index
      %c0_485 = arith.constant 0 : index
      %726 = vector.load %arg5[%c0_483, %c0_484, %c0_485] : memref<2x16x16xf32, #tpu.memory_space<vmem>>, vector<2x16x16xf32>
      tpu.vector_store %arg5[%c0_483, %c0_484, %c0_485], %725 {strides = array<i32>} : memref<2x16x16xf32, #tpu.memory_space<vmem>>, vector<2x16x16xf32>,
    } else {
    }
    return
  }
  func.func @transform_0(%arg0: i32, %arg1: i32) -> (i32, i32, i32) {
    %c0_i32 = arith.constant 0 : i32
    %c0_i32_0 = arith.constant 0 : i32
    return %arg0, %arg1, %c0_i32 : i32, i32, i32
  }
  func.func @transform_1(%arg0: i32, %arg1: i32) -> (i32, i32) {
    %c0_i32 = arith.constant 0 : i32
    %c0_i32_0 = arith.constant 0 : i32
    %c0_i32_1 = arith.constant 0 : i32
    return %c0_i32, %c0_i32_0 : i32, i32
  }
  func.func @transform_2(%arg0: i32, %arg1: i32) -> i32 {
    %c0_i32 = arith.constant 0 : i32
    %c0_i32_0 = arith.constant 0 : i32
    return %c0_i32 : i32
  }
  func.func @transform_3(%arg0: i32, %arg1: i32) -> (i32, i32, i32) {
    %c0_i32 = arith.constant 0 : i32
    %c0_i32_0 = arith.constant 0 : i32
    %c0_i32_1 = arith.constant 0 : i32
    return %arg0, %c0_i32, %c0_i32_0 : i32, i32, i32
  }
}

</mosaic_0001>

<bundles_post_ra>
// kernel: tpu_custom_call.1
= control target key start
LH: loop header
LB: loop body
LE: loop exit
PB: predicated region body
PF: predicated region fallthrough
CT: control target
= control target key end

     0   :  { %9 = vsyncpa [#allocation8], 0  ;;  %s9670_s0 = inlined_call_operand.hbm [shape: f32[2,4,256], index: 0, kind: input, shape index: {}]   ;;  %s9671_s1 = inlined_call_operand.vmem [shape: f32[2,49], index: 1, kind: input, shape index: {}]   ;;  %s9672_s2 = inlined_call_operand.<no memory space> [shape: f32[1], index: 2, kind: input, shape index: {}]   ;;  %s9673_s3 = inlined_call_operand.hbm [shape: f32[2,16,16], index: 3, kind: output, shape index: {}]  }
   0x1   :  { %10 = vsyncpa [#allocation10], 0 }
   0x2   :  { %11 = vsyncpa [#allocation9], 0  ;;  %s5755_s12 = smov [#allocation7]   ;;  %s30_s16 = sshll.u32 %s9671_s1, 4  ;;  %s31_s16 = int_to_ptr.vmem [resolvable:$true] %s30_s16 }
   0x3   :  { %s17_s13 = sshll.u32 %s5755_s12, 4  ;;  %s18_s13 = int_to_ptr.vmem [resolvable:$true] %s17_s13 }
   0x4   :  { %s5705_s17 = scalar_lea.vmem %s18_s13, 256  ;;  %p5710_p1 = scmp.lt.s32.totalorder %s18_s13, %s18_s13 }
   0x5   :  { %p5706_p0 = scmp.ne.s32.totalorder %s18_s13, %s5705_s17  ;;  %p5711_p2 = scmp.lt.s32.totalorder %s5705_s17, %s5705_s17 }
   0x7   :  { %p5712_p3 = por %p5711_p2, %p5710_p1 }
   0x9   :  { %p5713_p4 = pnand %p5712_p3, %p5706_p0 }
   0xb   :  { %5716 = shalt.err (!%p5713_p4)
}
   0xc   :  { %s5756_s18 = smov 128   ;;  %s5757_s19 = smov 8  }
   0xd   :  { %23 = dma.hbm_to_vmem [thread:$0]  %s9670_s0, 256, %s18_s13, [#allocation8], %s5756_s18, %s5756_s18, %s5757_s19  }
   0xe   :  { %s5717_s22 = scalar_lea.vmem %s31_s16, 32  ;;  %p5722_p6 = scmp.lt.s32.totalorder %s31_s16, %s31_s16 }
   0xf   :  { %p5718_p5 = scmp.ne.s32.totalorder %s31_s16, %s5717_s22  ;;  %p5723_p7 = scmp.lt.s32.totalorder %s5717_s22, %s5717_s22 }
  0x11   :  { %p5724_p8 = por %p5723_p7, %p5722_p6 }
  0x13   :  { %p5725_p9 = pnand %p5724_p8, %p5718_p5 }
  0x15   :  { %5728 = shalt.err (!%p5725_p9)
}
  0x16   :  { %s5758_s1 = smov [#allocation11]  }
  0x17   :  { %33 = dma.vmem_to_smem %s31_s16, 32, %s5758_s1, [#allocation10]  }
  0x18   :  { %5749 = dma.done.wait [#allocation8], 256  }
  0x19   :  { %5750 = vsyncadd [#allocation8], 4294967040 }
  0x1a   :  { %5751 = dma.done.wait [#allocation10], 32  }
  0x1b   :  { %5752 = vsyncadd [#allocation10], 4294967264 }
  0x1c   :  { %42 = sfence }
  0x1d   :  { %v43_v0 = vld [vmem:[#allocation7] sm:$0xff]  ;;  %v44_v1 = vld [vmem:[#allocation7 + $0x8] sm:$0xff]  ;;  %vm51_vm0 = vcmask 1043456   ;;  %v120_v2 = vlaneseq  ;;  %v5759_v11 = vmov 1983009808   ;;  %vm137_vm1 = vcmask 1041409  }
  0x1e   :  { %v47_v3 = vcombine.high %v43_v0, %v43_v0  ;;  %v48_v4 = vcombine.high %v44_v1, %v44_v1  ;;  %v80_v5 = vsel %vm51_vm0, %v43_v0, -inf  ;;  %v94_v6 = vsel %vm51_vm0, %v44_v1, -inf  ;;  %s5760_s0 = smov 83   ;;  %s5761_s23 = smov 99  }
  0x1f   :  { %v81_v7 = vrot.slane %v80_v5, 4  ;;  %v95_v8 = vrot.slane %v94_v6, 4  ;;  %v118_v12 = vunpack.c.l.s4 %v5759_v11  ;;  %v5812_v17 = vshrl.u32 %v120_v2, 7  ;;  %s5762_s24 = smov 115   ;;  %s5763_s25 = smov 3  }
  0x20   :  { %v87_v9 = vsel %vm51_vm0, %v47_v3, -inf  ;;  %v101_v10 = vsel %vm51_vm0, %v48_v4, -inf  ;;  %v52_v18 = vsel %vm51_vm0, %v43_v0, 0.0  ;;  %v59_v25 = vsel %vm51_vm0, %v47_v3, 0.0  ;;  %s5764_s26 = smov 67   ;;  %s5765_s27 = smov 51  }
  0x21   :  { %v82_v13 = vmax.f32 %v80_v5, %v81_v7  ;;  %v88_v14 = vrot.slane %v87_v9, 4  ;;  %v96_v15 = vmax.f32 %v94_v6, %v95_v8  ;;  %v102_v16 = vrot.slane %v101_v10, 4  ;;  %s5766_s28 = smov 35   ;;  %s5767_s29 = smov 19  }
  0x22   :  { %v119_v23 = vunpack.c.0.s8 %v118_v12  ;;  %v53_v24 = vrot.slane %v52_v18, 4  ;;  %v66_v26 = vsel %vm51_vm0, %v44_v1, 0.0  ;;  %v60_v32 = vrot.slane %v59_v25, 4  ;;  %s5768_s30 = smov 122   ;;  %s5769_s4 = smov 2  }
  0x23   :  { %v83_v19 = vrot.slane %v82_v13, 2  ;;  %v89_v20 = vmax.f32 %v87_v9, %v88_v14  ;;  %v97_v21 = vrot.slane %v96_v15, 2  ;;  %v103_v22 = vmax.f32 %v101_v10, %v102_v16  ;;  %s5770_s5 = smov 124   ;;  %s5771_s6 = smov 4  }
  0x24   :  { %v54_v31 = vadd.f32 %v53_v24, %v52_v18  ;;  %v67_v33 = vrot.slane %v66_v26, 4  ;;  %v73_v34 = vsel %vm51_vm0, %v48_v4, 0.0  ;;  %v61_v40 = vadd.f32 %v60_v32, %v59_v25  ;;  %s5772_s7 = smov 126   ;;  %s5773_s8 = smov 6  }
  0x25   :  { %v84_v27 = vmax.f32 %v82_v13, %v83_v19  ;;  %v90_v28 = vrot.slane %v89_v20, 2  ;;  %v98_v29 = vmax.f32 %v96_v15, %v97_v21  ;;  %v104_v30 = vrot.slane %v103_v22, 2  ;;  %s5541_s9 = sld [smem:[#allocation11 + $0x2]] }
  0x26   :  { %v55_v39 = vrot.slane %v54_v31, 2  ;;  %v68_v41 = vadd.f32 %v67_v33, %v66_v26  ;;  %v74_v42 = vrot.slane %v73_v34, 4  ;;  %v62_v48 = vrot.slane %v61_v40, 2  ;;  %s5542_s10 = sld [smem:[#allocation11 + $0x82]] }
  0x27   :  { %v85_v35 = vrot.slane %v84_v27, 1  ;;  %v91_v36 = vmax.f32 %v89_v20, %v90_v28  ;;  %v99_v37 = vrot.slane %v98_v29, 1  ;;  %v105_v38 = vmax.f32 %v103_v22, %v104_v30  ;;  %s5543_s11 = sld [smem:[#allocation11 + $0x3]] }
  0x28   :  { %v56_v47 = vadd.f32 %v55_v39, %v54_v31  ;;  %v69_v49 = vrot.slane %v68_v41, 2  ;;  %v75_v50 = vadd.f32 %v74_v42, %v73_v34  ;;  %v122_v53 = vsub.s32 %v119_v23, %v5812_v17  ;;  %s5544_s12 = sld [smem:[#allocation11 + $0x83]] }
  0x29   :  { %v86_v43 = vmax.f32 %v84_v27, %v85_v35  ;;  %v92_v44 = vrot.slane %v91_v36, 1  ;;  %v100_v45 = vmax.f32 %v98_v29, %v99_v37  ;;  %v106_v46 = vrot.slane %v105_v38, 1  ;;  %s5545_s13 = sld [smem:[#allocation11 + $0x4]] }
  0x2a   :  { %v57_v54 = vrot.slane %v56_v47, 1  ;;  %v63_v55 = vadd.f32 %v62_v48, %v61_v40  ;;  %v70_v56 = vadd.f32 %v69_v49, %v68_v41  ;;  %v76_v57 = vrot.slane %v75_v50, 2  ;;  %s5546_s14 = sld [smem:[#allocation11 + $0x84]] }
  0x2b   :  { %v93_v51 = vmax.f32 %v91_v36, %v92_v44  ;;  %v107_v52 = vmax.f32 %v105_v38, %v106_v46  ;;  %vm139_vm2 = vcmask 1043459   ;;  %vm141_vm3 = vcmask 1045509   ;;  %s5547_s15 = sld [smem:[#allocation11 + $0x5]] }
  0x2c   :  { %v58_v60 = vadd.f32 %v57_v54, %v56_v47  ;;  %v64_v61 = vrot.slane %v63_v55, 1  ;;  %v71_v62 = vrot.slane %v70_v56, 1  ;;  %v77_v63 = vadd.f32 %v76_v57, %v75_v50  ;;  %s5548_s16 = sld [smem:[#allocation11 + $0x85]] }
  0x2d   :  { %v151_v58 = vcombine.low %v86_v43, %v93_v51  ;;  %v159_v59 = vcombine.low %v100_v45, %v107_v52  ;;  %vm143_vm4 = vcmask 1047559   ;;  %v5824_v18 = vsub.s32 0, %v5812_v17  ;;  %s5549_s17 = sld [smem:[#allocation11 + $0x6]] }
  0x2e   :  { %v65_v2 = vadd.f32 %v64_v61, %v63_v55  ;;  %v72_v3 = vadd.f32 %v71_v62, %v70_v56  ;;  %v78_v4 = vrot.slane %v77_v63, 1  ;;  %vm275_vm5 = vcmask 147480   ;;  %s5550_s20 = sld [smem:[#allocation11 + $0x86]] }
  0x2f   :  { %v158_v0 = vrot.slane %v151_v58, %v122_v53  ;;  %v166_v1 = vrot.slane %v159_v59, %v122_v53  ;;  %vm1426_vm6 = vcmask 7168   ;;  %vm1429_vm7 = vcmask 5120   ;;  %s5551_s21 = sld [smem:[#allocation11 + $0x7]] }
  0x30   :  { %v79_v6 = vadd.f32 %v78_v4, %v77_v63  ;;  %v116_v7 = vcombine.low %v58_v60, %v65_v2  ;;  %vm1464_vm8 = vcmask 162968   ;;  %vm1467_vm9 = vcmask 160920   ;;  %s5552_s22 = sld [smem:[#allocation11 + $0x87]] }
  0x31   :  { %v169_v5 = vrot.slane %v166_v1, 7  ;;  %vm1574_vm10 = vcmask 15368   ;;  %vm1577_vm11 = vcmask 13320   ;;  %vm1612_vm12 = vcmask 171168   ;;  %s5553_s1 = sld [smem:[#allocation11 + $0x8]] }
  0x32   :  { %v124_v10 = vcombine.low %v72_v3, %v79_v6  ;;  %v123_v13 = vrot.slane %v116_v7, %v122_v53  ;;  %vm1615_vm13 = vcmask 169120   ;;  %vm1722_vm14 = vcmask 23568  }
  0x33   :  { %v170_v8 = vsel %vm137_vm1, %v169_v5, %v158_v0  ;;  %vm1725_vm15 = vcmask 21520  }
  0x34   :  { %v171_v9 = vsel %vm139_vm2, %v169_v5, %v170_v8  ;;  %v131_v14 = vrot.slane %v124_v10, %v122_v53 }
  0x35   :  { %v172_v11 = vsel %vm141_vm3, %v169_v5, %v171_v9 }
  0x36   :  { %v173_v12 = vsel %vm143_vm4, %v169_v5, %v172_v11  ;;  %v136_v15 = vrot.slane %v131_v14, 7 }
  0x37   :  { %175 = vst [vmem:[#allocation3] sm:$0xf] %v173_v12 }
  0x38   :  { %v138_v16 = vsel %vm137_vm1, %v136_v15, %v123_v13  ;;  %vm1760_vm1 = vcmask 179368  }
  0x39   :  { %v140_v19 = vsel %vm139_vm2, %v136_v15, %v138_v16  ;;  %vm1763_vm2 = vcmask 177320  }
  0x3a   :  { %v142_v20 = vsel %vm141_vm3, %v136_v15, %v140_v19  ;;  %vm2174_vm3 = vcmask 1046528  }
  0x3b   :  { %v144_v21 = vsel %vm143_vm4, %v136_v15, %v142_v20  ;;  %vm2735_vm4 = vcmask 1045504  }
  0x3c   :  { %146 = vst [vmem:[#allocation2] sm:$0xf] %v144_v21 }
  0x3e   :  { %v5495_v22 = vld.sshfl [vmem:[#allocation3] sm:$0x11 pattern:$0x75316420] }
  0x3f   :  { %v5829_v23 = vrot.slane %v5495_v22, %v5824_v18  ;;  %v287_v24 = vcombine.high %v5495_v22, %v5495_v22  ;;  %v5517_v31 = vld.sshfl [vmem:[#allocation3 + $0x2] sm:$0x11 pattern:$0x75316420] }
  0x40   :  { %v859_v33 = vcombine.high %v5517_v31, %v5517_v31  ;;  %v5905_v36 = vrot.slane %v5517_v31, %v5824_v18 }
  0x41   :  { %296 = vrot.lane.b32.xlu1 %v5829_v23, %s5760_s0  ;;  %v295_v25 = vrot.slane %v287_v24, %v5824_v18 }
  0x42   :  { %v5893_v34 = vrot.slane %v859_v33, %v5824_v18 }
  0x43   :  { %v5494_v26 = vld.sshfl [vmem:[#allocation2] sm:$0x11 pattern:$0x75316420] }
  0x44   :  { %v264_v17 = vrot.slane %v5494_v26, %v5824_v18  ;;  %v260_v27 = vcombine.high %v5494_v26, %v5494_v26  ;;  %v5516_v29 = vld.sshfl [vmem:[#allocation2 + $0x2] sm:$0x11 pattern:$0x75316420] }
  0x45   :  { %298 = vrot.lane.b32.xlu1 %v295_v25, %s5760_s0  ;;  %v833_v30 = vcombine.high %v5516_v29, %v5516_v29  ;;  %v5898_v35 = vrot.slane %v5516_v29, %v5824_v18 }
  0x46   :  { %269 = vrot.lane.b32.xlu0 %v264_v17, %s5760_s0  ;;  %v321_v28 = vrot.slane %v260_v27, %v5824_v18 }
  0x47   :  { %v5887_v32 = vrot.slane %v833_v30, %v5824_v18 }
  0x49   :  { %324 = vrot.lane.b32.xlu1 %v321_v28, %s5761_s23 }
  0x4a   :  { %322 = vrot.lane.b32.xlu0 %v264_v17, %s5761_s23 }
  0x4d   :  { %350 = vrot.lane.b32.xlu1 %v295_v25, %s5761_s23 }
  0x4e   :  { %348 = vrot.lane.b32.xlu0 %v5829_v23, %s5761_s23 }
  0x51   :  { %376 = vrot.lane.b32.xlu1 %v321_v28, %s5762_s24 }
  0x52   :  { %374 = vrot.lane.b32.xlu0 %v264_v17, %s5762_s24 }
  0x55   :  { %402 = vrot.lane.b32.xlu1 %v295_v25, %s5762_s24 }
  0x56   :  { %400 = vrot.lane.b32.xlu0 %v5829_v23, %s5762_s24 }
  0x59   :  { %428 = vrot.lane.b32.xlu1 %v321_v28, %s5763_s25 }
  0x5a   :  { %426 = vrot.lane.b32.xlu0 %v264_v17, %s5763_s25 }
  0x5d   :  { %454 = vrot.lane.b32.xlu1 %v295_v25, %s5763_s25 }
  0x5e   :  { %452 = vrot.lane.b32.xlu0 %v5829_v23, %s5763_s25 }
  0x61   :  { %480 = vrot.lane.b32.xlu1 %v321_v28, %s5762_s24 }
  0x62   :  { %478 = vrot.lane.b32.xlu0 %v264_v17, %s5762_s24 }
  0x65   :  { %506 = vrot.lane.b32.xlu1 %v295_v25, %s5762_s24 }
  0x66   :  { %504 = vrot.lane.b32.xlu0 %v5829_v23, %s5762_s24 }
  0x69   :  { %532 = vrot.lane.b32.xlu1 %v321_v28, %s5761_s23 }
  0x6a   :  { %271 = vrot.lane.b32.xlu0 %v321_v28, %s5760_s0 }
  0x6d   :  { %558 = vrot.lane.b32.xlu1 %v295_v25, %s5761_s23 }
  0x6e   :  { %530 = vrot.lane.b32.xlu0 %v264_v17, %s5761_s23 }
  0x71   :  { %584 = vrot.lane.b32.xlu1 %v321_v28, %s5760_s0 }
  0x72   :  { %556 = vrot.lane.b32.xlu0 %v5829_v23, %s5761_s23 }
  0x75   :  { %610 = vrot.lane.b32.xlu1 %v295_v25, %s5760_s0 }
  0x76   :  { %582 = vrot.lane.b32.xlu0 %v264_v17, %s5760_s0 }
  0x79   :  { %636 = vrot.lane.b32.xlu1 %v321_v28, %s5764_s26 }
  0x7a   :  { %608 = vrot.lane.b32.xlu0 %v5829_v23, %s5760_s0 }
  0x7d   :  { %662 = vrot.lane.b32.xlu1 %v295_v25, %s5764_s26 }
  0x7e   :  { %634 = vrot.lane.b32.xlu0 %v264_v17, %s5764_s26 }
  0x81   :  { %688 = vrot.lane.b32.xlu1 %v321_v28, %s5765_s27 }
  0x82   :  { %660 = vrot.lane.b32.xlu0 %v5829_v23, %s5764_s26 }
  0x85   :  { %714 = vrot.lane.b32.xlu1 %v295_v25, %s5765_s27 }
  0x86   :  { %686 = vrot.lane.b32.xlu0 %v264_v17, %s5765_s27 }
  0x89   :  { %740 = vrot.lane.b32.xlu1 %v321_v28, %s5766_s28 }
  0x8a   :  { %712 = vrot.lane.b32.xlu0 %v5829_v23, %s5765_s27 }
  0x8d   :  { %766 = vrot.lane.b32.xlu1 %v295_v25, %s5766_s28 }
  0x8e   :  { %738 = vrot.lane.b32.xlu0 %v264_v17, %s5766_s28 }
  0x91   :  { %792 = vrot.lane.b32.xlu1 %v321_v28, %s5767_s29 }
  0x92   :  { %764 = vrot.lane.b32.xlu0 %v5829_v23, %s5766_s28 }
  0x95   :  { %818 = vrot.lane.b32.xlu1 %v295_v25, %s5767_s29 }
  0x96   :  { %790 = vrot.lane.b32.xlu0 %v264_v17, %s5767_s29 }
  0x99   :  { %844 = vrot.lane.b32.xlu1 %v5887_v32, %s5763_s25 }
  0x9a   :  { %816 = vrot.lane.b32.xlu0 %v5829_v23, %s5767_s29 }
  0x9d   :  { %870 = vrot.lane.b32.xlu1 %v5893_v34, %s5763_s25 }
  0x9e   :  { %842 = vrot.lane.b32.xlu0 %v5898_v35, %s5763_s25 }
  0xa1   :  { %896 = vrot.lane.b32.xlu1 %v5887_v32, %s5762_s24 }
  0xa2   :  { %868 = vrot.lane.b32.xlu0 %v5905_v36, %s5763_s25  ;;  %s5556_s25 = sld [smem:[#allocation11 + $0x89]] }
  0xa5   :  { %922 = vrot.lane.b32.xlu1 %v5893_v34, %s5762_s24 }
  0xa6   :  { %894 = vrot.lane.b32.xlu0 %v5898_v35, %s5762_s24 }
  0xa9   :  { %948 = vrot.lane.b32.xlu1 %v5887_v32, %s5761_s23 }
  0xaa   :  { %920 = vrot.lane.b32.xlu0 %v5905_v36, %s5762_s24  ;;  %s5774_s24 = smov 1  }
  0xad   :  { %974 = vrot.lane.b32.xlu1 %v5893_v34, %s5761_s23 }
  0xae   :  { %946 = vrot.lane.b32.xlu0 %v5898_v35, %s5761_s23 }
  0xb1   :  { %1000 = vrot.lane.b32.xlu1 %v5887_v32, %s5760_s0 }
  0xb2   :  { %972 = vrot.lane.b32.xlu0 %v5905_v36, %s5761_s23  ;;  %s5555_s23 = sld [smem:[#allocation11 + $0x9]] }
  0xb3   :  { %v297_v37 = vpop.permute.xlu1 %296 }
  0xb4   :  { %302 = vst.msk [vmem:[#allocation5] sm:$0x1] %vm275_vm5, %v297_v37 }
  0xb5   :  { %1026 = vrot.lane.b32.xlu1 %v5893_v34, %s5760_s0 }
  0xb6   :  { %998 = vrot.lane.b32.xlu0 %v5898_v35, %s5760_s0 }
  0xb7   :  { %v299_v38 = vpop.permute.xlu1 %298 }
  0xb8   :  { %303 = vst.msk [vmem:[#allocation5 + $0x18] sm:$0x1] %vm275_vm5, %v299_v38  ;;  %v270_v39 = vpop.permute.xlu0 %269 }
  0xb9   :  { %1052 = vrot.lane.b32.xlu1 %v5887_v32, %s5764_s26  ;;  %276 = vst.msk [vmem:[#allocation4] sm:$0x1] %vm275_vm5, %v270_v39 }
  0xba   :  { %1024 = vrot.lane.b32.xlu0 %v5905_v36, %s5760_s0  ;;  %s5554_s0 = sld [smem:[#allocation11 + $0x88]] }
  0xbb   :  { %v325_v40 = vpop.permute.xlu1 %324 }
  0xbc   :  { %329 = vst.msk [vmem:[#allocation4 + $0x19] sm:$0x1] %vm275_vm5, %v325_v40  ;;  %v323_v41 = vpop.permute.xlu0 %322 }
  0xbd   :  { %1078 = vrot.lane.b32.xlu1 %v5893_v34, %s5764_s26  ;;  %328 = vst.msk [vmem:[#allocation4 + $0x1] sm:$0x1] %vm275_vm5, %v323_v41 }
  0xbe   :  { %1050 = vrot.lane.b32.xlu0 %v5898_v35, %s5764_s26 }
  0xbf   :  { %v351_v42 = vpop.permute.xlu1 %350 }
  0xc0   :  { %355 = vst.msk [vmem:[#allocation5 + $0x19] sm:$0x1] %vm275_vm5, %v351_v42  ;;  %v349_v43 = vpop.permute.xlu0 %348 }
  0xc1   :  { %1104 = vrot.lane.b32.xlu1 %v5887_v32, %s5765_s27  ;;  %354 = vst.msk [vmem:[#allocation5 + $0x1] sm:$0x1] %vm275_vm5, %v349_v43 }
  0xc2   :  { %1076 = vrot.lane.b32.xlu0 %v5905_v36, %s5764_s26 }
  0xc3   :  { %v377_v44 = vpop.permute.xlu1 %376 }
  0xc4   :  { %381 = vst.msk [vmem:[#allocation4 + $0x1a] sm:$0x1] %vm275_vm5, %v377_v44  ;;  %v375_v45 = vpop.permute.xlu0 %374 }
  0xc5   :  { %1130 = vrot.lane.b32.xlu1 %v5893_v34, %s5765_s27  ;;  %380 = vst.msk [vmem:[#allocation4 + $0x2] sm:$0x1] %vm275_vm5, %v375_v45 }
  0xc6   :  { %1102 = vrot.lane.b32.xlu0 %v5898_v35, %s5765_s27 }
  0xc7   :  { %v403_v46 = vpop.permute.xlu1 %402 }
  0xc8   :  { %407 = vst.msk [vmem:[#allocation5 + $0x1a] sm:$0x1] %vm275_vm5, %v403_v46  ;;  %v401_v47 = vpop.permute.xlu0 %400 }
  0xc9   :  { %1156 = vrot.lane.b32.xlu1 %v5887_v32, %s5766_s28  ;;  %406 = vst.msk [vmem:[#allocation5 + $0x2] sm:$0x1] %vm275_vm5, %v401_v47 }
  0xca   :  { %1128 = vrot.lane.b32.xlu0 %v5905_v36, %s5765_s27 }
  0xcb   :  { %v429_v48 = vpop.permute.xlu1 %428 }
  0xcc   :  { %433 = vst.msk [vmem:[#allocation4 + $0x1b] sm:$0x1] %vm275_vm5, %v429_v48  ;;  %v427_v49 = vpop.permute.xlu0 %426 }
  0xcd   :  { %1182 = vrot.lane.b32.xlu1 %v5893_v34, %s5766_s28  ;;  %432 = vst.msk [vmem:[#allocation4 + $0x3] sm:$0x1] %vm275_vm5, %v427_v49 }
  0xce   :  { %1154 = vrot.lane.b32.xlu0 %v5898_v35, %s5766_s28 }
  0xcf   :  { %v455_v50 = vpop.permute.xlu1 %454 }
  0xd0   :  { %459 = vst.msk [vmem:[#allocation5 + $0x1b] sm:$0x1] %vm275_vm5, %v455_v50  ;;  %v453_v51 = vpop.permute.xlu0 %452 }
  0xd1   :  { %1208 = vrot.lane.b32.xlu1 %v5887_v32, %s5767_s29  ;;  %458 = vst.msk [vmem:[#allocation5 + $0x3] sm:$0x1] %vm275_vm5, %v453_v51 }
  0xd2   :  { %1180 = vrot.lane.b32.xlu0 %v5905_v36, %s5766_s28 }
  0xd3   :  { %v481_v52 = vpop.permute.xlu1 %480 }
  0xd4   :  { %485 = vst.msk [vmem:[#allocation4 + $0x1c] sm:$0x1] %vm275_vm5, %v481_v52  ;;  %v479_v53 = vpop.permute.xlu0 %478 }
  0xd5   :  { %1234 = vrot.lane.b32.xlu1 %v5893_v34, %s5767_s29  ;;  %484 = vst.msk [vmem:[#allocation4 + $0x4] sm:$0x1] %vm275_vm5, %v479_v53 }
  0xd6   :  { %1206 = vrot.lane.b32.xlu0 %v5898_v35, %s5767_s29 }
  0xd7   :  { %v507_v54 = vpop.permute.xlu1 %506 }
  0xd8   :  { %511 = vst.msk [vmem:[#allocation5 + $0x1c] sm:$0x1] %vm275_vm5, %v507_v54  ;;  %v505_v55 = vpop.permute.xlu0 %504 }
  0xd9   :  { %1260 = vrot.lane.b32.xlu1 %v5887_v32, %s5766_s28  ;;  %510 = vst.msk [vmem:[#allocation5 + $0x4] sm:$0x1] %vm275_vm5, %v505_v55 }
  0xda   :  { %1232 = vrot.lane.b32.xlu0 %v5905_v36, %s5767_s29  ;;  %s5559_s29 = sld [smem:[#allocation11 + $0xb]] }
  0xdb   :  { %v533_v56 = vpop.permute.xlu1 %532 }
  0xdc   :  { %537 = vst.msk [vmem:[#allocation4 + $0x1d] sm:$0x1] %vm275_vm5, %v533_v56  ;;  %v272_v57 = vpop.permute.xlu0 %271 }
  0xdd   :  { %1286 = vrot.lane.b32.xlu1 %v5893_v34, %s5766_s28  ;;  %277 = vst.msk [vmem:[#allocation4 + $0x18] sm:$0x1] %vm275_vm5, %v272_v57 }
  0xde   :  { %1258 = vrot.lane.b32.xlu0 %v5898_v35, %s5766_s28 }
  0xdf   :  { %v559_v58 = vpop.permute.xlu1 %558 }
  0xe0   :  { %563 = vst.msk [vmem:[#allocation5 + $0x1d] sm:$0x1] %vm275_vm5, %v559_v58  ;;  %v531_v59 = vpop.permute.xlu0 %530 }
  0xe1   :  { %1312 = vrot.lane.b32.xlu1 %v5887_v32, %s5765_s27  ;;  %536 = vst.msk [vmem:[#allocation4 + $0x5] sm:$0x1] %vm275_vm5, %v531_v59 }
  0xe2   :  { %1284 = vrot.lane.b32.xlu0 %v5905_v36, %s5766_s28  ;;  %s5558_s28 = sld [smem:[#allocation11 + $0x8a]] }
  0xe3   :  { %v585_v60 = vpop.permute.xlu1 %584 }
  0xe4   :  { %589 = vst.msk [vmem:[#allocation4 + $0x1e] sm:$0x1] %vm275_vm5, %v585_v60  ;;  %v557_v61 = vpop.permute.xlu0 %556 }
  0xe5   :  { %1338 = vrot.lane.b32.xlu1 %v5893_v34, %s5765_s27  ;;  %562 = vst.msk [vmem:[#allocation5 + $0x5] sm:$0x1] %vm275_vm5, %v557_v61 }
  0xe6   :  { %1310 = vrot.lane.b32.xlu0 %v5898_v35, %s5765_s27 }
  0xe7   :  { %v611_v62 = vpop.permute.xlu1 %610 }
  0xe8   :  { %615 = vst.msk [vmem:[#allocation5 + $0x1e] sm:$0x1] %vm275_vm5, %v611_v62  ;;  %v583_v63 = vpop.permute.xlu0 %582 }
  0xe9   :  { %1364 = vrot.lane.b32.xlu1 %v5887_v32, %s5764_s26  ;;  %588 = vst.msk [vmem:[#allocation4 + $0x6] sm:$0x1] %vm275_vm5, %v583_v63 }
  0xea   :  { %1336 = vrot.lane.b32.xlu0 %v5905_v36, %s5765_s27  ;;  %s5775_s27 = smov 127  }
  0xeb   :  { %v637_v0 = vpop.permute.xlu1 %636 }
  0xec   :  { %641 = vst.msk [vmem:[#allocation4 + $0x1f] sm:$0x1] %vm275_vm5, %v637_v0  ;;  %v609_v1 = vpop.permute.xlu0 %608 }
  0xed   :  { %1390 = vrot.lane.b32.xlu1 %v5893_v34, %s5764_s26  ;;  %614 = vst.msk [vmem:[#allocation5 + $0x6] sm:$0x1] %vm275_vm5, %v609_v1 }
  0xee   :  { %1362 = vrot.lane.b32.xlu0 %v5898_v35, %s5764_s26 }
  0xef   :  { %v663_v2 = vpop.permute.xlu1 %662 }
  0xf0   :  { %667 = vst.msk [vmem:[#allocation5 + $0x1f] sm:$0x1] %vm275_vm5, %v663_v2  ;;  %v635_v3 = vpop.permute.xlu0 %634 }
  0xf1   :  { %640 = vst.msk [vmem:[#allocation4 + $0x7] sm:$0x1] %vm275_vm5, %v635_v3 }
  0xf2   :  { %1388 = vrot.lane.b32.xlu0 %v5905_v36, %s5764_s26  ;;  %s5557_s26 = sld [smem:[#allocation11 + $0xa]] }
  0xf3   :  { %v689_v4 = vpop.permute.xlu1 %688  ;;  %v1399_v44 = vld [vmem:[#allocation4 + $0x18] sm:$0xff] }
  0xf4   :  { %693 = vst.msk [vmem:[#allocation4 + $0x20] sm:$0x1] %vm275_vm5, %v689_v4  ;;  %v661_v5 = vpop.permute.xlu0 %660 }
  0xf5   :  { %666 = vst.msk [vmem:[#allocation5 + $0x7] sm:$0x1] %vm275_vm5, %v661_v5 }
  0xf7   :  { %v715_v6 = vpop.permute.xlu1 %714  ;;  %v1475_v3 = vld [vmem:[#allocation5 + $0x18] sm:$0xff] }
  0xf8   :  { %719 = vst.msk [vmem:[#allocation5 + $0x20] sm:$0x1] %vm275_vm5, %v715_v6  ;;  %v687_v7 = vpop.permute.xlu0 %686  ;;  %v1396_v8 = vld [vmem:[#allocation4] sm:$0xff] }
  0xf9   :  { %692 = vst.msk [vmem:[#allocation4 + $0x8] sm:$0x1] %vm275_vm5, %v687_v7  ;;  %1408 = vrot.lane.b32.xlu0 %v1396_v8, %s5768_s30 }
  0xfb   :  { %v741_v9 = vpop.permute.xlu1 %740 }
  0xfc   :  { %745 = vst.msk [vmem:[#allocation4 + $0x21] sm:$0x1] %vm275_vm5, %v741_v9  ;;  %v713_v10 = vpop.permute.xlu0 %712  ;;  %v1472_v7 = vld [vmem:[#allocation5] sm:$0xff] }
  0xfd   :  { %718 = vst.msk [vmem:[#allocation5 + $0x8] sm:$0x1] %vm275_vm5, %v713_v10 }
  0xff   :  { %v767_v11 = vpop.permute.xlu1 %766 }
 0x100   :  { %771 = vst.msk [vmem:[#allocation5 + $0x21] sm:$0x1] %vm275_vm5, %v767_v11  ;;  %v739_v12 = vpop.permute.xlu0 %738 }
 0x101   :  { %744 = vst.msk [vmem:[#allocation4 + $0x9] sm:$0x1] %vm275_vm5, %v739_v12 }
 0x103   :  { %v793_v13 = vpop.permute.xlu1 %792 }
 0x104   :  { %797 = vst.msk [vmem:[#allocation4 + $0x22] sm:$0x1] %vm275_vm5, %v793_v13  ;;  %v765_v14 = vpop.permute.xlu0 %764 }
 0x105   :  { %770 = vst.msk [vmem:[#allocation5 + $0x9] sm:$0x1] %vm275_vm5, %v765_v14 }
 0x107   :  { %v819_v15 = vpop.permute.xlu1 %818 }
 0x108   :  { %823 = vst.msk [vmem:[#allocation5 + $0x22] sm:$0x1] %vm275_vm5, %v819_v15  ;;  %v791_v16 = vpop.permute.xlu0 %790 }
 0x109   :  { %796 = vst.msk [vmem:[#allocation4 + $0xa] sm:$0x1] %vm275_vm5, %v791_v16 }
 0x10b   :  { %v845_v18 = vpop.permute.xlu1 %844 }
 0x10c   :  { %849 = vst.msk [vmem:[#allocation4 + $0x23] sm:$0x1] %vm275_vm5, %v845_v18  ;;  %v817_v19 = vpop.permute.xlu0 %816 }
 0x10d   :  { %822 = vst.msk [vmem:[#allocation5 + $0xa] sm:$0x1] %vm275_vm5, %v817_v19 }
 0x10f   :  { %v871_v20 = vpop.permute.xlu1 %870 }
 0x110   :  { %875 = vst.msk [vmem:[#allocation5 + $0x23] sm:$0x1] %vm275_vm5, %v871_v20  ;;  %v843_v21 = vpop.permute.xlu0 %842 }
 0x111   :  { %848 = vst.msk [vmem:[#allocation4 + $0xb] sm:$0x1] %vm275_vm5, %v843_v21 }
 0x113   :  { %v897_v22 = vpop.permute.xlu1 %896 }
 0x114   :  { %901 = vst.msk [vmem:[#allocation4 + $0x24] sm:$0x1] %vm275_vm5, %v897_v22  ;;  %v869_v23 = vpop.permute.xlu0 %868 }
 0x115   :  { %874 = vst.msk [vmem:[#allocation5 + $0xb] sm:$0x1] %vm275_vm5, %v869_v23 }
 0x117   :  { %v923_v24 = vpop.permute.xlu1 %922 }
 0x118   :  { %927 = vst.msk [vmem:[#allocation5 + $0x24] sm:$0x1] %vm275_vm5, %v923_v24  ;;  %v895_v25 = vpop.permute.xlu0 %894 }
 0x119   :  { %900 = vst.msk [vmem:[#allocation4 + $0xc] sm:$0x1] %vm275_vm5, %v895_v25 }
 0x11b   :  { %v949_v26 = vpop.permute.xlu1 %948 }
 0x11c   :  { %953 = vst.msk [vmem:[#allocation4 + $0x25] sm:$0x1] %vm275_vm5, %v949_v26  ;;  %v921_v17 = vpop.permute.xlu0 %920 }
 0x11d   :  { %926 = vst.msk [vmem:[#allocation5 + $0xc] sm:$0x1] %vm275_vm5, %v921_v17 }
 0x11f   :  { %v975_v27 = vpop.permute.xlu1 %974 }
 0x120   :  { %979 = vst.msk [vmem:[#allocation5 + $0x25] sm:$0x1] %vm275_vm5, %v975_v27  ;;  %v947_v28 = vpop.permute.xlu0 %946 }
 0x121   :  { %952 = vst.msk [vmem:[#allocation4 + $0xd] sm:$0x1] %vm275_vm5, %v947_v28 }
 0x123   :  { %v1001_v29 = vpop.permute.xlu1 %1000 }
 0x124   :  { %1005 = vst.msk [vmem:[#allocation4 + $0x26] sm:$0x1] %vm275_vm5, %v1001_v29  ;;  %v973_v30 = vpop.permute.xlu0 %972 }
 0x125   :  { %978 = vst.msk [vmem:[#allocation5 + $0xd] sm:$0x1] %vm275_vm5, %v973_v30 }
 0x127   :  { %v1027_v31 = vpop.permute.xlu1 %1026 }
 0x128   :  { %1031 = vst.msk [vmem:[#allocation5 + $0x26] sm:$0x1] %vm275_vm5, %v1027_v31  ;;  %v999_v32 = vpop.permute.xlu0 %998 }
 0x129   :  { %1004 = vst.msk [vmem:[#allocation4 + $0xe] sm:$0x1] %vm275_vm5, %v999_v32 }
 0x12b   :  { %v1053_v33 = vpop.permute.xlu1 %1052 }
 0x12c   :  { %1057 = vst.msk [vmem:[#allocation4 + $0x27] sm:$0x1] %vm275_vm5, %v1053_v33  ;;  %v1025_v34 = vpop.permute.xlu0 %1024 }
 0x12d   :  { %1030 = vst.msk [vmem:[#allocation5 + $0xe] sm:$0x1] %vm275_vm5, %v1025_v34 }
 0x12f   :  { %v1079_v35 = vpop.permute.xlu1 %1078 }
 0x130   :  { %1083 = vst.msk [vmem:[#allocation5 + $0x27] sm:$0x1] %vm275_vm5, %v1079_v35  ;;  %v1051_v36 = vpop.permute.xlu0 %1050 }
 0x131   :  { %1056 = vst.msk [vmem:[#allocation4 + $0xf] sm:$0x1] %vm275_vm5, %v1051_v36 }
 0x133   :  { %v1105_v37 = vpop.permute.xlu1 %1104  ;;  %v1400_v5 = vld [vmem:[#allocation4 + $0x20] sm:$0xff] }
 0x134   :  { %1109 = vst.msk [vmem:[#allocation4 + $0x28] sm:$0x1] %vm275_vm5, %v1105_v37  ;;  %v1077_v38 = vpop.permute.xlu0 %1076 }
 0x135   :  { %1082 = vst.msk [vmem:[#allocation5 + $0xf] sm:$0x1] %vm275_vm5, %v1077_v38 }
 0x137   :  { %v1131_v39 = vpop.permute.xlu1 %1130  ;;  %v1476_v9 = vld [vmem:[#allocation5 + $0x20] sm:$0xff] }
 0x138   :  { %1135 = vst.msk [vmem:[#allocation5 + $0x28] sm:$0x1] %vm275_vm5, %v1131_v39  ;;  %v1103_v40 = vpop.permute.xlu0 %1102  ;;  %v1397_v41 = vld [vmem:[#allocation4 + $0x8] sm:$0xff] }
 0x139   :  { %1108 = vst.msk [vmem:[#allocation4 + $0x10] sm:$0x1] %vm275_vm5, %v1103_v40  ;;  %1410 = vrot.lane.b32.xlu1 %v1397_v41, %s5768_s30 }
 0x13b   :  { %v1157_v42 = vpop.permute.xlu1 %1156 }
 0x13c   :  { %1161 = vst.msk [vmem:[#allocation4 + $0x29] sm:$0x1] %vm275_vm5, %v1157_v42  ;;  %v1129_v43 = vpop.permute.xlu0 %1128  ;;  %v1473_v1 = vld [vmem:[#allocation5 + $0x8] sm:$0xff] }
 0x13d   :  { %1134 = vst.msk [vmem:[#allocation5 + $0x10] sm:$0x1] %vm275_vm5, %v1129_v43  ;;  %1414 = vrot.lane.b32.xlu1 %v1399_v44, %s5768_s30 }
 0x13f   :  { %v1183_v45 = vpop.permute.xlu1 %1182 }
 0x140   :  { %1187 = vst.msk [vmem:[#allocation5 + $0x29] sm:$0x1] %vm275_vm5, %v1183_v45  ;;  %v1155_v46 = vpop.permute.xlu0 %1154 }
 0x141   :  { %1160 = vst.msk [vmem:[#allocation4 + $0x11] sm:$0x1] %vm275_vm5, %v1155_v46 }
 0x143   :  { %v1209_v47 = vpop.permute.xlu1 %1208 }
 0x144   :  { %1213 = vst.msk [vmem:[#allocation4 + $0x2a] sm:$0x1] %vm275_vm5, %v1209_v47  ;;  %v1181_v48 = vpop.permute.xlu0 %1180 }
 0x145   :  { %1186 = vst.msk [vmem:[#allocation5 + $0x11] sm:$0x1] %vm275_vm5, %v1181_v48 }
 0x147   :  { %v1235_v49 = vpop.permute.xlu1 %1234 }
 0x148   :  { %1239 = vst.msk [vmem:[#allocation5 + $0x2a] sm:$0x1] %vm275_vm5, %v1235_v49  ;;  %v1207_v50 = vpop.permute.xlu0 %1206 }
 0x149   :  { %1212 = vst.msk [vmem:[#allocation4 + $0x12] sm:$0x1] %vm275_vm5, %v1207_v50 }
 0x14b   :  { %v1261_v51 = vpop.permute.xlu1 %1260 }
 0x14c   :  { %1265 = vst.msk [vmem:[#allocation4 + $0x2b] sm:$0x1] %vm275_vm5, %v1261_v51  ;;  %v1233_v52 = vpop.permute.xlu0 %1232 }
 0x14d   :  { %1238 = vst.msk [vmem:[#allocation5 + $0x12] sm:$0x1] %vm275_vm5, %v1233_v52 }
 0x14f   :  { %v1287_v53 = vpop.permute.xlu1 %1286 }
 0x150   :  { %1291 = vst.msk [vmem:[#allocation5 + $0x2b] sm:$0x1] %vm275_vm5, %v1287_v53  ;;  %v1259_v54 = vpop.permute.xlu0 %1258 }
 0x151   :  { %1264 = vst.msk [vmem:[#allocation4 + $0x13] sm:$0x1] %vm275_vm5, %v1259_v54 }
 0x153   :  { %v1313_v55 = vpop.permute.xlu1 %1312 }
 0x154   :  { %1317 = vst.msk [vmem:[#allocation4 + $0x2c] sm:$0x1] %vm275_vm5, %v1313_v55  ;;  %v1285_v56 = vpop.permute.xlu0 %1284 }
 0x155   :  { %1290 = vst.msk [vmem:[#allocation5 + $0x13] sm:$0x1] %vm275_vm5, %v1285_v56 }
 0x157   :  { %v1339_v57 = vpop.permute.xlu1 %1338 }
 0x158   :  { %1343 = vst.msk [vmem:[#allocation5 + $0x2c] sm:$0x1] %vm275_vm5, %v1339_v57  ;;  %v1311_v58 = vpop.permute.xlu0 %1310 }
 0x159   :  { %1316 = vst.msk [vmem:[#allocation4 + $0x14] sm:$0x1] %vm275_vm5, %v1311_v58 }
 0x15b   :  { %v1365_v59 = vpop.permute.xlu1 %1364 }
 0x15c   :  { %1369 = vst.msk [vmem:[#allocation4 + $0x2d] sm:$0x1] %vm275_vm5, %v1365_v59  ;;  %v1337_v60 = vpop.permute.xlu0 %1336 }
 0x15d   :  { %1342 = vst.msk [vmem:[#allocation5 + $0x14] sm:$0x1] %vm275_vm5, %v1337_v60 }
 0x15f   :  { %v1391_v61 = vpop.permute.xlu1 %1390 }
 0x160   :  { %1395 = vst.msk [vmem:[#allocation5 + $0x2d] sm:$0x1] %vm275_vm5, %v1391_v61  ;;  %v1363_v62 = vpop.permute.xlu0 %1362 }
 0x161   :  { %1368 = vst.msk [vmem:[#allocation4 + $0x15] sm:$0x1] %vm275_vm5, %v1363_v62 }
 0x163   :  { %v1401_v63 = vld [vmem:[#allocation4 + $0x28] sm:$0x3f] }
 0x164   :  { %1418 = vrot.lane.b32.xlu1 %v1401_v63, %s5768_s30  ;;  %v1389_v0 = vpop.permute.xlu0 %1388 }
 0x165   :  { %1394 = vst.msk [vmem:[#allocation5 + $0x15] sm:$0x1] %vm275_vm5, %v1389_v0  ;;  %vm3264_vm5 = vcmask 1044480  }
 0x167   :  { %v1477_v6 = vld [vmem:[#allocation5 + $0x28] sm:$0x3f] }
 0x168   :  { %1486 = vrot.lane.b32.xlu1 %v1473_v1, %s5768_s30  ;;  %v1398_v2 = vld [vmem:[#allocation4 + $0x10] sm:$0x3f] }
 0x169   :  { %1412 = vrot.lane.b32.xlu0 %v1398_v2, %s5768_s30 }
 0x16b   :  { %v1409_v4 = vpop.permute.xlu0 %1408 }
 0x16c   :  { %1490 = vrot.lane.b32.xlu1 %v1475_v3, %s5768_s30  ;;  %1427 = vst.msk [vmem:[#allocation4] sm:$0xff] %vm1426_vm6, %v1409_v4  ;;  %v1474_v8 = vld [vmem:[#allocation5 + $0x10] sm:$0x3f] }
 0x16d   :  { %1416 = vrot.lane.b32.xlu0 %v1400_v5, %s5768_s30 }
 0x170   :  { %1494 = vrot.lane.b32.xlu1 %v1477_v6, %s5768_s30 }
 0x171   :  { %1484 = vrot.lane.b32.xlu0 %v1472_v7, %s5768_s30 }
 0x173   :  { %v1434_v10 = vld [vmem:[#allocation4] sm:$0xff] }
 0x175   :  { %1488 = vrot.lane.b32.xlu0 %v1474_v8, %s5768_s30 }
 0x179   :  { %1492 = vrot.lane.b32.xlu0 %v1476_v9, %s5768_s30 }
 0x17d   :  { %1446 = vrot.lane.b32.xlu0 %v1434_v10, %s5769_s4 }
 0x1ab   :  { %v1411_v11 = vpop.permute.xlu1 %1410 }
 0x1ac   :  { %1428 = vst.msk [vmem:[#allocation4 + $0x8] sm:$0xff] %vm1426_vm6, %v1411_v11 }
 0x1af   :  { %v1415_v12 = vpop.permute.xlu1 %1414 }
 0x1b0   :  { %1431 = vst.msk [vmem:[#allocation4 + $0x18] sm:$0xff] %vm1426_vm6, %v1415_v12 }
 0x1b3   :  { %v1435_v13 = vld [vmem:[#allocation4 + $0x8] sm:$0xff] }
 0x1b4   :  { %1448 = vrot.lane.b32.xlu1 %v1435_v13, %s5769_s4 }
 0x1b7   :  { %v1437_v24 = vld [vmem:[#allocation4 + $0x18] sm:$0xff] }
 0x1d6   :  { %v1419_v14 = vpop.permute.xlu1 %1418 }
 0x1d7   :  { %1433 = vst.msk [vmem:[#allocation4 + $0x28] sm:$0x3f] %vm1429_vm7, %v1419_v14 }
 0x1da   :  { %v1487_v15 = vpop.permute.xlu1 %1486 }
 0x1db   :  { %1503 = vst.msk [vmem:[#allocation5 + $0x8] sm:$0xff] %vm1426_vm6, %v1487_v15  ;;  %v1413_v16 = vpop.permute.xlu0 %1412 }
 0x1dc   :  { %1430 = vst.msk [vmem:[#allocation4 + $0x10] sm:$0x3f] %vm1429_vm7, %v1413_v16 }
 0x1de   :  { %v1491_v18 = vpop.permute.xlu1 %1490  ;;  %v1439_v26 = vld [vmem:[#allocation4 + $0x28] sm:$0x3f] }
 0x1df   :  { %1505 = vst.msk [vmem:[#allocation5 + $0x18] sm:$0xff] %vm1426_vm6, %v1491_v18  ;;  %v1417_v19 = vpop.permute.xlu0 %1416 }
 0x1e0   :  { %1432 = vst.msk [vmem:[#allocation4 + $0x20] sm:$0xff] %vm1426_vm6, %v1417_v19 }
 0x1e2   :  { %v1495_v20 = vpop.permute.xlu1 %1494  ;;  %v1509_v21 = vld [vmem:[#allocation5 + $0x8] sm:$0xff] }
 0x1e3   :  { %1507 = vst.msk [vmem:[#allocation5 + $0x28] sm:$0x3f] %vm1429_vm7, %v1495_v20  ;;  %1522 = vrot.lane.b32.xlu1 %v1509_v21, %s5769_s4  ;;  %v1485_v22 = vpop.permute.xlu0 %1484  ;;  %v1436_v23 = vld [vmem:[#allocation4 + $0x10] sm:$0x3f] }
 0x1e4   :  { %1502 = vst.msk [vmem:[#allocation5] sm:$0xff] %vm1426_vm6, %v1485_v22  ;;  %1450 = vrot.lane.b32.xlu0 %v1436_v23, %s5769_s4 }
 0x1e6   :  { %v1511_v28 = vld [vmem:[#allocation5 + $0x18] sm:$0xff] }
 0x1e7   :  { %1452 = vrot.lane.b32.xlu1 %v1437_v24, %s5769_s4  ;;  %v1489_v25 = vpop.permute.xlu0 %1488  ;;  %v1438_v32 = vld [vmem:[#allocation4 + $0x20] sm:$0xff] }
 0x1e8   :  { %1504 = vst.msk [vmem:[#allocation5 + $0x10] sm:$0x3f] %vm1429_vm7, %v1489_v25  ;;  %vm4914_vm7 = vcmask 1041408  }
 0x1ea   :  { %v1513_v31 = vld [vmem:[#allocation5 + $0x28] sm:$0x3f] }
 0x1eb   :  { %1456 = vrot.lane.b32.xlu1 %v1439_v26, %s5769_s4  ;;  %v1493_v17 = vpop.permute.xlu0 %1492  ;;  %v1508_v27 = vld [vmem:[#allocation5] sm:$0xff] }
 0x1ec   :  { %1506 = vst.msk [vmem:[#allocation5 + $0x20] sm:$0xff] %vm1426_vm6, %v1493_v17  ;;  %1520 = vrot.lane.b32.xlu0 %v1508_v27, %s5769_s4  ;;  %vm4353_vm6 = vcmask 1042432  }
 0x1ef   :  { %1526 = vrot.lane.b32.xlu1 %v1511_v28, %s5769_s4  ;;  %v1447_v29 = vpop.permute.xlu0 %1446  ;;  %v1510_v30 = vld [vmem:[#allocation5 + $0x10] sm:$0x3f] }
 0x1f0   :  { %1465 = vst.msk [vmem:[#allocation4] sm:$0xff] %vm1464_vm8, %v1447_v29  ;;  %1524 = vrot.lane.b32.xlu0 %v1510_v30, %s5769_s4 }
 0x1f3   :  { %1530 = vrot.lane.b32.xlu1 %v1513_v31, %s5769_s4  ;;  %v1512_v33 = vld [vmem:[#allocation5 + $0x20] sm:$0xff] }
 0x1f4   :  { %1454 = vrot.lane.b32.xlu0 %v1438_v32, %s5769_s4 }
 0x1f7   :  { %v1544_v34 = vld [vmem:[#allocation4] sm:$0xff] }
 0x1f8   :  { %1528 = vrot.lane.b32.xlu0 %v1512_v33, %s5769_s4  ;;  %s5560_s4 = sld [smem:[#allocation11 + $0x8b]] }
 0x1fc   :  { %1556 = vrot.lane.b32.xlu0 %v1544_v34, %s5770_s5 }
 0x226   :  { %v1449_v35 = vpop.permute.xlu1 %1448 }
 0x227   :  { %1466 = vst.msk [vmem:[#allocation4 + $0x8] sm:$0xff] %vm1464_vm8, %v1449_v35 }
 0x22e   :  { %v1545_v36 = vld [vmem:[#allocation4 + $0x8] sm:$0xff] }
 0x22f   :  { %1558 = vrot.lane.b32.xlu1 %v1545_v36, %s5770_s5 }
 0x255   :  { %v1523_v37 = vpop.permute.xlu1 %1522 }
 0x256   :  { %1539 = vst.msk [vmem:[#allocation5 + $0x8] sm:$0xff] %vm1464_vm8, %v1523_v37  ;;  %v1451_v38 = vpop.permute.xlu0 %1450 }
 0x257   :  { %1468 = vst.msk [vmem:[#allocation4 + $0x10] sm:$0x3f] %vm1467_vm9, %v1451_v38 }
 0x259   :  { %v1453_v39 = vpop.permute.xlu1 %1452 }
 0x25a   :  { %1469 = vst.msk [vmem:[#allocation4 + $0x18] sm:$0xff] %vm1464_vm8, %v1453_v39 }
 0x25d   :  { %v1457_v40 = vpop.permute.xlu1 %1456  ;;  %v1621_v41 = vld [vmem:[#allocation5 + $0x8] sm:$0xff] }
 0x25e   :  { %1471 = vst.msk [vmem:[#allocation4 + $0x28] sm:$0x3f] %vm1467_vm9, %v1457_v40  ;;  %1634 = vrot.lane.b32.xlu1 %v1621_v41, %s5770_s5  ;;  %v1521_v42 = vpop.permute.xlu0 %1520  ;;  %v1546_v43 = vld [vmem:[#allocation4 + $0x10] sm:$0x3f] }
 0x25f   :  { %1538 = vst.msk [vmem:[#allocation5] sm:$0xff] %vm1464_vm8, %v1521_v42  ;;  %1560 = vrot.lane.b32.xlu0 %v1546_v43, %s5770_s5 }
 0x261   :  { %v1527_v44 = vpop.permute.xlu1 %1526  ;;  %v1547_v45 = vld [vmem:[#allocation4 + $0x18] sm:$0xff] }
 0x262   :  { %1541 = vst.msk [vmem:[#allocation5 + $0x18] sm:$0xff] %vm1464_vm8, %v1527_v44  ;;  %1562 = vrot.lane.b32.xlu1 %v1547_v45, %s5770_s5  ;;  %v1525_v46 = vpop.permute.xlu0 %1524 }
 0x263   :  { %1540 = vst.msk [vmem:[#allocation5 + $0x10] sm:$0x3f] %vm1467_vm9, %v1525_v46 }
 0x265   :  { %v1531_v47 = vpop.permute.xlu1 %1530  ;;  %v1549_v48 = vld [vmem:[#allocation4 + $0x28] sm:$0x3f] }
 0x266   :  { %1543 = vst.msk [vmem:[#allocation5 + $0x28] sm:$0x3f] %vm1467_vm9, %v1531_v47  ;;  %1566 = vrot.lane.b32.xlu1 %v1549_v48, %s5770_s5  ;;  %v1455_v49 = vpop.permute.xlu0 %1454  ;;  %v1620_v50 = vld [vmem:[#allocation5] sm:$0xff] }
 0x267   :  { %1470 = vst.msk [vmem:[#allocation4 + $0x20] sm:$0xff] %vm1464_vm8, %v1455_v49  ;;  %1632 = vrot.lane.b32.xlu0 %v1620_v50, %s5770_s5 }
 0x269   :  { %v1623_v51 = vld [vmem:[#allocation5 + $0x18] sm:$0xff] }
 0x26a   :  { %1638 = vrot.lane.b32.xlu1 %v1623_v51, %s5770_s5  ;;  %v1529_v52 = vpop.permute.xlu0 %1528  ;;  %v1622_v53 = vld [vmem:[#allocation5 + $0x10] sm:$0x3f] }
 0x26b   :  { %1542 = vst.msk [vmem:[#allocation5 + $0x20] sm:$0xff] %vm1464_vm8, %v1529_v52  ;;  %1636 = vrot.lane.b32.xlu0 %v1622_v53, %s5770_s5 }
 0x26d   :  { %v1625_v54 = vld [vmem:[#allocation5 + $0x28] sm:$0x3f] }
 0x26e   :  { %1642 = vrot.lane.b32.xlu1 %v1625_v54, %s5770_s5  ;;  %v1557_v55 = vpop.permute.xlu0 %1556  ;;  %v1548_v56 = vld [vmem:[#allocation4 + $0x20] sm:$0xff] }
 0x26f   :  { %1575 = vst.msk [vmem:[#allocation4] sm:$0xff] %vm1574_vm10, %v1557_v55  ;;  %1564 = vrot.lane.b32.xlu0 %v1548_v56, %s5770_s5 }
 0x272   :  { %v1624_v57 = vld [vmem:[#allocation5 + $0x20] sm:$0xff] }
 0x273   :  { %1640 = vrot.lane.b32.xlu0 %v1624_v57, %s5770_s5 }
 0x276   :  { %v1582_v58 = vld [vmem:[#allocation4] sm:$0xff] }
 0x277   :  { %1594 = vrot.lane.b32.xlu0 %v1582_v58, %s5771_s6 }
 0x2a1   :  { %v1559_v59 = vpop.permute.xlu1 %1558 }
 0x2a2   :  { %1576 = vst.msk [vmem:[#allocation4 + $0x8] sm:$0xff] %vm1574_vm10, %v1559_v59 }
 0x2a9   :  { %v1583_v60 = vld [vmem:[#allocation4 + $0x8] sm:$0xff] }
 0x2aa   :  { %1596 = vrot.lane.b32.xlu1 %v1583_v60, %s5771_s6 }
 0x2d0   :  { %v1635_v61 = vpop.permute.xlu1 %1634 }
 0x2d1   :  { %1651 = vst.msk [vmem:[#allocation5 + $0x8] sm:$0xff] %vm1574_vm10, %v1635_v61  ;;  %v1561_v62 = vpop.permute.xlu0 %1560 }
 0x2d2   :  { %1578 = vst.msk [vmem:[#allocation4 + $0x10] sm:$0x3f] %vm1577_vm11, %v1561_v62 }
 0x2d4   :  { %v1563_v63 = vpop.permute.xlu1 %1562 }
 0x2d5   :  { %1579 = vst.msk [vmem:[#allocation4 + $0x18] sm:$0xff] %vm1574_vm10, %v1563_v63 }
 0x2d8   :  { %v1567_v0 = vpop.permute.xlu1 %1566  ;;  %v1657_v1 = vld [vmem:[#allocation5 + $0x8] sm:$0xff] }
 0x2d9   :  { %1581 = vst.msk [vmem:[#allocation4 + $0x28] sm:$0x3f] %vm1577_vm11, %v1567_v0  ;;  %1670 = vrot.lane.b32.xlu1 %v1657_v1, %s5771_s6  ;;  %v1633_v2 = vpop.permute.xlu0 %1632  ;;  %v1584_v3 = vld [vmem:[#allocation4 + $0x10] sm:$0x3f] }
 0x2da   :  { %1650 = vst.msk [vmem:[#allocation5] sm:$0xff] %vm1574_vm10, %v1633_v2  ;;  %1598 = vrot.lane.b32.xlu0 %v1584_v3, %s5771_s6  ;;  %v6210_v2 = vstv %s5541_s9  ;;  %s5562_s9 = sld [smem:[#allocation11 + $0x8c]] }
 0x2dc   :  { %v1639_v4 = vpop.permute.xlu1 %1638  ;;  %v1585_v5 = vld [vmem:[#allocation4 + $0x18] sm:$0xff] }
 0x2dd   :  { %1653 = vst.msk [vmem:[#allocation5 + $0x18] sm:$0xff] %vm1574_vm10, %v1639_v4  ;;  %1600 = vrot.lane.b32.xlu1 %v1585_v5, %s5771_s6  ;;  %v1637_v6 = vpop.permute.xlu0 %1636 }
 0x2de   :  { %1652 = vst.msk [vmem:[#allocation5 + $0x10] sm:$0x3f] %vm1577_vm11, %v1637_v6 }
 0x2e0   :  { %v1643_v7 = vpop.permute.xlu1 %1642  ;;  %v1587_v8 = vld [vmem:[#allocation4 + $0x28] sm:$0x3f] }
 0x2e1   :  { %1655 = vst.msk [vmem:[#allocation5 + $0x28] sm:$0x3f] %vm1577_vm11, %v1643_v7  ;;  %1604 = vrot.lane.b32.xlu1 %v1587_v8, %s5771_s6  ;;  %v1565_v9 = vpop.permute.xlu0 %1564  ;;  %v1656_v10 = vld [vmem:[#allocation5] sm:$0xff] }
 0x2e2   :  { %1580 = vst.msk [vmem:[#allocation4 + $0x20] sm:$0xff] %vm1574_vm10, %v1565_v9  ;;  %1668 = vrot.lane.b32.xlu0 %v1656_v10, %s5771_s6 }
 0x2e4   :  { %v1659_v11 = vld [vmem:[#allocation5 + $0x18] sm:$0xff] }
 0x2e5   :  { %1674 = vrot.lane.b32.xlu1 %v1659_v11, %s5771_s6  ;;  %v1641_v12 = vpop.permute.xlu0 %1640  ;;  %v1658_v13 = vld [vmem:[#allocation5 + $0x10] sm:$0x3f]  ;;  %v6226_v11 = vstv %s5542_s10  ;;  %s5563_s10 = sld [smem:[#allocation11 + $0xd]] }
 0x2e6   :  { %1654 = vst.msk [vmem:[#allocation5 + $0x20] sm:$0xff] %vm1574_vm10, %v1641_v12  ;;  %1672 = vrot.lane.b32.xlu0 %v1658_v13, %s5771_s6 }
 0x2e8   :  { %v1661_v14 = vld [vmem:[#allocation5 + $0x28] sm:$0x3f] }
 0x2e9   :  { %1678 = vrot.lane.b32.xlu1 %v1661_v14, %s5771_s6  ;;  %v1595_v15 = vpop.permute.xlu0 %1594  ;;  %v1586_v16 = vld [vmem:[#allocation4 + $0x20] sm:$0xff] }
 0x2ea   :  { %1613 = vst.msk [vmem:[#allocation4] sm:$0xff] %vm1612_vm12, %v1595_v15  ;;  %1602 = vrot.lane.b32.xlu0 %v1586_v16, %s5771_s6 }
 0x2ed   :  { %v1660_v18 = vld [vmem:[#allocation5 + $0x20] sm:$0xff] }
 0x2ee   :  { %1676 = vrot.lane.b32.xlu0 %v1660_v18, %s5771_s6  ;;  %v6235_v18 = vstv %s5543_s11  ;;  %s5561_s6 = sld [smem:[#allocation11 + $0xc]] }
 0x2ef   :  { %s5564_s11 = sld [smem:[#allocation11 + $0x8d]] }
 0x2f1   :  { %v1692_v19 = vld [vmem:[#allocation4] sm:$0xff] }
 0x2f2   :  { %1704 = vrot.lane.b32.xlu0 %v1692_v19, %s5772_s7 }
 0x31c   :  { %v1597_v20 = vpop.permute.xlu1 %1596 }
 0x31d   :  { %1614 = vst.msk [vmem:[#allocation4 + $0x8] sm:$0xff] %vm1612_vm12, %v1597_v20 }
 0x324   :  { %v1693_v21 = vld [vmem:[#allocation4 + $0x8] sm:$0xff] }
 0x325   :  { %1706 = vrot.lane.b32.xlu1 %v1693_v21, %s5772_s7  ;;  %v6240_v21 = vstv %s5544_s12  ;;  %s5569_s12 = sld [smem:[#allocation11 + $0x10]] }
 0x34b   :  { %v1671_v22 = vpop.permute.xlu1 %1670 }
 0x34c   :  { %1687 = vst.msk [vmem:[#allocation5 + $0x8] sm:$0xff] %vm1612_vm12, %v1671_v22  ;;  %v1599_v23 = vpop.permute.xlu0 %1598 }
 0x34d   :  { %1616 = vst.msk [vmem:[#allocation4 + $0x10] sm:$0x3f] %vm1615_vm13, %v1599_v23 }
 0x34f   :  { %v1601_v24 = vpop.permute.xlu1 %1600 }
 0x350   :  { %1617 = vst.msk [vmem:[#allocation4 + $0x18] sm:$0xff] %vm1612_vm12, %v1601_v24 }
 0x353   :  { %v1605_v25 = vpop.permute.xlu1 %1604  ;;  %v1769_v26 = vld [vmem:[#allocation5 + $0x8] sm:$0xff] }
 0x354   :  { %1619 = vst.msk [vmem:[#allocation4 + $0x28] sm:$0x3f] %vm1615_vm13, %v1605_v25  ;;  %1782 = vrot.lane.b32.xlu1 %v1769_v26, %s5772_s7  ;;  %v1669_v17 = vpop.permute.xlu0 %1668  ;;  %v1694_v27 = vld [vmem:[#allocation4 + $0x10] sm:$0x3f] }
 0x355   :  { %1686 = vst.msk [vmem:[#allocation5] sm:$0xff] %vm1612_vm12, %v1669_v17  ;;  %1708 = vrot.lane.b32.xlu0 %v1694_v27, %s5772_s7  ;;  %v6253_v17 = vstv %s5545_s13  ;;  %s5777_s13 = smov 123  }
 0x357   :  { %v1675_v28 = vpop.permute.xlu1 %1674  ;;  %v1695_v29 = vld [vmem:[#allocation4 + $0x18] sm:$0xff] }
 0x358   :  { %1689 = vst.msk [vmem:[#allocation5 + $0x18] sm:$0xff] %vm1612_vm12, %v1675_v28  ;;  %1710 = vrot.lane.b32.xlu1 %v1695_v29, %s5772_s7  ;;  %v1673_v30 = vpop.permute.xlu0 %1672  ;;  %v6258_v29 = vstv %s5546_s14  ;;  %s5570_s14 = sld [smem:[#allocation11 + $0x90]] }
 0x359   :  { %1688 = vst.msk [vmem:[#allocation5 + $0x10] sm:$0x3f] %vm1615_vm13, %v1673_v30 }
 0x35b   :  { %v1679_v31 = vpop.permute.xlu1 %1678  ;;  %v1697_v32 = vld [vmem:[#allocation4 + $0x28] sm:$0x3f] }
 0x35c   :  { %1691 = vst.msk [vmem:[#allocation5 + $0x28] sm:$0x3f] %vm1615_vm13, %v1679_v31  ;;  %1714 = vrot.lane.b32.xlu1 %v1697_v32, %s5772_s7  ;;  %v1603_v33 = vpop.permute.xlu0 %1602  ;;  %v1768_v34 = vld [vmem:[#allocation5] sm:$0xff] }
 0x35d   :  { %1618 = vst.msk [vmem:[#allocation4 + $0x20] sm:$0xff] %vm1612_vm12, %v1603_v33  ;;  %1780 = vrot.lane.b32.xlu0 %v1768_v34, %s5772_s7  ;;  %v6270_v33 = vstv %s5547_s15  ;;  %s5571_s15 = sld [smem:[#allocation11 + $0x11]] }
 0x35f   :  { %v1771_v35 = vld [vmem:[#allocation5 + $0x18] sm:$0xff] }
 0x360   :  { %1786 = vrot.lane.b32.xlu1 %v1771_v35, %s5772_s7  ;;  %v1677_v36 = vpop.permute.xlu0 %1676  ;;  %v1770_v37 = vld [vmem:[#allocation5 + $0x10] sm:$0x3f]  ;;  %v6275_v35 = vstv %s5548_s16  ;;  %s5572_s16 = sld [smem:[#allocation11 + $0x91]] }
 0x361   :  { %1690 = vst.msk [vmem:[#allocation5 + $0x20] sm:$0xff] %vm1612_vm12, %v1677_v36  ;;  %1784 = vrot.lane.b32.xlu0 %v1770_v37, %s5772_s7 }
 0x363   :  { %v1773_v38 = vld [vmem:[#allocation5 + $0x28] sm:$0x3f] }
 0x364   :  { %1790 = vrot.lane.b32.xlu1 %v1773_v38, %s5772_s7  ;;  %v1705_v39 = vpop.permute.xlu0 %1704  ;;  %v1696_v40 = vld [vmem:[#allocation4 + $0x20] sm:$0xff] }
 0x365   :  { %1723 = vst.msk [vmem:[#allocation4] sm:$0xff] %vm1722_vm14, %v1705_v39  ;;  %1712 = vrot.lane.b32.xlu0 %v1696_v40, %s5772_s7  ;;  %v6286_v39 = vstv %s5549_s17  ;;  %s5573_s17 = sld [smem:[#allocation11 + $0x12]] }
 0x368   :  { %v1772_v41 = vld [vmem:[#allocation5 + $0x20] sm:$0xff] }
 0x369   :  { %1788 = vrot.lane.b32.xlu0 %v1772_v41, %s5772_s7  ;;  %v6291_v41 = vstv %s5550_s20  ;;  %s5574_s20 = sld [smem:[#allocation11 + $0x92]] }
 0x36c   :  { %v1730_v42 = vld [vmem:[#allocation4] sm:$0xff] }
 0x36d   :  { %1742 = vrot.lane.b32.xlu0 %v1730_v42, %s5773_s8 }
 0x397   :  { %v1707_v43 = vpop.permute.xlu1 %1706 }
 0x398   :  { %1724 = vst.msk [vmem:[#allocation4 + $0x8] sm:$0xff] %vm1722_vm14, %v1707_v43 }
 0x39f   :  { %v1731_v44 = vld [vmem:[#allocation4 + $0x8] sm:$0xff] }
 0x3a0   :  { %1744 = vrot.lane.b32.xlu1 %v1731_v44, %s5773_s8 }
 0x3c6   :  { %v1783_v45 = vpop.permute.xlu1 %1782 }
 0x3c7   :  { %1799 = vst.msk [vmem:[#allocation5 + $0x8] sm:$0xff] %vm1722_vm14, %v1783_v45  ;;  %v1709_v46 = vpop.permute.xlu0 %1708 }
 0x3c8   :  { %1726 = vst.msk [vmem:[#allocation4 + $0x10] sm:$0x3f] %vm1725_vm15, %v1709_v46 }
 0x3ca   :  { %v1711_v47 = vpop.permute.xlu1 %1710 }
 0x3cb   :  { %1727 = vst.msk [vmem:[#allocation4 + $0x18] sm:$0xff] %vm1722_vm14, %v1711_v47 }
 0x3ce   :  { %v1715_v48 = vpop.permute.xlu1 %1714  ;;  %v1805_v49 = vld [vmem:[#allocation5 + $0x8] sm:$0xff] }
 0x3cf   :  { %1729 = vst.msk [vmem:[#allocation4 + $0x28] sm:$0x3f] %vm1725_vm15, %v1715_v48  ;;  %1818 = vrot.lane.b32.xlu1 %v1805_v49, %s5773_s8  ;;  %v1781_v50 = vpop.permute.xlu0 %1780  ;;  %v1732_v51 = vld [vmem:[#allocation4 + $0x10] sm:$0x3f] }
 0x3d0   :  { %1798 = vst.msk [vmem:[#allocation5] sm:$0xff] %vm1722_vm14, %v1781_v50  ;;  %1746 = vrot.lane.b32.xlu0 %v1732_v51, %s5773_s8 }
 0x3d2   :  { %v1787_v52 = vpop.permute.xlu1 %1786  ;;  %v1733_v53 = vld [vmem:[#allocation4 + $0x18] sm:$0xff] }
 0x3d3   :  { %1801 = vst.msk [vmem:[#allocation5 + $0x18] sm:$0xff] %vm1722_vm14, %v1787_v52  ;;  %1748 = vrot.lane.b32.xlu1 %v1733_v53, %s5773_s8  ;;  %v1785_v54 = vpop.permute.xlu0 %1784 }
 0x3d4   :  { %1800 = vst.msk [vmem:[#allocation5 + $0x10] sm:$0x3f] %vm1725_vm15, %v1785_v54 }
 0x3d6   :  { %v1791_v55 = vpop.permute.xlu1 %1790  ;;  %v1735_v56 = vld [vmem:[#allocation4 + $0x28] sm:$0x3f] }
 0x3d7   :  { %1803 = vst.msk [vmem:[#allocation5 + $0x28] sm:$0x3f] %vm1725_vm15, %v1791_v55  ;;  %1752 = vrot.lane.b32.xlu1 %v1735_v56, %s5773_s8  ;;  %v1713_v57 = vpop.permute.xlu0 %1712  ;;  %v1804_v58 = vld [vmem:[#allocation5] sm:$0xff] }
 0x3d8   :  { %1728 = vst.msk [vmem:[#allocation4 + $0x20] sm:$0xff] %vm1722_vm14, %v1713_v57  ;;  %1816 = vrot.lane.b32.xlu0 %v1804_v58, %s5773_s8 }
 0x3da   :  { %v1807_v59 = vld [vmem:[#allocation5 + $0x18] sm:$0xff] }
 0x3db   :  { %1822 = vrot.lane.b32.xlu1 %v1807_v59, %s5773_s8  ;;  %v1789_v60 = vpop.permute.xlu0 %1788  ;;  %v1806_v61 = vld [vmem:[#allocation5 + $0x10] sm:$0x3f] }
 0x3dc   :  { %1802 = vst.msk [vmem:[#allocation5 + $0x20] sm:$0xff] %vm1722_vm14, %v1789_v60  ;;  %1820 = vrot.lane.b32.xlu0 %v1806_v61, %s5773_s8 }
 0x3de   :  { %v1809_v62 = vld [vmem:[#allocation5 + $0x28] sm:$0x3f] }
 0x3df   :  { %1826 = vrot.lane.b32.xlu1 %v1809_v62, %s5773_s8  ;;  %v1743_v63 = vpop.permute.xlu0 %1742  ;;  %v1734_v0 = vld [vmem:[#allocation4 + $0x20] sm:$0xff] }
 0x3e0   :  { %1761 = vst.msk [vmem:[#allocation4] sm:$0xff] %vm1760_vm1, %v1743_v63  ;;  %1750 = vrot.lane.b32.xlu0 %v1734_v0, %s5773_s8 }
 0x3e3   :  { %v1808_v1 = vld [vmem:[#allocation5 + $0x20] sm:$0xff] }
 0x3e4   :  { %1824 = vrot.lane.b32.xlu0 %v1808_v1, %s5773_s8  ;;  %s5776_s8 = smov 125  }
 0x3e7   :  { %v6212_v3 = vld [vmem:[#allocation4] sm:$0xff] }
 0x3e8   :  { %v1894_v4 = vmul.f32 %v6210_v2, %v6212_v3  ;;  %v1946_v30 = vmul.f32 %v6235_v18, %v6212_v3  ;;  %v1998_v36 = vmul.f32 %v6253_v17, %v6212_v3  ;;  %v2050_v42 = vmul.f32 %v6270_v33, %v6212_v3 }
 0x3e9   :  { %v2102_v48 = vmul.f32 %v6286_v39, %v6212_v3 }
 0x3ea   :  { %1908 = vrot.lane.b32.xlu0 %v1894_v4, %s5772_s7  ;;  %v6340_v4 = vstv %s5551_s21  ;;  %s5575_s21 = sld [smem:[#allocation11 + $0x13]] }
 0x412   :  { %v1745_v5 = vpop.permute.xlu1 %1744 }
 0x413   :  { %1762 = vst.msk [vmem:[#allocation4 + $0x8] sm:$0xff] %vm1760_vm1, %v1745_v5 }
 0x41a   :  { %v6218_v6 = vld [vmem:[#allocation4 + $0x8] sm:$0xff] }
 0x41b   :  { %v1895_v7 = vmul.f32 %v6210_v2, %v6218_v6  ;;  %v1947_v19 = vmul.f32 %v6235_v18, %v6218_v6  ;;  %v1999_v27 = vmul.f32 %v6253_v17, %v6218_v6  ;;  %v2051_v34 = vmul.f32 %v6270_v33, %v6218_v6 }
 0x41c   :  { %v2103_v40 = vmul.f32 %v6286_v39, %v6218_v6 }
 0x41d   :  { %1910 = vrot.lane.b32.xlu1 %v1895_v7, %s5772_s7 }
 0x441   :  { %v1819_v8 = vpop.permute.xlu1 %1818 }
 0x442   :  { %1835 = vst.msk [vmem:[#allocation5 + $0x8] sm:$0xff] %vm1760_vm1, %v1819_v8  ;;  %v1747_v9 = vpop.permute.xlu0 %1746 }
 0x443   :  { %1764 = vst.msk [vmem:[#allocation4 + $0x10] sm:$0x3f] %vm1763_vm2, %v1747_v9  ;;  %v2155_v9 = vmul.f32 %v6340_v4, %v6218_v6 }
 0x445   :  { %v1749_v10 = vpop.permute.xlu1 %1748 }
 0x446   :  { %1765 = vst.msk [vmem:[#allocation4 + $0x18] sm:$0xff] %vm1760_vm1, %v1749_v10 }
 0x449   :  { %v6228_v12 = vld [vmem:[#allocation5 + $0x8] sm:$0xff]  ;;  %v1753_v13 = vpop.permute.xlu1 %1752 }
 0x44a   :  { %1767 = vst.msk [vmem:[#allocation4 + $0x28] sm:$0x3f] %vm1763_vm2, %v1753_v13  ;;  %v1901_v14 = vmul.f32 %v6226_v11, %v6228_v12  ;;  %v1817_v15 = vpop.permute.xlu0 %1816  ;;  %v1953_v23 = vmul.f32 %v6240_v21, %v6228_v12  ;;  %v2005_v31 = vmul.f32 %v6258_v29, %v6228_v12  ;;  %v2057_v37 = vmul.f32 %v6275_v35, %v6228_v12  ;;  %v6334_v0 = vld [vmem:[#allocation4 + $0x10] sm:$0x3f] }
 0x44b   :  { %1834 = vst.msk [vmem:[#allocation5] sm:$0xff] %vm1760_vm1, %v1817_v15  ;;  %v2109_v43 = vmul.f32 %v6291_v41, %v6228_v12  ;;  %v2156_v5 = vmul.f32 %v6340_v4, %v6334_v0 }
 0x44c   :  { %1930 = vrot.lane.b32.xlu1 %v1901_v14, %s5772_s7 }
 0x44d   :  { %v1823_v16 = vpop.permute.xlu1 %1822  ;;  %v1843_v51 = vld [vmem:[#allocation4 + $0x18] sm:$0xff]  ;;  %v2178_v13 = vrot.slane %v2156_v5, 1 }
 0x44e   :  { %1837 = vst.msk [vmem:[#allocation5 + $0x18] sm:$0xff] %vm1760_vm1, %v1823_v16  ;;  %v1821_v20 = vpop.permute.xlu0 %1820  ;;  %v1896_v53 = vmul.f32 %v6210_v2, %v1843_v51  ;;  %v1948_v58 = vmul.f32 %v6235_v18, %v1843_v51  ;;  %v2000_v62 = vmul.f32 %v6253_v17, %v1843_v51  ;;  %v2052_v8 = vmul.f32 %v6270_v33, %v1843_v51 }
 0x44f   :  { %1836 = vst.msk [vmem:[#allocation5 + $0x10] sm:$0x3f] %vm1763_vm2, %v1821_v20  ;;  %v2176_v16 = vrot.slane %v2155_v9, 1 }
 0x450   :  { %1962 = vrot.lane.b32.xlu1 %v1947_v19, %s5772_s7  ;;  %v6361_v19 = vstv %s5553_s1  ;;  %s5577_s1 = sld [smem:[#allocation11 + $0x14]] }
 0x451   :  { %v1827_v22 = vpop.permute.xlu1 %1826  ;;  %v2179_v20 = vsel %vm2174_vm3, %v2176_v16, %v2178_v13 }
 0x452   :  { %1839 = vst.msk [vmem:[#allocation5 + $0x28] sm:$0x3f] %vm1763_vm2, %v1827_v22  ;;  %v6247_v24 = vld [vmem:[#allocation5] sm:$0xff]  ;;  %v1751_v25 = vpop.permute.xlu0 %1750  ;;  %v2237_v22 = vmul.f32 %v6361_v19, %v6334_v0 }
 0x453   :  { %1766 = vst.msk [vmem:[#allocation4 + $0x20] sm:$0xff] %vm1760_vm1, %v1751_v25  ;;  %v1900_v26 = vmul.f32 %v6226_v11, %v6247_v24  ;;  %v1952_v32 = vmul.f32 %v6240_v21, %v6247_v24  ;;  %v2004_v38 = vmul.f32 %v6258_v29, %v6247_v24  ;;  %v2056_v45 = vmul.f32 %v6275_v35, %v6247_v24 }
 0x454   :  { %1982 = vrot.lane.b32.xlu1 %v1953_v23, %s5772_s7  ;;  %v2108_v50 = vmul.f32 %v6291_v41, %v6247_v24  ;;  %v2104_v23 = vmul.f32 %v6286_v39, %v1843_v51 }
 0x455   :  { %1928 = vrot.lane.b32.xlu0 %v1900_v26, %s5772_s7  ;;  %v1849_v54 = vld [vmem:[#allocation5 + $0x18] sm:$0xff]  ;;  %v2236_v26 = vmul.f32 %v6361_v19, %v6218_v6 }
 0x456   :  { %v1825_v28 = vpop.permute.xlu0 %1824  ;;  %v1902_v56 = vmul.f32 %v6226_v11, %v1849_v54  ;;  %v1954_v60 = vmul.f32 %v6240_v21, %v1849_v54  ;;  %v2006_v1 = vmul.f32 %v6258_v29, %v1849_v54  ;;  %v6344_v7 = vld [vmem:[#allocation5 + $0x10] sm:$0x3f]  ;;  %v2058_v15 = vmul.f32 %v6275_v35, %v1849_v54 }
 0x457   :  { %1838 = vst.msk [vmem:[#allocation5 + $0x20] sm:$0xff] %vm1760_vm1, %v1825_v28 }
 0x458   :  { %2014 = vrot.lane.b32.xlu1 %v1999_v27, %s5770_s5  ;;  %v2154_v27 = vmul.f32 %v6340_v4, %v6212_v3 }
 0x459   :  { %1960 = vrot.lane.b32.xlu0 %v1946_v30, %s5772_s7 }
 0x45a   :  { %v1844_v44 = vld [vmem:[#allocation4 + $0x20] sm:$0xff] }
 0x45b   :  { %v1897_v46 = vmul.f32 %v6210_v2, %v1844_v44  ;;  %v1949_v52 = vmul.f32 %v6235_v18, %v1844_v44  ;;  %v2001_v57 = vmul.f32 %v6253_v17, %v1844_v44  ;;  %v2053_v61 = vmul.f32 %v6270_v33, %v1844_v44 }
 0x45c   :  { %2034 = vrot.lane.b32.xlu1 %v2005_v31, %s5770_s5  ;;  %v2105_v2 = vmul.f32 %v6286_v39, %v1844_v44  ;;  %v6371_v17 = vstv %s5554_s0  ;;  %v2110_v31 = vmul.f32 %v6291_v41, %v1849_v54  ;;  %v2256_v33 = vrot.slane %v2236_v26, 1  ;;  %s5578_s0 = sld [smem:[#allocation11 + $0x94]] }
 0x45d   :  { %1980 = vrot.lane.b32.xlu0 %v1952_v32, %s5772_s7  ;;  %v2245_v30 = vmul.f32 %v6371_v17, %v6344_v7  ;;  %v6395_v44 = vstv %s5556_s25  ;;  %v6443_v26 = vstv %s5560_s4  ;;  %s5580_s25 = sld [smem:[#allocation11 + $0x95]] }
 0x45e   :  { %v1850_v47 = vld [vmem:[#allocation5 + $0x20] sm:$0xff]  ;;  %v2323_v9 = vmul.f32 %v6395_v44, %v6247_v24  ;;  %s5584_s4 = sld [smem:[#allocation11 + $0x97]] }
 0x45f   :  { %v1903_v49 = vmul.f32 %v6226_v11, %v1850_v47  ;;  %v1955_v55 = vmul.f32 %v6240_v21, %v1850_v47  ;;  %v2007_v59 = vmul.f32 %v6258_v29, %v1850_v47  ;;  %v2059_v63 = vmul.f32 %v6275_v35, %v1850_v47 }
 0x460   :  { %2066 = vrot.lane.b32.xlu1 %v2051_v34, %s5770_s5  ;;  %v2111_v10 = vmul.f32 %v6291_v41, %v1850_v47  ;;  %v6352_v11 = vstv %s5552_s22  ;;  %v2258_v29 = vrot.slane %v2237_v22, 1  ;;  %v2244_v34 = vmul.f32 %v6371_v17, %v6228_v12  ;;  %s5576_s22 = sld [smem:[#allocation11 + $0x93]] }
 0x461   :  { %2012 = vrot.lane.b32.xlu0 %v1998_v36, %s5770_s5  ;;  %v2164_v14 = vmul.f32 %v6352_v11, %v6344_v7  ;;  %v2163_v18 = vmul.f32 %v6352_v11, %v6228_v12  ;;  %v2162_v32 = vmul.f32 %v6352_v11, %v6247_v24  ;;  %v6385_v35 = vstv %s5555_s23  ;;  %s5579_s23 = sld [smem:[#allocation11 + $0x15]] }
 0x462   :  { %v2175_v36 = vrot.slane %v2154_v27, 1  ;;  %v2317_v39 = vmul.f32 %v6385_v35, %v6334_v0  ;;  %v2367_v22 = vrot.slane %v2323_v9, 1 }
 0x463   :  { %v2210_v21 = vrot.slane %v2164_v14, 1  ;;  %v2208_v25 = vrot.slane %v2163_v18, 1  ;;  %v2207_v41 = vrot.slane %v2162_v32, 1  ;;  %v6433_v14 = vstv %s5559_s29  ;;  %s5583_s29 = sld [smem:[#allocation11 + $0x17]] }
 0x464   :  { %2086 = vrot.lane.b32.xlu1 %v2057_v37, %s5770_s5  ;;  %v2259_v37 = vsel %vm2174_vm3, %v2256_v33, %v2258_v29  ;;  %v2338_v47 = vrot.slane %v2317_v39, 1 }
 0x465   :  { %2032 = vrot.lane.b32.xlu0 %v2004_v38, %s5770_s5  ;;  %v2211_v28 = vsel %vm2174_vm3, %v2208_v25, %v2210_v21  ;;  %v2290_v38 = vrot.slane %v2245_v30, 1  ;;  %v2485_v30 = vmul.f32 %v6443_v26, %v6344_v7 }
 0x467   :  { %v2530_v39 = vrot.slane %v2485_v30, 1 }
 0x468   :  { %2118 = vrot.lane.b32.xlu1 %v2103_v40, %s5768_s30  ;;  %v2177_v40 = vsel %vm2174_vm3, %v2175_v36, %v2176_v16  ;;  %v6457_v36 = vstv %s5561_s6  ;;  %s5585_s6 = sld [smem:[#allocation11 + $0x18]] }
 0x469   :  { %2064 = vrot.lane.b32.xlu0 %v2050_v42, %s5770_s5  ;;  %v2288_v42 = vrot.slane %v2244_v34, 1  ;;  %v2484_v34 = vmul.f32 %v6443_v26, %v6228_v12 }
 0x46c   :  { %2138 = vrot.lane.b32.xlu1 %v2109_v43, %s5768_s30  ;;  %v2316_v43 = vmul.f32 %v6385_v35, %v6218_v6 }
 0x46d   :  { %2084 = vrot.lane.b32.xlu0 %v2056_v45, %s5770_s5  ;;  %v2235_v45 = vmul.f32 %v6361_v19, %v6212_v3 }
 0x46e   :  { %v2336_v51 = vrot.slane %v2316_v43, 1  ;;  %v2528_v43 = vrot.slane %v2484_v34, 1 }
 0x46f   :  { %v2255_v54 = vrot.slane %v2235_v45, 1  ;;  %v2556_v45 = vmul.f32 %v6457_v36, %v6218_v6 }
 0x470   :  { %1914 = vrot.lane.b32.xlu1 %v1897_v46, %s5772_s7  ;;  %v2291_v46 = vsel %vm2174_vm3, %v2288_v42, %v2290_v38 }
 0x471   :  { %2116 = vrot.lane.b32.xlu0 %v2102_v48, %s5768_s30  ;;  %v2325_v48 = vmul.f32 %v6395_v44, %v6344_v7 }
 0x474   :  { %1934 = vrot.lane.b32.xlu1 %v1903_v49, %s5772_s7  ;;  %v2209_v49 = vsel %vm2174_vm3, %v2207_v41, %v2208_v25  ;;  %v2476_v25 = vmul.f32 %v6433_v14, %v6218_v6 }
 0x475   :  { %2136 = vrot.lane.b32.xlu0 %v2108_v50, %s5768_s30  ;;  %v2243_v50 = vmul.f32 %v6371_v17, %v6247_v24 }
 0x478   :  { %1966 = vrot.lane.b32.xlu1 %v1949_v52, %s5772_s7  ;;  %v2324_v52 = vmul.f32 %v6395_v44, %v6228_v12 }
 0x479   :  { %1912 = vrot.lane.b32.xlu0 %v1896_v53, %s5772_s7  ;;  %v6409_v53 = vstv %s5557_s26  ;;  %s5581_s26 = sld [smem:[#allocation11 + $0x16]] }
 0x47a   :  { %v2395_v27 = vmul.f32 %v6409_v53, %v6212_v3 }
 0x47c   :  { %1986 = vrot.lane.b32.xlu1 %v1955_v55, %s5772_s7  ;;  %v2339_v55 = vsel %vm2174_vm3, %v2336_v51, %v2338_v47  ;;  %v6469_v47 = vstv %s5562_s9  ;;  %s5586_s9 = sld [smem:[#allocation11 + $0x98]] }
 0x47d   :  { %1932 = vrot.lane.b32.xlu0 %v1902_v56, %s5772_s7  ;;  %v2370_v56 = vrot.slane %v2325_v48, 1  ;;  %v2475_v48 = vmul.f32 %v6433_v14, %v6212_v3 }
 0x480   :  { %2018 = vrot.lane.b32.xlu1 %v2001_v57, %s5770_s5  ;;  %v2397_v57 = vmul.f32 %v6409_v53, %v6334_v0 }
 0x481   :  { %1964 = vrot.lane.b32.xlu0 %v1948_v58, %s5772_s7  ;;  %v2257_v58 = vsel %vm2174_vm3, %v2255_v54, %v2256_v33  ;;  %v2496_v33 = vrot.slane %v2476_v25, 1  ;;  %v2483_v54 = vmul.f32 %v6443_v26, %v6247_v24 }
 0x484   :  { %2038 = vrot.lane.b32.xlu1 %v2007_v59, %s5770_s5  ;;  %v2287_v59 = vrot.slane %v2243_v50, 1 }
 0x485   :  { %1984 = vrot.lane.b32.xlu0 %v1954_v60, %s5772_s7  ;;  %v2368_v60 = vrot.slane %v2324_v52, 1 }
 0x488   :  { %2070 = vrot.lane.b32.xlu1 %v2053_v61, %s5770_s5  ;;  %v2396_v61 = vmul.f32 %v6409_v53, %v6218_v6 }
 0x489   :  { %2016 = vrot.lane.b32.xlu0 %v2000_v62, %s5770_s5  ;;  %v6419_v62 = vstv %s5558_s28  ;;  %s5582_s28 = sld [smem:[#allocation11 + $0x96]] }
 0x48a   :  { %v2405_v5 = vmul.f32 %v6419_v62, %v6344_v7  ;;  %v2404_v13 = vmul.f32 %v6419_v62, %v6228_v12  ;;  %v2403_v32 = vmul.f32 %v6419_v62, %v6247_v24 }
 0x48c   :  { %2090 = vrot.lane.b32.xlu1 %v2059_v63, %s5770_s5  ;;  %v2315_v63 = vmul.f32 %v6385_v35, %v6212_v3  ;;  %v2450_v18 = vrot.slane %v2405_v5, 1 }
 0x48d   :  { %2036 = vrot.lane.b32.xlu0 %v2006_v1, %s5770_s5  ;;  %v2371_v1 = vsel %vm2174_vm3, %v2368_v60, %v2370_v56  ;;  %v2564_v56 = vmul.f32 %v6469_v47, %v6228_v12 }
 0x48f   :  { %v2608_v5 = vrot.slane %v2564_v56, 1  ;;  %v6547_v56 = vstv %s5571_s15  ;;  %s5591_s15 = sld [smem:[#allocation11 + $0x1b]] }
 0x490   :  { %2122 = vrot.lane.b32.xlu1 %v2105_v2, %s5768_s30  ;;  %v2418_v2 = vrot.slane %v2397_v57, 1 }
 0x491   :  { %2068 = vrot.lane.b32.xlu0 %v2052_v8, %s5770_s5  ;;  %v2289_v8 = vsel %vm2174_vm3, %v2287_v59, %v2288_v42  ;;  %v2447_v42 = vrot.slane %v2403_v32, 1  ;;  %v2495_v59 = vrot.slane %v2475_v48, 1 }
 0x494   :  { %2142 = vrot.lane.b32.xlu1 %v2111_v10, %s5768_s30  ;;  %v2416_v10 = vrot.slane %v2396_v61, 1 }
 0x495   :  { %2088 = vrot.lane.b32.xlu0 %v2058_v15, %s5770_s5  ;;  %v2335_v15 = vrot.slane %v2315_v63, 1 }
 0x496   :  { %v2419_v16 = vsel %vm2174_vm3, %v2416_v10, %v2418_v2  ;;  %v2527_v2 = vrot.slane %v2483_v54, 1 }
 0x497   :  { %v2337_v21 = vsel %vm2174_vm3, %v2335_v15, %v2336_v51  ;;  %v2565_v51 = vmul.f32 %v6469_v47, %v6344_v7 }
 0x498   :  { %2187 = vrot.lane.b32.xlu1 %v2179_v20, %s5774_s24  ;;  %v2477_v20 = vmul.f32 %v6433_v14, %v6334_v0 }
 0x499   :  { %2120 = vrot.lane.b32.xlu0 %v2104_v23, %s5768_s30  ;;  %v2448_v23 = vrot.slane %v2404_v13, 1  ;;  %v2610_v61 = vrot.slane %v2565_v51, 1  ;;  %v2555_v13 = vmul.f32 %v6457_v36, %v6212_v3 }
 0x49a   :  { %v2498_v29 = vrot.slane %v2477_v20, 1  ;;  %v6504_v20 = vpop.permute.xlu0 %1908 }
 0x49b   :  { %v2449_v52 = vsel %vm2174_vm3, %v2447_v42, %v2448_v23  ;;  %v2611_v15 = vsel %vm2174_vm3, %v2608_v5, %v2610_v61  ;;  %9755 = vst [vmem:[#allocation19_spill] sm:$0xff] %v6504_v20 }
 0x49c   :  { %2219 = vrot.lane.b32.xlu1 %v2211_v28, %s5774_s24  ;;  %v2451_v28 = vsel %vm2174_vm3, %v2448_v23, %v2450_v18  ;;  %v2499_v38 = vsel %vm2174_vm3, %v2496_v33, %v2498_v29  ;;  %v2575_v29 = vrot.slane %v2555_v13, 1  ;;  %v2925_v13 = vmul.f32 %v6547_v56, %v6218_v6 }
 0x49d   :  { %2140 = vrot.lane.b32.xlu0 %v2110_v31, %s5768_s30  ;;  %v2369_v31 = vsel %vm2174_vm3, %v2367_v22, %v2368_v60  ;;  %v2563_v22 = vmul.f32 %v6469_v47, %v6247_v24 }
 0x4a0   :  { %2267 = vrot.lane.b32.xlu1 %v2259_v37, %s5775_s27  ;;  %v2415_v37 = vrot.slane %v2395_v27, 1 }
 0x4a1   :  { %2185 = vrot.lane.b32.xlu0 %v2177_v40, %s5774_s24  ;;  %v2557_v40 = vmul.f32 %v6457_v36, %v6334_v0 }
 0x4a2   :  { %v2417_v41 = vsel %vm2174_vm3, %v2415_v37, %v2416_v10  ;;  %v6497_v10 = vstv %s5564_s11  ;;  %v2607_v37 = vrot.slane %v2563_v22, 1  ;;  %s5588_s11 = sld [smem:[#allocation11 + $0x99]] }
 0x4a3   :  { %v2578_v50 = vrot.slane %v2557_v40, 1  ;;  %v2645_v18 = vmul.f32 %v6497_v10, %v6344_v7  ;;  %v2644_v25 = vmul.f32 %v6497_v10, %v6228_v12  ;;  %v2643_v51 = vmul.f32 %v6497_v10, %v6247_v24 }
 0x4a4   :  { %2299 = vrot.lane.b32.xlu1 %v2291_v46, %s5775_s27  ;;  %v6466_v46 = vpop.permute.xlu1 %1910 }
 0x4a5   :  { %2217 = vrot.lane.b32.xlu0 %v2209_v49, %s5774_s24  ;;  %9752 = vst [vmem:[#allocation16_spill] sm:$0xff] %v6466_v46  ;;  %v2531_v49 = vsel %vm2174_vm3, %v2528_v43, %v2530_v39 }
 0x4a8   :  { %2347 = vrot.lane.b32.xlu1 %v2339_v55, %s5775_s27  ;;  %v2576_v55 = vrot.slane %v2556_v45, 1 }
 0x4a9   :  { %2265 = vrot.lane.b32.xlu0 %v2257_v58, %s5775_s27  ;;  %v6485_v58 = vstv %s5563_s10  ;;  %s5587_s10 = sld [smem:[#allocation11 + $0x19]] }
 0x4aa   :  { %v2579_v60 = vsel %vm2174_vm3, %v2576_v55, %v2578_v50  ;;  %v2637_v63 = vmul.f32 %v6485_v58, %v6334_v0  ;;  %v2577_v34 = vsel %vm2174_vm3, %v2575_v29, %v2576_v55  ;;  %v2635_v42 = vmul.f32 %v6485_v58, %v6212_v3 }
 0x4ab   :  { %v2609_v50 = vsel %vm2174_vm3, %v2607_v37, %v2608_v5  ;;  %v2687_v5 = vrot.slane %v2643_v51, 1  ;;  %v6579_v37 = vstv %s5573_s17  ;;  %s5597_s17 = sld [smem:[#allocation11 + $0x1e]] }
 0x4ac   :  { %2379 = vrot.lane.b32.xlu1 %v2371_v1, %s5775_s27  ;;  %v2497_v1 = vsel %vm2174_vm3, %v2495_v59, %v2496_v33  ;;  %v2655_v59 = vrot.slane %v2635_v42, 1 }
 0x4ad   :  { %2297 = vrot.lane.b32.xlu0 %v2289_v8, %s5775_s27  ;;  %v2636_v8 = vmul.f32 %v6485_v58, %v6218_v6 }
 0x4af   :  { %v2656_v23 = vrot.slane %v2636_v8, 1 }
 0x4b0   :  { %2427 = vrot.lane.b32.xlu1 %v2419_v16, %s5776_s8  ;;  %v2658_v16 = vrot.slane %v2637_v63, 1  ;;  %v2926_v63 = vmul.f32 %v6547_v56, %v6334_v0 }
 0x4b1   :  { %2345 = vrot.lane.b32.xlu0 %v2337_v21, %s5775_s27  ;;  %v2529_v21 = vsel %vm2174_vm3, %v2527_v2, %v2528_v43  ;;  %v2657_v2 = vsel %vm2174_vm3, %v2655_v59, %v2656_v23 }
 0x4b2   :  { %v2659_v30 = vsel %vm2174_vm3, %v2656_v23, %v2658_v16  ;;  %v6561_v16 = vstv %s5572_s16  ;;  %v2947_v22 = vrot.slane %v2926_v63, 2  ;;  %s5592_s16 = sld [smem:[#allocation11 + $0x9b]] }
 0x4b3   :  { %v2934_v23 = vmul.f32 %v6561_v16, %v6344_v7 }
 0x4b4   :  { %2459 = vrot.lane.b32.xlu1 %v2451_v28, %s5776_s8  ;;  %v6515_v28 = vstv %s5569_s12  ;;  %s5589_s12 = sld [smem:[#allocation11 + $0x1a]] }
 0x4b5   :  { %2377 = vrot.lane.b32.xlu0 %v2369_v31, %s5775_s27  ;;  %v2690_v31 = vrot.slane %v2645_v18, 1  ;;  %v2846_v32 = vmul.f32 %v6515_v28, %v6334_v0  ;;  %v2845_v39 = vmul.f32 %v6515_v28, %v6218_v6  ;;  %v2844_v18 = vmul.f32 %v6515_v28, %v6212_v3 }
 0x4b7   :  { %v2867_v45 = vrot.slane %v2846_v32, 2  ;;  %v2933_v32 = vmul.f32 %v6561_v16, %v6228_v12 }
 0x4b8   :  { %2507 = vrot.lane.b32.xlu1 %v2499_v38, %s5776_s8  ;;  %v2688_v38 = vrot.slane %v2644_v25, 1 }
 0x4b9   :  { %2425 = vrot.lane.b32.xlu0 %v2417_v41, %s5776_s8  ;;  %v6529_v41 = vstv %s5570_s14  ;;  %v2977_v51 = vrot.slane %v2933_v32, 2  ;;  %s5590_s14 = sld [smem:[#allocation11 + $0x9a]] }
 0x4ba   :  { %v2691_v43 = vsel %vm2174_vm3, %v2688_v38, %v2690_v31  ;;  %v2854_v48 = vmul.f32 %v6529_v41, %v6344_v7  ;;  %v2853_v54 = vmul.f32 %v6529_v41, %v6228_v12  ;;  %v2689_v29 = vsel %vm2174_vm3, %v2687_v5, %v2688_v38 }
 0x4bb   :  { %v2945_v31 = vrot.slane %v2925_v13, 2  ;;  %v3006_v38 = vmul.f32 %v6579_v37, %v6334_v0 }
 0x4bc   :  { %2539 = vrot.lane.b32.xlu1 %v2531_v49, %s5776_s8  ;;  %v2899_v61 = vrot.slane %v2854_v48, 2  ;;  %v2897_v8 = vrot.slane %v2853_v54, 2  ;;  %v3005_v54 = vmul.f32 %v6579_v37, %v6218_v6 }
 0x4bd   :  { %2457 = vrot.lane.b32.xlu0 %v2449_v52, %s5776_s8  ;;  %v2865_v52 = vrot.slane %v2845_v39, 2  ;;  %v2864_v39 = vrot.slane %v2844_v18, 2  ;;  %v2948_v42 = vsel %vm2735_vm4, %v2945_v31, %v2947_v22  ;;  %v2932_v18 = vmul.f32 %v6561_v16, %v6247_v24 }
 0x4be   :  { %v6483_v57 = vpop.permute.xlu1 %1930 }
 0x4bf   :  { %9753 = vst [vmem:[#allocation17_spill] sm:$0xff] %v6483_v57  ;;  %v2866_v48 = vsel %vm2735_vm4, %v2864_v39, %v2865_v52 }
 0x4c0   :  { %2587 = vrot.lane.b32.xlu1 %v2579_v60, %s5777_s13  ;;  %v2868_v60 = vsel %vm2735_vm4, %v2865_v52, %v2867_v45 }
 0x4c1   :  { %2505 = vrot.lane.b32.xlu0 %v2497_v1, %s5776_s8 }
 0x4c2   :  { %v6495_v9 = vpop.permute.xlu1 %1962 }
 0x4c3   :  { %9754 = vst [vmem:[#allocation18_spill] sm:$0xff] %v6495_v9 }
 0x4c4   :  { %2619 = vrot.lane.b32.xlu1 %v2611_v15, %s5777_s13 }
 0x4c5   :  { %2537 = vrot.lane.b32.xlu0 %v2529_v21, %s5776_s8  ;;  %v2900_v21 = vsel %vm2735_vm4, %v2897_v8, %v2899_v61  ;;  %v2924_v61 = vmul.f32 %v6547_v56, %v6212_v3 }
 0x4c6   :  { %v6513_v27 = vpop.permute.xlu1 %1982 }
 0x4c7   :  { %9756 = vst [vmem:[#allocation20_spill] sm:$0xff] %v6513_v27  ;;  %v6520_v33 = vpop.permute.xlu0 %1928 }
 0x4c8   :  { %9757 = vst [vmem:[#allocation21_spill] sm:$0xff] %v6520_v33  ;;  %2667 = vrot.lane.b32.xlu1 %v2659_v30, %s5777_s13  ;;  %v2852_v30 = vmul.f32 %v6529_v41, %v6247_v24 }
 0x4c9   :  { %2585 = vrot.lane.b32.xlu0 %v2577_v34, %s5777_s13 }
 0x4ca   :  { %v6527_v40 = vpop.permute.xlu1 %2014 }
 0x4cb   :  { %9758 = vst [vmem:[#allocation22_spill] sm:$0xff] %v6527_v40  ;;  %v6536_v49 = vpop.permute.xlu0 %1960 }
 0x4cc   :  { %9759 = vst [vmem:[#allocation23_spill] sm:$0xff] %v6536_v49  ;;  %2699 = vrot.lane.b32.xlu1 %v2691_v43, %s5777_s13  ;;  %v2979_v43 = vrot.slane %v2934_v23, 2  ;;  %v6928_v49 = vld [vmem:[#allocation5 + $0x10] sm:$0x3f] }
 0x4cd   :  { %2617 = vrot.lane.b32.xlu0 %v2609_v50, %s5777_s13  ;;  %v2896_v50 = vrot.slane %v2852_v30, 2  ;;  %v2944_v30 = vrot.slane %v2924_v61, 2  ;;  %v6625_v61 = vstv %s5576_s22  ;;  %s5600_s22 = sld [smem:[#allocation11 + $0x9f]] }
 0x4ce   :  { %v6545_v55 = vpop.permute.xlu1 %2034  ;;  %v2980_v63 = vsel %vm2735_vm4, %v2977_v51, %v2979_v43 }
 0x4cf   :  { %9760 = vst [vmem:[#allocation24_spill] sm:$0xff] %v6545_v55  ;;  %v6552_v1 = vpop.permute.xlu0 %1980  ;;  %v2898_v13 = vsel %vm2735_vm4, %v2896_v50, %v2897_v8  ;;  %v2946_v43 = vsel %vm2735_vm4, %v2944_v30, %v2945_v31  ;;  %v3094_v31 = vmul.f32 %v6625_v61, %v6344_v7 }
 0x4d0   :  { %9761 = vst [vmem:[#allocation25_spill] sm:$0xff] %v6552_v1  ;;  %2876 = vrot.lane.b32.xlu1 %v2868_v60, %s5772_s7  ;;  %v6593_v60 = vstv %s5574_s20  ;;  %s5598_s20 = sld [smem:[#allocation11 + $0x9e]] }
 0x4d1   :  { %2665 = vrot.lane.b32.xlu0 %v2657_v2, %s5777_s13  ;;  %v3027_v2 = vrot.slane %v3006_v38, 2  ;;  %v3014_v52 = vmul.f32 %v6593_v60, %v6344_v7  ;;  %v3013_v22 = vmul.f32 %v6593_v60, %v6228_v12  ;;  %v2976_v38 = vrot.slane %v2932_v18, 2 }
 0x4d2   :  { %v6559_v15 = vpop.permute.xlu1 %2066 }
 0x4d3   :  { %9762 = vst [vmem:[#allocation26_spill] sm:$0xff] %v6559_v15  ;;  %v6568_v25 = vpop.permute.xlu0 %2012  ;;  %v3059_v39 = vrot.slane %v3014_v52, 2  ;;  %v2978_v18 = vsel %vm2735_vm4, %v2976_v38, %v2977_v51 }
 0x4d4   :  { %9763 = vst [vmem:[#allocation27_spill] sm:$0xff] %v6568_v25  ;;  %2908 = vrot.lane.b32.xlu1 %v2900_v21, %s5772_s7  ;;  %v3025_v21 = vrot.slane %v3005_v54, 2 }
 0x4d5   :  { %2697 = vrot.lane.b32.xlu0 %v2689_v29, %s5777_s13  ;;  %v6611_v29 = vstv %s5575_s21  ;;  %s5599_s21 = sld [smem:[#allocation11 + $0x1f]] }
 0x4d6   :  { %v6577_v34 = vpop.permute.xlu1 %2086  ;;  %v3028_v32 = vsel %vm2735_vm4, %v3025_v21, %v3027_v2  ;;  %v3086_v8 = vmul.f32 %v6611_v29, %v6334_v0  ;;  %v3085_v50 = vmul.f32 %v6611_v29, %v6218_v6 }
 0x4d7   :  { %9764 = vst [vmem:[#allocation28_spill] sm:$0xff] %v6577_v34  ;;  %v6584_v45 = vpop.permute.xlu0 %2032 }
 0x4d8   :  { %9765 = vst [vmem:[#allocation29_spill] sm:$0xff] %v6584_v45  ;;  %2956 = vrot.lane.b32.xlu1 %v2948_v42, %s5772_s7  ;;  %v3107_v52 = vrot.slane %v3086_v8, 2  ;;  %v3105_v30 = vrot.slane %v3085_v50, 2  ;;  %v6643_v8 = vstv %s5577_s1  ;;  %s5601_s1 = sld [smem:[#allocation11 + $0x20]] }
 0x4d9   :  { %2874 = vrot.lane.b32.xlu0 %v2866_v48, %s5772_s7  ;;  %v3057_v48 = vrot.slane %v3013_v22, 2  ;;  %v3012_v22 = vmul.f32 %v6593_v60, %v6247_v24  ;;  %v3166_v51 = vmul.f32 %v6643_v8, %v6334_v0  ;;  %v3165_v25 = vmul.f32 %v6643_v8, %v6218_v6 }
 0x4da   :  { %v6591_v59 = vpop.permute.xlu1 %2118 }
 0x4db   :  { %9766 = vst [vmem:[#allocation30_spill] sm:$0xff] %v6591_v59  ;;  %v6600_v5 = vpop.permute.xlu0 %2064  ;;  %v3060_v2 = vsel %vm2735_vm4, %v3057_v48, %v3059_v39  ;;  %v3056_v45 = vrot.slane %v3012_v22, 2 }
 0x4dc   :  { %9767 = vst [vmem:[#allocation31_spill] sm:$0xff] %v6600_v5  ;;  %2988 = vrot.lane.b32.xlu1 %v2980_v63, %s5772_s7  ;;  %v3004_v63 = vmul.f32 %v6579_v37, %v6212_v3 }
 0x4dd   :  { %2906 = vrot.lane.b32.xlu0 %v2898_v13, %s5772_s7 }
 0x4de   :  { %v6609_v23 = vpop.permute.xlu1 %2138 }
 0x4df   :  { %9768 = vst [vmem:[#allocation32_spill] sm:$0xff] %v6609_v23  ;;  %v6616_v42 = vpop.permute.xlu0 %2084 }
 0x4e0   :  { %9769 = vst [vmem:[#allocation33_spill] sm:$0xff] %v6616_v42  ;;  %3036 = vrot.lane.b32.xlu1 %v3028_v32, %s5770_s5  ;;  %v3093_v32 = vmul.f32 %v6625_v61, %v6228_v12 }
 0x4e1   :  { %2954 = vrot.lane.b32.xlu0 %v2946_v43, %s5772_s7  ;;  %v3024_v43 = vrot.slane %v3004_v63, 2 }
 0x4e2   :  { %v6623_v54 = vpop.permute.xlu1 %1914 }
 0x4e3   :  { %9770 = vst [vmem:[#allocation34_spill] sm:$0xff] %v6623_v54  ;;  %v6632_v13 = vpop.permute.xlu0 %2116  ;;  %v3026_v50 = vsel %vm2735_vm4, %v3024_v43, %v3025_v21  ;;  %v3092_v43 = vmul.f32 %v6625_v61, %v6247_v24  ;;  %v6843_v54 = vstv %s5589_s12  ;;  %s5613_s12 = sld [smem:[#allocation11 + $0x26]] }
 0x4e4   :  { %9771 = vst [vmem:[#allocation35_spill] sm:$0xff] %v6632_v13  ;;  %3068 = vrot.lane.b32.xlu1 %v3060_v2, %s5770_s5  ;;  %v3108_v13 = vsel %vm2735_vm4, %v3105_v30, %v3107_v52  ;;  %v3139_v2 = vrot.slane %v3094_v31, 2  ;;  %v6657_v52 = vstv %s5578_s0  ;;  %v3084_v31 = vmul.f32 %v6611_v29, %v6212_v3  ;;  %s5602_s0 = sld [smem:[#allocation11 + $0xa0]] }
 0x4e5   :  { %2986 = vrot.lane.b32.xlu0 %v2978_v18, %s5772_s7  ;;  %v3137_v18 = vrot.slane %v3093_v32, 2  ;;  %v3174_v21 = vmul.f32 %v6657_v52, %v6344_v7  ;;  %v3058_v32 = vsel %vm2735_vm4, %v3056_v45, %v3057_v48  ;;  %v3173_v33 = vmul.f32 %v6657_v52, %v6228_v12 }
 0x4e6   :  { %v6641_v39 = vpop.permute.xlu1 %1934  ;;  %v3104_v20 = vrot.slane %v3084_v31, 2  ;;  %v3136_v59 = vrot.slane %v3092_v43, 2  ;;  %v3172_v43 = vmul.f32 %v6657_v52, %v6247_v24 }
 0x4e7   :  { %9772 = vst [vmem:[#allocation36_spill] sm:$0xff] %v6641_v39  ;;  %v6648_v38 = vpop.permute.xlu0 %2136 }
 0x4e8   :  { %9773 = vst [vmem:[#allocation37_spill] sm:$0xff] %v6648_v38  ;;  %3116 = vrot.lane.b32.xlu1 %v3108_v13, %s5770_s5  ;;  %v3140_v38 = vsel %vm2735_vm4, %v3137_v18, %v3139_v2  ;;  %v3187_v13 = vrot.slane %v3166_v51, 2  ;;  %v6675_v51 = vstv %s5579_s23  ;;  %s5603_s23 = sld [smem:[#allocation11 + $0x21]] }
 0x4e9   :  { %3034 = vrot.lane.b32.xlu0 %v3026_v50, %s5770_s5  ;;  %v3185_v50 = vrot.slane %v3165_v25, 2  ;;  %v3246_v45 = vmul.f32 %v6675_v51, %v6334_v0  ;;  %v3106_v25 = vsel %vm2735_vm4, %v3104_v20, %v3105_v30  ;;  %v3245_v55 = vmul.f32 %v6675_v51, %v6218_v6 }
 0x4ea   :  { %v6655_v63 = vpop.permute.xlu1 %1966  ;;  %v3138_v30 = vsel %vm2735_vm4, %v3136_v59, %v3137_v18 }
 0x4eb   :  { %9774 = vst [vmem:[#allocation38_spill] sm:$0xff] %v6655_v63  ;;  %v6664_v22 = vpop.permute.xlu0 %1912  ;;  %v3188_v23 = vsel %vm2735_vm4, %v3185_v50, %v3187_v13  ;;  %v6689_v13 = vstv %s5580_s25  ;;  %s5604_s25 = sld [smem:[#allocation11 + $0xa1]] }
 0x4ec   :  { %9775 = vst [vmem:[#allocation39_spill] sm:$0xff] %v6664_v22  ;;  %3148 = vrot.lane.b32.xlu1 %v3140_v38, %s5770_s5  ;;  %v3219_v38 = vrot.slane %v3174_v21, 2  ;;  %v3164_v21 = vmul.f32 %v6643_v8, %v6212_v3  ;;  %v3254_v20 = vmul.f32 %v6689_v13, %v6344_v7  ;;  %v3253_v57 = vmul.f32 %v6689_v13, %v6228_v12 }
 0x4ed   :  { %3066 = vrot.lane.b32.xlu0 %v3058_v32, %s5770_s5  ;;  %v3217_v32 = vrot.slane %v3173_v33, 2  ;;  %v6809_v22 = vstv %s5587_s10  ;;  %s5611_s10 = sld [smem:[#allocation11 + $0x25]] }
 0x4ee   :  { %v6673_v2 = vpop.permute.xlu1 %1986  ;;  %v3184_v46 = vrot.slane %v3164_v21, 2 }
 0x4ef   :  { %9776 = vst [vmem:[#allocation40_spill] sm:$0xff] %v6673_v2  ;;  %v6680_v48 = vpop.permute.xlu0 %1932  ;;  %v3220_v40 = vsel %vm2735_vm4, %v3217_v32, %v3219_v38 }
 0x4f0   :  { %9777 = vst [vmem:[#allocation41_spill] sm:$0xff] %v6680_v48  ;;  %3196 = vrot.lane.b32.xlu1 %v3188_v23, %s5768_s30  ;;  %v3268_v23 = vrot.slane %v3246_v45, 3  ;;  %v6707_v45 = vstv %s5581_s26  ;;  %s5605_s26 = sld [smem:[#allocation11 + $0x22]] }
 0x4f1   :  { %3114 = vrot.lane.b32.xlu0 %v3106_v25, %s5770_s5  ;;  %v3266_v25 = vrot.slane %v3245_v55, 3  ;;  %v3327_v59 = vmul.f32 %v6707_v45, %v6334_v0  ;;  %v3186_v55 = vsel %vm2735_vm4, %v3184_v46, %v3185_v50 }
 0x4f2   :  { %v6687_v31 = vpop.permute.xlu1 %2018 }
 0x4f3   :  { %9778 = vst [vmem:[#allocation42_spill] sm:$0xff] %v6687_v31  ;;  %v6696_v33 = vpop.permute.xlu0 %1964  ;;  %v3300_v31 = vrot.slane %v3254_v20, 3  ;;  %v3244_v20 = vmul.f32 %v6675_v51, %v6212_v3 }
 0x4f4   :  { %9779 = vst [vmem:[#allocation43_spill] sm:$0xff] %v6696_v33  ;;  %3228 = vrot.lane.b32.xlu1 %v3220_v40, %s5768_s30  ;;  %v3269_v40 = vsel %vm3264_vm5, %v3266_v25, %v3268_v23  ;;  %v3298_v33 = vrot.slane %v3253_v57, 3  ;;  %v6721_v23 = vstv %s5582_s28  ;;  %s5606_s28 = sld [smem:[#allocation11 + $0xa2]] }
 0x4f5   :  { %3146 = vrot.lane.b32.xlu0 %v3138_v30, %s5770_s5  ;;  %v3216_v30 = vrot.slane %v3172_v43, 2  ;;  %v3335_v46 = vmul.f32 %v6721_v23, %v6344_v7  ;;  %v3252_v43 = vmul.f32 %v6689_v13, %v6247_v24  ;;  %v3265_v2 = vrot.slane %v3244_v20, 3 }
 0x4f6   :  { %v6705_v38 = vpop.permute.xlu1 %2038 }
 0x4f7   :  { %9780 = vst [vmem:[#allocation44_spill] sm:$0xff] %v6705_v38  ;;  %v6712_v18 = vpop.permute.xlu0 %1984  ;;  %v3326_v38 = vmul.f32 %v6707_v45, %v6218_v6  ;;  %v3218_v50 = vsel %vm2735_vm4, %v3216_v30, %v3217_v32  ;;  %v3297_v48 = vrot.slane %v3252_v43, 3 }
 0x4f8   :  { %9781 = vst [vmem:[#allocation45_spill] sm:$0xff] %v6712_v18  ;;  %3277 = vrot.lane.b32.xlu1 %v3269_v40, %s5774_s24  ;;  %v3301_v18 = vsel %vm3264_vm5, %v3298_v33, %v3300_v31  ;;  %v3348_v40 = vrot.slane %v3327_v59, 3  ;;  %v6739_v59 = vstv %s5583_s29  ;;  %s5607_s29 = sld [smem:[#allocation11 + $0x23]] }
 0x4f9   :  { %3194 = vrot.lane.b32.xlu0 %v3186_v55, %s5768_s30  ;;  %v3346_v55 = vrot.slane %v3326_v38, 3  ;;  %v3407_v32 = vmul.f32 %v6739_v59, %v6334_v0  ;;  %v3267_v38 = vsel %vm3264_vm5, %v3265_v2, %v3266_v25 }
 0x4fa   :  { %v6719_v21 = vpop.permute.xlu1 %2070 }
 0x4fb   :  { %9782 = vst [vmem:[#allocation46_spill] sm:$0xff] %v6719_v21  ;;  %v6728_v57 = vpop.permute.xlu0 %2016  ;;  %v3334_v21 = vmul.f32 %v6721_v23, %v6228_v12 }
 0x4fc   :  { %9783 = vst [vmem:[#allocation47_spill] sm:$0xff] %v6728_v57  ;;  %3309 = vrot.lane.b32.xlu1 %v3301_v18, %s5774_s24  ;;  %v3349_v57 = vsel %vm3264_vm5, %v3346_v55, %v3348_v40  ;;  %v3380_v18 = vrot.slane %v3335_v46, 3  ;;  %v6753_v40 = vstv %s5584_s4  ;;  %v3325_v46 = vmul.f32 %v6707_v45, %v6212_v3  ;;  %s5608_s4 = sld [smem:[#allocation11 + $0xa3]] }
 0x4fd   :  { %3226 = vrot.lane.b32.xlu0 %v3218_v50, %s5768_s30  ;;  %v3378_v50 = vrot.slane %v3334_v21, 3  ;;  %v3415_v2 = vmul.f32 %v6753_v40, %v6344_v7  ;;  %v3333_v21 = vmul.f32 %v6721_v23, %v6247_v24 }
 0x4fe   :  { %v6737_v31 = vpop.permute.xlu1 %2090 }
 0x4ff   :  { %9784 = vst [vmem:[#allocation48_spill] sm:$0xff] %v6737_v31  ;;  %v6744_v30 = vpop.permute.xlu0 %2036  ;;  %v3406_v31 = vmul.f32 %v6739_v59, %v6218_v6  ;;  %v3299_v6 = vsel %vm3264_vm5, %v3297_v48, %v3298_v33 }
 0x500   :  { %9785 = vst [vmem:[#allocation49_spill] sm:$0xff] %v6744_v30  ;;  %3357 = vrot.lane.b32.xlu1 %v3349_v57, %s5775_s27  ;;  %v3381_v30 = vsel %vm3264_vm5, %v3378_v50, %v3380_v18  ;;  %v3428_v57 = vrot.slane %v3407_v32, 3  ;;  %v6771_v18 = vstv %s5585_s6  ;;  %v3345_v32 = vrot.slane %v3325_v46, 3  ;;  %s5609_s6 = sld [smem:[#allocation11 + $0x24]] }
 0x501   :  { %3275 = vrot.lane.b32.xlu0 %v3267_v38, %s5774_s24  ;;  %v3426_v43 = vrot.slane %v3406_v31, 3  ;;  %v3414_v38 = vmul.f32 %v6753_v40, %v6228_v12  ;;  %v3487_v48 = vmul.f32 %v6771_v18, %v6334_v0  ;;  %v3377_v31 = vrot.slane %v3333_v21, 3 }
 0x502   :  { %v6751_v20 = vpop.permute.xlu1 %2122  ;;  %v3347_v12 = vsel %vm3264_vm5, %v3345_v32, %v3346_v55 }
 0x503   :  { %9786 = vst [vmem:[#allocation50_spill] sm:$0xff] %v6751_v20  ;;  %v6760_v25 = vpop.permute.xlu0 %2068  ;;  %v3429_v20 = vsel %vm3264_vm5, %v3426_v43, %v3428_v57  ;;  %v6787_v57 = vstv %s5586_s9  ;;  %v3379_v32 = vsel %vm3264_vm5, %v3377_v31, %v3378_v50  ;;  %s5610_s9 = sld [smem:[#allocation11 + $0xa4]] }
 0x504   :  { %9787 = vst [vmem:[#allocation51_spill] sm:$0xff] %v6760_v25  ;;  %3389 = vrot.lane.b32.xlu1 %v3381_v30, %s5775_s27  ;;  %v3460_v30 = vrot.slane %v3415_v2, 3  ;;  %v6780_v25 = vld [vmem:[#allocation4 + $0x8] sm:$0xff]  ;;  %v3495_v21 = vmul.f32 %v6787_v57, %v6344_v7 }
 0x505   :  { %3307 = vrot.lane.b32.xlu0 %v3299_v6, %s5774_s24  ;;  %v3458_v6 = vrot.slane %v3414_v38, 3 }
 0x506   :  { %v6769_v3 = vpop.permute.xlu1 %2142  ;;  %v3540_v50 = vrot.slane %v3495_v21, 3 }
 0x507   :  { %9788 = vst [vmem:[#allocation52_spill] sm:$0xff] %v6769_v3  ;;  %v6776_v33 = vpop.permute.xlu0 %2088  ;;  %v3486_v3 = vmul.f32 %v6780_v25, %v6771_v18  ;;  %v3461_v2 = vsel %vm3264_vm5, %v3458_v6, %v3460_v30  ;;  %v6802_v30 = vld [vmem:[#allocation5 + $0x8] sm:$0xff] }
 0x508   :  { %9789 = vst [vmem:[#allocation53_spill] sm:$0xff] %v6776_v33  ;;  %3437 = vrot.lane.b32.xlu1 %v3429_v20, %s5775_s27  ;;  %v6790_v33 = vld [vmem:[#allocation4] sm:$0xff]  ;;  %v3508_v20 = vrot.slane %v3487_v48, 3  ;;  %v3494_v63 = vmul.f32 %v6802_v30, %v6787_v57 }
 0x509   :  { %3355 = vrot.lane.b32.xlu0 %v3347_v12, %s5775_s27  ;;  %v3405_v55 = vmul.f32 %v6790_v33, %v6739_v59  ;;  %v3506_v12 = vrot.slane %v3486_v3, 3  ;;  %v3567_v3 = vmul.f32 %v6809_v22, %v6334_v0 }
 0x50a   :  { %v6785_v46 = vpop.permute.xlu1 %2187 }
 0x50b   :  { %9790 = vst [vmem:[#allocation54_spill] sm:$0xff] %v6785_v46  ;;  %v6796_v38 = vpop.permute.xlu0 %2120  ;;  %v3413_v46 = vmul.f32 %v6753_v40, %v6247_v24 }
 0x50c   :  { %9791 = vst [vmem:[#allocation55_spill] sm:$0xff] %v6796_v38  ;;  %3469 = vrot.lane.b32.xlu1 %v3461_v2, %s5775_s27  ;;  %v3425_v38 = vrot.slane %v3405_v55, 3  ;;  %v3509_v2 = vsel %vm3264_vm5, %v3506_v12, %v3508_v20  ;;  %v6823_v20 = vstv %s5588_s11  ;;  %s5612_s11 = sld [smem:[#allocation11 + $0xa5]] }
 0x50d   :  { %3387 = vrot.lane.b32.xlu0 %v3379_v32, %s5775_s27  ;;  %v3457_v39 = vrot.slane %v3413_v46, 3  ;;  %v3538_v32 = vrot.slane %v3494_v63, 3 }
 0x50e   :  { %v6807_v48 = vpop.permute.xlu1 %2219  ;;  %v3427_v31 = vsel %vm3264_vm5, %v3425_v38, %v3426_v43  ;;  %v3575_v43 = vmul.f32 %v6823_v20, %v6344_v7 }
 0x50f   :  { %9792 = vst [vmem:[#allocation56_spill] sm:$0xff] %v6807_v48  ;;  %v6814_v24 = vpop.permute.xlu0 %2140  ;;  %v3566_v48 = vmul.f32 %v6780_v25, %v6809_v22  ;;  %v3541_v21 = vsel %vm3264_vm5, %v3538_v32, %v3540_v50  ;;  %v3459_v46 = vsel %vm3264_vm5, %v3457_v39, %v3458_v6  ;;  %v3574_v50 = vmul.f32 %v6802_v30, %v6823_v20 }
 0x510   :  { %9793 = vst [vmem:[#allocation57_spill] sm:$0xff] %v6814_v24  ;;  %3517 = vrot.lane.b32.xlu1 %v3509_v2, %s5776_s8  ;;  %v3485_v24 = vmul.f32 %v6790_v33, %v6771_v18  ;;  %v3588_v2 = vrot.slane %v3567_v3, 3  ;;  %v3620_v39 = vrot.slane %v3575_v43, 3  ;;  %v3647_v6 = vmul.f32 %v6843_v54, %v6334_v0 }
 0x511   :  { %3435 = vrot.lane.b32.xlu0 %v3427_v31, %s5775_s27  ;;  %v3586_v38 = vrot.slane %v3566_v48, 3  ;;  %v6834_v31 = vld [vmem:[#allocation5] sm:$0xff] }
 0x512   :  { %v6821_v55 = vpop.permute.xlu1 %2267 }
 0x513   :  { %9794 = vst [vmem:[#allocation58_spill] sm:$0xff] %v6821_v55  ;;  %v6830_v63 = vpop.permute.xlu0 %2185  ;;  %v3493_v55 = vmul.f32 %v6834_v31, %v6787_v57 }
 0x514   :  { %9795 = vst [vmem:[#allocation59_spill] sm:$0xff] %v6830_v63  ;;  %3549 = vrot.lane.b32.xlu1 %v3541_v21, %s5776_s8  ;;  %v3505_v63 = vrot.slane %v3485_v24, 3  ;;  %v3589_v21 = vsel %vm3264_vm5, %v3586_v38, %v3588_v2  ;;  %v6857_v2 = vstv %s5590_s14  ;;  %s5614_s14 = sld [smem:[#allocation11 + $0xa6]] }
 0x515   :  { %3467 = vrot.lane.b32.xlu0 %v3459_v46, %s5775_s27  ;;  %v3537_v5 = vrot.slane %v3493_v55, 3  ;;  %v3618_v46 = vrot.slane %v3574_v50, 3  ;;  %v3573_v50 = vmul.f32 %v6834_v31, %v6823_v20 }
 0x516   :  { %v6841_v3 = vpop.permute.xlu1 %2299  ;;  %v3507_v42 = vsel %vm3264_vm5, %v3505_v63, %v3506_v12  ;;  %v3655_v12 = vmul.f32 %v6857_v2, %v6344_v7 }
 0x517   :  { %9796 = vst [vmem:[#allocation60_spill] sm:$0xff] %v6841_v3  ;;  %v6848_v48 = vpop.permute.xlu0 %2217  ;;  %v3646_v3 = vmul.f32 %v6780_v25, %v6843_v54  ;;  %v3621_v43 = vsel %vm3264_vm5, %v3618_v46, %v3620_v39  ;;  %v3654_v39 = vmul.f32 %v6802_v30, %v6857_v2  ;;  %v3617_v15 = vrot.slane %v3573_v50, 3 }
 0x518   :  { %9797 = vst [vmem:[#allocation61_spill] sm:$0xff] %v6848_v48  ;;  %3597 = vrot.lane.b32.xlu1 %v3589_v21, %s5776_s8  ;;  %v3565_v48 = vmul.f32 %v6790_v33, %v6809_v22  ;;  %v3668_v21 = vrot.slane %v3647_v6, 3  ;;  %v6875_v6 = vstv %s5591_s15  ;;  %s5615_s15 = sld [smem:[#allocation11 + $0x27]] }
 0x519   :  { %3515 = vrot.lane.b32.xlu0 %v3507_v42, %s5776_s8  ;;  %v3539_v42 = vsel %vm3264_vm5, %v3537_v5, %v3538_v32  ;;  %v3666_v63 = vrot.slane %v3646_v3, 3  ;;  %v3727_v5 = vmul.f32 %v6875_v6, %v6334_v0  ;;  %v3619_v50 = vsel %vm3264_vm5, %v3617_v15, %v3618_v46 }
 0x51a   :  { %v6855_v24 = vpop.permute.xlu1 %2347  ;;  %v3585_v34 = vrot.slane %v3565_v48, 3 }
 0x51b   :  { %9798 = vst [vmem:[#allocation62_spill] sm:$0xff] %v6855_v24  ;;  %v6864_v55 = vpop.permute.xlu0 %2265 }
 0x51c   :  { %9799 = vst [vmem:[#allocation63_spill] sm:$0xff] %v6864_v55  ;;  %3629 = vrot.lane.b32.xlu1 %v3621_v43, %s5776_s8  ;;  %v3669_v55 = vsel %vm3264_vm5, %v3666_v63, %v3668_v21  ;;  %v3700_v43 = vrot.slane %v3655_v12, 3  ;;  %v3587_v3 = vsel %vm3264_vm5, %v3585_v34, %v3586_v38  ;;  %v6889_v21 = vstv %s5592_s16  ;;  %s5616_s16 = sld [smem:[#allocation11 + $0xa7]] }
 0x51d   :  { %3547 = vrot.lane.b32.xlu0 %v3539_v42, %s5776_s8  ;;  %v3698_v42 = vrot.slane %v3654_v39, 3  ;;  %v3645_v12 = vmul.f32 %v6790_v33, %v6843_v54  ;;  %v3735_v34 = vmul.f32 %v6889_v21, %v6344_v7 }
 0x51e   :  { %v6873_v24 = vpop.permute.xlu1 %2379 }
 0x51f   :  { %9800 = vst [vmem:[#allocation64_spill] sm:$0xff] %v6873_v24  ;;  %v6880_v32 = vpop.permute.xlu0 %2297  ;;  %v3726_v24 = vmul.f32 %v6780_v25, %v6875_v6  ;;  %v3701_v0 = vsel %vm3264_vm5, %v3698_v42, %v3700_v43  ;;  %v3734_v43 = vmul.f32 %v6802_v30, %v6889_v21  ;;  %v3665_v7 = vrot.slane %v3645_v12, 3 }
 0x520   :  { %9801 = vst [vmem:[#allocation65_spill] sm:$0xff] %v6880_v32  ;;  %3677 = vrot.lane.b32.xlu1 %v3669_v55, %s5777_s13  ;;  %v3748_v55 = vrot.slane %v3727_v5, 3  ;;  %v6907_v5 = vstv %s5597_s17  ;;  %s5619_s17 = sld [smem:[#allocation11 + $0x29]] }
 0x521   :  { %3595 = vrot.lane.b32.xlu0 %v3587_v3, %s5776_s8  ;;  %v3746_v39 = vrot.slane %v3726_v24, 3  ;;  %v3653_v3 = vmul.f32 %v6834_v31, %v6857_v2  ;;  %9805 = vst [vmem:[#allocation69_spill] sm:$0xff] %v6907_v5  ;;  %v3667_v24 = vsel %vm3264_vm5, %v3665_v7, %v3666_v63  ;;  %v3934_v1 = vmul.f32 %v6780_v25, %v6907_v5 }
 0x522   :  { %v6887_v48 = vpop.permute.xlu1 %2427 }
 0x523   :  { %9802 = vst [vmem:[#allocation66_spill] sm:$0xff] %v6887_v48  ;;  %v6896_v38 = vpop.permute.xlu0 %2345  ;;  %v3749_v48 = vsel %vm3264_vm5, %v3746_v39, %v3748_v55  ;;  %v6923_v55 = vstv %s5598_s20  ;;  %v3954_v7 = vrot.slane %v3934_v1, 4  ;;  %s5620_s20 = sld [smem:[#allocation11 + $0xa9]] }
 0x524   :  { %9803 = vst [vmem:[#allocation67_spill] sm:$0xff] %v6896_v38  ;;  %3709 = vrot.lane.b32.xlu1 %v3701_v0, %s5777_s13  ;;  %v3780_v0 = vrot.slane %v3735_v34, 3  ;;  %v6910_v38 = vld [vmem:[#allocation4 + $0x10] sm:$0x3f]  ;;  %9808 = vst [vmem:[#allocation72_spill] sm:$0xff] %v6923_v55  ;;  %v3943_v63 = vmul.f32 %v6928_v49, %v6923_v55 }
 0x525   :  { %3627 = vrot.lane.b32.xlu0 %v3619_v50, %s5776_s8  ;;  %v3935_v15 = vmul.f32 %v6910_v38, %v6907_v5  ;;  %v3697_v50 = vrot.slane %v3653_v3, 3 }
 0x526   :  { %v6905_v32 = vpop.permute.xlu1 %2459 }
 0x527   :  { %9804 = vst [vmem:[#allocation68_spill] sm:$0xff] %v6905_v32  ;;  %v6914_v46 = vpop.permute.xlu0 %2377  ;;  %v3778_v32 = vrot.slane %v3734_v43, 3  ;;  %v3699_v43 = vsel %vm3264_vm5, %v3697_v50, %v3698_v42 }
 0x528   :  { %9806 = vst [vmem:[#allocation70_spill] sm:$0xff] %v6914_v46  ;;  %3757 = vrot.lane.b32.xlu1 %v3749_v48, %s5777_s13  ;;  %v3725_v46 = vmul.f32 %v6790_v33, %v6875_v6  ;;  %v3956_v48 = vrot.slane %v3935_v15, 4 }
 0x529   :  { %3675 = vrot.lane.b32.xlu0 %v3667_v24, %s5777_s13  ;;  %v3781_v34 = vsel %vm3264_vm5, %v3778_v32, %v3780_v0  ;;  %v3733_v24 = vmul.f32 %v6834_v31, %v6889_v21  ;;  %v3942_v0 = vmul.f32 %v6802_v30, %v6923_v55 }
 0x52a   :  { %v6921_v12 = vpop.permute.xlu1 %2507  ;;  %v3745_v27 = vrot.slane %v3725_v46, 3 }
 0x52b   :  { %9807 = vst [vmem:[#allocation71_spill] sm:$0xff] %v6921_v12  ;;  %v6932_v3 = vpop.permute.xlu0 %2425  ;;  %v6943_v12 = vstv %s5599_s21  ;;  %v3777_v9 = vrot.slane %v3733_v24, 3  ;;  %s5627_s21 = sld [smem:[#allocation11 + $0x2d]] }
 0x52c   :  { %9809 = vst [vmem:[#allocation73_spill] sm:$0xff] %v6932_v3  ;;  %3789 = vrot.lane.b32.xlu1 %v3781_v34, %s5777_s13  ;;  %9811 = vst [vmem:[#allocation75_spill] sm:$0xff] %v6943_v12  ;;  %v3957_v3 = vsel %vm51_vm0, %v3954_v7, %v3956_v48  ;;  %v3988_v34 = vrot.slane %v3943_v63, 4  ;;  %v4015_v1 = vmul.f32 %v6910_v38, %v6943_v12  ;;  %v6957_v48 = vstv %s5600_s22  ;;  %s5628_s22 = sld [smem:[#allocation11 + $0xad]] }
 0x52d   :  { %3707 = vrot.lane.b32.xlu0 %v3699_v43, %s5777_s13  ;;  %v3747_v50 = vsel %vm3264_vm5, %v3745_v27, %v3746_v39  ;;  %v3986_v43 = vrot.slane %v3942_v0, 4  ;;  %9814 = vst [vmem:[#allocation78_spill] sm:$0xff] %v6957_v48  ;;  %v4023_v27 = vmul.f32 %v6928_v49, %v6957_v48  ;;  %v3779_v24 = vsel %vm3264_vm5, %v3777_v9, %v3778_v32 }
 0x52e   :  { %v6941_v15 = vpop.permute.xlu1 %2539 }
 0x52f   :  { %9810 = vst [vmem:[#allocation74_spill] sm:$0xff] %v6941_v15  ;;  %v6948_v42 = vpop.permute.xlu0 %2457  ;;  %v4014_v15 = vmul.f32 %v6780_v25, %v6943_v12  ;;  %v3989_v63 = vsel %vm51_vm0, %v3986_v43, %v3988_v34  ;;  %v4022_v34 = vmul.f32 %v6802_v30, %v6957_v48 }
 0x530   :  { %9812 = vst [vmem:[#allocation76_spill] sm:$0xff] %v6948_v42  ;;  %3965 = vrot.lane.b32.xlu1 %v3957_v3, %s5772_s7  ;;  %v3933_v42 = vmul.f32 %v6790_v33, %v6907_v5  ;;  %v4036_v3 = vrot.slane %v4015_v1, 4  ;;  %v6975_v1 = vstv %s5601_s1  ;;  %s5631_s1 = sld [smem:[#allocation11 + $0x2f]] }
 0x531   :  { %3755 = vrot.lane.b32.xlu0 %v3747_v50, %s5777_s13  ;;  %v4034_v0 = vrot.slane %v4014_v15, 4  ;;  %v3941_v50 = vmul.f32 %v6834_v31, %v6923_v55  ;;  %9817 = vst [vmem:[#allocation81_spill] sm:$0xff] %v6975_v1  ;;  %v4095_v9 = vmul.f32 %v6910_v38, %v6975_v1 }
 0x532   :  { %v6955_v46 = vpop.permute.xlu1 %2587  ;;  %v3953_v5 = vrot.slane %v3933_v42, 4 }
 0x533   :  { %9813 = vst [vmem:[#allocation77_spill] sm:$0xff] %v6955_v46  ;;  %v6964_v39 = vpop.permute.xlu0 %2505  ;;  %v3985_v55 = vrot.slane %v3941_v50, 4 }
 0x534   :  { %9815 = vst [vmem:[#allocation79_spill] sm:$0xff] %v6964_v39  ;;  %3997 = vrot.lane.b32.xlu1 %v3989_v63, %s5772_s7  ;;  %v4037_v39 = vsel %vm51_vm0, %v4034_v0, %v4036_v3  ;;  %v4068_v63 = vrot.slane %v4023_v27, 4  ;;  %v3955_v15 = vsel %vm51_vm0, %v3953_v5, %v3954_v7  ;;  %v6989_v3 = vstv %s5602_s0  ;;  %s5632_s0 = sld [smem:[#allocation11 + $0xaf]] }
 0x535   :  { %3787 = vrot.lane.b32.xlu0 %v3779_v24, %s5777_s13  ;;  %v4066_v24 = vrot.slane %v4022_v34, 4  ;;  %9820 = vst [vmem:[#allocation84_spill] sm:$0xff] %v6989_v3  ;;  %v4103_v5 = vmul.f32 %v6928_v49, %v6989_v3  ;;  %v3987_v50 = vsel %vm51_vm0, %v3985_v55, %v3986_v43 }
 0x536   :  { %v6973_v46 = vpop.permute.xlu1 %2619 }
 0x537   :  { %9816 = vst [vmem:[#allocation80_spill] sm:$0xff] %v6973_v46  ;;  %v6980_v32 = vpop.permute.xlu0 %2537  ;;  %v4094_v46 = vmul.f32 %v6780_v25, %v6975_v1  ;;  %v4069_v27 = vsel %vm51_vm0, %v4066_v24, %v4068_v63  ;;  %v4102_v63 = vmul.f32 %v6802_v30, %v6989_v3 }
 0x538   :  { %9818 = vst [vmem:[#allocation82_spill] sm:$0xff] %v6980_v32  ;;  %4045 = vrot.lane.b32.xlu1 %v4037_v39, %s5772_s7  ;;  %v4013_v32 = vmul.f32 %v6790_v33, %v6943_v12  ;;  %v4116_v39 = vrot.slane %v4095_v9, 4  ;;  %v7007_v9 = vstv %s5603_s23  ;;  %s7854_s23 = sld [smem:[#allocation11]] }
 0x539   :  { %3963 = vrot.lane.b32.xlu0 %v3955_v15, %s5772_s7  ;;  %v4114_v34 = vrot.slane %v4094_v46, 4  ;;  %v4021_v15 = vmul.f32 %v6834_v31, %v6957_v48  ;;  %9823 = vst [vmem:[#allocation87_spill] sm:$0xff] %v7007_v9  ;;  %v4175_v55 = vmul.f32 %v6910_v38, %v7007_v9 }
 0x53a   :  { %v6987_v42 = vpop.permute.xlu1 %2667  ;;  %v4033_v12 = vrot.slane %v4013_v32, 4 }
 0x53b   :  { %9819 = vst [vmem:[#allocation83_spill] sm:$0xff] %v6987_v42  ;;  %v6996_v7 = vpop.permute.xlu0 %2585  ;;  %v4065_v48 = vrot.slane %v4021_v15, 4 }
 0x53c   :  { %9821 = vst [vmem:[#allocation85_spill] sm:$0xff] %v6996_v7  ;;  %4077 = vrot.lane.b32.xlu1 %v4069_v27, %s5772_s7  ;;  %v4117_v7 = vsel %vm51_vm0, %v4114_v34, %v4116_v39  ;;  %v4148_v27 = vrot.slane %v4103_v5, 4  ;;  %v4035_v46 = vsel %vm51_vm0, %v4033_v12, %v4034_v0  ;;  %v7021_v39 = vstv %s5604_s25  ;;  %s7859_s25 = sld [smem:[#allocation11 + $0xf]] }
 0x53d   :  { %3995 = vrot.lane.b32.xlu0 %v3987_v50, %s5772_s7  ;;  %v4146_v50 = vrot.slane %v4102_v63, 4  ;;  %9826 = vst [vmem:[#allocation90_spill] sm:$0xff] %v7021_v39  ;;  %v4183_v12 = vmul.f32 %v6928_v49, %v7021_v39  ;;  %v4067_v15 = vsel %vm51_vm0, %v4065_v48, %v4066_v24 }
 0x53e   :  { %v7005_v42 = vpop.permute.xlu1 %2699 }
 0x53f   :  { %9822 = vst [vmem:[#allocation86_spill] sm:$0xff] %v7005_v42  ;;  %v7012_v43 = vpop.permute.xlu0 %2617  ;;  %v4174_v42 = vmul.f32 %v6780_v25, %v7007_v9  ;;  %v4149_v5 = vsel %vm51_vm0, %v4146_v50, %v4148_v27  ;;  %v4182_v27 = vmul.f32 %v6802_v30, %v7021_v39 }
 0x540   :  { %9824 = vst [vmem:[#allocation88_spill] sm:$0xff] %v7012_v43  ;;  %4125 = vrot.lane.b32.xlu1 %v4117_v7, %s5770_s5  ;;  %v4093_v43 = vmul.f32 %v6790_v33, %v6975_v1  ;;  %v4196_v7 = vrot.slane %v4175_v55, 4  ;;  %v7039_v55 = vstv %s5605_s26  ;;  %s7866_s26 = sld [smem:[#allocation11 + $0x1]] }
 0x541   :  { %4043 = vrot.lane.b32.xlu0 %v4035_v46, %s5772_s7  ;;  %v4194_v63 = vrot.slane %v4174_v42, 4  ;;  %v4101_v46 = vmul.f32 %v6834_v31, %v6989_v3  ;;  %9829 = vst [vmem:[#allocation93_spill] sm:$0xff] %v7039_v55  ;;  %v4255_v48 = vmul.f32 %v6910_v38, %v7039_v55 }
 0x542   :  { %v7019_v32 = vpop.permute.xlu1 %2876  ;;  %v4113_v1 = vrot.slane %v4093_v43, 4 }
 0x543   :  { %9825 = vst [vmem:[#allocation89_spill] sm:$0xff] %v7019_v32  ;;  %v7028_v0 = vpop.permute.xlu0 %2665  ;;  %v4145_v3 = vrot.slane %v4101_v46, 4 }
 0x544   :  { %9827 = vst [vmem:[#allocation91_spill] sm:$0xff] %v7028_v0  ;;  %4157 = vrot.lane.b32.xlu1 %v4149_v5, %s5770_s5  ;;  %v4197_v0 = vsel %vm51_vm0, %v4194_v63, %v4196_v7  ;;  %v4228_v5 = vrot.slane %v4183_v12, 4  ;;  %v4115_v42 = vsel %vm51_vm0, %v4113_v1, %v4114_v34  ;;  %v7053_v7 = vstv %s5606_s28  ;;  %s7876_s28 = sld [smem:[#allocation11 + $0xe]] }
 0x545   :  { %4075 = vrot.lane.b32.xlu0 %v4067_v15, %s5772_s7  ;;  %v4226_v15 = vrot.slane %v4182_v27, 4  ;;  %9832 = vst [vmem:[#allocation96_spill] sm:$0xff] %v7053_v7  ;;  %v4263_v1 = vmul.f32 %v6928_v49, %v7053_v7  ;;  %v4147_v46 = vsel %vm51_vm0, %v4145_v3, %v4146_v50 }
 0x546   :  { %v7037_v32 = vpop.permute.xlu1 %2908 }
 0x547   :  { %9828 = vst [vmem:[#allocation92_spill] sm:$0xff] %v7037_v32  ;;  %v7044_v24 = vpop.permute.xlu0 %2697  ;;  %v4254_v32 = vmul.f32 %v6780_v25, %v7039_v55  ;;  %v4229_v12 = vsel %vm51_vm0, %v4226_v15, %v4228_v5  ;;  %v4262_v5 = vmul.f32 %v6802_v30, %v7053_v7 }
 0x548   :  { %9830 = vst [vmem:[#allocation94_spill] sm:$0xff] %v7044_v24  ;;  %4205 = vrot.lane.b32.xlu1 %v4197_v0, %s5770_s5  ;;  %v4173_v24 = vmul.f32 %v6790_v33, %v7007_v9  ;;  %v4276_v0 = vrot.slane %v4255_v48, 4  ;;  %v7071_v48 = vstv %s5607_s29  ;;  %s7881_s29 = sld [smem:[#allocation11 + $0x1d]] }
 0x549   :  { %4123 = vrot.lane.b32.xlu0 %v4115_v42, %s5770_s5  ;;  %v4274_v27 = vrot.slane %v4254_v32, 4  ;;  %v4181_v42 = vmul.f32 %v6834_v31, %v7021_v39  ;;  %9835 = vst [vmem:[#allocation99_spill] sm:$0xff] %v7071_v48  ;;  %v4335_v3 = vmul.f32 %v6910_v38, %v7071_v48 }
 0x54a   :  { %v7051_v43 = vpop.permute.xlu1 %2956  ;;  %v4193_v9 = vrot.slane %v4173_v24, 4 }
 0x54b   :  { %9831 = vst [vmem:[#allocation95_spill] sm:$0xff] %v7051_v43  ;;  %v7060_v34 = vpop.permute.xlu0 %2874  ;;  %v4225_v39 = vrot.slane %v4181_v42, 4 }
 0x54c   :  { %9833 = vst [vmem:[#allocation97_spill] sm:$0xff] %v7060_v34  ;;  %4237 = vrot.lane.b32.xlu1 %v4229_v12, %s5770_s5  ;;  %v4277_v34 = vsel %vm51_vm0, %v4274_v27, %v4276_v0  ;;  %v4308_v12 = vrot.slane %v4263_v1, 4  ;;  %v4195_v32 = vsel %vm51_vm0, %v4193_v9, %v4194_v63  ;;  %v7085_v0 = vstv %s5608_s4  ;;  %s7884_s4 = sld [smem:[#allocation11 + $0x1c]] }
 0x54d   :  { %4155 = vrot.lane.b32.xlu0 %v4147_v46, %s5770_s5  ;;  %v4306_v46 = vrot.slane %v4262_v5, 4  ;;  %9838 = vst [vmem:[#allocation102_spill] sm:$0xff] %v7085_v0  ;;  %v4343_v9 = vmul.f32 %v6928_v49, %v7085_v0  ;;  %v4227_v42 = vsel %vm51_vm0, %v4225_v39, %v4226_v15 }
 0x54e   :  { %v7069_v43 = vpop.permute.xlu1 %2988 }
 0x54f   :  { %9834 = vst [vmem:[#allocation98_spill] sm:$0xff] %v7069_v43  ;;  %v7076_v50 = vpop.permute.xlu0 %2906  ;;  %v4334_v43 = vmul.f32 %v6780_v25, %v7071_v48  ;;  %v4309_v1 = vsel %vm51_vm0, %v4306_v46, %v4308_v12  ;;  %v4342_v12 = vmul.f32 %v6802_v30, %v7085_v0 }
 0x550   :  { %9836 = vst [vmem:[#allocation100_spill] sm:$0xff] %v7076_v50  ;;  %4285 = vrot.lane.b32.xlu1 %v4277_v34, %s5768_s30  ;;  %v4253_v50 = vmul.f32 %v6790_v33, %v7039_v55  ;;  %v4357_v34 = vrot.slane %v4335_v3, 5  ;;  %v7103_v3 = vstv %s5609_s6  ;;  %v4389_v55 = vrot.slane %v4343_v9, 5  ;;  %s7891_s6 = sld [smem:[#allocation11 + $0x80]] }
 0x551   :  { %4203 = vrot.lane.b32.xlu0 %v4195_v32, %s5770_s5  ;;  %v4355_v5 = vrot.slane %v4334_v43, 5  ;;  %v4261_v32 = vmul.f32 %v6834_v31, %v7053_v7  ;;  %9841 = vst [vmem:[#allocation105_spill] sm:$0xff] %v7103_v3  ;;  %v4416_v39 = vmul.f32 %v6910_v38, %v7103_v3  ;;  %v4387_v7 = vrot.slane %v4342_v12, 5 }
 0x552   :  { %v7083_v24 = vpop.permute.xlu1 %3036 }
 0x553   :  { %9837 = vst [vmem:[#allocation101_spill] sm:$0xff] %v7083_v24  ;;  %v7092_v63 = vpop.permute.xlu0 %2954  ;;  %v4390_v9 = vsel %vm4353_vm6, %v4387_v7, %v4389_v55 }
 0x554   :  { %9839 = vst [vmem:[#allocation103_spill] sm:$0xff] %v7092_v63  ;;  %4317 = vrot.lane.b32.xlu1 %v4309_v1, %s5768_s30  ;;  %v4273_v63 = vrot.slane %v4253_v50, 4  ;;  %v4358_v1 = vsel %vm4353_vm6, %v4355_v5, %v4357_v34  ;;  %v7117_v34 = vstv %s5610_s9  ;;  %s7901_s9 = sld [smem:[#allocation11 + $0x81]] }
 0x555   :  { %4235 = vrot.lane.b32.xlu0 %v4227_v42, %s5770_s5  ;;  %v4305_v42 = vrot.slane %v4261_v32, 4  ;;  %9844 = vst [vmem:[#allocation108_spill] sm:$0xff] %v7117_v34  ;;  %v4423_v55 = vmul.f32 %v6802_v30, %v7117_v34 }
 0x556   :  { %v7101_v24 = vpop.permute.xlu1 %3068  ;;  %v4275_v43 = vsel %vm51_vm0, %v4273_v63, %v4274_v27  ;;  %v4424_v27 = vmul.f32 %v6928_v49, %v7117_v34 }
 0x557   :  { %9840 = vst [vmem:[#allocation104_spill] sm:$0xff] %v7101_v24  ;;  %v7108_v15 = vpop.permute.xlu0 %2986  ;;  %v4415_v24 = vmul.f32 %v6780_v25, %v7103_v3  ;;  %v4307_v32 = vsel %vm51_vm0, %v4305_v42, %v4306_v46 }
 0x558   :  { %9842 = vst [vmem:[#allocation106_spill] sm:$0xff] %v7108_v15  ;;  %4366 = vrot.lane.b32.xlu1 %v4358_v1, %s5774_s24  ;;  %v4333_v15 = vmul.f32 %v6790_v33, %v7071_v48  ;;  %v4437_v1 = vrot.slane %v4416_v39, 5  ;;  %v7135_v39 = vstv %s5611_s10  ;;  %s7912_s10 = sld [smem:[#allocation11 + $0x2b]] }
 0x559   :  { %4283 = vrot.lane.b32.xlu0 %v4275_v43, %s5768_s30  ;;  %v4435_v12 = vrot.slane %v4415_v24, 5  ;;  %v4341_v43 = vmul.f32 %v6834_v31, %v7085_v0  ;;  %9847 = vst [vmem:[#allocation111_spill] sm:$0xff] %v7135_v39  ;;  %v4496_v46 = vmul.f32 %v6910_v38, %v7135_v39 }
 0x55a   :  { %v7115_v50 = vpop.permute.xlu1 %3116  ;;  %v4354_v48 = vrot.slane %v4333_v15, 5 }
 0x55b   :  { %9843 = vst [vmem:[#allocation107_spill] sm:$0xff] %v7115_v50  ;;  %v7124_v63 = vpop.permute.xlu0 %3034  ;;  %v4386_v0 = vrot.slane %v4341_v43, 5 }
 0x55c   :  { %9845 = vst [vmem:[#allocation109_spill] sm:$0xff] %v7124_v63  ;;  %4398 = vrot.lane.b32.xlu1 %v4390_v9, %s5774_s24  ;;  %v4438_v63 = vsel %vm4353_vm6, %v4435_v12, %v4437_v1  ;;  %v4469_v9 = vrot.slane %v4424_v27, 5  ;;  %v4356_v42 = vsel %vm4353_vm6, %v4354_v48, %v4355_v5  ;;  %v7149_v1 = vstv %s5612_s11  ;;  %s7938_s11 = sld [smem:[#allocation11 + $0x8e]] }
 0x55d   :  { %4315 = vrot.lane.b32.xlu0 %v4307_v32, %s5768_s30  ;;  %v4467_v32 = vrot.slane %v4423_v55, 5  ;;  %9850 = vst [vmem:[#allocation114_spill] sm:$0xff] %v7149_v1  ;;  %v4504_v48 = vmul.f32 %v6928_v49, %v7149_v1  ;;  %v4388_v43 = vsel %vm4353_vm6, %v4386_v0, %v4387_v7 }
 0x55e   :  { %v7133_v50 = vpop.permute.xlu1 %3148 }
 0x55f   :  { %9846 = vst [vmem:[#allocation110_spill] sm:$0xff] %v7133_v50  ;;  %v7140_v24 = vpop.permute.xlu0 %3066  ;;  %v4495_v50 = vmul.f32 %v6780_v25, %v7135_v39  ;;  %v4470_v27 = vsel %vm4353_vm6, %v4467_v32, %v4469_v9  ;;  %v4503_v9 = vmul.f32 %v6802_v30, %v7149_v1 }
 0x560   :  { %9848 = vst [vmem:[#allocation112_spill] sm:$0xff] %v7140_v24  ;;  %4446 = vrot.lane.b32.xlu1 %v4438_v63, %s5775_s27  ;;  %v4414_v24 = vmul.f32 %v6790_v33, %v7103_v3  ;;  %v4517_v63 = vrot.slane %v4496_v46, 5  ;;  %v7167_v46 = vstv %s5613_s12  ;;  %s7943_s12 = sld [smem:[#allocation11 + $0x8f]] }
 0x561   :  { %4364 = vrot.lane.b32.xlu0 %v4356_v42, %s5774_s24  ;;  %v4515_v55 = vrot.slane %v4495_v50, 5  ;;  %v4422_v42 = vmul.f32 %v6834_v31, %v7117_v34  ;;  %9853 = vst [vmem:[#allocation117_spill] sm:$0xff] %v7167_v46  ;;  %v4576_v7 = vmul.f32 %v6910_v38, %v7167_v46 }
 0x562   :  { %v7147_v15 = vpop.permute.xlu1 %3196  ;;  %v4434_v3 = vrot.slane %v4414_v24, 5 }
 0x563   :  { %9849 = vst [vmem:[#allocation113_spill] sm:$0xff] %v7147_v15  ;;  %v7156_v5 = vpop.permute.xlu0 %3114  ;;  %v4466_v34 = vrot.slane %v4422_v42, 5 }
 0x564   :  { %9851 = vst [vmem:[#allocation115_spill] sm:$0xff] %v7156_v5  ;;  %4478 = vrot.lane.b32.xlu1 %v4470_v27, %s5775_s27  ;;  %v4518_v5 = vsel %vm4353_vm6, %v4515_v55, %v4517_v63  ;;  %v4549_v27 = vrot.slane %v4504_v48, 5  ;;  %v4436_v50 = vsel %vm4353_vm6, %v4434_v3, %v4435_v12  ;;  %v7181_v63 = vstv %s5614_s14  ;;  %s7962_s14 = sld [smem:[#allocation11 + $0x9c]] }
 0x565   :  { %4396 = vrot.lane.b32.xlu0 %v4388_v43, %s5774_s24  ;;  %v4547_v43 = vrot.slane %v4503_v9, 5  ;;  %9856 = vst [vmem:[#allocation120_spill] sm:$0xff] %v7181_v63  ;;  %v4584_v3 = vmul.f32 %v6928_v49, %v7181_v63  ;;  %v4468_v42 = vsel %vm4353_vm6, %v4466_v34, %v4467_v32 }
 0x566   :  { %v7165_v15 = vpop.permute.xlu1 %3228 }
 0x567   :  { %9852 = vst [vmem:[#allocation116_spill] sm:$0xff] %v7165_v15  ;;  %v7172_v0 = vpop.permute.xlu0 %3146  ;;  %v4575_v15 = vmul.f32 %v6780_v25, %v7167_v46  ;;  %v4550_v48 = vsel %vm4353_vm6, %v4547_v43, %v4549_v27  ;;  %v4583_v27 = vmul.f32 %v6802_v30, %v7181_v63 }
 0x568   :  { %9854 = vst [vmem:[#allocation118_spill] sm:$0xff] %v7172_v0  ;;  %4526 = vrot.lane.b32.xlu1 %v4518_v5, %s5775_s27  ;;  %v4494_v0 = vmul.f32 %v6790_v33, %v7135_v39  ;;  %v4597_v5 = vrot.slane %v4576_v7, 5  ;;  %v7199_v7 = vstv %s5615_s15  ;;  %s7987_s15 = sld [smem:[#allocation11 + $0x9d]] }
 0x569   :  { %4444 = vrot.lane.b32.xlu0 %v4436_v50, %s5775_s27  ;;  %v4595_v9 = vrot.slane %v4575_v15, 5  ;;  %v4502_v50 = vmul.f32 %v6834_v31, %v7149_v1  ;;  %9859 = vst [vmem:[#allocation123_spill] sm:$0xff] %v7199_v7  ;;  %v4656_v34 = vmul.f32 %v6910_v38, %v7199_v7 }
 0x56a   :  { %v7179_v24 = vpop.permute.xlu1 %3277  ;;  %v4514_v39 = vrot.slane %v4494_v0, 5 }
 0x56b   :  { %9855 = vst [vmem:[#allocation119_spill] sm:$0xff] %v7179_v24  ;;  %v7188_v12 = vpop.permute.xlu0 %3194  ;;  %v4546_v1 = vrot.slane %v4502_v50, 5 }
 0x56c   :  { %9857 = vst [vmem:[#allocation121_spill] sm:$0xff] %v7188_v12  ;;  %4558 = vrot.lane.b32.xlu1 %v4550_v48, %s5775_s27  ;;  %v4598_v12 = vsel %vm4353_vm6, %v4595_v9, %v4597_v5  ;;  %v4629_v48 = vrot.slane %v4584_v3, 5  ;;  %v4516_v15 = vsel %vm4353_vm6, %v4514_v39, %v4515_v55  ;;  %v7213_v5 = vstv %s5616_s16  ;;  %s8256_s16 = sld [smem:[#allocation11 + $0xab]] }
 0x56d   :  { %4476 = vrot.lane.b32.xlu0 %v4468_v42, %s5775_s27  ;;  %v4627_v42 = vrot.slane %v4583_v27, 5  ;;  %9862 = vst [vmem:[#allocation126_spill] sm:$0xff] %v7213_v5  ;;  %v4664_v39 = vmul.f32 %v6928_v49, %v7213_v5  ;;  %v4548_v50 = vsel %vm4353_vm6, %v4546_v1, %v4547_v43 }
 0x56e   :  { %v7197_v24 = vpop.permute.xlu1 %3309 }
 0x56f   :  { %9858 = vst [vmem:[#allocation122_spill] sm:$0xff] %v7197_v24  ;;  %v7204_v32 = vpop.permute.xlu0 %3226  ;;  %v4655_v24 = vmul.f32 %v6780_v25, %v7199_v7  ;;  %v4630_v3 = vsel %vm4353_vm6, %v4627_v42, %v4629_v48  ;;  %v4663_v48 = vmul.f32 %v6802_v30, %v7213_v5 }
 0x570   :  { %9860 = vst [vmem:[#allocation124_spill] sm:$0xff] %v7204_v32  ;;  %4606 = vrot.lane.b32.xlu1 %v4598_v12, %s5776_s8  ;;  %v4574_v32 = vmul.f32 %v6790_v33, %v7167_v46  ;;  %v4677_v12 = vrot.slane %v4656_v34, 5  ;;  %v7231_v34 = vstv %s5619_s17  ;;  %s8693_s17 = sld [smem:[#allocation11 + $0xa8]] }
 0x571   :  { %4524 = vrot.lane.b32.xlu0 %v4516_v15, %s5775_s27  ;;  %v4675_v27 = vrot.slane %v4655_v24, 5  ;;  %v4582_v15 = vmul.f32 %v6834_v31, %v7181_v63  ;;  %9865 = vst [vmem:[#allocation129_spill] sm:$0xff] %v7231_v34  ;;  %v4816_v1 = vmul.f32 %v6910_v38, %v7231_v34 }
 0x572   :  { %v7211_v0 = vpop.permute.xlu1 %3357  ;;  %v4594_v46 = vrot.slane %v4574_v32, 5 }
 0x573   :  { %9861 = vst [vmem:[#allocation125_spill] sm:$0xff] %v7211_v0  ;;  %v7220_v55 = vpop.permute.xlu0 %3275  ;;  %v4626_v63 = vrot.slane %v4582_v15, 5 }
 0x574   :  { %9863 = vst [vmem:[#allocation127_spill] sm:$0xff] %v7220_v55  ;;  %4638 = vrot.lane.b32.xlu1 %v4630_v3, %s5776_s8  ;;  %v4678_v55 = vsel %vm4353_vm6, %v4675_v27, %v4677_v12  ;;  %v4709_v3 = vrot.slane %v4664_v39, 5  ;;  %v4596_v24 = vsel %vm4353_vm6, %v4594_v46, %v4595_v9  ;;  %v7245_v12 = vstv %s5620_s20  ;;  %s8740_s20 = sld [smem:[#allocation11 + $0x2c]] }
 0x575   :  { %4556 = vrot.lane.b32.xlu0 %v4548_v50, %s5775_s27  ;;  %v4707_v50 = vrot.slane %v4663_v48, 5  ;;  %9868 = vst [vmem:[#allocation132_spill] sm:$0xff] %v7245_v12  ;;  %v4824_v46 = vmul.f32 %v6928_v49, %v7245_v12  ;;  %v4628_v15 = vsel %vm4353_vm6, %v4626_v63, %v4627_v42 }
 0x576   :  { %v7229_v0 = vpop.permute.xlu1 %3389 }
 0x577   :  { %9864 = vst [vmem:[#allocation128_spill] sm:$0xff] %v7229_v0  ;;  %v7236_v43 = vpop.permute.xlu0 %3307  ;;  %v4815_v0 = vmul.f32 %v6780_v25, %v7231_v34  ;;  %v4710_v39 = vsel %vm4353_vm6, %v4707_v50, %v4709_v3  ;;  %v4823_v3 = vmul.f32 %v6802_v30, %v7245_v12 }
 0x578   :  { %9866 = vst [vmem:[#allocation130_spill] sm:$0xff] %v7236_v43  ;;  %4686 = vrot.lane.b32.xlu1 %v4678_v55, %s5776_s8  ;;  %v4654_v43 = vmul.f32 %v6790_v33, %v7199_v7  ;;  %v4837_v55 = vrot.slane %v4816_v1, 5  ;;  %v7263_v1 = vstv %s5627_s21  ;;  %s9019_s21 = sld [smem:[#allocation11 + $0x2e]] }
 0x579   :  { %4604 = vrot.lane.b32.xlu0 %v4596_v24, %s5776_s8  ;;  %v4835_v48 = vrot.slane %v4815_v0, 5  ;;  %v4662_v24 = vmul.f32 %v6834_v31, %v7213_v5  ;;  %9871 = vst [vmem:[#allocation135_spill] sm:$0xff] %v7263_v1  ;;  %v5105_v63 = vmul.f32 %v6910_v38, %v7263_v1 }
 0x57a   :  { %v7243_v32 = vpop.permute.xlu1 %3437  ;;  %v4674_v7 = vrot.slane %v4654_v43, 5 }
 0x57b   :  { %9867 = vst [vmem:[#allocation131_spill] sm:$0xff] %v7243_v32  ;;  %v7252_v9 = vpop.permute.xlu0 %3355  ;;  %v4706_v5 = vrot.slane %v4662_v24, 5 }
 0x57c   :  { %9869 = vst [vmem:[#allocation133_spill] sm:$0xff] %v7252_v9  ;;  %4718 = vrot.lane.b32.xlu1 %v4710_v39, %s5776_s8  ;;  %v4838_v9 = vsel %vm4353_vm6, %v4835_v48, %v4837_v55  ;;  %v4869_v39 = vrot.slane %v4824_v46, 5  ;;  %v4676_v0 = vsel %vm4353_vm6, %v4674_v7, %v4675_v27  ;;  %v7277_v55 = vstv %s5628_s22  ;;  %s9089_s22 = sld [smem:[#allocation11 + $0xae]] }
 0x57d   :  { %4636 = vrot.lane.b32.xlu0 %v4628_v15, %s5776_s8  ;;  %v4867_v15 = vrot.slane %v4823_v3, 5  ;;  %9874 = vst [vmem:[#allocation138_spill] sm:$0xff] %v7277_v55  ;;  %v5113_v7 = vmul.f32 %v6928_v49, %v7277_v55  ;;  %v4708_v24 = vsel %vm4353_vm6, %v4706_v5, %v4707_v50 }
 0x57e   :  { %v7261_v32 = vpop.permute.xlu1 %3469 }
 0x57f   :  { %9870 = vst [vmem:[#allocation134_spill] sm:$0xff] %v7261_v32  ;;  %v7268_v42 = vpop.permute.xlu0 %3387  ;;  %v5104_v32 = vmul.f32 %v6780_v25, %v7263_v1  ;;  %v4870_v46 = vsel %vm4353_vm6, %v4867_v15, %v4869_v39  ;;  %v5112_v39 = vmul.f32 %v6802_v30, %v7277_v55 }
 0x580   :  { %9872 = vst [vmem:[#allocation136_spill] sm:$0xff] %v7268_v42  ;;  %4846 = vrot.lane.b32.xlu1 %v4838_v9, %s5777_s13  ;;  %v4814_v42 = vmul.f32 %v6790_v33, %v7231_v34  ;;  %v5126_v9 = vrot.slane %v5105_v63, 6  ;;  %v7295_v63 = vstv %s5631_s1  ;;  %s9224_s1 = sld [smem:[#allocation11 + $0xb0]] }
 0x581   :  { %4684 = vrot.lane.b32.xlu0 %v4676_v0, %s5776_s8  ;;  %v5124_v3 = vrot.slane %v5104_v32, 6  ;;  %v4822_v0 = vmul.f32 %v6834_v31, %v7245_v12  ;;  %9877 = vst [vmem:[#allocation141_spill] sm:$0xff] %v7295_v63  ;;  %v5265_v5 = vmul.f32 %v6910_v38, %v7295_v63  ;;  %v5103_v38 = vmul.f32 %v6790_v33, %v7263_v1 }
 0x582   :  { %v7275_v43 = vpop.permute.xlu1 %3517  ;;  %v4834_v34 = vrot.slane %v4814_v42, 5 }
 0x583   :  { %9873 = vst [vmem:[#allocation137_spill] sm:$0xff] %v7275_v43  ;;  %v7284_v27 = vpop.permute.xlu0 %3435  ;;  %v4866_v12 = vrot.slane %v4822_v0, 5  ;;  %v5111_v0 = vmul.f32 %v6834_v31, %v7277_v55 }
 0x584   :  { %9875 = vst [vmem:[#allocation139_spill] sm:$0xff] %v7284_v27  ;;  %4878 = vrot.lane.b32.xlu1 %v4870_v46, %s5777_s13  ;;  %v5127_v27 = vsel %vm4914_vm7, %v5124_v3, %v5126_v9  ;;  %v5158_v46 = vrot.slane %v5113_v7, 6  ;;  %v4836_v32 = vsel %vm4353_vm6, %v4834_v34, %v4835_v48  ;;  %v7309_v9 = vstv %s5632_s0 }
 0x585   :  { %4716 = vrot.lane.b32.xlu0 %v4708_v24, %s5776_s8  ;;  %v5156_v24 = vrot.slane %v5112_v39, 6  ;;  %v5273_v34 = vmul.f32 %v6928_v49, %v7309_v9  ;;  %v5272_v39 = vmul.f32 %v6802_v30, %v7309_v9  ;;  %v5123_v49 = vrot.slane %v5103_v38, 6 }
 0x586   :  { %v7293_v43 = vpop.permute.xlu1 %3549 }
 0x587   :  { %9876 = vst [vmem:[#allocation140_spill] sm:$0xff] %v7293_v43  ;;  %v7300_v50 = vpop.permute.xlu0 %3467  ;;  %v5264_v43 = vmul.f32 %v6780_v25, %v7295_v63  ;;  %v5159_v7 = vsel %vm4914_vm7, %v5156_v24, %v5158_v46  ;;  %v4868_v25 = vsel %vm4353_vm6, %v4866_v12, %v4867_v15  ;;  %v7324_v46 = vld [vmem:[#allocation4 + $0x28] sm:$0x3f]  ;;  %v7334_v15 = vld [vmem:[#allocation5 + $0x28] sm:$0x3f]  ;;  %v5125_v30 = vsel %vm4914_vm7, %v5123_v49, %v5124_v3 }
 0x588   :  { %9878 = vst [vmem:[#allocation142_spill] sm:$0xff] %v7300_v50  ;;  %5135 = vrot.lane.b32.xlu1 %v5127_v27, %s5772_s7  ;;  %v5286_v50 = vrot.slane %v5265_v5, 6  ;;  %v2159_v38 = vmul.f32 %v6340_v4, %v7324_v46 }
 0x589   :  { %4844 = vrot.lane.b32.xlu0 %v4836_v32, %s5777_s13  ;;  %v5284_v27 = vrot.slane %v5264_v43, 6 }
 0x58a   :  { %v7307_v42 = vpop.permute.xlu1 %3597 }
 0x58b   :  { %9879 = vst [vmem:[#allocation143_spill] sm:$0xff] %v7307_v42  ;;  %v7316_v48 = vpop.permute.xlu0 %3515  ;;  %v5287_v32 = vsel %vm4914_vm7, %v5284_v27, %v5286_v50  ;;  %v5316_v42 = vrot.slane %v5272_v39, 6 }
 0x58c   :  { %9880 = vst [vmem:[#allocation144_spill] sm:$0xff] %v7316_v48  ;;  %5167 = vrot.lane.b32.xlu1 %v5159_v7, %s5772_s7  ;;  %v5318_v48 = vrot.slane %v5273_v34, 6  ;;  %v7330_v7 = vld [vmem:[#allocation4 + $0x20] sm:$0xff]  ;;  %v5263_v34 = vmul.f32 %v6790_v33, %v7295_v63  ;;  %v5271_v33 = vmul.f32 %v6834_v31, %v7309_v9  ;;  %v2240_v31 = vmul.f32 %v6361_v19, %v7324_v46 }
 0x58d   :  { %4876 = vrot.lane.b32.xlu0 %v4868_v25, %s5777_s13  ;;  %v2158_v12 = vmul.f32 %v7330_v7, %v6340_v4  ;;  %v5155_v25 = vrot.slane %v5111_v0, 6  ;;  %v2167_v0 = vmul.f32 %v6352_v11, %v7334_v15 }
 0x58e   :  { %v7327_v5 = vpop.permute.xlu1 %3629 }
 0x58f   :  { %9881 = vst [vmem:[#allocation145_spill] sm:$0xff] %v7327_v5  ;;  %v7336_v43 = vpop.permute.xlu0 %3547  ;;  %v5319_v5 = vsel %vm4914_vm7, %v5316_v42, %v5318_v48  ;;  %v2181_v55 = vrot.slane %v2158_v12, 1  ;;  %v5157_v49 = vsel %vm4914_vm7, %v5155_v25, %v5156_v24  ;;  %v5283_v48 = vrot.slane %v5263_v34, 6 }
 0x590   :  { %9882 = vst [vmem:[#allocation146_spill] sm:$0xff] %v7336_v43  ;;  %5295 = vrot.lane.b32.xlu1 %v5287_v32, %s5770_s5  ;;  %v7348_v43 = vld [vmem:[#allocation5 + $0x20] sm:$0xff]  ;;  %v2183_v32 = vrot.slane %v2159_v38, 1  ;;  %v2215_v63 = vrot.slane %v2167_v0, 1  ;;  %v7375_v38 = vld [vmem:[#allocation4 + $0x18] sm:$0xff] }
 0x591   :  { %5133 = vrot.lane.b32.xlu0 %v5125_v30, %s5772_s7  ;;  %v2166_v3 = vmul.f32 %v7348_v43, %v6352_v11  ;;  %v5285_v24 = vsel %vm4914_vm7, %v5283_v48, %v5284_v27  ;;  %v2157_v34 = vmul.f32 %v7375_v38, %v6340_v4  ;;  %v2248_v27 = vmul.f32 %v6371_v17, %v7334_v15 }
 0x592   :  { %v7343_v50 = vpop.permute.xlu1 %3677  ;;  %v2184_v30 = vsel %vm2174_vm3, %v2181_v55, %v2183_v32  ;;  %v2263_v48 = vrot.slane %v2240_v31, 1 }
 0x593   :  { %9883 = vst [vmem:[#allocation147_spill] sm:$0xff] %v7343_v50  ;;  %v7354_v39 = vpop.permute.xlu0 %3595  ;;  %v2213_v50 = vrot.slane %v2166_v3, 1 }
 0x594   :  { %9884 = vst [vmem:[#allocation148_spill] sm:$0xff] %v7354_v39  ;;  %5327 = vrot.lane.b32.xlu1 %v5319_v5, %s5770_s5  ;;  %v2239_v39 = vmul.f32 %v7330_v7, %v6361_v19  ;;  %v5315_v5 = vrot.slane %v5271_v33, 6 }
 0x595   :  { %5165 = vrot.lane.b32.xlu0 %v5157_v49, %s5772_s7  ;;  %v2216_v3 = vsel %vm2174_vm3, %v2213_v50, %v2215_v63  ;;  %v2247_v49 = vmul.f32 %v7348_v43, %v6371_v17  ;;  %v7391_v63 = vld [vmem:[#allocation5 + $0x18] sm:$0xff] }
 0x596   :  { %v7361_v12 = vpop.permute.xlu1 %3709  ;;  %v2261_v0 = vrot.slane %v2239_v39, 1  ;;  %v5317_v33 = vsel %vm4914_vm7, %v5315_v5, %v5316_v42  ;;  %v2165_v39 = vmul.f32 %v7391_v63, %v6352_v11  ;;  %v2320_v5 = vmul.f32 %v6385_v35, %v7324_v46 }
 0x597   :  { %9885 = vst [vmem:[#allocation149_spill] sm:$0xff] %v7361_v12  ;;  %v7366_v1 = vpop.permute.xlu0 %3627  ;;  %v2293_v12 = vrot.slane %v2247_v49, 1 }
 0x598   :  { %9886 = vst [vmem:[#allocation150_spill] sm:$0xff] %v7366_v1  ;;  %2191 = vrot.lane.b32.xlu1 %v2184_v30, %s5774_s24  ;;  %v2180_v30 = vrot.slane %v2157_v34, 1  ;;  %v2295_v1 = vrot.slane %v2248_v27, 1  ;;  %v2212_v31 = vrot.slane %v2165_v39, 1  ;;  %v2238_v34 = vmul.f32 %v7375_v38, %v6361_v19 }
 0x599   :  { %5293 = vrot.lane.b32.xlu0 %v5285_v24, %s5770_s5  ;;  %v2264_v24 = vsel %vm2174_vm3, %v2261_v0, %v2263_v48  ;;  %v2343_v39 = vrot.slane %v2320_v5, 1  ;;  %v2400_v5 = vmul.f32 %v6409_v53, %v7324_v46 }
 0x59a   :  { %v7373_v25 = vpop.permute.xlu1 %3757  ;;  %v2182_v42 = vsel %vm2174_vm3, %v2180_v30, %v2181_v55  ;;  %v2296_v49 = vsel %vm2174_vm3, %v2293_v12, %v2295_v1  ;;  %v2328_v55 = vmul.f32 %v6395_v44, %v7334_v15  ;;  %v2214_v30 = vsel %vm2174_vm3, %v2212_v31, %v2213_v50 }
 0x59b   :  { %9887 = vst [vmem:[#allocation151_spill] sm:$0xff] %v7373_v25  ;;  %v7384_v32 = vpop.permute.xlu0 %3675  ;;  %v2246_v1 = vmul.f32 %v7391_v63, %v6371_v17 }
 0x59c   :  { %9888 = vst [vmem:[#allocation152_spill] sm:$0xff] %v7384_v32  ;;  %2223 = vrot.lane.b32.xlu1 %v2216_v3, %s5774_s24  ;;  %v2319_v3 = vmul.f32 %v7330_v7, %v6385_v35 }
 0x59d   :  { %5325 = vrot.lane.b32.xlu0 %v5317_v33, %s5770_s5  ;;  %v2327_v33 = vmul.f32 %v7348_v43, %v6395_v44  ;;  %v2292_v31 = vrot.slane %v2246_v1, 1 }
 0x59e   :  { %v7389_v4 = vpop.permute.xlu1 %3789  ;;  %v2341_v27 = vrot.slane %v2319_v3, 1 }
 0x59f   :  { %9889 = vst [vmem:[#allocation153_spill] sm:$0xff] %v7389_v4  ;;  %v7398_v32 = vpop.permute.xlu0 %3707  ;;  %v8053_v4 = vstv %s7962_s14 }
 0x5a0   :  { %9890 = vst [vmem:[#allocation154_spill] sm:$0xff] %v7398_v32  ;;  %2271 = vrot.lane.b32.xlu1 %v2264_v24, %s5775_s27  ;;  %v2260_v24 = vrot.slane %v2238_v34, 1  ;;  %v2344_v3 = vsel %vm2174_vm3, %v2341_v27, %v2343_v39  ;;  %v2375_v32 = vrot.slane %v2328_v55, 1  ;;  %v2318_v34 = vmul.f32 %v7375_v38, %v6385_v35  ;;  %9983 = vst [vmem:[#allocation233_spill] sm:$0xff] %v8053_v4 }
 0x5a1   :  { %2189 = vrot.lane.b32.xlu0 %v2182_v42, %s5774_s24  ;;  %v2373_v42 = vrot.slane %v2327_v33, 1  ;;  %v2407_v55 = vmul.f32 %v7348_v43, %v6419_v62  ;;  %v2294_v39 = vsel %vm2174_vm3, %v2292_v31, %v2293_v12 }
 0x5a2   :  { %v7405_v11 = vpop.permute.xlu1 %3965  ;;  %v2262_v50 = vsel %vm2174_vm3, %v2260_v24, %v2261_v0  ;;  %v2408_v0 = vmul.f32 %v6419_v62, %v7334_v15  ;;  %v2423_v24 = vrot.slane %v2400_v5, 1  ;;  %v2340_v1 = vrot.slane %v2318_v34, 1 }
 0x5a3   :  { %9891 = vst [vmem:[#allocation155_spill] sm:$0xff] %v7405_v11  ;;  %v7414_v48 = vpop.permute.xlu0 %3755  ;;  %v2399_v11 = vmul.f32 %v7330_v7, %v6409_v53  ;;  %v2480_v5 = vmul.f32 %v6433_v14, %v7324_v46  ;;  %v2398_v34 = vmul.f32 %v7375_v38, %v6409_v53 }
 0x5a4   :  { %9892 = vst [vmem:[#allocation156_spill] sm:$0xff] %v7414_v48  ;;  %2303 = vrot.lane.b32.xlu1 %v2296_v49, %s5775_s27  ;;  %v2376_v49 = vsel %vm2174_vm3, %v2373_v42, %v2375_v32  ;;  %v2326_v32 = vmul.f32 %v7391_v63, %v6395_v44  ;;  %v2342_v12 = vsel %vm2174_vm3, %v2340_v1, %v2341_v27 }
 0x5a5   :  { %2221 = vrot.lane.b32.xlu0 %v2214_v30, %s5774_s24  ;;  %v2421_v33 = vrot.slane %v2399_v11, 1  ;;  %v2488_v27 = vmul.f32 %v6443_v26, %v7334_v15  ;;  %v2503_v1 = vrot.slane %v2480_v5, 1  ;;  %v2560_v5 = vmul.f32 %v6457_v36, %v7324_v46 }
 0x5a6   :  { %v7419_v19 = vpop.permute.xlu1 %3997  ;;  %v2372_v31 = vrot.slane %v2326_v32, 1  ;;  %v2420_v32 = vrot.slane %v2398_v34, 1  ;;  %v2478_v34 = vmul.f32 %v7375_v38, %v6433_v14 }
 0x5a7   :  { %9893 = vst [vmem:[#allocation157_spill] sm:$0xff] %v7419_v19  ;;  %v7426_v48 = vpop.permute.xlu0 %3787  ;;  %v2424_v11 = vsel %vm2174_vm3, %v2421_v33, %v2423_v24 }
 0x5a8   :  { %9894 = vst [vmem:[#allocation158_spill] sm:$0xff] %v7426_v48  ;;  %2351 = vrot.lane.b32.xlu1 %v2344_v3, %s5775_s27  ;;  %v2453_v3 = vrot.slane %v2407_v55, 1  ;;  %v2374_v24 = vsel %vm2174_vm3, %v2372_v31, %v2373_v42  ;;  %v2422_v42 = vsel %vm2174_vm3, %v2420_v32, %v2421_v33  ;;  %v2568_v33 = vmul.f32 %v6469_v47, %v7334_v15 }
 0x5a9   :  { %2269 = vrot.lane.b32.xlu0 %v2262_v50, %s5775_s27  ;;  %v2455_v50 = vrot.slane %v2408_v0, 1  ;;  %v2487_v0 = vmul.f32 %v7348_v43, %v6443_v26  ;;  %v2583_v32 = vrot.slane %v2560_v5, 1  ;;  %v2640_v5 = vmul.f32 %v6485_v58, %v7324_v46 }
 0x5aa   :  { %v7433_v17 = vpop.permute.xlu1 %4045  ;;  %v8007_v48 = vstv %s7912_s10 }
 0x5ab   :  { %9895 = vst [vmem:[#allocation159_spill] sm:$0xff] %v7433_v17  ;;  %v7442_v30 = vpop.permute.xlu0 %3963  ;;  %9974 = vst [vmem:[#allocation229_spill] sm:$0xff] %v8007_v48 }
 0x5ac   :  { %9896 = vst [vmem:[#allocation160_spill] sm:$0xff] %v7442_v30  ;;  %2383 = vrot.lane.b32.xlu1 %v2376_v49, %s5775_s27  ;;  %v2479_v30 = vmul.f32 %v7330_v7, %v6433_v14  ;;  %v2456_v49 = vsel %vm2174_vm3, %v2453_v3, %v2455_v50  ;;  %v2533_v50 = vrot.slane %v2487_v0, 1 }
 0x5ad   :  { %2301 = vrot.lane.b32.xlu0 %v2294_v39, %s5775_s27 }
 0x5ae   :  { %v7447_v35 = vpop.permute.xlu1 %4077  ;;  %v2501_v55 = vrot.slane %v2479_v30, 1  ;;  %v2406_v30 = vmul.f32 %v7391_v63, %v6419_v62 }
 0x5af   :  { %9897 = vst [vmem:[#allocation161_spill] sm:$0xff] %v7447_v35  ;;  %v7454_v19 = vpop.permute.xlu0 %3995 }
 0x5b0   :  { %9898 = vst [vmem:[#allocation162_spill] sm:$0xff] %v7454_v19  ;;  %2431 = vrot.lane.b32.xlu1 %v2424_v11, %s5776_s8  ;;  %v2504_v11 = vsel %vm2174_vm3, %v2501_v55, %v2503_v1  ;;  %v2559_v19 = vmul.f32 %v7330_v7, %v6457_v36  ;;  %v2452_v31 = vrot.slane %v2406_v30, 1  ;;  %v2500_v30 = vrot.slane %v2478_v34, 1 }
 0x5b1   :  { %2349 = vrot.lane.b32.xlu0 %v2342_v12, %s5775_s27  ;;  %v2535_v12 = vrot.slane %v2488_v27, 1  ;;  %v2567_v27 = vmul.f32 %v7348_v43, %v6469_v47  ;;  %v2558_v34 = vmul.f32 %v7375_v38, %v6457_v36 }
 0x5b2   :  { %v7461_v44 = vpop.permute.xlu1 %4125  ;;  %v2581_v0 = vrot.slane %v2559_v19, 1  ;;  %v2454_v1 = vsel %vm2174_vm3, %v2452_v31, %v2453_v3  ;;  %v2486_v19 = vmul.f32 %v7391_v63, %v6443_v26  ;;  %v2502_v3 = vsel %vm2174_vm3, %v2500_v30, %v2501_v55 }
 0x5b3   :  { %9899 = vst [vmem:[#allocation163_spill] sm:$0xff] %v7461_v44  ;;  %v7470_v39 = vpop.permute.xlu0 %4043  ;;  %v2648_v55 = vmul.f32 %v6497_v10, %v7334_v15  ;;  %v2663_v30 = vrot.slane %v2640_v5, 1  ;;  %v2849_v5 = vmul.f32 %v6515_v28, %v7324_v46 }
 0x5b4   :  { %9900 = vst [vmem:[#allocation164_spill] sm:$0xff] %v7470_v39  ;;  %2463 = vrot.lane.b32.xlu1 %v2456_v49, %s5776_s8  ;;  %v2536_v49 = vsel %vm2174_vm3, %v2533_v50, %v2535_v12  ;;  %v2613_v12 = vrot.slane %v2567_v27, 1  ;;  %v2532_v31 = vrot.slane %v2486_v19, 1  ;;  %v2580_v19 = vrot.slane %v2558_v34, 1  ;;  %v8001_v39 = vld [vmem:[#allocation4 + $0x28] sm:$0x3f] }
 0x5b5   :  { %2381 = vrot.lane.b32.xlu0 %v2374_v24, %s5775_s27  ;;  %v2638_v34 = vmul.f32 %v7375_v38, %v6485_v58 }
 0x5b6   :  { %v7475_v53 = vpop.permute.xlu1 %4157 }
 0x5b7   :  { %9901 = vst [vmem:[#allocation165_spill] sm:$0xff] %v7475_v53  ;;  %v7482_v44 = vpop.permute.xlu0 %4075 }
 0x5b8   :  { %9902 = vst [vmem:[#allocation166_spill] sm:$0xff] %v7482_v44  ;;  %2511 = vrot.lane.b32.xlu1 %v2504_v11, %s5776_s8  ;;  %v2584_v11 = vsel %vm2174_vm3, %v2581_v0, %v2583_v32  ;;  %v2534_v32 = vsel %vm2174_vm3, %v2532_v31, %v2533_v50  ;;  %v2582_v50 = vsel %vm2174_vm3, %v2580_v19, %v2581_v0  ;;  %v2872_v19 = vrot.slane %v2849_v5, 2 }
 0x5b9   :  { %2429 = vrot.lane.b32.xlu0 %v2422_v42, %s5776_s8  ;;  %v2615_v42 = vrot.slane %v2568_v33, 1  ;;  %v2647_v33 = vmul.f32 %v7348_v43, %v6497_v10  ;;  %v2857_v0 = vmul.f32 %v6529_v41, %v7334_v15  ;;  %v2929_v5 = vmul.f32 %v6547_v56, %v7324_v46 }
 0x5ba   :  { %v7489_v62 = vpop.permute.xlu1 %4205  ;;  %v3736_v44 = vmul.f32 %v7391_v63, %v6889_v21 }
 0x5bb   :  { %9903 = vst [vmem:[#allocation167_spill] sm:$0xff] %v7489_v62  ;;  %v7498_v24 = vpop.permute.xlu0 %4123 }
 0x5bc   :  { %9904 = vst [vmem:[#allocation168_spill] sm:$0xff] %v7498_v24  ;;  %2543 = vrot.lane.b32.xlu1 %v2536_v49, %s5776_s8  ;;  %v2639_v24 = vmul.f32 %v7330_v7, %v6485_v58  ;;  %v2616_v49 = vsel %vm2174_vm3, %v2613_v12, %v2615_v42  ;;  %v2693_v42 = vrot.slane %v2647_v33, 1 }
 0x5bd   :  { %2461 = vrot.lane.b32.xlu0 %v2454_v1, %s5776_s8 }
 0x5be   :  { %v7503_v14 = vpop.permute.xlu1 %4237  ;;  %v2661_v27 = vrot.slane %v2639_v24, 1  ;;  %v2566_v24 = vmul.f32 %v7391_v63, %v6469_v47 }
 0x5bf   :  { %9905 = vst [vmem:[#allocation169_spill] sm:$0xff] %v7503_v14  ;;  %v7510_v53 = vpop.permute.xlu0 %4155  ;;  %v9977_v14 = vld [vmem:[#allocation78_spill] sm:$0xff] }
 0x5c0   :  { %9906 = vst [vmem:[#allocation170_spill] sm:$0xff] %v7510_v53  ;;  %2591 = vrot.lane.b32.xlu1 %v2584_v11, %s5777_s13  ;;  %v2664_v11 = vsel %vm2174_vm3, %v2661_v27, %v2663_v30  ;;  %v2848_v53 = vmul.f32 %v7330_v7, %v6515_v28  ;;  %v2612_v31 = vrot.slane %v2566_v24, 1  ;;  %v2660_v24 = vrot.slane %v2638_v34, 1 }
 0x5c1   :  { %2509 = vrot.lane.b32.xlu0 %v2502_v3, %s5776_s8  ;;  %v2695_v3 = vrot.slane %v2648_v55, 1  ;;  %v2856_v55 = vmul.f32 %v7348_v43, %v6529_v41  ;;  %v2847_v34 = vmul.f32 %v7375_v38, %v6515_v28 }
 0x5c2   :  { %v7517_v26 = vpop.permute.xlu1 %4285  ;;  %v2870_v33 = vrot.slane %v2848_v53, 2  ;;  %v2614_v30 = vsel %vm2174_vm3, %v2612_v31, %v2613_v12  ;;  %v2646_v53 = vmul.f32 %v7391_v63, %v6497_v10  ;;  %v2662_v12 = vsel %vm2174_vm3, %v2660_v24, %v2661_v27 }
 0x5c3   :  { %9907 = vst [vmem:[#allocation171_spill] sm:$0xff] %v7517_v26  ;;  %v7526_v1 = vpop.permute.xlu0 %4203  ;;  %v2937_v27 = vmul.f32 %v6561_v16, %v7334_v15  ;;  %v2952_v24 = vrot.slane %v2929_v5, 2  ;;  %v3009_v5 = vmul.f32 %v6579_v37, %v7324_v46 }
 0x5c4   :  { %9908 = vst [vmem:[#allocation172_spill] sm:$0xff] %v7526_v1  ;;  %2623 = vrot.lane.b32.xlu1 %v2616_v49, %s5777_s13  ;;  %v2696_v49 = vsel %vm2174_vm3, %v2693_v42, %v2695_v3  ;;  %v2902_v3 = vrot.slane %v2856_v55, 2  ;;  %v2692_v31 = vrot.slane %v2646_v53, 1  ;;  %v2869_v53 = vrot.slane %v2847_v34, 2  ;;  %v9970_v1 = vld [vmem:[#allocation75_spill] sm:$0xff] }
 0x5c5   :  { %2541 = vrot.lane.b32.xlu0 %v2534_v32, %s5776_s8  ;;  %v2927_v34 = vmul.f32 %v7375_v38, %v6547_v56 }
 0x5c6   :  { %v7531_v36 = vpop.permute.xlu1 %4317 }
 0x5c7   :  { %9909 = vst [vmem:[#allocation173_spill] sm:$0xff] %v7531_v36  ;;  %v7538_v26 = vpop.permute.xlu0 %4235 }
 0x5c8   :  { %9910 = vst [vmem:[#allocation174_spill] sm:$0xff] %v7538_v26  ;;  %2671 = vrot.lane.b32.xlu1 %v2664_v11, %s5777_s13  ;;  %v2873_v11 = vsel %vm2735_vm4, %v2870_v33, %v2872_v19  ;;  %v2694_v19 = vsel %vm2174_vm3, %v2692_v31, %v2693_v42  ;;  %v2871_v42 = vsel %vm2735_vm4, %v2869_v53, %v2870_v33  ;;  %v3032_v53 = vrot.slane %v3009_v5, 2 }
 0x5c9   :  { %2589 = vrot.lane.b32.xlu0 %v2582_v50, %s5777_s13  ;;  %v2904_v50 = vrot.slane %v2857_v0, 2  ;;  %v2936_v0 = vmul.f32 %v7348_v43, %v6561_v16  ;;  %v3017_v33 = vmul.f32 %v6593_v60, %v7334_v15  ;;  %v3089_v5 = vmul.f32 %v6611_v29, %v7324_v46 }
 0x5ca   :  { %v7545_v47 = vpop.permute.xlu1 %4366 }
 0x5cb   :  { %9911 = vst [vmem:[#allocation175_spill] sm:$0xff] %v7545_v47  ;;  %v7554_v32 = vpop.permute.xlu0 %4283  ;;  %v8022_v47 = vld [vmem:[#allocation5 + $0x28] sm:$0x3f] }
 0x5cc   :  { %9912 = vst [vmem:[#allocation176_spill] sm:$0xff] %v7554_v32  ;;  %2703 = vrot.lane.b32.xlu1 %v2696_v49, %s5777_s13  ;;  %v2928_v32 = vmul.f32 %v7330_v7, %v6547_v56  ;;  %v2905_v49 = vsel %vm2735_vm4, %v2902_v3, %v2904_v50  ;;  %v2982_v50 = vrot.slane %v2936_v0, 2 }
 0x5cd   :  { %2621 = vrot.lane.b32.xlu0 %v2614_v30, %s5777_s13 }
 0x5ce   :  { %v7559_v58 = vpop.permute.xlu1 %4398  ;;  %v2950_v55 = vrot.slane %v2928_v32, 2  ;;  %v2855_v32 = vmul.f32 %v7391_v63, %v6529_v41 }
 0x5cf   :  { %9913 = vst [vmem:[#allocation177_spill] sm:$0xff] %v7559_v58  ;;  %v7566_v36 = vpop.permute.xlu0 %4315  ;;  %v8020_v58 = vmul.f32 %v7348_v43, %v9977_v14 }
 0x5d0   :  { %9914 = vst [vmem:[#allocation178_spill] sm:$0xff] %v7566_v36  ;;  %2880 = vrot.lane.b32.xlu1 %v2873_v11, %s5772_s7  ;;  %v2953_v11 = vsel %vm2735_vm4, %v2950_v55, %v2952_v24  ;;  %v3008_v36 = vmul.f32 %v7330_v7, %v6579_v37  ;;  %v2901_v31 = vrot.slane %v2855_v32, 2  ;;  %v2949_v32 = vrot.slane %v2927_v34, 2 }
 0x5d1   :  { %2669 = vrot.lane.b32.xlu0 %v2662_v12, %s5777_s13  ;;  %v2984_v12 = vrot.slane %v2937_v27, 2  ;;  %v3016_v27 = vmul.f32 %v7348_v43, %v6593_v60  ;;  %v3007_v34 = vmul.f32 %v7375_v38, %v6579_v37  ;;  %v10008_v4 = vrot.slane %v8020_v58, 4 }
 0x5d2   :  { %v7573_v10 = vpop.permute.xlu1 %4446  ;;  %v3030_v0 = vrot.slane %v3008_v36, 2  ;;  %v2903_v24 = vsel %vm2735_vm4, %v2901_v31, %v2902_v3  ;;  %v2935_v36 = vmul.f32 %v7391_v63, %v6561_v16  ;;  %v2951_v3 = vsel %vm2735_vm4, %v2949_v32, %v2950_v55 }
 0x5d3   :  { %9915 = vst [vmem:[#allocation179_spill] sm:$0xff] %v7573_v10  ;;  %v7582_v30 = vpop.permute.xlu0 %4364  ;;  %v3097_v55 = vmul.f32 %v6625_v61, %v7334_v15  ;;  %v3112_v32 = vrot.slane %v3089_v5, 2  ;;  %v3169_v5 = vmul.f32 %v6643_v8, %v7324_v46 }
 0x5d4   :  { %9916 = vst [vmem:[#allocation180_spill] sm:$0xff] %v7582_v30  ;;  %2912 = vrot.lane.b32.xlu1 %v2905_v49, %s5772_s7  ;;  %v2985_v49 = vsel %vm2735_vm4, %v2982_v50, %v2984_v12  ;;  %v3062_v12 = vrot.slane %v3016_v27, 2  ;;  %v2981_v31 = vrot.slane %v2935_v36, 2  ;;  %v3029_v36 = vrot.slane %v3007_v34, 2 }
 0x5d5   :  { %2701 = vrot.lane.b32.xlu0 %v2694_v19, %s5777_s13  ;;  %v3087_v34 = vmul.f32 %v7375_v38, %v6611_v29 }
 0x5d6   :  { %v7587_v28 = vpop.permute.xlu1 %4478 }
 0x5d7   :  { %9917 = vst [vmem:[#allocation181_spill] sm:$0xff] %v7587_v28  ;;  %v7594_v10 = vpop.permute.xlu0 %4396 }
 0x5d8   :  { %9918 = vst [vmem:[#allocation182_spill] sm:$0xff] %v7594_v10  ;;  %2960 = vrot.lane.b32.xlu1 %v2953_v11, %s5772_s7  ;;  %v3033_v11 = vsel %vm2735_vm4, %v3030_v0, %v3032_v53  ;;  %v2983_v53 = vsel %vm2735_vm4, %v2981_v31, %v2982_v50  ;;  %v3031_v50 = vsel %vm2735_vm4, %v3029_v36, %v3030_v0  ;;  %v3192_v36 = vrot.slane %v3169_v5, 2 }
 0x5d9   :  { %2878 = vrot.lane.b32.xlu0 %v2871_v42, %s5772_s7  ;;  %v3064_v42 = vrot.slane %v3017_v33, 2  ;;  %v3096_v33 = vmul.f32 %v7348_v43, %v6625_v61  ;;  %v3177_v0 = vmul.f32 %v6657_v52, %v7334_v15  ;;  %v3249_v5 = vmul.f32 %v6675_v51, %v7324_v46 }
 0x5da   :  { %v7601_v41 = vpop.permute.xlu1 %4526  ;;  %v7936_v10 = vstv %s7876_s28 }
 0x5db   :  { %9919 = vst [vmem:[#allocation183_spill] sm:$0xff] %v7601_v41  ;;  %v7610_v19 = vpop.permute.xlu0 %4444  ;;  %9964 = vst [vmem:[#allocation223_spill] sm:$0xff] %v7936_v10 }
 0x5dc   :  { %9920 = vst [vmem:[#allocation184_spill] sm:$0xff] %v7610_v19  ;;  %2992 = vrot.lane.b32.xlu1 %v2985_v49, %s5772_s7  ;;  %v3088_v19 = vmul.f32 %v7330_v7, %v6611_v29  ;;  %v3065_v49 = vsel %vm2735_vm4, %v3062_v12, %v3064_v42  ;;  %v3142_v42 = vrot.slane %v3096_v33, 2 }
 0x5dd   :  { %2910 = vrot.lane.b32.xlu0 %v2903_v24, %s5772_s7 }
 0x5de   :  { %v7615_v56 = vpop.permute.xlu1 %4558  ;;  %v3110_v27 = vrot.slane %v3088_v19, 2  ;;  %v3015_v19 = vmul.f32 %v7391_v63, %v6593_v60 }
 0x5df   :  { %9921 = vst [vmem:[#allocation185_spill] sm:$0xff] %v7615_v56  ;;  %v7622_v28 = vpop.permute.xlu0 %4476  ;;  %v7978_v56 = vstv %s7891_s6 }
 0x5e0   :  { %9922 = vst [vmem:[#allocation186_spill] sm:$0xff] %v7622_v28  ;;  %3040 = vrot.lane.b32.xlu1 %v3033_v11, %s5770_s5  ;;  %v3113_v11 = vsel %vm2735_vm4, %v3110_v27, %v3112_v32  ;;  %v3168_v28 = vmul.f32 %v7330_v7, %v6643_v8  ;;  %v3061_v31 = vrot.slane %v3015_v19, 2  ;;  %v3109_v19 = vrot.slane %v3087_v34, 2  ;;  %9971 = vst [vmem:[#allocation75_spill] sm:$0xff] %v7978_v56 }
 0x5e1   :  { %2958 = vrot.lane.b32.xlu0 %v2951_v3, %s5772_s7  ;;  %v3144_v3 = vrot.slane %v3097_v55, 2  ;;  %v3176_v55 = vmul.f32 %v7348_v43, %v6657_v52  ;;  %v3167_v34 = vmul.f32 %v7375_v38, %v6643_v8 }
 0x5e2   :  { %v7629_v16 = vpop.permute.xlu1 %4606  ;;  %v3190_v33 = vrot.slane %v3168_v28, 2  ;;  %v3063_v32 = vsel %vm2735_vm4, %v3061_v31, %v3062_v12  ;;  %v3095_v28 = vmul.f32 %v7391_v63, %v6625_v61  ;;  %v3111_v12 = vsel %vm2735_vm4, %v3109_v19, %v3110_v27 }
 0x5e3   :  { %9923 = vst [vmem:[#allocation187_spill] sm:$0xff] %v7629_v16  ;;  %v7638_v24 = vpop.permute.xlu0 %4524  ;;  %v3257_v27 = vmul.f32 %v6689_v13, %v7334_v15  ;;  %v3273_v19 = vrot.slane %v3249_v5, 3  ;;  %v3330_v5 = vmul.f32 %v6707_v45, %v7324_v46 }
 0x5e4   :  { %9924 = vst [vmem:[#allocation188_spill] sm:$0xff] %v7638_v24  ;;  %3072 = vrot.lane.b32.xlu1 %v3065_v49, %s5770_s5  ;;  %v3145_v49 = vsel %vm2735_vm4, %v3142_v42, %v3144_v3  ;;  %v3222_v3 = vrot.slane %v3176_v55, 2  ;;  %v3141_v31 = vrot.slane %v3095_v28, 2  ;;  %v3189_v28 = vrot.slane %v3167_v34, 2  ;;  %v7953_v24 = vld [vmem:[#allocation4 + $0x8] sm:$0xff] }
 0x5e5   :  { %2990 = vrot.lane.b32.xlu0 %v2983_v53, %s5772_s7  ;;  %v3247_v34 = vmul.f32 %v7375_v38, %v6675_v51 }
 0x5e6   :  { %v7643_v37 = vpop.permute.xlu1 %4638 }
 0x5e7   :  { %9925 = vst [vmem:[#allocation189_spill] sm:$0xff] %v7643_v37  ;;  %v7650_v16 = vpop.permute.xlu0 %4556 }
 0x5e8   :  { %9926 = vst [vmem:[#allocation190_spill] sm:$0xff] %v7650_v16  ;;  %3120 = vrot.lane.b32.xlu1 %v3113_v11, %s5770_s5  ;;  %v3193_v11 = vsel %vm2735_vm4, %v3190_v33, %v3192_v36  ;;  %v3143_v36 = vsel %vm2735_vm4, %v3141_v31, %v3142_v42  ;;  %v3191_v42 = vsel %vm2735_vm4, %v3189_v28, %v3190_v33  ;;  %v3353_v28 = vrot.slane %v3330_v5, 3 }
 0x5e9   :  { %3038 = vrot.lane.b32.xlu0 %v3031_v50, %s5770_s5  ;;  %v3224_v50 = vrot.slane %v3177_v0, 2  ;;  %v3256_v0 = vmul.f32 %v7348_v43, %v6689_v13  ;;  %v3338_v33 = vmul.f32 %v6721_v23, %v7334_v15  ;;  %v3410_v5 = vmul.f32 %v6739_v59, %v7324_v46 }
 0x5ea   :  { %v7657_v60 = vpop.permute.xlu1 %4686 }
 0x5eb   :  { %9927 = vst [vmem:[#allocation191_spill] sm:$0xff] %v7657_v60  ;;  %v7666_v53 = vpop.permute.xlu0 %4604  ;;  %v4018_v60 = vmul.f32 %v8001_v39, %v9970_v1 }
 0x5ec   :  { %9928 = vst [vmem:[#allocation192_spill] sm:$0xff] %v7666_v53  ;;  %3152 = vrot.lane.b32.xlu1 %v3145_v49, %s5770_s5  ;;  %v3248_v53 = vmul.f32 %v7330_v7, %v6675_v51  ;;  %v3225_v49 = vsel %vm2735_vm4, %v3222_v3, %v3224_v50  ;;  %v3303_v50 = vrot.slane %v3256_v0, 3 }
 0x5ed   :  { %3070 = vrot.lane.b32.xlu0 %v3063_v32, %s5770_s5 }
 0x5ee   :  { %v7671_v29 = vpop.permute.xlu1 %4718  ;;  %v3271_v55 = vrot.slane %v3248_v53, 3  ;;  %v3175_v53 = vmul.f32 %v7391_v63, %v6657_v52 }
 0x5ef   :  { %9929 = vst [vmem:[#allocation193_spill] sm:$0xff] %v7671_v29  ;;  %v7678_v37 = vpop.permute.xlu0 %4636 }
 0x5f0   :  { %9930 = vst [vmem:[#allocation194_spill] sm:$0xff] %v7678_v37  ;;  %3200 = vrot.lane.b32.xlu1 %v3193_v11, %s5768_s30  ;;  %v3274_v11 = vsel %vm3264_vm5, %v3271_v55, %v3273_v19  ;;  %v3329_v37 = vmul.f32 %v7330_v7, %v6707_v45  ;;  %v3221_v31 = vrot.slane %v3175_v53, 2  ;;  %v3270_v53 = vrot.slane %v3247_v34, 3 }
 0x5f1   :  { %3118 = vrot.lane.b32.xlu0 %v3111_v12, %s5770_s5  ;;  %v3305_v12 = vrot.slane %v3257_v27, 3  ;;  %v3337_v27 = vmul.f32 %v7348_v43, %v6721_v23  ;;  %v3328_v34 = vmul.f32 %v7375_v38, %v6707_v45 }
 0x5f2   :  { %v7685_v61 = vpop.permute.xlu1 %4846  ;;  %v3351_v0 = vrot.slane %v3329_v37, 3  ;;  %v3223_v19 = vsel %vm2735_vm4, %v3221_v31, %v3222_v3  ;;  %v3255_v37 = vmul.f32 %v7391_v63, %v6689_v13  ;;  %v3272_v3 = vsel %vm3264_vm5, %v3270_v53, %v3271_v55 }
 0x5f3   :  { %9931 = vst [vmem:[#allocation195_spill] sm:$0xff] %v7685_v61  ;;  %v7694_v32 = vpop.permute.xlu0 %4684  ;;  %v3418_v55 = vmul.f32 %v6753_v40, %v7334_v15  ;;  %v3433_v53 = vrot.slane %v3410_v5, 3  ;;  %v3490_v5 = vmul.f32 %v6771_v18, %v7324_v46  ;;  %v7975_v61 = vmul.f32 %v7330_v7, %v9970_v1 }
 0x5f4   :  { %9932 = vst [vmem:[#allocation196_spill] sm:$0xff] %v7694_v32  ;;  %3232 = vrot.lane.b32.xlu1 %v3225_v49, %s5768_s30  ;;  %v3306_v49 = vsel %vm3264_vm5, %v3303_v50, %v3305_v12  ;;  %v3383_v12 = vrot.slane %v3337_v27, 3  ;;  %v3302_v31 = vrot.slane %v3255_v37, 3  ;;  %v3350_v37 = vrot.slane %v3328_v34, 3 }
 0x5f5   :  { %3150 = vrot.lane.b32.xlu0 %v3143_v36, %s5770_s5  ;;  %v3408_v34 = vmul.f32 %v7375_v38, %v6739_v59  ;;  %v7933_v32 = vstv %s7866_s26 }
 0x5f6   :  { %v7699_v8 = vpop.permute.xlu1 %4878 }
 0x5f7   :  { %9933 = vst [vmem:[#allocation197_spill] sm:$0xff] %v7699_v8  ;;  %v7706_v16 = vpop.permute.xlu0 %4716 }
 0x5f8   :  { %9934 = vst [vmem:[#allocation198_spill] sm:$0xff] %v7706_v16  ;;  %3281 = vrot.lane.b32.xlu1 %v3274_v11, %s5774_s24  ;;  %v3354_v11 = vsel %vm3264_vm5, %v3351_v0, %v3353_v28  ;;  %v3409_v16 = vmul.f32 %v7330_v7, %v6739_v59  ;;  %v3304_v28 = vsel %vm3264_vm5, %v3302_v31, %v3303_v50 }
 0x5f9   :  { %3198 = vrot.lane.b32.xlu0 %v3191_v42, %s5768_s30  ;;  %v3385_v42 = vrot.slane %v3338_v33, 3  ;;  %v3417_v33 = vmul.f32 %v7348_v43, %v6753_v40  ;;  %v3352_v50 = vsel %vm3264_vm5, %v3350_v37, %v3351_v0  ;;  %v3498_v0 = vmul.f32 %v6787_v57, %v7334_v15 }
 0x5fa   :  { %v7713_v52 = vpop.permute.xlu1 %5135  ;;  %v3431_v27 = vrot.slane %v3409_v16, 3  ;;  %v3336_v16 = vmul.f32 %v7391_v63, %v6721_v23  ;;  %v3513_v37 = vrot.slane %v3490_v5, 3  ;;  %v3570_v5 = vmul.f32 %v6809_v22, %v7324_v46 }
 0x5fb   :  { %9935 = vst [vmem:[#allocation199_spill] sm:$0xff] %v7713_v52  ;;  %v7722_v36 = vpop.permute.xlu0 %4844 }
 0x5fc   :  { %9936 = vst [vmem:[#allocation200_spill] sm:$0xff] %v7722_v36  ;;  %3313 = vrot.lane.b32.xlu1 %v3306_v49, %s5774_s24  ;;  %v3386_v49 = vsel %vm3264_vm5, %v3383_v12, %v3385_v42  ;;  %v3463_v42 = vrot.slane %v3417_v33, 3  ;;  %v3382_v31 = vrot.slane %v3336_v16, 3  ;;  %v3430_v16 = vrot.slane %v3408_v34, 3 }
 0x5fd   :  { %3230 = vrot.lane.b32.xlu0 %v3223_v19, %s5768_s30  ;;  %v3488_v34 = vmul.f32 %v7375_v38, %v6771_v18 }
 0x5fe   :  { %v7727_v51 = vpop.permute.xlu1 %5167 }
 0x5ff   :  { %9937 = vst [vmem:[#allocation201_spill] sm:$0xff] %v7727_v51  ;;  %v7734_v36 = vpop.permute.xlu0 %4876  ;;  %v7849_v51 = vmul.f32 %v7330_v7, %v6875_v6 }
 0x600   :  { %9938 = vst [vmem:[#allocation202_spill] sm:$0xff] %v7734_v36  ;;  %3361 = vrot.lane.b32.xlu1 %v3354_v11, %s5775_s27  ;;  %v3434_v11 = vsel %vm3264_vm5, %v3431_v27, %v3433_v53  ;;  %v3384_v53 = vsel %vm3264_vm5, %v3382_v31, %v3383_v12  ;;  %v3432_v12 = vsel %vm3264_vm5, %v3430_v16, %v3431_v27  ;;  %v3593_v16 = vrot.slane %v3570_v5, 3 }
 0x601   :  { %3279 = vrot.lane.b32.xlu0 %v3272_v3, %s5774_s24  ;;  %v3465_v3 = vrot.slane %v3418_v55, 3  ;;  %v3497_v55 = vmul.f32 %v7348_v43, %v6787_v57  ;;  %v3578_v27 = vmul.f32 %v6823_v20, %v7334_v15  ;;  %v3650_v5 = vmul.f32 %v6843_v54, %v7324_v46 }
 0x602   :  { %v7741_v13 = vpop.permute.xlu1 %5295 }
 0x603   :  { %9939 = vst [vmem:[#allocation203_spill] sm:$0xff] %v7741_v13  ;;  %v7750_v19 = vpop.permute.xlu0 %5133 }
 0x604   :  { %9940 = vst [vmem:[#allocation204_spill] sm:$0xff] %v7750_v19  ;;  %3393 = vrot.lane.b32.xlu1 %v3386_v49, %s5775_s27  ;;  %v3489_v19 = vmul.f32 %v7330_v7, %v6771_v18  ;;  %v3466_v49 = vsel %vm3264_vm5, %v3463_v42, %v3465_v3  ;;  %v3543_v3 = vrot.slane %v3497_v55, 3 }
 0x605   :  { %3311 = vrot.lane.b32.xlu0 %v3304_v28, %s5774_s24 }
 0x606   :  { %v7755_v45 = vpop.permute.xlu1 %5327  ;;  %v3511_v33 = vrot.slane %v3489_v19, 3  ;;  %v3416_v19 = vmul.f32 %v7391_v63, %v6753_v40 }
 0x607   :  { %9941 = vst [vmem:[#allocation205_spill] sm:$0xff] %v7755_v45  ;;  %v7762_v36 = vpop.permute.xlu0 %5165 }
 0x608   :  { %9942 = vst [vmem:[#allocation206_spill] sm:$0xff] %v7762_v36  ;;  %3441 = vrot.lane.b32.xlu1 %v3434_v11, %s5775_s27  ;;  %v3514_v11 = vsel %vm3264_vm5, %v3511_v33, %v3513_v37  ;;  %v3569_v36 = vmul.f32 %v7330_v7, %v6809_v22  ;;  %v3462_v31 = vrot.slane %v3416_v19, 3  ;;  %v3510_v19 = vrot.slane %v3488_v34, 3 }
 0x609   :  { %3359 = vrot.lane.b32.xlu0 %v3352_v50, %s5775_s27  ;;  %v3545_v50 = vrot.slane %v3498_v0, 3  ;;  %v3577_v0 = vmul.f32 %v7348_v43, %v6823_v20  ;;  %v3568_v34 = vmul.f32 %v7375_v38, %v6809_v22 }
 0x60a   :  { %v7769_v23 = vpop.permute.xlu1 %2191  ;;  %v3591_v55 = vrot.slane %v3569_v36, 3  ;;  %v3464_v37 = vsel %vm3264_vm5, %v3462_v31, %v3463_v42  ;;  %v3496_v36 = vmul.f32 %v7391_v63, %v6787_v57  ;;  %v3512_v42 = vsel %vm3264_vm5, %v3510_v19, %v3511_v33 }
 0x60b   :  { %9943 = vst [vmem:[#allocation207_spill] sm:$0xff] %v7769_v23  ;;  %v7778_v28 = vpop.permute.xlu0 %5293  ;;  %v3658_v33 = vmul.f32 %v6857_v2, %v7334_v15  ;;  %v3673_v19 = vrot.slane %v3650_v5, 3  ;;  %v3590_v22 = vrot.slane %v3568_v34, 3  ;;  %v3648_v34 = vmul.f32 %v7375_v38, %v6843_v54 }
 0x60c   :  { %9944 = vst [vmem:[#allocation208_spill] sm:$0xff] %v7778_v28  ;;  %3473 = vrot.lane.b32.xlu1 %v3466_v49, %s5775_s27  ;;  %v3546_v49 = vsel %vm3264_vm5, %v3543_v3, %v3545_v50  ;;  %v3623_v50 = vrot.slane %v3577_v0, 3  ;;  %v3542_v31 = vrot.slane %v3496_v36, 3 }
 0x60d   :  { %3391 = vrot.lane.b32.xlu0 %v3384_v53, %s5775_s27 }
 0x60e   :  { %v7783_v59 = vpop.permute.xlu1 %2223 }
 0x60f   :  { %9945 = vst [vmem:[#allocation209_spill] sm:$0xff] %v7783_v59  ;;  %v7790_v28 = vpop.permute.xlu0 %5325 }
 0x610   :  { %9946 = vst [vmem:[#allocation210_spill] sm:$0xff] %v7790_v28  ;;  %3521 = vrot.lane.b32.xlu1 %v3514_v11, %s5776_s8  ;;  %v3594_v11 = vsel %vm3264_vm5, %v3591_v55, %v3593_v16  ;;  %v3649_v28 = vmul.f32 %v7330_v7, %v6843_v54  ;;  %v3544_v16 = vsel %vm3264_vm5, %v3542_v31, %v3543_v3 }
 0x611   :  { %3439 = vrot.lane.b32.xlu0 %v3432_v12, %s5775_s27  ;;  %v3625_v12 = vrot.slane %v3578_v27, 3  ;;  %v7832_v27 = vmul.f32 %v7348_v43, %v6857_v2  ;;  %v3592_v3 = vsel %vm3264_vm5, %v3590_v22, %v3591_v55  ;;  %v7872_v55 = vmul.f32 %v7348_v43, %v6889_v21 }
 0x612   :  { %v7797_v40 = vpop.permute.xlu1 %2271  ;;  %v3671_v0 = vrot.slane %v3649_v28, 3  ;;  %v3576_v28 = vmul.f32 %v7391_v63, %v6823_v20  ;;  %v3730_v20 = vmul.f32 %v6875_v6, %v7324_v46 }
 0x613   :  { %9947 = vst [vmem:[#allocation211_spill] sm:$0xff] %v7797_v40  ;;  %v7806_v53 = vpop.permute.xlu0 %2189  ;;  %v9981_v35 = vrot.slane %v7872_v55, 3 }
 0x614   :  { %9948 = vst [vmem:[#allocation212_spill] sm:$0xff] %v7806_v53  ;;  %3553 = vrot.lane.b32.xlu1 %v3546_v49, %s5776_s8  ;;  %v3626_v49 = vsel %vm3264_vm5, %v3623_v50, %v3625_v12  ;;  %v3703_v12 = vrot.slane %v7832_v27, 3  ;;  %v3622_v5 = vrot.slane %v3576_v28, 3  ;;  %v3753_v22 = vrot.slane %v3730_v20, 3 }
 0x615   :  { %3471 = vrot.lane.b32.xlu0 %v3464_v37, %s5775_s27  ;;  %v3670_v28 = vrot.slane %v3648_v34, 3 }
 0x616   :  { %v7811_v18 = vpop.permute.xlu1 %2303  ;;  %v3624_v54 = vsel %vm3264_vm5, %v3622_v5, %v3623_v50  ;;  %v9958_v5 = vld [vmem:[#allocation69_spill] sm:$0xff]  ;;  %v3728_v50 = vmul.f32 %v7375_v38, %v6875_v6 }
 0x617   :  { %9949 = vst [vmem:[#allocation213_spill] sm:$0xff] %v7811_v18  ;;  %v7818_v45 = vpop.permute.xlu0 %2221 }
 0x618   :  { %9950 = vst [vmem:[#allocation214_spill] sm:$0xff] %v7818_v45  ;;  %3601 = vrot.lane.b32.xlu1 %v3594_v11, %s5776_s8  ;;  %v3674_v11 = vsel %vm3264_vm5, %v3671_v0, %v3673_v19  ;;  %v3750_v8 = vrot.slane %v3728_v50, 3  ;;  %v7981_v50 = vstv %s7901_s9 }
 0x619   :  { %3519 = vrot.lane.b32.xlu0 %v3512_v42, %s5776_s8  ;;  %v3705_v42 = vrot.slane %v3658_v33, 3  ;;  %v9724_v33 = vrot.slane %v7849_v51, 3 }
 0x61a   :  { %v7825_v57 = vpop.permute.xlu1 %2351 }
 0x61b   :  { %9951 = vst [vmem:[#allocation215_spill] sm:$0xff] %v7825_v57  ;;  %v7836_v37 = vpop.permute.xlu0 %2269  ;;  %v3706_v27 = vsel %vm3264_vm5, %v3703_v12, %v3705_v42  ;;  %v3656_v42 = vmul.f32 %v7391_v63, %v6857_v2  ;;  %v3672_v2 = vsel %vm3264_vm5, %v3670_v28, %v3671_v0 }
 0x61c   :  { %9952 = vst [vmem:[#allocation216_spill] sm:$0xff] %v7836_v37  ;;  %3633 = vrot.lane.b32.xlu1 %v3626_v49, %s5776_s8  ;;  %v8064_v37 = vld [vmem:[#allocation4 + $0x20] sm:$0xff] }
 0x61d   :  { %3551 = vrot.lane.b32.xlu0 %v3544_v16, %s5776_s8  ;;  %v3738_v16 = vmul.f32 %v6889_v21, %v7334_v15 }
 0x61e   :  { %v7841_v36 = vpop.permute.xlu1 %2383 }
 0x61f   :  { %9953 = vst [vmem:[#allocation217_spill] sm:$0xff] %v7841_v36  ;;  %v7851_v49 = vpop.permute.xlu0 %2301  ;;  %v3785_v20 = vrot.slane %v3738_v16, 3  ;;  %v3702_v16 = vrot.slane %v3656_v42, 3 }
 0x620   :  { %9954 = vst [vmem:[#allocation218_spill] sm:$0xff] %v7851_v49  ;;  %3681 = vrot.lane.b32.xlu1 %v3674_v11, %s5777_s13  ;;  %v8153_v49 = vld [vmem:[#allocation5 + $0x10] sm:$0x3f] }
 0x621   :  { %3599 = vrot.lane.b32.xlu0 %v3592_v3, %s5776_s8  ;;  %v3754_v3 = vsel %vm3264_vm5, %v9724_v33, %v3753_v22  ;;  %v7910_v22 = vstv %s7859_s25  ;;  %v3704_v28 = vsel %vm3264_vm5, %v3702_v16, %v3703_v12 }
 0x622   :  { %v7862_v31 = vpop.permute.xlu1 %2431  ;;  %v7957_v26 = vmul.f32 %v7953_v24, %v7910_v22 }
 0x623   :  { %9955 = vst [vmem:[#allocation219_spill] sm:$0xff] %v7862_v31  ;;  %v7878_v19 = vpop.permute.xlu0 %2349 }
 0x624   :  { %9956 = vst [vmem:[#allocation220_spill] sm:$0xff] %v7878_v19  ;;  %3713 = vrot.lane.b32.xlu1 %v3706_v27, %s5777_s13  ;;  %v7899_v27 = vmul.f32 %v7330_v7, %v9958_v5  ;;  %v9982_v62 = vrot.slane %v7957_v26, 2 }
 0x625   :  { %3631 = vrot.lane.b32.xlu0 %v3624_v54, %s5776_s8  ;;  %v3938_v54 = vmul.f32 %v9958_v5, %v7324_v46  ;;  %v9962_v46 = vld [vmem:[#allocation72_spill] sm:$0xff] }
 0x626   :  { %v7887_v11 = vpop.permute.xlu1 %2463  ;;  %v7925_v13 = vmul.f32 %v7348_v43, %v9962_v46  ;;  %v3946_v42 = vmul.f32 %v9962_v46, %v7334_v15  ;;  %v7950_v15 = vstv %s7881_s29  ;;  %v9969_v12 = vrot.slane %v7899_v27, 4 }
 0x627   :  { %9957 = vst [vmem:[#allocation221_spill] sm:$0xff] %v7887_v11  ;;  %v7903_v34 = vpop.permute.xlu0 %2381  ;;  %9966 = vst [vmem:[#allocation225_spill] sm:$0xff] %v7950_v15  ;;  %v3961_v52 = vrot.slane %v3938_v54, 4  ;;  %v8039_v43 = vmul.f32 %v7953_v24, %v7933_v32  ;;  %v9992_v45 = vrot.slane %v7899_v27, 4 }
 0x628   :  { %9959 = vst [vmem:[#allocation69_spill] sm:$0xff] %v7903_v34  ;;  %3761 = vrot.lane.b32.xlu1 %v3754_v3, %s5777_s13  ;;  %v9961_v3 = vrot.slane %v7872_v55, 3  ;;  %v3993_v29 = vrot.slane %v3946_v42, 4  ;;  %v9985_v55 = vrot.slane %v7975_v61, 4  ;;  %v9997_v40 = vrot.slane %v7925_v13, 4 }
 0x629   :  { %3679 = vrot.lane.b32.xlu0 %v3672_v2, %s5777_s13  ;;  %v7930_v2 = vstv %s7854_s23  ;;  %v3962_v54 = vsel %vm51_vm0, %v9969_v12, %v3961_v52  ;;  %v9973_v12 = vrot.slane %v7849_v51, 3  ;;  %v3936_v51 = vmul.f32 %v7375_v38, %v9958_v5 }
 0x62a   :  { %v7915_v33 = vpop.permute.xlu1 %2511  ;;  %v3786_v0 = vsel %vm3264_vm5, %v9961_v3, %v3785_v20  ;;  %9963 = vst [vmem:[#allocation72_spill] sm:$0xff] %v7930_v2  ;;  %v7945_v20 = vld [vmem:[#allocation4] sm:$0xff] }
 0x62b   :  { %9960 = vst [vmem:[#allocation222_spill] sm:$0xff] %v7915_v33  ;;  %v7940_v6 = vpop.permute.xlu0 %2429  ;;  %v2780_v3 = vmul.f32 %v7945_v20, %v7910_v22  ;;  %v3869_v21 = vmul.f32 %v7945_v20, %v7950_v15  ;;  %v7996_v7 = vmul.f32 %v7945_v20, %v7933_v32  ;;  %v3752_v16 = vsel %vm3264_vm5, %v3750_v8, %v9973_v12 }
 0x62c   :  { %9965 = vst [vmem:[#allocation224_spill] sm:$0xff] %v7940_v6  ;;  %3793 = vrot.lane.b32.xlu1 %v3786_v0, %s5777_s13  ;;  %v7960_v0 = vstv %s7884_s4  ;;  %v9976_v8 = vrot.slane %v7925_v13, 4  ;;  %v8042_v12 = vstv %s7943_s12  ;;  %v3944_v6 = vmul.f32 %v7391_v63, %v9962_v46 }
 0x62d   :  { %9967 = vst [vmem:[#allocation226_spill] sm:$0xff] %v7960_v0  ;;  %3711 = vrot.lane.b32.xlu0 %v3704_v28, %s5777_s13  ;;  %v7985_v28 = vmul.f32 %v7953_v24, %v7950_v15  ;;  %v2800_v42 = vrot.slane %v2780_v3, 2  ;;  %v3889_v5 = vrot.slane %v3869_v21, 4  ;;  %v4041_v21 = vrot.slane %v4018_v60, 4  ;;  %v8088_v60 = vld [vmem:[#allocation5] sm:$0xff] }
 0x62e   :  { %v7965_v30 = vpop.permute.xlu1 %2543  ;;  %v3994_v3 = vsel %vm51_vm0, %v9976_v8, %v3993_v29  ;;  %v8032_v29 = vmul.f32 %v7953_v24, %v8007_v48  ;;  %v8077_v63 = vstv %s7987_s15  ;;  %9991 = vst [vmem:[#allocation237_spill] sm:$0xff] %v8088_v60  ;;  %v8092_v34 = vmul.f32 %v8088_v60, %v7981_v50 }
 0x62f   :  { %9968 = vst [vmem:[#allocation227_spill] sm:$0xff] %v7965_v30  ;;  %v7991_v52 = vpop.permute.xlu0 %2461  ;;  %v8050_v17 = vsel %vm2735_vm4, %v2800_v42, %v9982_v62  ;;  %v9986_v62 = vld [vmem:[#allocation81_spill] sm:$0xff]  ;;  %v9988_v46 = vrot.slane %v7985_v28, 4  ;;  %v3990_v27 = vrot.slane %v3944_v6, 4  ;;  %v8132_v6 = vmul.f32 %v8064_v37, %v7933_v32 }
 0x630   :  { %9972 = vst [vmem:[#allocation228_spill] sm:$0xff] %v7991_v52  ;;  %3969 = vrot.lane.b32.xlu1 %v3962_v54, %s5772_s7  ;;  %v3782_v54 = vrot.slane %v3736_v44, 3  ;;  %v4026_v44 = vmul.f32 %v8022_v47, %v9977_v14  ;;  %9979 = vst [vmem:[#allocation231_spill] sm:$0xff] %v8032_v29  ;;  %v8068_v42 = vmul.f32 %v8064_v37, %v9986_v62  ;;  %v8109_v29 = vld [vmem:[#allocation4 + $0x18] sm:$0xff]  ;;  %v9995_v52 = vld [vmem:[#allocation84_spill] sm:$0xff] }
 0x631   :  { %3759 = vrot.lane.b32.xlu0 %v3752_v16, %s5777_s13  ;;  %v8027_v16 = vstv %s7938_s11  ;;  %9987 = vst [vmem:[#allocation81_spill] sm:$0xff] %v8077_v63  ;;  %v8162_v33 = vmul.f32 %v8109_v29, %v7933_v32  ;;  %v10000_v32 = vld [vmem:[#allocation87_spill] sm:$0xff] }
 0x632   :  { %v8010_v41 = vpop.permute.xlu1 %2591  ;;  %9978 = vst [vmem:[#allocation78_spill] sm:$0xff] %v8027_v16  ;;  %v3784_v38 = vsel %vm3264_vm5, %v3782_v54, %v9981_v35  ;;  %v4042_v35 = vsel %vm51_vm0, %v9985_v55, %v4041_v21  ;;  %v4073_v54 = vrot.slane %v4026_v44, 4  ;;  %v8082_v21 = vsel %vm51_vm0, %v3889_v5, %v9988_v46  ;;  %v8103_v44 = vld [vmem:[#allocation5 + $0x20] sm:$0xff] }
 0x633   :  { %9975 = vst [vmem:[#allocation230_spill] sm:$0xff] %v8010_v41  ;;  %v8034_v8 = vpop.permute.xlu0 %2509  ;;  %9989 = vst [vmem:[#allocation235_spill] sm:$0xff] %v8082_v21  ;;  %v4098_v46 = vmul.f32 %v8001_v39, %v9986_v62  ;;  %v8113_v21 = vmul.f32 %v8109_v29, %v7930_v2  ;;  %v8126_v31 = vmul.f32 %v8103_v44, %v9995_v52  ;;  %v9999_v13 = vrot.slane %v8068_v42, 4 }
 0x634   :  { %9980 = vst [vmem:[#allocation232_spill] sm:$0xff] %v8034_v8  ;;  %4001 = vrot.lane.b32.xlu1 %v3994_v3, %s5772_s7  ;;  %v3958_v3 = vrot.slane %v3936_v51, 4  ;;  %v8096_v8 = vmul.f32 %v8064_v37, %v7930_v2  ;;  %v4106_v2 = vmul.f32 %v8022_v47, %v9995_v52  ;;  %v8151_v30 = vmul.f32 %v8103_v44, %v7981_v50 }
 0x635   :  { %3791 = vrot.lane.b32.xlu0 %v3784_v38, %s5777_s13  ;;  %v8070_v38 = vld [vmem:[#allocation5 + $0x8] sm:$0xff]  ;;  %v4121_v36 = vrot.slane %v4098_v46, 4  ;;  %v8177_v57 = vmul.f32 %v8064_v37, %v10000_v32 }
 0x636   :  { %v8056_v25 = vpop.permute.xlu1 %2623  ;;  %v8074_v51 = vmul.f32 %v8070_v38, %v7981_v50  ;;  %v3960_v5 = vsel %vm51_vm0, %v3958_v3, %v9992_v45  ;;  %v4016_v45 = vmul.f32 %v8109_v29, %v9970_v1  ;;  %v9994_v3 = vrot.slane %v8020_v58, 4 }
 0x637   :  { %9984 = vst [vmem:[#allocation234_spill] sm:$0xff] %v8056_v25  ;;  %v8085_v55 = vpop.permute.xlu0 %2541  ;;  %v2789_v19 = vmul.f32 %v8070_v38, %v8042_v12 }
 0x638   :  { %9990 = vst [vmem:[#allocation236_spill] sm:$0xff] %v8085_v55  ;;  %4049 = vrot.lane.b32.xlu1 %v4042_v35, %s5772_s7  ;;  %v8107_v35 = vmul.f32 %v8103_v44, %v7978_v56  ;;  %v4074_v41 = vsel %vm51_vm0, %v9994_v3, %v4073_v54  ;;  %v8140_v54 = vld [vmem:[#allocation4 + $0x10] sm:$0x3f] }
 0x639   :  { %3967 = vrot.lane.b32.xlu0 %v3960_v5, %s5772_s7  ;;  %v8134_v5 = vld [vmem:[#allocation5 + $0x18] sm:$0xff]  ;;  %v2782_v3 = vmul.f32 %v8140_v54, %v7910_v22  ;;  %v2825_v23 = vrot.slane %v2789_v19, 2  ;;  %v4178_v19 = vmul.f32 %v8001_v39, %v10000_v32 }
 0x63a   :  { %v8116_v55 = vpop.permute.xlu1 %2671  ;;  %v8138_v1 = vmul.f32 %v8134_v5, %v7978_v56  ;;  %v2790_v56 = vmul.f32 %v8153_v49, %v8042_v12  ;;  %v4024_v25 = vmul.f32 %v8134_v5, %v9977_v14 }
 0x63b   :  { %9993 = vst [vmem:[#allocation238_spill] sm:$0xff] %v8116_v55  ;;  %v8146_v53 = vpop.permute.xlu0 %2589  ;;  %v3992_v55 = vsel %vm51_vm0, %v3990_v27, %v9997_v40  ;;  %v4122_v40 = vsel %vm51_vm0, %v9999_v13, %v4121_v36  ;;  %v4153_v27 = vrot.slane %v4106_v2, 4  ;;  %v2803_v11 = vrot.slane %v2782_v3, 2 }
 0x63c   :  { %9996 = vst [vmem:[#allocation84_spill] sm:$0xff] %v8146_v53  ;;  %4081 = vrot.lane.b32.xlu1 %v4074_v41, %s5772_s7  ;;  %v2788_v41 = vmul.f32 %v8088_v60, %v8042_v12  ;;  %v4038_v53 = vrot.slane %v4016_v45, 4  ;;  %v3879_v45 = vmul.f32 %v8153_v49, %v8077_v63  ;;  %v2827_v36 = vrot.slane %v2790_v56, 2 }
 0x63d   :  { %3999 = vrot.lane.b32.xlu0 %v3992_v55, %s5772_s7  ;;  %v3871_v55 = vmul.f32 %v8140_v54, %v7950_v15  ;;  %v3877_v2 = vmul.f32 %v8088_v60, %v8077_v63  ;;  %v10002_v13 = vrot.slane %v7975_v61, 4  ;;  %v4096_v56 = vmul.f32 %v8109_v29, %v9986_v62 }
 0x63e   :  { %v8167_v59 = vpop.permute.xlu1 %2703  ;;  %v2824_v3 = vrot.slane %v2788_v41, 2  ;;  %v4201_v60 = vrot.slane %v4178_v19, 4 }
 0x63f   :  { %9998 = vst [vmem:[#allocation239_spill] sm:$0xff] %v8167_v59  ;;  %v8183_v14 = vpop.permute.xlu0 %2621  ;;  %v4040_v46 = vsel %vm51_vm0, %v4038_v53, %v10002_v13  ;;  %v3878_v59 = vmul.f32 %v8070_v38, %v8077_v63  ;;  %v10005_v13 = vld [vmem:[#allocation90_spill] sm:$0xff]  ;;  %v8223_v53 = vsel %vm2735_vm4, %v2825_v23, %v2827_v36  ;;  %v3913_v18 = vrot.slane %v3877_v2, 4 }
 0x640   :  { %10001 = vst [vmem:[#allocation87_spill] sm:$0xff] %v8183_v14  ;;  %4129 = vrot.lane.b32.xlu1 %v4122_v40, %s5770_s5  ;;  %v4070_v14 = vrot.slane %v4024_v25, 4  ;;  %v10004_v40 = vrot.slane %v8126_v31, 4  ;;  %v8206_v41 = vmul.f32 %v8103_v44, %v10005_v13  ;;  %v4186_v63 = vmul.f32 %v8022_v47, %v10005_v13 }
 0x641   :  { %4047 = vrot.lane.b32.xlu0 %v4040_v46, %s5772_s7  ;;  %v8212_v25 = vmul.f32 %v8134_v5, %v7981_v50  ;;  %v10006_v46 = vrot.slane %v7957_v26, 2  ;;  %v8229_v26 = vsel %vm2735_vm4, %v2824_v3, %v2825_v23  ;;  %v10009_v36 = vrot.slane %v8177_v57, 4  ;;  %v10012_v3 = vld [vmem:[#allocation20_spill] sm:$0xff] }
 0x642   :  { %v8196_v15 = vpop.permute.xlu1 %2880  ;;  %v4154_v61 = vsel %vm51_vm0, %v10004_v40, %v4153_v27  ;;  %v3916_v27 = vrot.slane %v3879_v45, 4  ;;  %v4072_v50 = vsel %vm51_vm0, %v4070_v14, %v10008_v4  ;;  %v9737_v58 = vrot.slane %v8206_v41, 4  ;;  %v10010_v14 = vld [vmem:[#allocation93_spill] sm:$0xff] }
 0x643   :  { %10003 = vst [vmem:[#allocation240_spill] sm:$0xff] %v8196_v15  ;;  %v8217_v62 = vsel %vm2735_vm4, %v10006_v46, %v2803_v11  ;;  %v3892_v15 = vrot.slane %v3871_v55, 4  ;;  %v8219_v40 = vpop.permute.xlu0 %2669  ;;  %v3914_v11 = vrot.slane %v3878_v59, 4  ;;  %v4118_v55 = vrot.slane %v4096_v56, 4  ;;  %v10011_v59 = vld [vmem:[#allocation18_spill] sm:$0xff] }
 0x644   :  { %10007 = vst [vmem:[#allocation90_spill] sm:$0xff] %v8219_v40  ;;  %4161 = vrot.lane.b32.xlu1 %v4154_v61, %s5770_s5  ;;  %v4104_v61 = vmul.f32 %v8134_v5, %v9995_v52  ;;  %v4202_v2 = vsel %vm51_vm0, %v10009_v36, %v4201_v60  ;;  %v4233_v4 = vrot.slane %v4186_v63, 4  ;;  %v8242_v23 = vmul.f32 %v8064_v37, %v10010_v14 }
 0x645   :  { %4079 = vrot.lane.b32.xlu0 %v4072_v50, %s5772_s7  ;;  %v1973_v19 = vadd.f32 %v10011_v59, %v8039_v43  ;;  %v1993_v56 = vadd.f32 %v10012_v3, %v8074_v51  ;;  %v10013_v46 = vrot.slane %v7985_v28, 4  ;;  %v8254_v60 = vsel %vm51_vm0, %v3914_v11, %v3916_v27  ;;  %v10017_v50 = vld [vmem:[#allocation23_spill] sm:$0xff]  ;;  %v10020_v27 = vld [vmem:[#allocation25_spill] sm:$0xff]  ;;  %v10021_v3 = vld [vmem:[#allocation26_spill] sm:$0xff] }
 0x646   :  { %v8232_v45 = vpop.permute.xlu1 %2912  ;;  %10015 = vst [vmem:[#allocation18_spill] sm:$0xff] %v8254_v60  ;;  %v1972_v43 = vadd.f32 %v10017_v50, %v7996_v7  ;;  %v8264_v36 = vsel %vm51_vm0, %v3913_v18, %v3914_v11  ;;  %v10019_v28 = vrot.slane %v8068_v42, 4  ;;  %v4258_v51 = vmul.f32 %v8001_v39, %v10010_v14  ;;  %v10023_v50 = vld [vmem:[#allocation28_spill] sm:$0xff] }
 0x647   :  { %v8251_v52 = vsel %vm51_vm0, %v10013_v46, %v3892_v15  ;;  %v8258_v63 = vpop.permute.xlu0 %2701  ;;  %10018 = vst [vmem:[#allocation23_spill] sm:$0xff] %v8264_v36  ;;  %v1992_v59 = vadd.f32 %v10020_v27, %v8092_v34  ;;  %v8274_v46 = vadd.f32 %v10021_v3, %v1973_v19  ;;  %v4176_v18 = vmul.f32 %v8109_v29, %v10000_v32  ;;  %v10025_v32 = vld [vmem:[#allocation33_spill] sm:$0xff]  ;;  %v10032_v36 = vld [vmem:[#allocation38_spill] sm:$0xff] }
 0x648   :  { %10014 = vst [vmem:[#allocation93_spill] sm:$0xff] %v8251_v52  ;;  %10016 = vst [vmem:[#allocation20_spill] sm:$0xff] %v8258_v63  ;;  %4209 = vrot.lane.b32.xlu1 %v4202_v2, %s5770_s5  ;;  %v4120_v15 = vsel %vm51_vm0, %v4118_v55, %v10019_v28  ;;  %v4150_v2 = vrot.slane %v4104_v61, 4  ;;  %v4234_v42 = vsel %vm51_vm0, %v9737_v58, %v4233_v4  ;;  %v10022_v55 = vld [vmem:[#allocation96_spill] sm:$0xff]  ;;  %v10024_v28 = vld [vmem:[#allocation31_spill] sm:$0xff] }
 0x649   :  { %4127 = vrot.lane.b32.xlu0 %v4120_v15, %s5770_s5  ;;  %v8287_v34 = vmul.f32 %v8103_v44, %v10022_v55  ;;  %v4266_v19 = vmul.f32 %v8022_v47, %v10022_v55  ;;  %v8292_v61 = vadd.f32 %v10023_v50, %v1993_v56  ;;  %v8295_v15 = vadd.f32 %v10024_v28, %v1972_v43  ;;  %v10028_v58 = vld [vmem:[#allocation34_spill] sm:$0xff]  ;;  %v10029_v56 = vld [vmem:[#allocation36_spill] sm:$0xff] }
 0x64a   :  { %v8277_v7 = vpop.permute.xlu1 %2960  ;;  %v8298_v27 = vadd.f32 %v10025_v32, %v1992_v59  ;;  %v8302_v4 = vmul.f32 %v8140_v54, %v8007_v48  ;;  %v1923_v11 = vadd.f32 %v10028_v58, %v8096_v8  ;;  %v1943_v50 = vadd.f32 %v10029_v56, %v8107_v35  ;;  %v10031_v32 = vld [vmem:[#allocation39_spill] sm:$0xff] }
 0x64b   :  { %v8304_v3 = vpop.permute.xlu0 %2878  ;;  %v10030_v43 = vrot.slane %v8126_v31, 4  ;;  %v4281_v28 = vrot.slane %v4258_v51, 4  ;;  %v1922_v48 = vadd.f32 %v10031_v32, %v8113_v21  ;;  %v1975_v60 = vadd.f32 %v10032_v36, %v8132_v6  ;;  %v10036_v6 = vld [vmem:[#allocation41_spill] sm:$0xff]  ;;  %v10041_v32 = vld [vmem:[#allocation42_spill] sm:$0xff] }
 0x64c   :  { %10026 = vst [vmem:[#allocation25_spill] sm:$0xff] %v8302_v4  ;;  %10027 = vst [vmem:[#allocation26_spill] sm:$0xff] %v8304_v3  ;;  %4241 = vrot.lane.b32.xlu1 %v4234_v42, %s5770_s5  ;;  %v4198_v42 = vrot.slane %v4176_v18, 4  ;;  %v4184_v8 = vmul.f32 %v8134_v5, %v10005_v13  ;;  %v10034_v31 = vrot.slane %v8242_v23, 4  ;;  %v4313_v51 = vrot.slane %v4266_v19, 4  ;;  %v10037_v18 = vld [vmem:[#allocation40_spill] sm:$0xff] }
 0x64d   :  { %v4152_v59 = vsel %vm51_vm0, %v4150_v2, %v10030_v43  ;;  %v10035_v2 = vld [vmem:[#allocation99_spill] sm:$0xff]  ;;  %v1942_v36 = vadd.f32 %v10036_v6, %v8138_v1  ;;  %v1995_v56 = vadd.f32 %v10037_v18, %v8151_v30  ;;  %v8337_v13 = vstv %s8256_s16  ;;  %v10043_v6 = vld [vmem:[#allocation45_spill] sm:$0xff]  ;;  %v10044_v43 = vld [vmem:[#allocation44_spill] sm:$0xff] }
 0x64e   :  { %4159 = vrot.lane.b32.xlu0 %v4152_v59, %s5770_s5  ;;  %v8319_v52 = vpop.permute.xlu1 %2992  ;;  %v4282_v35 = vsel %vm51_vm0, %v10034_v31, %v4281_v28  ;;  %v8329_v21 = vmul.f32 %v8064_v37, %v10035_v2  ;;  %10038 = vst [vmem:[#allocation28_spill] sm:$0xff] %v8337_v13  ;;  %v10040_v19 = vld [vmem:[#allocation43_spill] sm:$0xff]  ;;  %v2027_v31 = vadd.f32 %v10041_v32, %v1923_v11  ;;  %v10042_v58 = vrot.slane %v8177_v57, 4 }
 0x64f   :  { %10033 = vst [vmem:[#allocation96_spill] sm:$0xff] %v8319_v52  ;;  %v8339_v59 = vpop.permute.xlu0 %2910  ;;  %v1974_v28 = vadd.f32 %v10040_v19, %v8162_v33  ;;  %v4338_v30 = vmul.f32 %v8001_v39, %v10035_v2  ;;  %v1994_v18 = vadd.f32 %v10043_v6, %v8212_v25  ;;  %v2047_v4 = vadd.f32 %v10044_v43, %v1943_v50  ;;  %v10048_v50 = vld [vmem:[#allocation47_spill] sm:$0xff]  ;;  %v10049_v43 = vld [vmem:[#allocation46_spill] sm:$0xff]  ;;  %v10051_v6 = vld [vmem:[#allocation48_spill] sm:$0xff] }
 0x650   :  { %10039 = vst [vmem:[#allocation31_spill] sm:$0xff] %v8339_v59  ;;  %4289 = vrot.lane.b32.xlu1 %v4282_v35, %s5768_s30  ;;  %v4200_v1 = vsel %vm51_vm0, %v4198_v42, %v10042_v58  ;;  %v4230_v35 = vrot.slane %v4184_v8, 4  ;;  %v4256_v33 = vmul.f32 %v8109_v29, %v10010_v14  ;;  %v10046_v57 = vrot.slane %v8287_v34, 4  ;;  %v10047_v58 = vld [vmem:[#allocation102_spill] sm:$0xff] }
 0x651   :  { %v8364_v19 = vmul.f32 %v8103_v44, %v10047_v58  ;;  %v4346_v25 = vmul.f32 %v8022_v47, %v10047_v58  ;;  %v2026_v8 = vadd.f32 %v10048_v50, %v1922_v48  ;;  %v8370_v32 = vadd.f32 %v10049_v43, %v1975_v60  ;;  %v10056_v43 = vld [vmem:[#allocation53_spill] sm:$0xff] }
 0x652   :  { %4207 = vrot.lane.b32.xlu0 %v4200_v1, %s5770_s5  ;;  %v8354_v13 = vpop.permute.xlu1 %3040  ;;  %v4314_v11 = vsel %vm51_vm0, %v10046_v57, %v4313_v51  ;;  %v10050_v1 = vld [vmem:[#allocation49_spill] sm:$0xff]  ;;  %v8374_v3 = vadd.f32 %v10051_v6, %v1995_v56  ;;  %v10053_v57 = vld [vmem:[#allocation51_spill] sm:$0xff]  ;;  %v10055_v48 = vrot.slane %v8206_v41, 4  ;;  %v4362_v50 = vrot.slane %v4338_v30, 5  ;;  %v10057_v56 = vld [vmem:[#allocation52_spill] sm:$0xff] }
 0x653   :  { %10045 = vst [vmem:[#allocation33_spill] sm:$0xff] %v8354_v13  ;;  %v2046_v14 = vadd.f32 %v10050_v1, %v1942_v36  ;;  %v8376_v51 = vpop.permute.xlu0 %2958  ;;  %v8380_v42 = vadd.f32 %v10053_v57, %v1974_v28  ;;  %v10054_v13 = vld [vmem:[#allocation50_spill] sm:$0xff]  ;;  %v8389_v36 = vadd.f32 %v10056_v43, %v1994_v18  ;;  %v8392_v1 = vadd.f32 %v10057_v56, %v2047_v4  ;;  %v10059_v18 = vld [vmem:[#allocation105_spill] sm:$0xff]  ;;  %v10060_v4 = vld [vmem:[#allocation55_spill] sm:$0xff] }
 0x654   :  { %10052 = vst [vmem:[#allocation34_spill] sm:$0xff] %v8376_v51  ;;  %4321 = vrot.lane.b32.xlu1 %v4314_v11, %s5768_s30  ;;  %v8383_v63 = vadd.f32 %v10054_v13, %v2027_v31  ;;  %v4232_v60 = vsel %vm51_vm0, %v4230_v35, %v10055_v48  ;;  %v4278_v11 = vrot.slane %v4256_v33, 4  ;;  %v4264_v13 = vmul.f32 %v8134_v5, %v10022_v55  ;;  %v10062_v33 = vld [vmem:[#allocation54_spill] sm:$0xff]  ;;  %v10070_v51 = vld [vmem:[#allocation61_spill] sm:$0xff] }
 0x655   :  { %v10058_v28 = vrot.slane %v8329_v21, 5  ;;  %v4394_v30 = vrot.slane %v4346_v25, 5  ;;  %v8405_v35 = vmul.f32 %v8064_v37, %v10059_v18  ;;  %v8408_v57 = vadd.f32 %v10060_v4, %v2026_v8  ;;  %v10064_v25 = vld [vmem:[#allocation56_spill] sm:$0xff]  ;;  %v10066_v4 = vld [vmem:[#allocation57_spill] sm:$0xff] }
 0x656   :  { %4239 = vrot.lane.b32.xlu0 %v4232_v60, %s5770_s5  ;;  %v8395_v6 = vpop.permute.xlu1 %3072  ;;  %v2198_v48 = vadd.f32 %v10062_v33, %v8274_v46  ;;  %v2719_v55 = vmul.f32 %v8064_v37, %v7936_v10  ;;  %v8416_v60 = vmul.f32 %v8103_v44, %v8027_v16  ;;  %v2230_v43 = vadd.f32 %v10064_v25, %v8292_v61 }
 0x657   :  { %v4363_v41 = vsel %vm4353_vm6, %v10058_v28, %v4362_v50  ;;  %10061 = vst [vmem:[#allocation36_spill] sm:$0xff] %v8408_v57  ;;  %v8418_v50 = vpop.permute.xlu0 %2990  ;;  %v2728_v8 = vmul.f32 %v8022_v47, %v8027_v16  ;;  %v10065_v56 = vrot.slane %v8242_v23, 4  ;;  %v4419_v28 = vmul.f32 %v8001_v39, %v10059_v18 }
 0x658   :  { %10063 = vst [vmem:[#allocation39_spill] sm:$0xff] %v8418_v50  ;;  %4370 = vrot.lane.b32.xlu1 %v4363_v41, %s5774_s24  ;;  %v8431_v33 = vadd.f32 %v10066_v4, %v2046_v14  ;;  %v2720_v31 = vmul.f32 %v8001_v39, %v7936_v10  ;;  %v4310_v41 = vrot.slane %v4264_v13, 4  ;;  %v4336_v25 = vmul.f32 %v8109_v29, %v10035_v2  ;;  %v10068_v50 = vld [vmem:[#allocation108_spill] sm:$0xff]  ;;  %v10069_v13 = vld [vmem:[#allocation59_spill] sm:$0xff] }
 0x659   :  { %v4280_v46 = vsel %vm51_vm0, %v4278_v11, %v10065_v56  ;;  %v10067_v23 = vrot.slane %v8364_v19, 5  ;;  %v8446_v14 = vmul.f32 %v8103_v44, %v10068_v50  ;;  %v4427_v4 = vmul.f32 %v8022_v47, %v10068_v50 }
 0x65a   :  { %4287 = vrot.lane.b32.xlu0 %v4280_v46, %s5768_s30  ;;  %v8436_v61 = vpop.permute.xlu1 %3120  ;;  %v2197_v46 = vadd.f32 %v10069_v13, %v8295_v15  ;;  %v8454_v59 = vadd.f32 %v10070_v51, %v8298_v27  ;;  %v2742_v2 = vrot.slane %v2719_v55, 2  ;;  %v2766_v57 = vrot.slane %v8416_v60, 2 }
 0x65b   :  { %v4395_v11 = vsel %vm4353_vm6, %v10067_v23, %v4394_v30  ;;  %v8457_v30 = vpop.permute.xlu0 %3038  ;;  %v2768_v23 = vrot.slane %v2728_v8, 2  ;;  %v2718_v56 = vmul.f32 %v8109_v29, %v7936_v10  ;;  %v10072_v52 = vrot.slane %v8287_v34, 4 }
 0x65c   :  { %10071 = vst [vmem:[#allocation38_spill] sm:$0xff] %v8457_v30  ;;  %4402 = vrot.lane.b32.xlu1 %v4395_v11, %s5774_s24  ;;  %v4442_v15 = vrot.slane %v4419_v28, 5  ;;  %v2744_v13 = vrot.slane %v2720_v31, 2  ;;  %v8467_v27 = vmul.f32 %v8064_v37, %v7910_v22  ;;  %v4359_v51 = vrot.slane %v4336_v25, 5  ;;  %v10075_v31 = vld [vmem:[#allocation111_spill] sm:$0xff]  ;;  %v10076_v11 = vld [vmem:[#allocation62_spill] sm:$0xff] }
 0x65d   :  { %v4312_v40 = vsel %vm51_vm0, %v4310_v41, %v10072_v52  ;;  %v4344_v60 = vmul.f32 %v8134_v5, %v10047_v58  ;;  %v10074_v8 = vrot.slane %v8405_v35, 5  ;;  %v9746_v52 = vrot.slane %v8446_v14, 5 }
 0x65e   :  { %4319 = vrot.lane.b32.xlu0 %v4312_v40, %s5768_s30  ;;  %v8470_v55 = vpop.permute.xlu1 %3152  ;;  %v4474_v28 = vrot.slane %v4427_v4, 5  ;;  %v8480_v41 = vmul.f32 %v8064_v37, %v10075_v31  ;;  %v2358_v10 = vadd.f32 %v10076_v11, %v2198_v48  ;;  %v10077_v40 = vld [vmem:[#allocation64_spill] sm:$0xff]  ;;  %v8485_v30 = vsel %vm2735_vm4, %v2742_v2, %v2744_v13 }
 0x65f   :  { %10073 = vst [vmem:[#allocation99_spill] sm:$0xff] %v8470_v55  ;;  %v4443_v34 = vsel %vm4353_vm6, %v10074_v8, %v4442_v15  ;;  %v2390_v25 = vadd.f32 %v10077_v40, %v2230_v43  ;;  %10078 = vst [vmem:[#allocation41_spill] sm:$0xff] %v8485_v30  ;;  %v2785_v58 = vmul.f32 %v8001_v39, %v7910_v22  ;;  %v8489_v55 = vpop.permute.xlu0 %3070  ;;  %v2741_v15 = vrot.slane %v2718_v56, 2 }
 0x660   :  { %10079 = vst [vmem:[#allocation40_spill] sm:$0xff] %v8489_v55  ;;  %4450 = vrot.lane.b32.xlu1 %v4443_v34, %s5775_s27  ;;  %v8493_v4 = vsel %vm2735_vm4, %v2766_v57, %v2768_v23  ;;  %v10080_v8 = vrot.slane %v8329_v21, 5  ;;  %v4499_v43 = vmul.f32 %v8001_v39, %v10075_v31  ;;  %v2806_v13 = vrot.slane %v8467_v27, 2 }
 0x661   :  { %v2726_v11 = vmul.f32 %v8134_v5, %v8027_v16  ;;  %v4391_v40 = vrot.slane %v4344_v60, 5  ;;  %v4417_v56 = vmul.f32 %v8109_v29, %v10059_v18  ;;  %v4475_v21 = vsel %vm4353_vm6, %v9746_v52, %v4474_v28  ;;  %v10085_v52 = vld [vmem:[#allocation67_spill] sm:$0xff] }
 0x662   :  { %v4361_v48 = vsel %vm4353_vm6, %v4359_v51, %v10080_v8  ;;  %v8504_v34 = vpop.permute.xlu1 %3200  ;;  %v10082_v51 = vld [vmem:[#allocation114_spill] sm:$0xff]  ;;  %v8519_v60 = vsel %vm2735_vm4, %v2741_v15, %v2742_v2  ;;  %v2792_v18 = vmul.f32 %v8103_v44, %v8042_v12  ;;  %v2793_v16 = vmul.f32 %v8022_v47, %v8042_v12 }
 0x663   :  { %4368 = vrot.lane.b32.xlu0 %v4361_v48, %s5774_s24  ;;  %10081 = vst [vmem:[#allocation43_spill] sm:$0xff] %v8504_v34  ;;  %v8514_v27 = vmul.f32 %v8103_v44, %v10082_v51  ;;  %v4507_v8 = vmul.f32 %v8022_v47, %v10082_v51  ;;  %10083 = vst [vmem:[#allocation42_spill] sm:$0xff] %v8519_v60  ;;  %v2808_v48 = vrot.slane %v2785_v58, 2  ;;  %v8525_v28 = vpop.permute.xlu0 %3118  ;;  %v10086_v55 = vrot.slane %v8364_v19, 5 }
 0x664   :  { %10084 = vst [vmem:[#allocation45_spill] sm:$0xff] %v8525_v28  ;;  %4482 = vrot.lane.b32.xlu1 %v4475_v21, %s5775_s27  ;;  %v2357_v23 = vadd.f32 %v10085_v52, %v2197_v46  ;;  %v2783_v34 = vmul.f32 %v8109_v29, %v7910_v22  ;;  %v4522_v58 = vrot.slane %v4499_v43, 5  ;;  %v2765_v60 = vrot.slane %v2726_v11, 2  ;;  %v10088_v43 = vld [vmem:[#allocation117_spill] sm:$0xff] }
 0x665   :  { %v4393_v2 = vsel %vm4353_vm6, %v4391_v40, %v10086_v55  ;;  %v8535_v15 = vsel %vm2735_vm4, %v2806_v13, %v2808_v48  ;;  %v4439_v30 = vrot.slane %v4417_v56, 5  ;;  %v4425_v46 = vmul.f32 %v8134_v5, %v10068_v50 }
 0x666   :  { %v8538_v28 = vpop.permute.xlu1 %3232  ;;  %v10087_v52 = vrot.slane %v8480_v41, 5  ;;  %v4554_v55 = vrot.slane %v4507_v8, 5  ;;  %v8548_v40 = vmul.f32 %v8064_v37, %v10088_v43  ;;  %v8551_v11 = vsel %vm2735_vm4, %v2765_v60, %v2766_v57  ;;  %v10093_v60 = vld [vmem:[#allocation71_spill] sm:$0xff] }
 0x667   :  { %4400 = vrot.lane.b32.xlu0 %v4393_v2, %s5774_s24  ;;  %10089 = vst [vmem:[#allocation44_spill] sm:$0xff] %v8551_v11  ;;  %v2830_v56 = vrot.slane %v2792_v18, 2  ;;  %v2832_v21 = vrot.slane %v2793_v16, 2  ;;  %v2791_v48 = vmul.f32 %v8134_v5, %v8042_v12  ;;  %v8555_v50 = vpop.permute.xlu0 %3150  ;;  %v10091_v2 = vld [vmem:[#allocation70_spill] sm:$0xff]  ;;  %v2805_v8 = vrot.slane %v2783_v34, 2  ;;  %s8661_s24 = sld [smem:[#allocation11 + $0x28]] }
 0x668   :  { %v4523_v22 = vsel %vm4353_vm6, %v10087_v52, %v4522_v58  ;;  %10090 = vst [vmem:[#allocation102_spill] sm:$0xff] %v8555_v50  ;;  %v2389_v58 = vadd.f32 %v10091_v2, %v8454_v59  ;;  %v10092_v52 = vrot.slane %v8405_v35, 5  ;;  %v4579_v57 = vmul.f32 %v8001_v39, %v10088_v43  ;;  %v10094_v18 = vld [vmem:[#allocation74_spill] sm:$0xff] }
 0x669   :  { %4530 = vrot.lane.b32.xlu1 %v4523_v22, %s5775_s27  ;;  %v2518_v16 = vadd.f32 %v10093_v60, %v2358_v10  ;;  %v2550_v11 = vadd.f32 %v10094_v18, %v2390_v25  ;;  %v4471_v12 = vrot.slane %v4425_v46, 5  ;;  %v4497_v59 = vmul.f32 %v8109_v29, %v10075_v31  ;;  %v10097_v22 = vld [vmem:[#allocation120_spill] sm:$0xff]  ;;  %v10098_v25 = vld [vmem:[#allocation83_spill] sm:$0xff] }
 0x66a   :  { %v4441_v19 = vsel %vm4353_vm6, %v4439_v30, %v10092_v52  ;;  %v8568_v50 = vpop.permute.xlu1 %3281  ;;  %v10096_v34 = vrot.slane %v8514_v27, 5  ;;  %v4600_v30 = vrot.slane %v8548_v40, 5  ;;  %v4586_v2 = vmul.f32 %v8103_v44, %v10097_v22 }
 0x66b   :  { %4448 = vrot.lane.b32.xlu0 %v4441_v19, %s5775_s27  ;;  %10095 = vst [vmem:[#allocation47_spill] sm:$0xff] %v8568_v50  ;;  %v4587_v10 = vmul.f32 %v8022_v47, %v10097_v22  ;;  %v2678_v19 = vadd.f32 %v10098_v25, %v2518_v16  ;;  %v8582_v46 = vsel %vm2735_vm4, %v2830_v56, %v2832_v21  ;;  %v2829_v31 = vrot.slane %v2791_v48, 2  ;;  %v8587_v60 = vpop.permute.xlu0 %3198 }
 0x66c   :  { %v4555_v35 = vsel %vm4353_vm6, %v10096_v34, %v4554_v55  ;;  %v8585_v52 = vsel %vm2735_vm4, %v2805_v8, %v2806_v13  ;;  %10099 = vst [vmem:[#allocation46_spill] sm:$0xff] %v8587_v60  ;;  %v10100_v55 = vld [vmem:[#allocation86_spill] sm:$0xff]  ;;  %v10101_v18 = vrot.slane %v8446_v14, 5  ;;  %v4602_v50 = vrot.slane %v4579_v57, 5 }
 0x66d   :  { %4562 = vrot.lane.b32.xlu1 %v4555_v35, %s5775_s27  ;;  %v2710_v40 = vadd.f32 %v10100_v55, %v2550_v11  ;;  %v4505_v16 = vmul.f32 %v8134_v5, %v10082_v51  ;;  %v8597_v21 = vsel %vm2735_vm4, %v2829_v31, %v2830_v56  ;;  %v4519_v13 = vrot.slane %v4497_v59, 5  ;;  %v10103_v11 = vld [vmem:[#allocation123_spill] sm:$0xff]  ;;  %v10105_v31 = vld [vmem:[#allocation82_spill] sm:$0xff] }
 0x66e   :  { %v4473_v34 = vsel %vm4353_vm6, %v4471_v12, %v10101_v18  ;;  %10102 = vst [vmem:[#allocation49_spill] sm:$0xff] %v8597_v21  ;;  %v8600_v48 = vpop.permute.xlu1 %3313  ;;  %v4577_v8 = vmul.f32 %v8109_v29, %v10088_v43  ;;  %v4658_v14 = vmul.f32 %v8064_v37, %v10103_v11  ;;  %v4603_v12 = vsel %vm4353_vm6, %v4600_v30, %v4602_v50  ;;  %v10104_v56 = vld [vmem:[#allocation79_spill] sm:$0xff] }
 0x66f   :  { %4480 = vrot.lane.b32.xlu0 %v4473_v34, %s5775_s27  ;;  %v4632_v57 = vrot.slane %v4586_v2, 5  ;;  %v4634_v35 = vrot.slane %v4587_v10, 5  ;;  %v4659_v51 = vmul.f32 %v8001_v39, %v10103_v11  ;;  %v2517_v25 = vadd.f32 %v10104_v56, %v2357_v23  ;;  %v8612_v18 = vpop.permute.xlu0 %3230  ;;  %v10108_v23 = vld [vmem:[#allocation126_spill] sm:$0xff]  ;;  %v10109_v56 = vld [vmem:[#allocation91_spill] sm:$0xff] }
 0x670   :  { %v2549_v55 = vadd.f32 %v10105_v31, %v2389_v58  ;;  %v2815_v59 = vadd.f32 %v8217_v62, %v2678_v19  ;;  %10106 = vst [vmem:[#allocation48_spill] sm:$0xff] %v8612_v18  ;;  %v4585_v43 = vmul.f32 %v8134_v5, %v10097_v22  ;;  %v8618_v50 = vadd.f32 %v8223_v53, %v2710_v40  ;;  %v10144_v18 = vld [vmem:[#allocation221_spill] sm:$0xff] }
 0x671   :  { %4610 = vrot.lane.b32.xlu1 %v4603_v12, %s5776_s8  ;;  %v10107_v2 = vrot.slane %v8480_v41, 5  ;;  %v4551_v34 = vrot.slane %v4505_v16, 5  ;;  %v4666_v58 = vmul.f32 %v8103_v44, %v10108_v23  ;;  %v2677_v62 = vadd.f32 %v10109_v56, %v2517_v25  ;;  %v10111_v16 = vld [vmem:[#allocation129_spill] sm:$0xff] }
 0x672   :  { %v8627_v19 = vpop.permute.xlu1 %3361  ;;  %v4599_v12 = vrot.slane %v4577_v8, 5  ;;  %v4680_v31 = vrot.slane %v4658_v14, 5  ;;  %v4667_v53 = vmul.f32 %v8022_v47, %v10108_v23  ;;  %v4635_v22 = vsel %vm4353_vm6, %v4632_v57, %v4634_v35  ;;  %v10113_v14 = vld [vmem:[#allocation132_spill] sm:$0xff] }
 0x673   :  { %v4521_v10 = vsel %vm4353_vm6, %v4519_v13, %v10107_v2  ;;  %10110 = vst [vmem:[#allocation51_spill] sm:$0xff] %v8627_v19  ;;  %v4682_v41 = vrot.slane %v4659_v51, 5  ;;  %v4657_v40 = vmul.f32 %v8109_v29, %v10103_v11  ;;  %v4818_v13 = vmul.f32 %v8064_v37, %v10111_v16  ;;  %v8636_v2 = vpop.permute.xlu0 %3279 }
 0x674   :  { %4528 = vrot.lane.b32.xlu0 %v4521_v10, %s5775_s27  ;;  %10112 = vst [vmem:[#allocation50_spill] sm:$0xff] %v8636_v2  ;;  %v4631_v25 = vrot.slane %v4585_v43, 5  ;;  %v4819_v8 = vmul.f32 %v8001_v39, %v10111_v16  ;;  %v8643_v10 = vmul.f32 %v8103_v44, %v10113_v14  ;;  %v4827_v35 = vmul.f32 %v8022_v47, %v10113_v14 }
 0x675   :  { %4642 = vrot.lane.b32.xlu1 %v4635_v22, %s5776_s8  ;;  %v10114_v11 = vrot.slane %v8514_v27, 5  ;;  %v4601_v56 = vsel %vm4353_vm6, %v4599_v12, %v4600_v30  ;;  %v4712_v60 = vrot.slane %v4666_v58, 5  ;;  %v4665_v43 = vmul.f32 %v8134_v5, %v10108_v23 }
 0x676   :  { %v8654_v22 = vadd.f32 %v8050_v17, %v2677_v62  ;;  %v8657_v2 = vpop.permute.xlu1 %3393  ;;  %v4683_v19 = vsel %vm4353_vm6, %v4680_v31, %v4682_v41  ;;  %v4633_v21 = vsel %vm4353_vm6, %v4631_v25, %v4632_v57  ;;  %v4714_v27 = vrot.slane %v4667_v53, 5  ;;  %v10120_v25 = vld [vmem:[#allocation95_spill] sm:$0xff] }
 0x677   :  { %v4553_v51 = vsel %vm4353_vm6, %v4551_v34, %v10114_v11  ;;  %v10116_v34 = vld [vmem:[#allocation94_spill] sm:$0xff]  ;;  %v4679_v58 = vrot.slane %v4657_v40, 5  ;;  %v4840_v12 = vrot.slane %v4818_v13, 5  ;;  %v4817_v23 = vmul.f32 %v8109_v29, %v10111_v16  ;;  %v8666_v17 = vpop.permute.xlu0 %3311 }
 0x678   :  { %10115 = vst [vmem:[#allocation53_spill] sm:$0xff] %v8654_v22  ;;  %4560 = vrot.lane.b32.xlu0 %v4553_v51, %s5775_s27  ;;  %v2709_v30 = vadd.f32 %v10116_v34, %v2549_v55  ;;  %10117 = vst [vmem:[#allocation52_spill] sm:$0xff] %v8666_v17  ;;  %v4842_v62 = vrot.slane %v4819_v8, 5  ;;  %v4872_v11 = vrot.slane %v8643_v10, 5  ;;  %v4874_v41 = vrot.slane %v4827_v35, 5  ;;  %v10118_v51 = vld [vmem:[#allocation135_spill] sm:$0xff] }
 0x679   :  { %4690 = vrot.lane.b32.xlu1 %v4683_v19, %s5776_s8  ;;  %v5107_v57 = vmul.f32 %v8064_v37, %v10118_v51  ;;  %v4711_v53 = vrot.slane %v4665_v43, 5  ;;  %v5108_v55 = vmul.f32 %v8001_v39, %v10118_v51  ;;  %v10119_v40 = vld [vmem:[#allocation138_spill] sm:$0xff]  ;;  %v8679_v34 = vadd.f32 %v10120_v25, %v2815_v59 }
 0x67a   :  { %v5115_v13 = vmul.f32 %v8103_v44, %v10119_v40  ;;  %v5116_v16 = vmul.f32 %v8022_v47, %v10119_v40  ;;  %v8682_v19 = vpop.permute.xlu1 %3441  ;;  %v4715_v8 = vsel %vm4353_vm6, %v4712_v60, %v4714_v27  ;;  %v4681_v10 = vsel %vm4353_vm6, %v4679_v58, %v4680_v31 }
 0x67b   :  { %v4825_v35 = vmul.f32 %v8134_v5, %v10113_v14  ;;  %v8689_v43 = vadd.f32 %v8229_v26, %v2709_v30  ;;  %v4843_v22 = vsel %vm4353_vm6, %v4840_v12, %v4842_v62  ;;  %v4713_v17 = vsel %vm4353_vm6, %v4711_v53, %v4712_v60  ;;  %v10123_v26 = vld [vmem:[#allocation141_spill] sm:$0xff] }
 0x67c   :  { %4608 = vrot.lane.b32.xlu0 %v4601_v56, %s5776_s8  ;;  %v4839_v59 = vrot.slane %v4817_v23, 5  ;;  %v8695_v56 = vpop.permute.xlu0 %3359  ;;  %v4875_v31 = vsel %vm4353_vm6, %v4872_v11, %v4874_v41  ;;  %v5129_v27 = vrot.slane %v5107_v57, 6  ;;  %v5106_v14 = vmul.f32 %v8109_v29, %v10118_v51 }
 0x67d   :  { %10121 = vst [vmem:[#allocation105_spill] sm:$0xff] %v8689_v43  ;;  %10122 = vst [vmem:[#allocation55_spill] sm:$0xff] %v8695_v56  ;;  %4722 = vrot.lane.b32.xlu1 %v4715_v8, %s5776_s8  ;;  %v5267_v30 = vmul.f32 %v8064_v37, %v10123_v26  ;;  %v5131_v58 = vrot.slane %v5108_v55, 6  ;;  %v5161_v62 = vrot.slane %v5115_v13, 6  ;;  %v5163_v60 = vrot.slane %v5116_v16, 6  ;;  %v10125_v8 = vld [vmem:[#allocation98_spill] sm:$0xff] }
 0x67e   :  { %v5268_v23 = vmul.f32 %v8001_v39, %v10123_v26  ;;  %v8706_v53 = vpop.permute.xlu1 %3473  ;;  %v4871_v25 = vrot.slane %v4825_v35, 5  ;;  %v5114_v41 = vmul.f32 %v8134_v5, %v10119_v40  ;;  %v5275_v51 = vmul.f32 %v8103_v44, %v7309_v9 }
 0x67f   :  { %10124 = vst [vmem:[#allocation54_spill] sm:$0xff] %v8706_v53  ;;  %v4733_v57 = vstv %s8661_s24  ;;  %v8715_v55 = vadd.f32 %v10125_v8, %v8618_v50  ;;  %v4841_v13 = vsel %vm4353_vm6, %v4839_v59, %v4840_v12  ;;  %v5276_v16 = vmul.f32 %v8022_v47, %v7309_v9 }
 0x680   :  { %4640 = vrot.lane.b32.xlu0 %v4633_v21, %s5776_s8  ;;  %v4736_v21 = vmul.f32 %v8140_v54, %v4733_v57  ;;  %v8721_v43 = vpop.permute.xlu0 %3391  ;;  %v5132_v40 = vsel %vm4914_vm7, %v5129_v27, %v5131_v58  ;;  %v8726_v35 = vsel %vm4353_vm6, %v4871_v25, %v4872_v11  ;;  %v5128_v56 = vrot.slane %v5106_v14, 6 }
 0x681   :  { %10126 = vst [vmem:[#allocation56_spill] sm:$0xff] %v8715_v55  ;;  %10127 = vst [vmem:[#allocation57_spill] sm:$0xff] %v8721_v43  ;;  %4850 = vrot.lane.b32.xlu1 %v4843_v22, %s5777_s13  ;;  %v5289_v50 = vrot.slane %v5267_v30, 6  ;;  %v5164_v8 = vsel %vm4914_vm7, %v5161_v62, %v5163_v60  ;;  %v5291_v12 = vrot.slane %v5268_v23, 6  ;;  %v5266_v59 = vmul.f32 %v8109_v29, %v10123_v26 }
 0x682   :  { %v4735_v55 = vmul.f32 %v7953_v24, %v4733_v57  ;;  %v8733_v43 = vpop.permute.xlu1 %3521  ;;  %v5160_v22 = vrot.slane %v5114_v41, 6  ;;  %v5321_v58 = vrot.slane %v5275_v51, 6  ;;  %v5274_v11 = vmul.f32 %v8134_v5, %v7309_v9 }
 0x683   :  { %10128 = vst [vmem:[#allocation108_spill] sm:$0xff] %v8733_v43  ;;  %v4738_v14 = vmul.f32 %v8064_v37, %v4733_v57  ;;  %v5323_v30 = vrot.slane %v5276_v16, 6  ;;  %v4757_v25 = vrot.slane %v4736_v21, 5  ;;  %v4739_v60 = vmul.f32 %v8001_v39, %v4733_v57 }
 0x684   :  { %4688 = vrot.lane.b32.xlu0 %v4681_v10, %s5776_s8  ;;  %v4741_v23 = vstv %s8693_s17  ;;  %v8742_v26 = vpop.permute.xlu0 %3439  ;;  %v8746_v10 = vsel %vm4914_vm7, %v5128_v56, %v5129_v27  ;;  %v5292_v41 = vsel %vm4914_vm7, %v5289_v50, %v5291_v12  ;;  %v8750_v9 = vsel %vm4914_vm7, %v5160_v22, %v5161_v62 }
 0x685   :  { %10129 = vst [vmem:[#allocation59_spill] sm:$0xff] %v8742_v26  ;;  %4882 = vrot.lane.b32.xlu1 %v4875_v31, %s5777_s13  ;;  %v4744_v51 = vmul.f32 %v8153_v49, %v4741_v23  ;;  %v5288_v16 = vrot.slane %v5266_v59, 6  ;;  %v4755_v21 = vrot.slane %v4735_v55, 5  ;;  %v4734_v43 = vmul.f32 %v7945_v20, %v4733_v57 }
 0x686   :  { %v4737_v53 = vmul.f32 %v8109_v29, %v4733_v57  ;;  %v8756_v26 = vpop.permute.xlu1 %3553  ;;  %v5320_v31 = vrot.slane %v5274_v11, 6  ;;  %v4760_v56 = vrot.slane %v4738_v14, 5  ;;  %v4743_v27 = vmul.f32 %v8070_v38, %v4741_v23  ;;  %v10131_v57 = vld [vmem:[#allocation107_spill] sm:$0xff] }
 0x687   :  { %v8761_v62 = vmul.f32 %v8064_v37, %v7960_v0  ;;  %v8764_v12 = vsel %vm4914_vm7, %v5321_v58, %v5323_v30  ;;  %v8767_v55 = vsel %vm4914_vm7, %v5288_v16, %v5289_v50  ;;  %v8770_v20 = vsel %vm4353_vm6, %v4755_v21, %v4757_v25 }
 0x688   :  { %4720 = vrot.lane.b32.xlu0 %v4713_v17, %s5776_s8  ;;  %v4762_v17 = vrot.slane %v4739_v60, 5  ;;  %v8774_v59 = vadd.f32 %v10131_v57, %v8679_v34  ;;  %v8776_v22 = vpop.permute.xlu0 %3471  ;;  %v8780_v38 = vsel %vm4914_vm7, %v5320_v31, %v5321_v58  ;;  %v4789_v11 = vrot.slane %v4744_v51, 5  ;;  %v10135_v51 = vld [vmem:[#allocation237_spill] sm:$0xff]  ;;  %s8872_s8 = sld [smem:[#allocation11 + $0xac]] }
 0x689   :  { %10130 = vst [vmem:[#allocation61_spill] sm:$0xff] %v8761_v62  ;;  %10133 = vst [vmem:[#allocation62_spill] sm:$0xff] %v8776_v22  ;;  %5139 = vrot.lane.b32.xlu1 %v5132_v40, %s5772_s7  ;;  %v3810_v50 = vmul.f32 %v8001_v39, %v7960_v0  ;;  %v4754_v14 = vrot.slane %v4734_v43, 5  ;;  %v4759_v30 = vrot.slane %v4737_v53, 5  ;;  %v4746_v25 = vmul.f32 %v8103_v44, %v4741_v23  ;;  %v10137_v53 = vld [vmem:[#allocation233_spill] sm:$0xff] }
 0x68a   :  { %10132 = vst [vmem:[#allocation111_spill] sm:$0xff] %v8774_v59  ;;  %v4747_v60 = vmul.f32 %v8022_v47, %v4741_v23  ;;  %v8787_v34 = vpop.permute.xlu1 %3601  ;;  %v8790_v40 = vsel %vm4353_vm6, %v4760_v56, %v4762_v17  ;;  %v4787_v58 = vrot.slane %v4743_v27, 5  ;;  %v4742_v31 = vmul.f32 %v10135_v51, %v4741_v23 }
 0x68b   :  { %10134 = vst [vmem:[#allocation64_spill] sm:$0xff] %v8787_v34  ;;  %v8795_v57 = vsel %vm4353_vm6, %v4754_v14, %v4755_v21  ;;  %v8798_v43 = vsel %vm4353_vm6, %v4759_v30, %v4760_v56  ;;  %v3817_v59 = vmul.f32 %v8103_v44, %v10137_v53  ;;  %v3833_v17 = vrot.slane %v3810_v50, 4  ;;  %v10139_v14 = vld [vmem:[#allocation213_spill] sm:$0xff] }
 0x68c   :  { %4848 = vrot.lane.b32.xlu0 %v4841_v13, %s5777_s13  ;;  %10136 = vst [vmem:[#allocation114_spill] sm:$0xff] %v8798_v43  ;;  %v8803_v13 = vstv %s8740_s20  ;;  %v8805_v22 = vpop.permute.xlu0 %3519  ;;  %v8809_v27 = vsel %vm4353_vm6, %v4787_v58, %v4789_v11  ;;  %v3818_v21 = vmul.f32 %v8022_v47, %v10137_v53  ;;  %v2312_v30 = vadd.f32 %v10139_v14, %v8392_v1  ;;  %v10140_v43 = vld [vmem:[#allocation225_spill] sm:$0xff] }
 0x68d   :  { %10138 = vst [vmem:[#allocation67_spill] sm:$0xff] %v8805_v22  ;;  %5171 = vrot.lane.b32.xlu1 %v5164_v8, %s5772_s7  ;;  %v5025_v56 = vmul.f32 %v8140_v54, %v8803_v13  ;;  %v4792_v51 = vrot.slane %v4746_v25, 5  ;;  %v4794_v16 = vrot.slane %v4747_v60, 5  ;;  %v8819_v22 = vmul.f32 %v8064_v37, %v10140_v43  ;;  %v10143_v60 = vld [vmem:[#allocation207_spill] sm:$0xff] }
 0x68e   :  { %v8823_v8 = vpop.permute.xlu1 %3633  ;;  %v10142_v11 = vrot.slane %v8761_v62, 4  ;;  %v4786_v54 = vrot.slane %v4742_v31, 5  ;;  %v8832_v1 = vmul.f32 %v7953_v24, %v8803_v13  ;;  %v4745_v25 = vmul.f32 %v8134_v5, %v4741_v23 }
 0x68f   :  { %10141 = vst [vmem:[#allocation117_spill] sm:$0xff] %v8823_v8  ;;  %v2200_v14 = vadd.f32 %v10143_v60, %v8370_v32  ;;  %v2472_v34 = vadd.f32 %v10144_v18, %v2312_v30  ;;  %v3874_v8 = vmul.f32 %v8001_v39, %v10140_v43  ;;  %v3857_v31 = vrot.slane %v3818_v21, 4  ;;  %v10145_v32 = vld [vmem:[#allocation215_spill] sm:$0xff]  ;;  %v10146_v18 = vld [vmem:[#allocation234_spill] sm:$0xff] }
 0x690   :  { %4880 = vrot.lane.b32.xlu0 %v8726_v35, %s5777_s13  ;;  %v8828_v50 = vsel %vm51_vm0, %v10142_v11, %v3833_v17  ;;  %v3855_v35 = vrot.slane %v3817_v59, 4  ;;  %v8840_v62 = vpop.permute.xlu0 %3551  ;;  %v8845_v24 = vmul.f32 %v8109_v29, %v7960_v0  ;;  %v5046_v17 = vrot.slane %v5025_v56, 6 }
 0x691   :  { %5299 = vrot.lane.b32.xlu1 %v5292_v41, %s5770_s5  ;;  %v3816_v23 = vmul.f32 %v8134_v5, %v10137_v53  ;;  %v2360_v11 = vadd.f32 %v10145_v32, %v2200_v14  ;;  %v2632_v59 = vadd.f32 %v10146_v18, %v2472_v34  ;;  %v8852_v30 = vsel %vm4353_vm6, %v4792_v51, %v4794_v16  ;;  %v10147_v34 = vld [vmem:[#allocation209_spill] sm:$0xff]  ;;  %v10148_v32 = vld [vmem:[#allocation222_spill] sm:$0xff]  ;;  %v10152_v53 = vld [vmem:[#allocation211_spill] sm:$0xff] }
 0x692   :  { %v8857_v41 = vpop.permute.xlu1 %3681  ;;  %v8860_v21 = vsel %vm4353_vm6, %v4786_v54, %v4787_v58  ;;  %v9751_v56 = vrot.slane %v8832_v1, 6  ;;  %v4791_v5 = vrot.slane %v4745_v25, 5  ;;  %v8865_v14 = vmul.f32 %v8064_v37, %v8803_v13 }
 0x693   :  { %v2232_v16 = vadd.f32 %v10147_v34, %v8374_v3  ;;  %v2520_v18 = vadd.f32 %v10148_v32, %v2360_v11  ;;  %v3897_v60 = vrot.slane %v3874_v8, 4  ;;  %v8879_v54 = vsel %vm51_vm0, %v3855_v35, %v3857_v31  ;;  %v10150_v11 = vld [vmem:[#allocation238_spill] sm:$0xff] }
 0x694   :  { %5137 = vrot.lane.b32.xlu0 %v8746_v10, %s5772_s7  ;;  %v5028_v10 = vmul.f32 %v8001_v39, %v8803_v13  ;;  %v8874_v58 = vpop.permute.xlu0 %3599  ;;  %v8884_v37 = vsel %vm4914_vm7, %v9751_v56, %v5046_v17  ;;  %v8887_v3 = vsel %vm4353_vm6, %v4791_v5, %v4792_v51  ;;  %v3854_v8 = vrot.slane %v3816_v23, 4  ;;  %v10149_v39 = vld [vmem:[#allocation217_spill] sm:$0xff]  ;;  %v8905_v5 = vld [vmem:[#allocation4] sm:$0xff] }
 0x695   :  { %5331 = vrot.lane.b32.xlu1 %v8764_v12, %s5770_s5  ;;  %v2392_v25 = vadd.f32 %v10149_v39, %v2232_v16  ;;  %v2680_v34 = vadd.f32 %v10150_v11, %v2520_v18  ;;  %v2777_v32 = vadd.f32 %v8493_v4, %v2632_v59  ;;  %v10151_v12 = vrot.slane %v8819_v22, 4  ;;  %v10153_v59 = vld [vmem:[#allocation218_spill] sm:$0xff]  ;;  %v10154_v16 = vld [vmem:[#allocation227_spill] sm:$0xff]  ;;  %v10155_v18 = vld [vmem:[#allocation212_spill] sm:$0xff] }
 0x696   :  { %v2280_v0 = vadd.f32 %v10152_v53, %v8383_v63  ;;  %v3714_v51 = vpop.permute.xlu1 %3713  ;;  %v8902_v17 = vsel %vm51_vm0, %v3854_v8, %v3855_v35  ;;  %v5049_v23 = vrot.slane %v8865_v14, 6  ;;  %v8909_v4 = vmul.f32 %v8905_v5, %v8803_v13  ;;  %v10156_v8 = vld [vmem:[#allocation219_spill] sm:$0xff] }
 0x697   :  { %v8895_v31 = vsel %vm51_vm0, %v10151_v12, %v3897_v60  ;;  %v2311_v60 = vadd.f32 %v10153_v59, %v8431_v33  ;;  %v2552_v63 = vadd.f32 %v10154_v16, %v2392_v25  ;;  %v2921_v53 = vadd.f32 %v8232_v45, %v2777_v32  ;;  %v10157_v12 = vld [vmem:[#allocation81_spill] sm:$0xff]  ;;  %v10158_v45 = vld [vmem:[#allocation228_spill] sm:$0xff]  ;;  %v10159_v25 = vld [vmem:[#allocation239_spill] sm:$0xff] }
 0x698   :  { %5169 = vrot.lane.b32.xlu0 %v8750_v9, %s5772_s7  ;;  %v5051_v9 = vrot.slane %v5028_v10, 6  ;;  %v2199_v35 = vadd.f32 %v10155_v18, %v8380_v42  ;;  %v2440_v39 = vadd.f32 %v10156_v8, %v2280_v0  ;;  %v8918_v11 = vpop.permute.xlu0 %3631  ;;  %v8924_v56 = vmul.f32 %v8103_v44, %v10157_v12  ;;  %v10160_v59 = vld [vmem:[#allocation220_spill] sm:$0xff] }
 0x699   :  { %4766 = vrot.lane.b32.xlu1 %v8770_v20, %s5777_s13  ;;  %v8928_v33 = vmul.f32 %v8022_v47, %v10157_v12  ;;  %v2471_v10 = vadd.f32 %v10158_v45, %v2311_v60  ;;  %v2712_v42 = vadd.f32 %v10159_v25, %v2552_v63  ;;  %v2817_v0 = vadd.f32 %v8535_v15, %v2680_v34  ;;  %v10161_v20 = vld [vmem:[#allocation230_spill] sm:$0xff]  ;;  %v10162_v60 = vld [vmem:[#allocation87_spill] sm:$0xff] }
 0x69a   :  { %v3081_v32 = vadd.f32 %v8395_v6, %v2921_v53  ;;  %v2359_v16 = vadd.f32 %v10160_v59, %v2199_v35  ;;  %v2600_v18 = vadd.f32 %v10161_v20, %v2440_v39  ;;  %v3762_v44 = vpop.permute.xlu1 %3761  ;;  %v5043_v8 = vrot.slane %v8909_v4, 6  ;;  %v10163_v53 = vld [vmem:[#allocation214_spill] sm:$0xff]  ;;  %v10164_v39 = vld [vmem:[#allocation232_spill] sm:$0xff]  ;;  %v10170_v20 = vld [vmem:[#allocation47_spill] sm:$0xff] }
 0x69b   :  { %v8941_v47 = vmul.f32 %v8109_v29, %v10140_v43  ;;  %v2631_v63 = vadd.f32 %v10162_v60, %v2471_v10  ;;  %v2969_v15 = vadd.f32 %v8277_v7, %v2817_v0  ;;  %v8947_v34 = vstv %s8872_s8  ;;  %v10165_v10 = vld [vmem:[#allocation69_spill] sm:$0xff]  ;;  %v10166_v0 = vld [vmem:[#allocation90_spill] sm:$0xff] }
 0x69c   :  { %5297 = vrot.lane.b32.xlu0 %v8767_v55, %s5770_s5  ;;  %v3241_v6 = vadd.f32 %v8538_v28, %v3081_v32  ;;  %v2231_v35 = vadd.f32 %v10163_v53, %v8389_v36  ;;  %v2519_v55 = vadd.f32 %v10164_v39, %v2359_v16  ;;  %v8952_v45 = vpop.permute.xlu0 %3679  ;;  %v8959_v29 = vsel %vm4914_vm7, %v5049_v23, %v5051_v9  ;;  %v8971_v16 = vld [vmem:[#allocation5 + $0x8] sm:$0xff]  ;;  %v10174_v39 = vld [vmem:[#allocation240_spill] sm:$0xff] }
 0x69d   :  { %4770 = vrot.lane.b32.xlu1 %v8790_v40, %s5777_s13  ;;  %v3919_v7 = vrot.slane %v8924_v56, 4  ;;  %v2841_v28 = vadd.f32 %v8582_v46, %v2712_v42  ;;  %v3129_v43 = vadd.f32 %v8436_v61, %v2969_v15  ;;  %v3921_v4 = vrot.slane %v8928_v33, 4  ;;  %v10167_v40 = vld [vmem:[#allocation41_spill] sm:$0xff]  ;;  %v10168_v61 = vld [vmem:[#allocation44_spill] sm:$0xff] }
 0x69e   :  { %v3402_v36 = vadd.f32 %v8657_v2, %v3241_v6  ;;  %v2391_v25 = vadd.f32 %v10165_v10, %v2231_v35  ;;  %v2679_v32 = vadd.f32 %v10166_v0, %v2519_v55  ;;  %v2753_v59 = vadd.f32 %v10167_v40, %v2600_v18  ;;  %v3794_v9 = vpop.permute.xlu1 %3793  ;;  %v10169_v42 = vld [vmem:[#allocation96_spill] sm:$0xff] }
 0x69f   :  { %v8975_v46 = vmul.f32 %v8971_v16, %v8947_v34  ;;  %v2776_v2 = vadd.f32 %v10168_v61, %v2631_v63  ;;  %v3001_v33 = vadd.f32 %v10169_v42, %v2841_v28  ;;  %v3290_v60 = vadd.f32 %v10170_v20, %v3129_v43  ;;  %v10171_v6 = vld [vmem:[#allocation36_spill] sm:$0xff]  ;;  %v10175_v28 = vld [vmem:[#allocation31_spill] sm:$0xff] }
 0x6a0   :  { %5329 = vrot.lane.b32.xlu0 %v8780_v38, %s5770_s5  ;;  %v3562_v15 = vadd.f32 %v8756_v26, %v3402_v36  ;;  %v10172_v18 = vld [vmem:[#allocation216_spill] sm:$0xff]  ;;  %v2889_v55 = vadd.f32 %v10174_v39, %v2753_v59  ;;  %v3712_v10 = vpop.permute.xlu0 %3711  ;;  %v8989_v63 = vmul.f32 %v8153_v49, %v8947_v34  ;;  %v10176_v43 = vld [vmem:[#allocation99_spill] sm:$0xff]  ;;  %v2816_v59 = vadd.f32 %v8585_v52, %v2679_v32  ;;  %v10184_v32 = vld [vmem:[#allocation34_spill] sm:$0xff] }
 0x6a1   :  { %v2279_v53 = vadd.f32 %v10172_v18, %v10171_v6  ;;  %v10173_v35 = vld [vmem:[#allocation236_spill] sm:$0xff]  ;;  %4798 = vrot.lane.b32.xlu1 %v8809_v27, %s5777_s13  ;;  %v2920_v0 = vadd.f32 %v10175_v28, %v2776_v2  ;;  %v3161_v40 = vadd.f32 %v10176_v43, %v3001_v33  ;;  %v3450_v26 = vadd.f32 %v8682_v19, %v3290_v60  ;;  %v10179_v6 = vld [vmem:[#allocation33_spill] sm:$0xff] }
 0x6a2   :  { %v2551_v38 = vadd.f32 %v10173_v35, %v2391_v25  ;;  %v3722_v36 = vadd.f32 %v3714_v51, %v3562_v15  ;;  %v10177_v61 = vld [vmem:[#allocation224_spill] sm:$0xff]  ;;  %v3049_v18 = vadd.f32 %v10179_v6, %v2889_v55  ;;  %v9000_v49 = vpop.permute.xlu1 %3969  ;;  %v10182_v51 = vrot.slane %v8832_v1, 6 }
 0x6a3   :  { %v2439_v42 = vadd.f32 %v10177_v61, %v2279_v53  ;;  %v10178_v25 = vld [vmem:[#allocation20_spill] sm:$0xff]  ;;  %v3322_v33 = vadd.f32 %v8600_v48, %v3161_v40  ;;  %v2968_v53 = vadd.f32 %v10184_v32, %v2816_v59  ;;  %v3894_v55 = vrot.slane %v8941_v47, 4  ;;  %v10188_v40 = vld [vmem:[#allocation49_spill] sm:$0xff]  ;;  %v10206_v47 = vld [vmem:[#allocation55_spill] sm:$0xff] }
 0x6a4   :  { %v2711_v20 = vadd.f32 %v10178_v25, %v2551_v38  ;;  %4764 = vrot.lane.b32.xlu0 %v8795_v57, %s5777_s13  ;;  %v10180_v27 = vld [vmem:[#allocation40_spill] sm:$0xff]  ;;  %v9008_v60 = vsel %vm4914_vm7, %v5043_v8, %v10182_v51  ;;  %v10185_v38 = vld [vmem:[#allocation43_spill] sm:$0xff]  ;;  %v3760_v57 = vpop.permute.xlu0 %3759  ;;  %v3866_v8 = vadd.f32 %v8879_v54, %v3722_v36  ;;  %v10189_v61 = vld [vmem:[#allocation45_spill] sm:$0xff]  ;;  %v5078_v6 = vrot.slane %v8989_v63, 6 }
 0x6a5   :  { %v3080_v2 = vadd.f32 %v10180_v27, %v2920_v0  ;;  %v10181_v35 = vld [vmem:[#allocation64_spill] sm:$0xff]  ;;  %v3209_v39 = vadd.f32 %v10185_v38, %v3049_v18  ;;  %4802 = vrot.lane.b32.xlu1 %v8852_v30, %s5777_s13  ;;  %v10187_v0 = vld [vmem:[#allocation54_spill] sm:$0xff]  ;;  %v3922_v30 = vsel %vm51_vm0, %v3919_v7, %v3921_v4  ;;  %v10191_v18 = vld [vmem:[#allocation51_spill] sm:$0xff] }
 0x6a6   :  { %v3610_v19 = vadd.f32 %v10181_v35, %v3450_v26  ;;  %v10183_v15 = vld [vmem:[#allocation84_spill] sm:$0xff]  ;;  %v3482_v43 = vadd.f32 %v10187_v0, %v3322_v33  ;;  %v2840_v26 = vadd.f32 %v10188_v40, %v2711_v20  ;;  %v10190_v25 = vld [vmem:[#allocation114_spill] sm:$0xff]  ;;  %v4002_v59 = vpop.permute.xlu1 %4001  ;;  %v10192_v27 = vld [vmem:[#allocation57_spill] sm:$0xff] }
 0x6a7   :  { %v2599_v52 = vadd.f32 %v10183_v15, %v2439_v42  ;;  %v10186_v48 = vld [vmem:[#allocation48_spill] sm:$0xff]  ;;  %v3128_v42 = vadd.f32 %v10189_v61, %v2968_v53  ;;  %v10193_v36 = vld [vmem:[#allocation117_spill] sm:$0xff]  ;;  %v9032_v33 = vadd.f32 %v4002_v59, %v3866_v8  ;;  %v10194_v20 = vld [vmem:[#allocation42_spill] sm:$0xff] }
 0x6a8   :  { %v3240_v28 = vadd.f32 %v10186_v48, %v3080_v2  ;;  %v3770_v1 = vadd.f32 %v3762_v44, %v3610_v19  ;;  %4768 = vrot.lane.b32.xlu0 %v10190_v25, %s5777_s13  ;;  %v3370_v44 = vadd.f32 %v10191_v18, %v3209_v39  ;;  %v3642_v2 = vadd.f32 %v10193_v36, %v3482_v43  ;;  %v10195_v19 = vld [vmem:[#allocation39_spill] sm:$0xff]  ;;  %v10196_v15 = vld [vmem:[#allocation50_spill] sm:$0xff]  ;;  %v9037_v53 = vpop.permute.xlu0 %3791  ;;  %v9041_v4 = vld [vmem:[#allocation5 + $0x20] sm:$0xff] }
 0x6a9   :  { %v2752_v35 = vadd.f32 %v10194_v20, %v2599_v52  ;;  %v3000_v51 = vadd.f32 %v10195_v19, %v2840_v26  ;;  %v3289_v32 = vadd.f32 %v10196_v15, %v3128_v42  ;;  %5055 = vrot.lane.b32.xlu1 %v8884_v37, %s5772_s7  ;;  %v9045_v63 = vmul.f32 %v9041_v4, %v8947_v34  ;;  %v10197_v38 = vld [vmem:[#allocation108_spill] sm:$0xff]  ;;  %v10198_v0 = vld [vmem:[#allocation26_spill] sm:$0xff]  ;;  %v9055_v61 = vld [vmem:[#allocation5 + $0x28] sm:$0x3f] }
 0x6aa   :  { %v3401_v54 = vadd.f32 %v10192_v27, %v3240_v28  ;;  %v3530_v39 = vadd.f32 %v10197_v38, %v3370_v44  ;;  %v3802_v52 = vadd.f32 %v3794_v9, %v3642_v2  ;;  %v3906_v28 = vadd.f32 %v8895_v31, %v3770_v1  ;;  %v10199_v8 = vld [vmem:[#allocation102_spill] sm:$0xff]  ;;  %v4050_v37 = vpop.permute.xlu1 %4049  ;;  %v10202_v44 = vld [vmem:[#allocation52_spill] sm:$0xff]  ;;  %v9072_v36 = vld [vmem:[#allocation4 + $0x18] sm:$0xff] }
 0x6ab   :  { %v2888_v43 = vadd.f32 %v10198_v0, %v2752_v35  ;;  %v3160_v40 = vadd.f32 %v10199_v8, %v3000_v51  ;;  %v5076_v26 = vrot.slane %v8975_v46, 6  ;;  %v5036_v42 = vmul.f32 %v9055_v61, %v8947_v34  ;;  %v10201_v59 = vld [vmem:[#allocation38_spill] sm:$0xff]  ;;  %v9085_v38 = vld [vmem:[#allocation4 + $0x10] sm:$0x3f]  ;;  %v9101_v0 = vld [vmem:[#allocation5 + $0x18] sm:$0xff] }
 0x6ac   :  { %v3561_v48 = vadd.f32 %v8840_v62, %v3401_v54  ;;  %4796 = vrot.lane.b32.xlu0 %v8860_v21, %s5777_s13  ;;  %v10200_v62 = vld [vmem:[#allocation59_spill] sm:$0xff]  ;;  %v3690_v31 = vadd.f32 %v8857_v41, %v3530_v39  ;;  %v9061_v25 = vadd.f32 %v4050_v37, %v3906_v28  ;;  %v9065_v27 = vpop.permute.xlu0 %3967  ;;  %v5026_v41 = vmul.f32 %v9072_v36, %v8803_v13  ;;  %v10203_v19 = vld [vmem:[#allocation46_spill] sm:$0xff] }
 0x6ad   :  { %v3449_v9 = vadd.f32 %v10200_v62, %v3289_v32  ;;  %v3048_v18 = vadd.f32 %v10201_v59, %v2888_v43  ;;  %v3321_v21 = vadd.f32 %v10202_v44, %v3160_v40  ;;  %5059 = vrot.lane.b32.xlu1 %v8959_v29, %s5772_s7  ;;  %v5079_v54 = vsel %vm4914_vm7, %v5076_v26, %v5078_v6  ;;  %v10204_v15 = vld [vmem:[#allocation62_spill] sm:$0xff]  ;;  %v9105_v43 = vld [vmem:[#allocation5] sm:$0xff] }
 0x6ae   :  { %v3721_v1 = vadd.f32 %v3712_v10, %v3561_v48  ;;  %v3930_v2 = vadd.f32 %v3922_v30, %v3802_v52  ;;  %v5081_v20 = vrot.slane %v9045_v63, 6  ;;  %v9079_v35 = vstv %s9019_s21  ;;  %v4082_v6 = vpop.permute.xlu1 %4081 }
 0x6af   :  { %v3609_v10 = vadd.f32 %v8874_v58, %v3449_v9  ;;  %v3208_v51 = vadd.f32 %v10203_v19, %v3048_v18  ;;  %v3481_v29 = vadd.f32 %v10204_v15, %v3321_v21  ;;  %v5083_v32 = vrot.slane %v5036_v42, 6 }
 0x6b0   :  { %4800 = vrot.lane.b32.xlu0 %v8887_v3, %s5777_s13  ;;  %v5185_v13 = vmul.f32 %v9085_v38, %v9079_v35  ;;  %v3842_v30 = vadd.f32 %v8828_v50, %v3690_v31  ;;  %v3865_v39 = vadd.f32 %v8902_v17, %v3721_v1  ;;  %v9093_v48 = vadd.f32 %v4082_v6, %v3930_v2  ;;  %v4000_v52 = vpop.permute.xlu0 %3999  ;;  %v9109_v17 = vld [vmem:[#allocation4 + $0x8] sm:$0xff]  ;;  %v9125_v31 = vld [vmem:[#allocation4 + $0x20] sm:$0xff]  ;;  %s9158_s13 = sld [smem:[#allocation11 + $0x30]] }
 0x6b1   :  { %v3769_v58 = vadd.f32 %v3760_v57, %v3609_v10  ;;  %v10205_v28 = vrot.slane %v8819_v22, 4  ;;  %5087 = vrot.lane.b32.xlu1 %v5079_v54, %s5772_s7  ;;  %v3880_v57 = vmul.f32 %v9101_v0, %v10157_v12  ;;  %v5031_v50 = vmul.f32 %v9105_v43, %v8947_v34  ;;  %v9137_v10 = vld [vmem:[#allocation4 + $0x28] sm:$0x3f] }
 0x6b2   :  { %v9113_v22 = vmul.f32 %v9109_v17, %v9079_v35  ;;  %v3641_v8 = vadd.f32 %v8918_v11, %v3481_v29  ;;  %v3978_v40 = vadd.f32 %v9000_v49, %v3842_v30  ;;  %v9118_v37 = vadd.f32 %v4000_v52, %v3865_v39  ;;  %v4130_v42 = vpop.permute.xlu1 %4129  ;;  %v10207_v11 = vld [vmem:[#allocation67_spill] sm:$0xff]  ;;  %v10210_v39 = vld [vmem:[#allocation61_spill] sm:$0xff] }
 0x6b3   :  { %v3896_v3 = vsel %vm51_vm0, %v3894_v55, %v10205_v28  ;;  %v3369_v55 = vadd.f32 %v10206_v47, %v3208_v51  ;;  %v5048_v12 = vrot.slane %v5026_v41, 6  ;;  %v5084_v62 = vsel %vm4914_vm7, %v5081_v20, %v5083_v32  ;;  %v10209_v30 = vld [vmem:[#allocation119_spill] sm:$0xff] }
 0x6b4   :  { %5053 = vrot.lane.b32.xlu0 %v9008_v60, %s5772_s7  ;;  %v5206_v9 = vrot.slane %v5185_v13, 6  ;;  %v9129_v1 = vmul.f32 %v9125_v31, %v9079_v35  ;;  %v3801_v59 = vadd.f32 %v9037_v53, %v3641_v8  ;;  %v3905_v18 = vadd.f32 %v3896_v3, %v3769_v58  ;;  %v4048_v21 = vpop.permute.xlu0 %4047  ;;  %v9164_v58 = vld [vmem:[#allocation5 + $0x10] sm:$0x3f]  ;;  %v10212_v8 = vld [vmem:[#allocation56_spill] sm:$0xff] }
 0x6b5   :  { %v3529_v49 = vadd.f32 %v10207_v11, %v3369_v55  ;;  %v9133_v44 = vadd.f32 %v4130_v42, %v3978_v40  ;;  %v3830_v60 = vrot.slane %v8845_v24, 4  ;;  %v3918_v54 = vrot.slane %v3880_v57, 4  ;;  %5091 = vrot.lane.b32.xlu1 %v5084_v62, %s5772_s7  ;;  %v10213_v40 = vld [vmem:[#allocation110_spill] sm:$0xff]  ;;  %v10214_v42 = vld [vmem:[#allocation131_spill] sm:$0xff] }
 0x6b6   :  { %v5075_v41 = vrot.slane %v5031_v50, 6  ;;  %v5188_v2 = vmul.f32 %v9137_v10, %v9079_v35  ;;  %v9142_v51 = vadd.f32 %v4048_v21, %v3905_v18  ;;  %v5050_v53 = vsel %vm4914_vm7, %v5048_v12, %v5049_v23  ;;  %v4162_v29 = vpop.permute.xlu1 %4161  ;;  %v10216_v21 = vld [vmem:[#allocation103_spill] sm:$0xff] }
 0x6b7   :  { %v3689_v19 = vadd.f32 %v8952_v45, %v3529_v49  ;;  %v5204_v24 = vrot.slane %v9113_v22, 6  ;;  %v3920_v15 = vsel %vm51_vm0, %v3918_v54, %v3919_v7  ;;  %v5034_v6 = vmul.f32 %v9101_v0, %v8947_v34  ;;  %v10208_v7 = vld [vmem:[#allocation111_spill] sm:$0xff] }
 0x6b8   :  { %5057 = vrot.lane.b32.xlu0 %v5050_v53, %s5772_s7  ;;  %v5209_v45 = vrot.slane %v9129_v1, 6  ;;  %v9156_v32 = vstv %s9089_s22  ;;  %v3929_v14 = vadd.f32 %v3920_v15, %v3801_v59  ;;  %v9161_v23 = vadd.f32 %v4162_v29, %v9032_v33  ;;  %v4080_v3 = vpop.permute.xlu0 %4079  ;;  %v10219_v53 = vld [vmem:[#allocation122_spill] sm:$0xff]  ;;  %v10220_v29 = vld [vmem:[#allocation143_spill] sm:$0xff] }
 0x6b9   :  { %v5207_v13 = vsel %vm4914_vm7, %v5204_v24, %v5206_v9  ;;  %v5193_v56 = vmul.f32 %v9164_v58, %v9156_v32  ;;  %v3288_v34 = vadd.f32 %v10209_v30, %v10208_v7  ;;  %v10211_v52 = vrot.slane %v10210_v39, 4  ;;  %v10221_v30 = vld [vmem:[#allocation134_spill] sm:$0xff]  ;;  %v10222_v39 = vld [vmem:[#allocation151_spill] sm:$0xff] }
 0x6ba   :  { %v5077_v33 = vsel %vm4914_vm7, %v5075_v41, %v5076_v26  ;;  %5215 = vrot.lane.b32.xlu1 %v5207_v13, %s5770_s5  ;;  %v5211_v57 = vrot.slane %v5188_v2, 6  ;;  %v9177_v22 = vadd.f32 %v4080_v3, %v3929_v14  ;;  %v5183_v47 = vmul.f32 %v8905_v5, %v9079_v35  ;;  %v9189_v62 = vpop.permute.xlu1 %4209  ;;  %v10217_v41 = vld [vmem:[#allocation105_spill] sm:$0xff]  ;;  %v10218_v2 = vld [vmem:[#allocation106_spill] sm:$0xff] }
 0x6bb   :  { %v3832_v28 = vsel %vm51_vm0, %v3830_v60, %v10211_v52  ;;  %v9183_v55 = vmul.f32 %v8971_v16, %v9156_v32  ;;  %v3159_v12 = vadd.f32 %v10213_v40, %v10212_v8  ;;  %v3448_v46 = vadd.f32 %v10214_v42, %v3288_v34  ;;  %v10215_v60 = vld [vmem:[#allocation53_spill] sm:$0xff]  ;;  %v10224_v8 = vld [vmem:[#allocation118_spill] sm:$0xff] }
 0x6bc   :  { %v3841_v50 = vadd.f32 %v3832_v28, %v3689_v19  ;;  %5085 = vrot.lane.b32.xlu0 %v5077_v33, %s5772_s7  ;;  %v5080_v26 = vrot.slane %v5034_v6, 6  ;;  %v5212_v9 = vsel %vm4914_vm7, %v5209_v45, %v5211_v57  ;;  %v5238_v49 = vrot.slane %v5193_v56, 6 }
 0x6bd   :  { %v9197_v59 = vmul.f32 %v9041_v4, %v9156_v32  ;;  %v5196_v18 = vmul.f32 %v9055_v61, %v9156_v32  ;;  %v2966_v54 = vadd.f32 %v10216_v21, %v10215_v60  ;;  %v2998_v19 = vadd.f32 %v10218_v2, %v10217_v41  ;;  %v10227_v60 = vld [vmem:[#allocation127_spill] sm:$0xff]  ;;  %v10229_v2 = vld [vmem:[#allocation93_spill] sm:$0xff] }
 0x6be   :  { %v3977_v11 = vadd.f32 %v9065_v27, %v3841_v50  ;;  %v3320_v15 = vadd.f32 %v10219_v53, %v3159_v12  ;;  %v3608_v6 = vadd.f32 %v10220_v29, %v3448_v46  ;;  %v4128_v27 = vpop.permute.xlu0 %4127  ;;  %5219 = vrot.lane.b32.xlu1 %v5212_v9, %s5770_s5  ;;  %v5082_v13 = vsel %vm4914_vm7, %v5080_v26, %v5081_v20  ;;  %v9217_v28 = vpop.permute.xlu1 %4241  ;;  %v10225_v12 = vld [vmem:[#allocation145_spill] sm:$0xff]  ;;  %v10226_v46 = vld [vmem:[#allocation28_spill] sm:$0xff] }
 0x6bf   :  { %v5203_v56 = vrot.slane %v5183_v47, 6  ;;  %v5236_v7 = vrot.slane %v9183_v55, 6  ;;  %v5186_v3 = vmul.f32 %v9072_v36, %v9079_v35  ;;  %v9222_v33 = vstv %s9158_s13  ;;  %v10223_v47 = vld [vmem:[#allocation115_spill] sm:$0xff] }
 0x6c0   :  { %v9208_v14 = vadd.f32 %v4128_v27, %v3977_v11  ;;  %v3480_v34 = vadd.f32 %v10221_v30, %v3320_v15  ;;  %v3768_v52 = vadd.f32 %v10222_v39, %v3608_v6  ;;  %5089 = vrot.lane.b32.xlu0 %v5082_v13, %s5772_s7  ;;  %v5241_v20 = vrot.slane %v9197_v59, 6  ;;  %v10230_v27 = vld [vmem:[#allocation130_spill] sm:$0xff] }
 0x6c1   :  { %v5239_v63 = vsel %vm4914_vm7, %v5236_v7, %v5238_v49  ;;  %v5243_v57 = vrot.slane %v5196_v18, 6  ;;  %v5345_v50 = vmul.f32 %v9085_v38, %v9222_v33  ;;  %v3126_v55 = vadd.f32 %v10223_v47, %v2966_v54  ;;  %v10228_v54 = vld [vmem:[#allocation153_spill] sm:$0xff]  ;;  %v10233_v47 = vld [vmem:[#allocation148_spill] sm:$0xff] }
 0x6c2   :  { %v3158_v40 = vadd.f32 %v10224_v8, %v2998_v19  ;;  %v3640_v42 = vadd.f32 %v10225_v12, %v3480_v34  ;;  %v9235_v35 = vmul.f32 %v8971_v16, %v10226_v46  ;;  %v4160_v26 = vpop.permute.xlu0 %4159  ;;  %5247 = vrot.lane.b32.xlu1 %v5239_v63, %s5770_s5  ;;  %v5205_v11 = vsel %vm4914_vm7, %v5203_v56, %v5204_v24  ;;  %v10231_v56 = vld [vmem:[#allocation139_spill] sm:$0xff]  ;;  %v10234_v8 = vld [vmem:[#allocation18_spill] sm:$0xff] }
 0x6c3   :  { %v9239_v9 = vadd.f32 %v4160_v26, %v9118_v37  ;;  %v5191_v49 = vmul.f32 %v9105_v43, %v9156_v32  ;;  %v9246_v18 = vmul.f32 %v9109_v17, %v9222_v33  ;;  %v3287_v21 = vadd.f32 %v10227_v60, %v3126_v55  ;;  %v4290_v37 = vpop.permute.xlu1 %4289  ;;  %v10232_v34 = vld [vmem:[#allocation159_spill] sm:$0xff] }
 0x6c4   :  { %v3800_v41 = vadd.f32 %v10228_v54, %v3640_v42  ;;  %v3904_v19 = vadd.f32 %v10229_v2, %v3768_v52  ;;  %5213 = vrot.lane.b32.xlu0 %v5205_v11, %s5770_s5  ;;  %v5208_v53 = vrot.slane %v5186_v3, 6  ;;  %v9253_v15 = vadd.f32 %v4290_v37, %v9133_v44  ;;  %v10235_v12 = vld [vmem:[#allocation167_spill] sm:$0xff] }
 0x6c5   :  { %v5244_v24 = vsel %vm4914_vm7, %v5241_v20, %v5243_v57  ;;  %v5366_v29 = vrot.slane %v5345_v50, 6  ;;  %v9260_v6 = vmul.f32 %v9125_v31, %v9222_v33  ;;  %v3319_v13 = vadd.f32 %v10230_v27, %v3158_v40 }
 0x6c6   :  { %v3447_v30 = vadd.f32 %v10231_v56, %v3287_v21  ;;  %v4056_v39 = vadd.f32 %v10232_v34, %v3904_v19  ;;  %v9265_v52 = vpop.permute.xlu0 %4207  ;;  %v5210_v44 = vsel %vm4914_vm7, %v5208_v53, %v5209_v45  ;;  %5251 = vrot.lane.b32.xlu1 %v5244_v24, %s5770_s5  ;;  %v5235_v3 = vrot.slane %v5191_v49, 6  ;;  %v10237_v21 = vld [vmem:[#allocation156_spill] sm:$0xff]  ;;  %v10239_v19 = vld [vmem:[#allocation175_spill] sm:$0xff]  ;;  %v10240_v56 = vld [vmem:[#allocation150_spill] sm:$0xff] }
 0x6c7   :  { %v5364_v63 = vrot.slane %v9246_v18, 6  ;;  %v5194_v57 = vmul.f32 %v9101_v0, %v9156_v32  ;;  %v5348_v50 = vmul.f32 %v9137_v10, %v9222_v33  ;;  %v3928_v40 = vadd.f32 %v10234_v8, %v3800_v41  ;;  %v4322_v1 = vpop.permute.xlu1 %4321  ;;  %v10236_v18 = vld [vmem:[#allocation142_spill] sm:$0xff]  ;;  %v10238_v41 = vld [vmem:[#allocation161_spill] sm:$0xff] }
 0x6c8   :  { %v3607_v55 = vadd.f32 %v10233_v47, %v3447_v30  ;;  %v4216_v42 = vadd.f32 %v10235_v12, %v4056_v39  ;;  %5217 = vrot.lane.b32.xlu0 %v5210_v44, %s5770_s5  ;;  %v9281_v45 = vstv %s9224_s1  ;;  %v9284_v26 = vadd.f32 %v4322_v1, %v9161_v23  ;;  %v10241_v30 = vld [vmem:[#allocation169_spill] sm:$0xff]  ;;  %v10242_v39 = vld [vmem:[#allocation183_spill] sm:$0xff]  ;;  %v10243_v8 = vld [vmem:[#allocation158_spill] sm:$0xff] }
 0x6c9   :  { %v5367_v11 = vsel %vm4914_vm7, %v5364_v63, %v5366_v29  ;;  %v5369_v32 = vrot.slane %v9260_v6, 6  ;;  %v5353_v49 = vmul.f32 %v9164_v58, %v9281_v45  ;;  %v3479_v60 = vadd.f32 %v10236_v18, %v3319_v13  ;;  %v10244_v12 = vld [vmem:[#allocation235_spill] sm:$0xff]  ;;  %v10245_v1 = vld [vmem:[#allocation177_spill] sm:$0xff] }
 0x6ca   :  { %v3767_v54 = vadd.f32 %v10237_v21, %v3607_v55  ;;  %v4088_v2 = vadd.f32 %v10238_v41, %v3928_v40  ;;  %v4377_v53 = vadd.f32 %v10239_v19, %v4216_v42  ;;  %v9294_v37 = vpop.permute.xlu0 %4239  ;;  %5375 = vrot.lane.b32.xlu1 %v5367_v11, %s5768_s30  ;;  %v5237_v23 = vsel %vm4914_vm7, %v5235_v3, %v5236_v7  ;;  %v10246_v18 = vld [vmem:[#allocation191_spill] sm:$0xff] }
 0x6cb   :  { %v5240_v24 = vrot.slane %v5194_v57, 6  ;;  %v5371_v29 = vrot.slane %v5348_v50, 6  ;;  %v9300_v27 = vmul.f32 %v8971_v16, %v9281_v45  ;;  %v3639_v13 = vadd.f32 %v10240_v56, %v3479_v60  ;;  %v9306_v47 = vpop.permute.xlu1 %4370  ;;  %v10249_v56 = vld [vmem:[#allocation195_spill] sm:$0xff] }
 0x6cc   :  { %v4248_v34 = vadd.f32 %v10241_v30, %v4088_v2  ;;  %v4537_v44 = vadd.f32 %v10242_v39, %v4377_v53  ;;  %5245 = vrot.lane.b32.xlu0 %v5237_v23, %s5770_s5  ;;  %v5343_v55 = vmul.f32 %v8905_v5, %v9222_v33  ;;  %v5398_v3 = vrot.slane %v5353_v49, 6  ;;  %v10248_v23 = vld [vmem:[#allocation185_spill] sm:$0xff] }
 0x6cd   :  { %v5372_v7 = vsel %vm4914_vm7, %v5369_v32, %v5371_v29  ;;  %v9315_v57 = vmul.f32 %v9041_v4, %v9281_v45  ;;  %v5356_v50 = vmul.f32 %v9055_v61, %v9281_v45  ;;  %v3799_v40 = vadd.f32 %v10243_v8, %v3639_v13  ;;  %v10252_v8 = vld [vmem:[#allocation193_spill] sm:$0xff] }
 0x6ce   :  { %v3903_v42 = vadd.f32 %v10244_v12, %v3767_v54  ;;  %v4409_v11 = vadd.f32 %v10245_v1, %v4248_v34  ;;  %v4697_v60 = vadd.f32 %v10246_v18, %v4537_v44  ;;  %v4288_v21 = vpop.permute.xlu0 %4287  ;;  %5379 = vrot.lane.b32.xlu1 %v5372_v7, %s5768_s30  ;;  %v4969_v49 = vmul.f32 %v9164_v58, %v10226_v46  ;;  %v10247_v54 = vld [vmem:[#allocation164_spill] sm:$0xff] }
 0x6cf   :  { %v9327_v41 = vadd.f32 %v4288_v21, %v9208_v14  ;;  %v5242_v2 = vsel %vm4914_vm7, %v5240_v24, %v5241_v20  ;;  %v5396_v19 = vrot.slane %v9300_v27, 6  ;;  %v9337_v30 = vpop.permute.xlu1 %4402  ;;  %v5346_v14 = vmul.f32 %v9072_v36, %v9222_v33  ;;  %v10250_v27 = vld [vmem:[#allocation23_spill] sm:$0xff]  ;;  %v10251_v44 = vld [vmem:[#allocation172_spill] sm:$0xff] }
 0x6d0   :  { %v4055_v53 = vadd.f32 %v10247_v54, %v3903_v42  ;;  %v4569_v29 = vadd.f32 %v10248_v23, %v4409_v11  ;;  %v4857_v13 = vadd.f32 %v10249_v56, %v4697_v60  ;;  %5249 = vrot.lane.b32.xlu0 %v5242_v2, %s5770_s5  ;;  %v5363_v34 = vrot.slane %v5343_v55, 6  ;;  %v10253_v42 = vld [vmem:[#allocation25_spill] sm:$0xff]  ;;  %v10255_v11 = vld [vmem:[#allocation231_spill] sm:$0xff]  ;;  %v10258_v2 = vld [vmem:[#allocation180_spill] sm:$0xff]  ;;  %s5622_s5 = sld [smem:[#allocation11 + $0xaa]] }
 0x6d1   :  { %v5399_v59 = vsel %vm4914_vm7, %v5396_v19, %v5398_v3  ;;  %v5401_v20 = vrot.slane %v9315_v57, 6  ;;  %v5403_v24 = vrot.slane %v5356_v50, 6  ;;  %v3927_v39 = vadd.f32 %v10250_v27, %v3799_v40  ;;  %v10257_v50 = vld [vmem:[#allocation166_spill] sm:$0xff] }
 0x6d2   :  { %v4215_v7 = vadd.f32 %v10251_v44, %v4055_v53  ;;  %v4729_v12 = vadd.f32 %v10252_v8, %v4569_v29  ;;  %v10254_v1 = vrot.slane %v10253_v42, 6  ;;  %v10256_v18 = vrot.slane %v10255_v11, 6  ;;  %v4320_v21 = vpop.permute.xlu0 %4319  ;;  %5407 = vrot.lane.b32.xlu1 %v5399_v59, %s5768_s30  ;;  %v10259_v53 = vld [vmem:[#allocation197_spill] sm:$0xff]  ;;  %v10261_v44 = vld [vmem:[#allocation188_spill] sm:$0xff] }
 0x6d3   :  { %v5006_v33 = vrot.slane %v4969_v49, 6  ;;  %v4329_v55 = vadd.f32 %v4320_v21, %v9239_v9  ;;  %v5365_v3 = vsel %vm4914_vm7, %v5363_v34, %v5364_v63  ;;  %v5351_v57 = vmul.f32 %v9105_v43, %v9281_v45  ;;  %v4451_v56 = vpop.permute.xlu1 %4450  ;;  %v10260_v34 = vld [vmem:[#allocation174_spill] sm:$0xff] }
 0x6d4   :  { %v4983_v60 = vsel %vm4914_vm7, %v10256_v18, %v10254_v1  ;;  %v4087_v40 = vadd.f32 %v10257_v50, %v3927_v39  ;;  %v4376_v54 = vadd.f32 %v10258_v2, %v4215_v7  ;;  %v4889_v23 = vadd.f32 %v10259_v53, %v4729_v12  ;;  %5373 = vrot.lane.b32.xlu0 %v5365_v3, %s5768_s30  ;;  %v10262_v39 = vld [vmem:[#allocation199_spill] sm:$0xff]  ;;  %v10263_v12 = vld [vmem:[#allocation229_spill] sm:$0xff]  ;;  %v10265_v18 = vld [vmem:[#allocation196_spill] sm:$0xff] }
 0x6d5   :  { %v4994_v29 = vadd.f32 %v4983_v60, %v4857_v13  ;;  %v5004_v59 = vrot.slane %v9235_v35, 6  ;;  %v5368_v49 = vrot.slane %v5346_v14, 6  ;;  %v4459_v9 = vadd.f32 %v4451_v56, %v9253_v15  ;;  %v10266_v3 = vld [vmem:[#allocation203_spill] sm:$0xff] }
 0x6d6   :  { %v5404_v63 = vsel %vm4914_vm7, %v5401_v20, %v5403_v24  ;;  %v4247_v27 = vadd.f32 %v10260_v34, %v4087_v40  ;;  %v4536_v8 = vadd.f32 %v10261_v44, %v4376_v54  ;;  %v9366_v7 = vpop.permute.xlu0 %4368  ;;  %v4959_v35 = vmul.f32 %v8905_v5, %v10263_v12  ;;  %v10264_v24 = vld [vmem:[#allocation182_spill] sm:$0xff]  ;;  %v10268_v54 = vld [vmem:[#allocation200_spill] sm:$0xff]  ;;  %v10271_v44 = vld [vmem:[#allocation205_spill] sm:$0xff] }
 0x6d7   :  { %v5146_v42 = vadd.f32 %v10262_v39, %v4994_v29  ;;  %5411 = vrot.lane.b32.xlu1 %v5404_v63, %s5768_s30  ;;  %v5007_v13 = vsel %vm4914_vm7, %v5004_v59, %v5006_v33  ;;  %v5370_v15 = vsel %vm4914_vm7, %v5368_v49, %v5369_v32  ;;  %v5395_v14 = vrot.slane %v5351_v57, 6  ;;  %v4483_v40 = vpop.permute.xlu1 %4482  ;;  %v10267_v32 = vld [vmem:[#allocation190_spill] sm:$0xff]  ;;  %v10269_v29 = vld [vmem:[#allocation201_spill] sm:$0xff] }
 0x6d8   :  { %v4408_v1 = vadd.f32 %v10264_v24, %v4247_v27  ;;  %v4696_v60 = vadd.f32 %v10265_v18, %v4536_v8  ;;  %v5018_v21 = vadd.f32 %v5007_v13, %v4889_v23  ;;  %5377 = vrot.lane.b32.xlu0 %v5370_v15, %s5768_s30  ;;  %v4967_v33 = vmul.f32 %v9105_v43, %v10226_v46  ;;  %v10270_v34 = vld [vmem:[#allocation198_spill] sm:$0xff] }
 0x6d9   :  { %v5306_v50 = vadd.f32 %v10266_v3, %v5146_v42  ;;  %v4491_v2 = vadd.f32 %v4483_v40, %v9284_v26  ;;  %v5354_v6 = vmul.f32 %v9101_v0, %v9281_v45  ;;  %v4979_v49 = vrot.slane %v4959_v35, 6  ;;  %v10273_v15 = vld [vmem:[#allocation202_spill] sm:$0xff] }
 0x6da   :  { %v4568_v57 = vadd.f32 %v10267_v32, %v4408_v1  ;;  %v4856_v53 = vadd.f32 %v10268_v54, %v4696_v60  ;;  %v5178_v56 = vadd.f32 %v10269_v29, %v5018_v21  ;;  %v9387_v23 = vpop.permute.xlu0 %4400  ;;  %v5397_v63 = vsel %vm4914_vm7, %v5395_v14, %v5396_v19  ;;  %v10274_v14 = vld [vmem:[#allocation204_spill] sm:$0xff]  ;;  %v10276_v32 = vld [vmem:[#allocation206_spill] sm:$0xff] }
 0x6db   :  { %5427 = vrot.lane.b32.xlu1 %v5306_v50, %s5775_s27  ;;  %v4531_v45 = vpop.permute.xlu1 %4530  ;;  %v10272_v8 = vrot.slane %v10255_v11, 6  ;;  %v5003_v42 = vrot.slane %v4967_v33, 6  ;;  %v5400_v13 = vrot.slane %v5354_v6, 6  ;;  %v10275_v50 = vld [vmem:[#allocation208_spill] sm:$0xff] }
 0x6dc   :  { %v4728_v27 = vadd.f32 %v10270_v34, %v4568_v57  ;;  %v5338_v26 = vadd.f32 %v10271_v44, %v5178_v56  ;;  %5405 = vrot.lane.b32.xlu0 %v5397_v63, %s5768_s30 }
 0x6dd   :  { %v4981_v39 = vsel %vm4914_vm7, %v4979_v49, %v10272_v8  ;;  %v5402_v35 = vsel %vm4914_vm7, %v5400_v13, %v5401_v20  ;;  %v5005_v11 = vsel %vm4914_vm7, %v5003_v42, %v5004_v59  ;;  %v10277_v20 = vld [vmem:[#allocation210_spill] sm:$0xff] }
 0x6de   :  { %v4888_v24 = vadd.f32 %v10273_v15, %v4728_v27  ;;  %v4993_v1 = vadd.f32 %v4981_v39, %v4856_v53  ;;  %v4449_v18 = vpop.permute.xlu0 %4448  ;;  %v4250_v15 = vadd.f32 %v9217_v28, %v9093_v48  ;;  %v4217_v28 = vadd.f32 %v9265_v52, %v9142_v51 }
 0x6df   :  { %5447 = vrot.lane.b32.xlu1 %v5338_v26, %s5775_s27  ;;  %v4458_v19 = vadd.f32 %v4449_v18, %v9327_v41  ;;  %v4563_v21 = vpop.permute.xlu1 %4562  ;;  %v4964_v18 = vmul.f32 %v9137_v10, %v10263_v12  ;;  %v4962_v51 = vmul.f32 %v9072_v36, %v10263_v12 }
 0x6e0   :  { %v5145_v60 = vadd.f32 %v10274_v14, %v4993_v1  ;;  %5409 = vrot.lane.b32.xlu0 %v5402_v35, %s5768_s30  ;;  %v5017_v3 = vadd.f32 %v5005_v11, %v4888_v24  ;;  %s5621_s30 = sld [smem:[#allocation11 + $0x2a]] }
 0x6e1   :  { %v4987_v48 = vrot.slane %v4964_v18, 6 }
 0x6e2   :  { %v5305_v40 = vadd.f32 %v10275_v50, %v5145_v60  ;;  %v4481_v33 = vpop.permute.xlu0 %4480  ;;  %v5177_v57 = vadd.f32 %v10276_v32, %v5017_v3 }
 0x6e3   :  { %v4490_v6 = vadd.f32 %v4481_v33, %v4329_v55  ;;  %v4611_v54 = vpop.permute.xlu1 %4610 }
 0x6e4   :  { %5425 = vrot.lane.b32.xlu0 %v5305_v40, %s5775_s27  ;;  %v9407_v41 = vadd.f32 %v4611_v54, %v4459_v9  ;;  %v5337_v53 = vadd.f32 %v10277_v20, %v5177_v57  ;;  %v4218_v9 = vadd.f32 %v9189_v62, %v9061_v25  ;;  %v4971_v62 = vmul.f32 %v9041_v4, %v10226_v46 }
 0x6e6   :  { %v4529_v29 = vpop.permute.xlu0 %4528  ;;  %v4379_v42 = vadd.f32 %v9306_v47, %v4218_v9  ;;  %v4972_v47 = vmul.f32 %v9055_v61, %v10226_v46 }
 0x6e7   :  { %v4643_v56 = vpop.permute.xlu1 %4642 }
 0x6e8   :  { %5445 = vrot.lane.b32.xlu0 %v5337_v53, %s5775_s27  ;;  %v9411_v49 = vadd.f32 %v4643_v56, %v4491_v2  ;;  %v4963_v2 = vmul.f32 %v9125_v31, %v10263_v12  ;;  %v4539_v24 = vadd.f32 %v4531_v45, %v4379_v42  ;;  %v5011_v40 = vrot.slane %v4972_v47, 6 }
 0x6ea   :  { %v4561_v59 = vpop.permute.xlu0 %4560  ;;  %v4985_v14 = vrot.slane %v4963_v2, 6 }
 0x6eb   :  { %v4691_v63 = vpop.permute.xlu1 %4690 }
 0x6ec   :  { %v4699_v35 = vadd.f32 %v4691_v63, %v4539_v24  ;;  %v4988_v50 = vsel %vm4914_vm7, %v4985_v14, %v4987_v48 }
 0x6ee   :  { %v4609_v34 = vpop.permute.xlu0 %4608 }
 0x6ef   :  { %v9413_v27 = vadd.f32 %v4609_v34, %v4458_v19  ;;  %v4723_v55 = vpop.permute.xlu1 %4722  ;;  %v4411_v19 = vadd.f32 %v9337_v30, %v4250_v15  ;;  %v5009_v30 = vrot.slane %v4971_v62, 6 }
 0x6f1   :  { %v4571_v60 = vadd.f32 %v4563_v21, %v4411_v19  ;;  %v4249_v21 = vadd.f32 %v9294_v37, %v9177_v22  ;;  %v5012_v56 = vsel %vm4914_vm7, %v5009_v30, %v5011_v40  ;;  %v4984_v22 = vrot.slane %v4962_v51, 6  ;;  %v10279_v40 = vld [vmem:[#allocation75_spill] sm:$0xff] }
 0x6f2   :  { %v4641_v44 = vpop.permute.xlu0 %4640  ;;  %v4970_v37 = vmul.f32 %v9101_v0, %v10226_v46 }
 0x6f3   :  { %v9415_v26 = vadd.f32 %v4641_v44, %v4490_v6  ;;  %v4851_v8 = vpop.permute.xlu1 %4850  ;;  %v4731_v45 = vadd.f32 %v4723_v55, %v4571_v60  ;;  %v4378_v6 = vadd.f32 %v9366_v7, %v4217_v28  ;;  %v4410_v63 = vadd.f32 %v9387_v23, %v4249_v21 }
 0x6f4   :  { %v4859_v11 = vadd.f32 %v4851_v8, %v4699_v35  ;;  %v4986_v12 = vsel %vm4914_vm7, %v4984_v22, %v4985_v14  ;;  %v5008_v24 = vrot.slane %v4970_v37, 6  ;;  %v10286_v37 = vld [vmem:[#allocation223_spill] sm:$0xff] }
 0x6f5   :  { %v4538_v20 = vadd.f32 %v4529_v29, %v4378_v6  ;;  %v4570_v8 = vadd.f32 %v4561_v59, %v4410_v63  ;;  %v10283_v63 = vld [vmem:[#allocation24_spill] sm:$0xff] }
 0x6f6   :  { %v4689_v39 = vpop.permute.xlu0 %4688  ;;  %v4996_v57 = vadd.f32 %v4988_v50, %v4859_v11  ;;  %v5010_v19 = vsel %vm4914_vm7, %v5008_v24, %v5009_v30  ;;  %v10278_v30 = vld [vmem:[#allocation72_spill] sm:$0xff] }
 0x6f7   :  { %v4883_v13 = vpop.permute.xlu1 %4882  ;;  %v4698_v34 = vadd.f32 %v4689_v39, %v4538_v20  ;;  %v10281_v20 = vld [vmem:[#allocation17_spill] sm:$0xff]  ;;  %v10289_v24 = vld [vmem:[#allocation60_spill] sm:$0xff] }
 0x6f8   :  { %v4891_v32 = vadd.f32 %v4883_v13, %v4731_v45 }
 0x6fa   :  { %v4721_v1 = vpop.permute.xlu0 %4720  ;;  %v5020_v55 = vadd.f32 %v5012_v56, %v4891_v32 }
 0x6fb   :  { %v5140_v25 = vpop.permute.xlu1 %5139  ;;  %v4730_v13 = vadd.f32 %v4721_v1, %v4570_v8  ;;  %v10284_v8 = vld [vmem:[#allocation30_spill] sm:$0xff] }
 0x6fc   :  { %v5148_v53 = vadd.f32 %v5140_v25, %v4996_v57 }
 0x6fe   :  { %v4849_v3 = vpop.permute.xlu0 %4848 }
 0x6ff   :  { %v5172_v33 = vpop.permute.xlu1 %5171  ;;  %v4858_v9 = vadd.f32 %v4849_v3, %v4698_v34  ;;  %v9454_v3 = vstv %s5621_s30 }
 0x700   :  { %v5180_v42 = vadd.f32 %v5172_v33, %v5020_v55  ;;  %v4898_v28 = vmul.f32 %v9125_v31, %v9454_v3  ;;  %v4899_v50 = vmul.f32 %v9137_v10, %v9454_v3  ;;  %v1861_v33 = vmul.f32 %v8971_v16, %v10279_v40  ;;  %v10282_v10 = vld [vmem:[#allocation22_spill] sm:$0xff] }
 0x701   :  { %v4995_v39 = vadd.f32 %v4986_v12, %v4858_v9  ;;  %v9474_v55 = vstv %s5622_s5  ;;  %v9493_v12 = vmul.f32 %v9109_v17, %v10286_v37 }
 0x702   :  { %v4881_v54 = vpop.permute.xlu0 %4880  ;;  %v4921_v57 = vrot.slane %v4898_v28, 6  ;;  %v4923_v51 = vrot.slane %v4899_v50, 6  ;;  %v10291_v28 = vld [vmem:[#allocation68_spill] sm:$0xff] }
 0x703   :  { %v5300_v52 = vpop.permute.xlu1 %5299  ;;  %v4890_v23 = vadd.f32 %v4881_v54, %v4730_v13  ;;  %v10280_v54 = vld [vmem:[#allocation16_spill] sm:$0xff] }
 0x704   :  { %v5308_v44 = vadd.f32 %v5300_v52, %v5148_v53  ;;  %v1941_v53 = vadd.f32 %v10281_v20, %v1861_v33  ;;  %v10294_v20 = vld [vmem:[#allocation77_spill] sm:$0xff] }
 0x705   :  { %v5019_v25 = vadd.f32 %v5010_v19, %v4890_v23 }
 0x706   :  { %v5138_v7 = vpop.permute.xlu0 %5137  ;;  %5431 = vrot.lane.b32.xlu1 %v5308_v44, %s5775_s27  ;;  %v2045_v34 = vadd.f32 %v10283_v63, %v1941_v53  ;;  %v10296_v63 = vld [vmem:[#allocation27_spill] sm:$0xff] }
 0x707   :  { %v5332_v29 = vpop.permute.xlu1 %5331  ;;  %v5147_v18 = vadd.f32 %v5138_v7, %v4995_v39  ;;  %v9481_v7 = vmul.f32 %v9041_v4, %v9474_v55  ;;  %v10287_v4 = vld [vmem:[#allocation78_spill] sm:$0xff] }
 0x708   :  { %v5340_v2 = vadd.f32 %v5332_v29, %v5180_v42  ;;  %v10285_v42 = vld [vmem:[#allocation32_spill] sm:$0xff]  ;;  %v2717_v29 = vmul.f32 %v9085_v38, %v10286_v37  ;;  %v9501_v19 = vmul.f32 %v8971_v16, %v10287_v4 }
 0x709   :  { %v2149_v22 = vadd.f32 %v10285_v42, %v2045_v34 }
 0x70a   :  { %v5170_v15 = vpop.permute.xlu0 %5169  ;;  %5451 = vrot.lane.b32.xlu1 %v5340_v2, %s5775_s27  ;;  %v1854_v2 = vmul.f32 %v8905_v5, %v10278_v30  ;;  %v2739_v50 = vrot.slane %v2717_v29, 2 }
 0x70b   :  { %v9446_v59 = vpop.permute.xlu1 %4766  ;;  %v5179_v1 = vadd.f32 %v5170_v15, %v5019_v25  ;;  %v2725_v15 = vmul.f32 %v9164_v58, %v10287_v4  ;;  %v1860_v25 = vmul.f32 %v9105_v43, %v10279_v40 }
 0x70e   :  { %v5298_v35 = vpop.permute.xlu0 %5297 }
 0x70f   :  { %v5307_v46 = vadd.f32 %v5298_v35, %v5147_v18  ;;  %v4771_v62 = vpop.permute.xlu1 %4770  ;;  %v2310_v18 = vadd.f32 %v10289_v24, %v2149_v22  ;;  %v10298_v22 = vld [vmem:[#allocation35_spill] sm:$0xff] }
 0x710   :  { %v4779_v14 = vadd.f32 %v4771_v62, %v9407_v41  ;;  %v1855_v41 = vmul.f32 %v9109_v17, %v10278_v30  ;;  %v4897_v62 = vmul.f32 %v9072_v36, %v9454_v3  ;;  %v10295_v36 = vld [vmem:[#allocation80_spill] sm:$0xff] }
 0x711   :  { %5429 = vrot.lane.b32.xlu0 %v5307_v46, %s5775_s27 }
 0x712   :  { %v5330_v47 = vpop.permute.xlu0 %5329  ;;  %v1921_v21 = vadd.f32 %v10280_v54, %v1855_v41  ;;  %v10292_v41 = vld [vmem:[#allocation19_spill] sm:$0xff] }
 0x713   :  { %v5339_v60 = vadd.f32 %v5330_v47, %v5179_v1  ;;  %v9451_v11 = vpop.permute.xlu1 %4798  ;;  %v4945_v1 = vrot.slane %v9481_v7, 6  ;;  %v10290_v47 = vld [vmem:[#allocation66_spill] sm:$0xff]  ;;  %v1920_v33 = vadd.f32 %v10292_v41, %v1854_v2  ;;  %v10304_v41 = vld [vmem:[#allocation73_spill] sm:$0xff] }
 0x714   :  { %v2025_v52 = vadd.f32 %v10282_v10, %v1921_v21  ;;  %v2763_v21 = vrot.slane %v2725_v15, 2  ;;  %v2737_v10 = vrot.slane %v9493_v12, 2 }
 0x715   :  { %5449 = vrot.lane.b32.xlu0 %v5339_v60, %s5775_s27  ;;  %v2024_v34 = vadd.f32 %v10296_v63, %v1920_v33 }
 0x716   :  { %v9456_v48 = vpop.permute.xlu0 %4764  ;;  %v2129_v9 = vadd.f32 %v10284_v8, %v2025_v52  ;;  %v2761_v52 = vrot.slane %v9501_v19, 2  ;;  %v10300_v19 = vld [vmem:[#allocation63_spill] sm:$0xff] }
 0x717   :  { %v4803_v45 = vpop.permute.xlu1 %4802  ;;  %v2128_v29 = vadd.f32 %v10298_v22, %v2024_v34 }
 0x718   :  { %v4811_v6 = vadd.f32 %v4803_v45, %v9411_v49  ;;  %v4924_v49 = vsel %vm4914_vm7, %v4921_v57, %v4923_v51  ;;  %v2470_v45 = vadd.f32 %v10291_v28, %v2310_v18  ;;  %v2764_v12 = vsel %vm2735_vm4, %v2761_v52, %v2763_v21 }
 0x719   :  { %v4932_v13 = vadd.f32 %v4924_v49, %v4779_v14  ;;  %v10297_v49 = vld [vmem:[#allocation29_spill] sm:$0xff] }
 0x71a   :  { %v4769_v32 = vpop.permute.xlu0 %4768  ;;  %v2630_v51 = vadd.f32 %v10295_v36, %v2470_v45  ;;  %v10303_v45 = vld [vmem:[#allocation92_spill] sm:$0xff] }
 0x71b   :  { %v4778_v31 = vadd.f32 %v4769_v32, %v9413_v27  ;;  %v9470_v56 = vpop.permute.xlu1 %5055  ;;  %v4907_v27 = vmul.f32 %v9055_v61, %v9474_v55  ;;  %v10288_v61 = vld [vmem:[#allocation58_spill] sm:$0xff]  ;;  %v10293_v32 = vld [vmem:[#allocation21_spill] sm:$0xff] }
 0x71c   :  { %v2278_v39 = vadd.f32 %v10288_v61, %v2129_v9  ;;  %v1940_v54 = vadd.f32 %v10293_v32, %v1860_v25  ;;  %v2740_v9 = vsel %vm2735_vm4, %v2737_v10, %v2739_v50  ;;  %v2277_v25 = vadd.f32 %v10300_v19, %v2128_v29  ;;  %v10312_v29 = vld [vmem:[#allocation226_spill] sm:$0xff] }
 0x71d   :  { %v4947_v14 = vrot.slane %v4907_v27, 6  ;;  %v4920_v27 = vrot.slane %v4897_v62, 6 }
 0x71e   :  { %v9476_v44 = vpop.permute.xlu0 %4796  ;;  %v2438_v60 = vadd.f32 %v10290_v47, %v2278_v39  ;;  %v2044_v7 = vadd.f32 %v10297_v49, %v1940_v54  ;;  %v2775_v39 = vadd.f32 %v2764_v12, %v2630_v51  ;;  %v10301_v47 = vld [vmem:[#allocation65_spill] sm:$0xff]  ;;  %v2437_v33 = vadd.f32 %v10304_v41, %v2277_v25  ;;  %v10305_v54 = vld [vmem:[#allocation76_spill] sm:$0xff] }
 0x71f   :  { %v5060_v23 = vpop.permute.xlu1 %5059  ;;  %v4948_v8 = vsel %vm4914_vm7, %v4945_v1, %v4947_v14  ;;  %v4922_v15 = vsel %vm4914_vm7, %v4920_v27, %v4921_v57  ;;  %v4905_v14 = vmul.f32 %v9101_v0, %v9474_v55  ;;  %v10302_v57 = vld [vmem:[#allocation89_spill] sm:$0xff]  ;;  %v10309_v49 = vld [vmem:[#allocation88_spill] sm:$0xff] }
 0x720   :  { %v9503_v35 = vadd.f32 %v5060_v23, %v4932_v13  ;;  %v2598_v53 = vadd.f32 %v10294_v20, %v2438_v60  ;;  %v4956_v42 = vadd.f32 %v4948_v8, %v4811_v6  ;;  %v10299_v13 = vld [vmem:[#allocation37_spill] sm:$0xff]  ;;  %v4931_v24 = vadd.f32 %v4922_v15, %v4778_v31 }
 0x721   :  { %v2148_v2 = vadd.f32 %v10299_v13, %v2044_v7  ;;  %v2723_v6 = vmul.f32 %v9105_v43, %v10287_v4  ;;  %v2919_v50 = vadd.f32 %v10303_v45, %v2775_v39  ;;  %v10307_v4 = vld [vmem:[#allocation104_spill] sm:$0xff]  ;;  %v4944_v34 = vrot.slane %v4905_v14, 6  ;;  %v10310_v27 = vld [vmem:[#allocation113_spill] sm:$0xff] }
 0x722   :  { %v4801_v46 = vpop.permute.xlu0 %4800  ;;  %v2751_v61 = vadd.f32 %v2740_v9, %v2598_v53  ;;  %v10308_v53 = vld [vmem:[#allocation85_spill] sm:$0xff]  ;;  %v10311_v9 = vld [vmem:[#allocation116_spill] sm:$0xff]  ;;  %v3807_v13 = vmul.f32 %v9085_v38, %v10312_v29 }
 0x723   :  { %v4810_v30 = vadd.f32 %v4801_v46, %v9415_v26  ;;  %v9515_v40 = vpop.permute.xlu1 %5087  ;;  %v2715_v46 = vmul.f32 %v8905_v5, %v10286_v37  ;;  %v2309_v60 = vadd.f32 %v10301_v47, %v2148_v2  ;;  %v10306_v37 = vld [vmem:[#allocation101_spill] sm:$0xff]  ;;  %v3079_v20 = vadd.f32 %v10307_v4, %v2919_v50 }
 0x724   :  { %v2887_v28 = vadd.f32 %v10302_v57, %v2751_v61  ;;  %v2597_v36 = vadd.f32 %v10308_v53, %v2437_v33  ;;  %v2760_v51 = vrot.slane %v2723_v6, 2  ;;  %v10313_v2 = vld [vmem:[#allocation233_spill] sm:$0xff]  ;;  %v4946_v15 = vsel %vm4914_vm7, %v4944_v34, %v4945_v1  ;;  %v10323_v34 = vld [vmem:[#allocation112_spill] sm:$0xff] }
 0x725   :  { %v2469_v5 = vadd.f32 %v10305_v54, %v2309_v60  ;;  %v2736_v0 = vrot.slane %v2715_v46, 2  ;;  %v3815_v12 = vmul.f32 %v9164_v58, %v10313_v2  ;;  %v10314_v61 = vld [vmem:[#allocation125_spill] sm:$0xff]  ;;  %v4955_v25 = vadd.f32 %v4946_v15, %v4810_v30 }
 0x726   :  { %v9523_v26 = vpop.permute.xlu0 %5053  ;;  %v3047_v21 = vadd.f32 %v10306_v37, %v2887_v28  ;;  %v3814_v14 = vmul.f32 %v8971_v16, %v10313_v2  ;;  %v10316_v60 = vld [vmem:[#allocation137_spill] sm:$0xff]  ;;  %v10317_v28 = vld [vmem:[#allocation140_spill] sm:$0xff]  ;;  %v10320_v37 = vld [vmem:[#allocation147_spill] sm:$0xff] }
 0x727   :  { %v5092_v23 = vpop.permute.xlu1 %5091  ;;  %v2629_v7 = vadd.f32 %v10309_v49, %v2469_v5  ;;  %v2738_v22 = vsel %vm2735_vm4, %v2736_v0, %v2737_v10  ;;  %v2762_v10 = vsel %vm2735_vm4, %v2760_v51, %v2761_v52  ;;  %v10318_v30 = vld [vmem:[#allocation97_spill] sm:$0xff]  ;;  %v3852_v33 = vrot.slane %v3815_v12, 4  ;;  %v10319_v52 = vld [vmem:[#allocation100_spill] sm:$0xff] }
 0x728   :  { %v5100_v18 = vadd.f32 %v5092_v23, %v4956_v42  ;;  %v3207_v8 = vadd.f32 %v10310_v27, %v3047_v21  ;;  %v3239_v42 = vadd.f32 %v10311_v9, %v3079_v20  ;;  %v2750_v6 = vadd.f32 %v2738_v22, %v2597_v36  ;;  %v10321_v4 = vld [vmem:[#allocation149_spill] sm:$0xff]  ;;  %v10325_v22 = vld [vmem:[#allocation124_spill] sm:$0xff] }
 0x729   :  { %v2774_v1 = vadd.f32 %v2762_v10, %v2629_v7  ;;  %v10322_v16 = vld [vmem:[#allocation109_spill] sm:$0xff]  ;;  %v3850_v0 = vrot.slane %v3814_v14, 4  ;;  %v10327_v10 = vld [vmem:[#allocation136_spill] sm:$0xff]  ;;  %v10328_v14 = vld [vmem:[#allocation155_spill] sm:$0xff] }
 0x72a   :  { %v5058_v62 = vpop.permute.xlu0 %5057  ;;  %v3368_v39 = vadd.f32 %v10314_v61, %v3207_v8  ;;  %v2886_v41 = vadd.f32 %v10318_v30, %v2750_v6  ;;  %v10324_v7 = vld [vmem:[#allocation121_spill] sm:$0xff]  ;;  %v10331_v30 = vld [vmem:[#allocation146_spill] sm:$0xff] }
 0x72b   :  { %v5067_v31 = vadd.f32 %v5058_v62, %v4931_v24  ;;  %v10315_v24 = vld [vmem:[#allocation128_spill] sm:$0xff]  ;;  %v3806_v62 = vmul.f32 %v9109_v17, %v10312_v29  ;;  %v2918_v5 = vadd.f32 %v10319_v52, %v2774_v1  ;;  %v3853_v9 = vsel %vm51_vm0, %v3850_v0, %v3852_v33  ;;  %v10326_v61 = vld [vmem:[#allocation133_spill] sm:$0xff] }
 0x72c   :  { %v9542_v32 = vpop.permute.xlu1 %5215  ;;  %v3400_v19 = vadd.f32 %v10315_v24, %v3239_v42  ;;  %v3528_v57 = vadd.f32 %v10316_v60, %v3368_v39  ;;  %v3046_v53 = vadd.f32 %v10322_v16, %v2886_v41  ;;  %v5695_v24 = vld [vmem:[#allocation4] sm:$0xff]  ;;  %v10329_v1 = vld [vmem:[#allocation157_spill] sm:$0xff] }
 0x72d   :  { %v3826_v36 = vrot.slane %v3806_v62, 4  ;;  %v3078_v49 = vadd.f32 %v10323_v34, %v2918_v5  ;;  %v10334_v5 = vld [vmem:[#allocation152_spill] sm:$0xff]  ;;  %v10337_v34 = vld [vmem:[#allocation173_spill] sm:$0xff] }
 0x72e   :  { %v9548_v63 = vpop.permute.xlu0 %5085  ;;  %v3560_v45 = vadd.f32 %v10317_v28, %v3400_v19  ;;  %v3688_v21 = vadd.f32 %v10320_v37, %v3528_v57  ;;  %v3206_v27 = vadd.f32 %v10324_v7, %v3046_v53  ;;  %v3805_v19 = vmul.f32 %v5695_v24, %v10312_v29  ;;  %v10330_v28 = vld [vmem:[#allocation144_spill] sm:$0xff]  ;;  %v10333_v29 = vld [vmem:[#allocation165_spill] sm:$0xff]  ;;  %v10336_v53 = vld [vmem:[#allocation171_spill] sm:$0xff] }
 0x72f   :  { %v4896_v7 = vmul.f32 %v9085_v38, %v9454_v3 }
 0x730   :  { %v5220_v23 = vpop.permute.xlu1 %5219  ;;  %v3720_v20 = vadd.f32 %v10321_v4, %v3560_v45  ;;  %v3367_v39 = vadd.f32 %v10326_v61, %v3206_v27  ;;  %v10335_v4 = vld [vmem:[#allocation154_spill] sm:$0xff]  ;;  %v3825_v16 = vrot.slane %v3805_v19, 4  ;;  %v4904_v27 = vmul.f32 %v9164_v58, %v9474_v55  ;;  %v5696_v19 = vld [vmem:[#allocation5 + $0x8] sm:$0xff]  ;;  %v10340_v58 = vld [vmem:[#allocation187_spill] sm:$0xff] }
 0x731   :  { %v9562_v46 = vadd.f32 %v5220_v23, %v9503_v35  ;;  %v3828_v35 = vrot.slane %v3807_v13, 4  ;;  %v3238_v13 = vadd.f32 %v10325_v22, %v3078_v49  ;;  %v4903_v38 = vmul.f32 %v5696_v19, %v9474_v55 }
 0x732   :  { %v5090_v47 = vpop.permute.xlu0 %5089  ;;  %v3864_v15 = vadd.f32 %v3853_v9, %v3720_v20  ;;  %v3827_v9 = vsel %vm51_vm0, %v3825_v16, %v3826_v36  ;;  %v10346_v16 = vld [vmem:[#allocation176_spill] sm:$0xff] }
 0x733   :  { %v5099_v50 = vadd.f32 %v5090_v47, %v4955_v25  ;;  %v3829_v8 = vsel %vm51_vm0, %v3826_v36, %v3828_v35  ;;  %v3813_v25 = vmul.f32 %v9105_v43, %v10313_v2  ;;  %v3399_v62 = vadd.f32 %v10327_v10, %v3238_v13  ;;  %v10332_v35 = vld [vmem:[#allocation163_spill] sm:$0xff]  ;;  %v10339_v13 = vld [vmem:[#allocation181_spill] sm:$0xff] }
 0x734   :  { %v9572_v54 = vpop.permute.xlu1 %5247  ;;  %v3840_v12 = vadd.f32 %v3829_v8, %v3688_v21  ;;  %v4008_v60 = vadd.f32 %v10329_v1, %v3864_v15  ;;  %v4942_v1 = vrot.slane %v4904_v27, 6  ;;  %v10348_v27 = vld [vmem:[#allocation184_spill] sm:$0xff] }
 0x735   :  { %v3559_v41 = vadd.f32 %v10331_v30, %v3399_v62  ;;  %v3849_v37 = vrot.slane %v3813_v25, 4  ;;  %v10341_v62 = vld [vmem:[#allocation189_spill] sm:$0xff] }
 0x736   :  { %v9578_v51 = vpop.permute.xlu0 %5213  ;;  %v3976_v47 = vadd.f32 %v10328_v14, %v3840_v12  ;;  %v4168_v52 = vadd.f32 %v10333_v29, %v4008_v60 }
 0x737   :  { %v3719_v20 = vadd.f32 %v10335_v4, %v3559_v41  ;;  %v3851_v61 = vsel %vm51_vm0, %v3849_v37, %v3850_v0  ;;  %v10343_v0 = vld [vmem:[#allocation162_spill] sm:$0xff]  ;;  %vm5471_vm0 = vcmask 130048  }
 0x738   :  { %v5252_v42 = vpop.permute.xlu1 %5251  ;;  %v4136_v33 = vadd.f32 %v10332_v35, %v3976_v47  ;;  %v4328_v49 = vadd.f32 %v10337_v34, %v4168_v52  ;;  %v4918_v47 = vrot.slane %v4896_v7, 6  ;;  %v10344_v52 = vld [vmem:[#allocation168_spill] sm:$0xff] }
 0x739   :  { %v9585_v23 = vadd.f32 %v5252_v42, %v5100_v18  ;;  %v3527_v18 = vadd.f32 %v10330_v28, %v3367_v39  ;;  %v10338_v42 = vld [vmem:[#allocation179_spill] sm:$0xff]  ;;  %v4895_v39 = vmul.f32 %v9109_v17, %v9454_v3  ;;  %v10342_v28 = vld [vmem:[#allocation160_spill] sm:$0xff] }
 0x73a   :  { %v5218_v6 = vpop.permute.xlu0 %5217  ;;  %v4489_v12 = vadd.f32 %v10339_v13, %v4328_v49 }
 0x73b   :  { %v9594_v57 = vadd.f32 %v5218_v6, %v5067_v31  ;;  %v3687_v2 = vadd.f32 %v10334_v5, %v3527_v18  ;;  %v4296_v31 = vadd.f32 %v10336_v53, %v4136_v33  ;;  %v3863_v6 = vadd.f32 %v3851_v61, %v3719_v20 }
 0x73c   :  { %v5376_v45 = vpop.permute.xlu1 %5375  ;;  %v4649_v14 = vadd.f32 %v10341_v62, %v4489_v12  ;;  %v4916_v35 = vrot.slane %v4895_v39, 6  ;;  %v4940_v33 = vrot.slane %v4903_v38, 6  ;;  %v10350_v39 = vld [vmem:[#allocation192_spill] sm:$0xff]  ;;  %v10351_v38 = vld [vmem:[#allocation194_spill] sm:$0xff] }
 0x73d   :  { %v4457_v22 = vadd.f32 %v10338_v42, %v4296_v31  ;;  %v3839_v15 = vadd.f32 %v3827_v9, %v3687_v2  ;;  %v4007_v30 = vadd.f32 %v10343_v0, %v3863_v6  ;;  %v10345_v2 = vld [vmem:[#allocation170_spill] sm:$0xff] }
 0x73e   :  { %v9601_v21 = vpop.permute.xlu0 %5245  ;;  %v4809_v41 = vadd.f32 %v9451_v11, %v4649_v14  ;;  %v4943_v4 = vsel %vm4914_vm7, %v4940_v33, %v4942_v1  ;;  %v10347_v31 = vld [vmem:[#allocation178_spill] sm:$0xff]  ;;  %v4902_v11 = vmul.f32 %v9105_v43, %v9474_v55 }
 0x73f   :  { %v4617_v10 = vadd.f32 %v10340_v58, %v4457_v22  ;;  %v3975_v18 = vadd.f32 %v10342_v28, %v3839_v15  ;;  %v4167_v37 = vadd.f32 %v10345_v2, %v4007_v30  ;;  %v10349_v42 = vld [vmem:[#allocation186_spill] sm:$0xff]  ;;  %v4894_v15 = vmul.f32 %v5695_v24, %v9454_v3 }
 0x740   :  { %v9610_v8 = vpop.permute.xlu1 %5379  ;;  %v4939_v55 = vrot.slane %v4902_v11, 6 }
 0x741   :  { %v4777_v17 = vadd.f32 %v9446_v59, %v4617_v10  ;;  %v4135_v5 = vadd.f32 %v10344_v52, %v3975_v18  ;;  %v4327_v34 = vadd.f32 %v10347_v31, %v4167_v37  ;;  %v4954_v59 = vadd.f32 %v4943_v4, %v4809_v41 }
 0x742   :  { %v5250_v25 = vpop.permute.xlu0 %5249  ;;  %v4941_v28 = vsel %vm4914_vm7, %v4939_v55, %v4940_v33 }
 0x743   :  { %v9621_v36 = vadd.f32 %v5250_v25, %v5099_v50  ;;  %v4919_v50 = vsel %vm4914_vm7, %v4916_v35, %v4918_v47  ;;  %v4295_v53 = vadd.f32 %v10346_v16, %v4135_v5  ;;  %v4488_v22 = vadd.f32 %v10349_v42, %v4327_v34 }
 0x744   :  { %v5408_v60 = vpop.permute.xlu1 %5407  ;;  %v4930_v49 = vadd.f32 %v4919_v50, %v4777_v17  ;;  %v5098_v12 = vadd.f32 %v9515_v40, %v4954_v59  ;;  %v4915_v40 = vrot.slane %v4894_v15, 6 }
 0x745   :  { %v4456_v9 = vadd.f32 %v10348_v27, %v4295_v53  ;;  %v4648_v25 = vadd.f32 %v10351_v38, %v4488_v22 }
 0x746   :  { %v5374_v29 = vpop.permute.xlu0 %5373  ;;  %v5066_v13 = vadd.f32 %v9470_v56, %v4930_v49  ;;  %v5258_v43 = vadd.f32 %v9572_v54, %v5098_v12  ;;  %v4917_v1 = vsel %vm4914_vm7, %v4915_v40, %v4916_v35 }
 0x747   :  { %v4616_v19 = vadd.f32 %v10350_v39, %v4456_v9  ;;  %v4808_v62 = vadd.f32 %v9476_v44, %v4648_v25 }
 0x748   :  { %v5226_v6 = vadd.f32 %v9542_v32, %v5066_v13  ;;  %v5418_v14 = vadd.f32 %v5408_v60, %v5258_v43  ;;  %v5466_v32 = vstv %s9672_s2  ;;  %s5778_s2 = smov [#allocation12]  }
 0x749   :  { %v5412_v20 = vpop.permute.xlu1 %5411  ;;  %v4776_v10 = vadd.f32 %v9456_v48, %v4616_v19  ;;  %v4953_v0 = vadd.f32 %v4941_v28, %v4808_v62  ;;  %s5481_s0 = sshll.u32 %s5778_s2, 4  ;;  %s5482_s0 = int_to_ptr.vmem [resolvable:$true] %s5481_s0 }
 0x74a   :  { %v5378_v7 = vpop.permute.xlu0 %5377  ;;  %v5386_v56 = vadd.f32 %v5376_v45, %v5226_v6  ;;  %v5420_v4 = vadd.f32 %v5412_v20, %v9585_v23  ;;  %s5729_s23 = scalar_lea.vmem %s5482_s0, 512  ;;  %p5734_p11 = scmp.lt.s32.totalorder %s5482_s0, %s5482_s0 }
 0x74b   :  { %v4929_v54 = vadd.f32 %v4917_v1, %v4776_v10  ;;  %v5097_v45 = vadd.f32 %v9548_v63, %v4953_v0  ;;  %v5388_v63 = vadd.f32 %v9610_v8, %v9562_v46  ;;  %v5387_v34 = vadd.f32 %v5378_v7, %v9594_v57  ;;  %p5730_p10 = scmp.ne.s32.totalorder %s5482_s0, %s5729_s23  ;;  %p5735_p12 = scmp.lt.s32.totalorder %s5729_s23, %s5729_s23 }
 0x74d   :  { %v5428_v61 = vpop.permute.xlu1 %5427  ;;  %v5065_v44 = vadd.f32 %v9523_v26, %v4929_v54  ;;  %v5257_v41 = vadd.f32 %v9601_v21, %v5097_v45  ;;  %p5736_p13 = por %p5735_p12, %p5734_p11 }
 0x74e   :  { %v5406_v58 = vpop.permute.xlu0 %5405  ;;  %v5438_v3 = vadd.f32 %v5428_v61, %v5386_v56 }
 0x74f   :  { %v5225_v17 = vadd.f32 %v9578_v51, %v5065_v44  ;;  %v5417_v33 = vadd.f32 %v5406_v58, %v5257_v41  ;;  %p5737_p0 = pnand %p5736_p13, %p5730_p10 }
 0x751   :  { %v5448_v47 = vpop.permute.xlu1 %5447  ;;  %v5385_v35 = vadd.f32 %v5374_v29, %v5225_v17 }
 0x752   :  { %v5458_v24 = vadd.f32 %v5448_v47, %v5418_v14  ;;  %v5410_v18 = vpop.permute.xlu0 %5409 }
 0x753   :  { %v5419_v49 = vadd.f32 %v5410_v18, %v9621_v36 }
 0x754   :  { %v5462_v48 = vadd.f32 %v5458_v24, %v5438_v3 }
 0x756   :  { %v5468_v60 = vadd.f32 %v5466_v32, %v5462_v48  ;;  %v5426_v30 = vpop.permute.xlu0 %5425 }
 0x757   :  { %v5437_v5 = vadd.f32 %v5426_v30, %v5385_v35 }
 0x758   :  { %5473 = vst.msk [vmem:[#allocation12 + $0x8] sm:$0xff] %vm5471_vm0, %v5468_v60 }
 0x75a   :  { %v5446_v52 = vpop.permute.xlu0 %5445 }
 0x75b   :  { %v5457_v2 = vadd.f32 %v5446_v52, %v5417_v33 }
 0x75d   :  { %v5461_v37 = vadd.f32 %v5457_v2, %v5437_v5 }
 0x75f   :  { %v5467_v50 = vadd.f32 %v5466_v32, %v5461_v37 }
 0x761   :  { %5472 = vst.msk [vmem:[#allocation12] sm:$0xff] %vm5471_vm0, %v5467_v50 }
 0x778   :  { %v5432_v26 = vpop.permute.xlu1 %5431 }
 0x779   :  { %v5440_v16 = vadd.f32 %v5432_v26, %v5388_v63 }
 0x77c   :  { %v5452_v51 = vpop.permute.xlu1 %5451 }
 0x77d   :  { %v5460_v21 = vadd.f32 %v5452_v51, %v5420_v4 }
 0x77f   :  { %v5464_v53 = vadd.f32 %v5460_v21, %v5440_v16 }
 0x781   :  { %v5470_v31 = vadd.f32 %v5466_v32, %v5464_v53 }
 0x783   :  { %v5430_v29 = vpop.permute.xlu0 %5429  ;;  %5475 = vst.msk [vmem:[#allocation12 + $0x18] sm:$0xff] %vm5471_vm0, %v5470_v31 }
 0x784   :  { %v5439_v11 = vadd.f32 %v5430_v29, %v5387_v34 }
 0x787   :  { %v5450_v59 = vpop.permute.xlu0 %5449 }
 0x788   :  { %v5459_v27 = vadd.f32 %v5450_v59, %v5419_v49 }
 0x78a   :  { %v5463_v46 = vadd.f32 %v5459_v27, %v5439_v11 }
 0x78c   :  { %v5469_v8 = vadd.f32 %v5466_v32, %v5463_v46 }
 0x78e   :  { %5474 = vst.msk [vmem:[#allocation12 + $0x10] sm:$0xff] %vm5471_vm0, %v5469_v8 }
 0x78f   :  { %5740 = shalt.err (!%p5737_p0)
}
 0x790   :  { %5487 = dma.vmem_to_hbm [thread:$0]  %s5482_s0, 512, %s9673_s3, [#allocation9], %s5756_s18, %s5756_s18, %s5757_s19  }
 0x791   :  { %5753 = dma.done.wait [#allocation9], 512  }
 0x792   :  { %5754 = vsyncadd [#allocation9], 4294966784 }
 0x793   :  { %5491 = vsyncpa [#allocation8], 1 }
 0x794   :  { %5492 = vsyncpa [#allocation9], 1 }
 0x795   :  { %5493 = vsyncpa [#allocation10], 1 }

</bundles_post_ra>
